<compile_context>
chip_gen: v7x
topology: tpu7x:2x2x1
jax: 0.10.0
libtpu: 0.0.40
codegen_flags: <defaults>
</compile_context>

<pallas_src>
import functools

import jax
import jax.numpy as jnp
from jax.experimental import pallas as pl
from jax.experimental.pallas import tpu as pltpu

BN_EPS = 1e-5
MATMUL_DTYPE = jnp.bfloat16  # MXU-native inputs; accumulation stays f32
LAYER_CFG = ((64, 1), (128, 2), (256, 2))  # (intermediate_channels, stride) per stage


# ----------------------------------------------------------------------------------
# Small helpers
# ----------------------------------------------------------------------------------
def _round_up(v, m):
    return (v + m - 1) // m * m


def _apply_act(y, activation):
    if activation == "relu":
        return jnp.maximum(y, 0.0)
    if activation == "sigmoid":
        return 1.0 / (1.0 + jnp.exp(-y))
    return y


def _row_tiles(M):
    """Row-tile size: biggest tile up to 256, but keep >=2 grid steps when possible
    (keeps both v7x TensorCores busy; free on v5e/v6e)."""
    TM = min(256, _round_up(M, 8))
    Mp = _round_up(M, TM)
    if Mp // TM < 2 and M > 16:
        TM = _round_up((M + 1) // 2, 16)
        Mp = _round_up(M, TM)
    return TM, Mp


def _col_tiles(Np, m_steps):
    """Column-tile size (Np is always a multiple of 128)."""
    TN = 256 if Np % 256 == 0 else 128
    TN = min(TN, Np)
    if m_steps * (Np // TN) < 2 and Np >= 256 and (Np // 2) % 128 == 0:
        TN = Np // 2  # give the grid a second parallel step via the N axis
    return TN


# ----------------------------------------------------------------------------------
# Pallas kernels
# ----------------------------------------------------------------------------------
def _matmul_kernel(x_ref, w_ref, b_ref, o_ref, *, activation):
    y = jnp.dot(x_ref[...], w_ref[...], preferred_element_type=jnp.float32)
    o_ref[...] = _apply_act(y + b_ref[...], activation).astype(o_ref.dtype)


def _matmul_res_kernel(x_ref, w_ref, b_ref, r_ref, o_ref, *, activation):
    y = jnp.dot(x_ref[...], w_ref[...], preferred_element_type=jnp.float32)
    y = y + b_ref[...] + r_ref[...].astype(jnp.float32)
    o_ref[...] = _apply_act(y, activation).astype(o_ref.dtype)


def _conv3x3_s1_kernel(x_ref, w_ref, b_ref, o_ref, *, oh, ow, activation):
    """3x3 / stride-1 / pad-1 conv: nine in-kernel taps from a VMEM-resident padded
    image; no im2col HBM expansion.  x_ref: (1, oh+2, ow+2, C)  w_ref: (9, C, Coutp)."""
    coutp = o_ref.shape[-1]
    acc = jnp.zeros((oh * ow, coutp), jnp.float32)
    for di in range(3):
        for dj in range(3):
            patch = x_ref[0, di:di + oh, dj:dj + ow, :]          # (oh, ow, C) bf16
            acc = acc + jnp.dot(patch.reshape(oh * ow, patch.shape[-1]),
                                w_ref[di * 3 + dj],
                                preferred_element_type=jnp.float32)
    y = _apply_act(acc + b_ref[...], activation)
    o_ref[0] = y.reshape(oh, ow, coutp).astype(o_ref.dtype)


def _max3_kernel(x_ref, o_ref):
    o_ref[...] = jnp.maximum(jnp.maximum(x_ref[0], x_ref[1]), x_ref[2])


def _avgpool_fc_kernel(x_ref, w_ref, b_ref, o_ref):
    """Fused adaptive-avg-pool (mean over HW) + Linear + sigmoid."""
    xm = jnp.mean(x_ref[...].astype(jnp.float32), axis=1)        # (B, C)
    y = jnp.dot(xm.astype(MATMUL_DTYPE), w_ref[...],
                preferred_element_type=jnp.float32) + b_ref[...]
    o_ref[...] = 1.0 / (1.0 + jnp.exp(-y))


# ----------------------------------------------------------------------------------
# Fused (matmul + bias/BN + optional residual + activation) Pallas call
# ----------------------------------------------------------------------------------
def pallas_linear(x, w, b, *, activation="none", residual=None):
    """y = act(x @ w + b [+ residual]);  x:(M,K) bf16  w:(K,Np) bf16  b:(1,Np) f32."""
    M, K = x.shape
    K2, Np = w.shape
    assert K == K2 and Np % 128 == 0
    TM, Mp = _row_tiles(M)
    nm = Mp // TM
    TN = _col_tiles(Np, nm)
    nn = Np // TN

    xp = x if Mp == M else jnp.pad(x, ((0, Mp - M), (0, 0)))
    in_specs = [
        pl.BlockSpec((TM, K), lambda i, j: (i, 0)),     # K never padded (full dim)
        pl.BlockSpec((K, TN), lambda i, j: (0, j)),
        pl.BlockSpec((1, TN), lambda i, j: (0, j)),
    ]
    args = [xp, w, b]
    if residual is None:
        kernel = functools.partial(_matmul_kernel, activation=activation)
    else:
        assert residual.shape == (M, Np)
        rp = residual if Mp == M else jnp.pad(residual, ((0, Mp - M), (0, 0)))
        in_specs.append(pl.BlockSpec((TM, TN), lambda i, j: (i, j)))
        args.append(rp)
        kernel = functools.partial(_matmul_res_kernel, activation=activation)

    out = pl.pallas_call(
        kernel,
        out_shape=jax.ShapeDtypeStruct((Mp, Np), MATMUL_DTYPE),
        grid=(nm, nn),
        in_specs=in_specs,
        out_specs=pl.BlockSpec((TM, TN), lambda i, j: (i, j)),
        compiler_params=pltpu.CompilerParams(
            dimension_semantics=("parallel", "parallel")),
    )(*args)
    return out if Mp == M else out[:M]


# ----------------------------------------------------------------------------------
# Convolution wrappers
# ----------------------------------------------------------------------------------
def _im2col(x_nhwc, kh, kw, stride, pad):
    B, H, W, C = x_nhwc.shape
    OH = (H + 2 * pad - kh) // stride + 1
    OW = (W + 2 * pad - kw) // stride + 1
    if pad > 0:
        x_nhwc = jnp.pad(x_nhwc, ((0, 0), (pad, pad), (pad, pad), (0, 0)))
    cols = []
    for i in range(kh):
        for j in range(kw):
            cols.append(
                jax.lax.slice(
                    x_nhwc,
                    (0, i, j, 0),
                    (B, i + (OH - 1) * stride + 1, j + (OW - 1) * stride + 1, C),
                    (1, stride, stride, 1),
                )
            )
    patches = cols[0] if len(cols) == 1 else jnp.concatenate(cols, axis=-1)
    return patches.reshape(B * OH * OW, kh * kw * C), OH, OW


def conv1x1_pallas(x_nhwc, cp, *, activation="none", residual=None):
    B, H, W, C = x_nhwc.shape
    r2 = None if residual is None else residual.reshape(B * H * W, residual.shape[-1])
    y = pallas_linear(x_nhwc.reshape(B * H * W, C), cp["w"], cp["b"],
                      activation=activation, residual=r2)
    return y.reshape(B, H, W, cp["w"].shape[1])


def conv_im2col_pallas(x_nhwc, cp, kh, kw, stride, pad, *, activation="none"):
    cols, OH, OW = _im2col(x_nhwc, kh, kw, stride, pad)
    y = pallas_linear(cols, cp["w"], cp["b"], activation=activation)
    return y.reshape(x_nhwc.shape[0], OH, OW, cp["w"].shape[1])


def conv3x3_s1_pallas(x_nhwc, cp, *, activation="none"):
    """3x3 stride-1 pad-1 conv with in-kernel tap accumulation (no im2col)."""
    B, H, W, C = x_nhwc.shape
    coutp = cp["w"].shape[-1]
    xp = jnp.pad(x_nhwc, ((0, 0), (1, 1), (1, 1), (0, 0)))
    return pl.pallas_call(
        functools.partial(_conv3x3_s1_kernel, oh=H, ow=W, activation=activation),
        out_shape=jax.ShapeDtypeStruct((B, H, W, coutp), MATMUL_DTYPE),
        grid=(B,),
        in_specs=[
            pl.BlockSpec((1, H + 2, W + 2, C), lambda b: (b, 0, 0, 0)),
            pl.BlockSpec((9, C, coutp), lambda b: (0, 0, 0)),   # weights resident
            pl.BlockSpec((1, coutp), lambda b: (0, 0)),
        ],
        out_specs=pl.BlockSpec((1, H, W, coutp), lambda b: (b, 0, 0, 0)),
        compiler_params=pltpu.CompilerParams(dimension_semantics=("parallel",)),
    )(xp, cp["w"], cp["b"])


# ----------------------------------------------------------------------------------
# MaxPool 3x3 / stride 2 / pad 1  (separable: two 3-tap Pallas passes)
# ----------------------------------------------------------------------------------
def _pool3_stride2_pallas(x_nhwc, axis):
    B, H, W, C = x_nhwc.shape
    L = x_nhwc.shape[axis]
    OL = (L + 2 - 3) // 2 + 1
    pad_cfg = [(0, 0)] * 4
    pad_cfg[axis] = (1, 1)
    xp = jnp.pad(x_nhwc, pad_cfg, constant_values=-1e30)  # every window has a real elem
    taps = []
    for t in range(3):
        idx = [slice(None)] * 4
        idx[axis] = slice(t, t + 2 * OL - 1, 2)
        taps.append(xp[tuple(idx)])
    out_shape4 = list(x_nhwc.shape)
    out_shape4[axis] = OL
    M = out_shape4[0] * out_shape4[1] * out_shape4[2]
    stack = jnp.stack(taps, axis=0).reshape(3, M, C)

    TM, Mp = _row_tiles(M)
    if Mp != M:
        stack = jnp.pad(stack, ((0, 0), (0, Mp - M), (0, 0)))
    out = pl.pallas_call(
        _max3_kernel,
        out_shape=jax.ShapeDtypeStruct((Mp, C), x_nhwc.dtype),
        grid=(Mp // TM,),
        in_specs=[pl.BlockSpec((3, TM, C), lambda i: (0, i, 0))],
        out_specs=pl.BlockSpec((TM, C), lambda i: (i, 0)),
        compiler_params=pltpu.CompilerParams(dimension_semantics=("parallel",)),
    )(stack)
    if Mp != M:
        out = out[:M]
    return out.reshape(out_shape4)


def maxpool2d_pallas(x_nhwc):
    # max over W first, then over H (separable; identical to a 3x3/2/1 max pool)
    return _pool3_stride2_pallas(_pool3_stride2_pallas(x_nhwc, axis=2), axis=1)


# ----------------------------------------------------------------------------------
# Fused adaptive-avg-pool + FC + sigmoid
# ----------------------------------------------------------------------------------
def avgpool_fc_sigmoid_pallas(x_nhwc, fcp, num_classes):
    B, H, W, C = x_nhwc.shape
    Np = fcp["w"].shape[1]
    out = pl.pallas_call(
        _avgpool_fc_kernel,
        out_shape=jax.ShapeDtypeStruct((B, Np), jnp.float32),
        grid=(1,),
        in_specs=[
            pl.BlockSpec((B, H * W, C), lambda i: (0, 0, 0)),
            pl.BlockSpec((C, Np), lambda i: (0, 0)),
            pl.BlockSpec((1, Np), lambda i: (0, 0)),
        ],
        out_specs=pl.BlockSpec((B, Np), lambda i: (0, 0)),
    )(x_nhwc.reshape(B, H * W, C), fcp["w"], fcp["b"])
    return out[:, :num_classes]


# ----------------------------------------------------------------------------------
# One-time parameter preparation (BN folding + channel padding + bf16 cast)
# ----------------------------------------------------------------------------------
def _prep_conv(p, cin_pad, style):
    kh, kw, cin, cout = p["w"].shape
    coutp = _round_up(cout, 128)
    scale = p["gamma"] * jax.lax.rsqrt(p["var"] + BN_EPS)
    w = p["w"] * scale[None, None, None, :]
    b = p["b"] * scale + (p["beta"] - p["mean"] * scale)
    w = jnp.pad(w, ((0, 0), (0, 0), (0, cin_pad - cin), (0, coutp - cout)))
    b = jnp.pad(b, (0, coutp - cout))
    if style == "taps":                       # for the in-kernel 3x3 stride-1 path
        wm = w.reshape(kh * kw, cin_pad, coutp)
    else:                                     # flattened im2col / 1x1 matmul weight
        wm = w.reshape(kh * kw * cin_pad, coutp)
    return {"w": wm.astype(MATMUL_DTYPE), "b": b.reshape(1, coutp).astype(jnp.float32)}


def prepare_params(params, image_channels):
    prep = {"conv1": _prep_conv(params["conv1"], image_channels, "matmul")}
    ch = _round_up(64, 128)                   # channels carried by the activation
    for li, (mid, stride) in enumerate(LAYER_CFG):
        blocks = []
        for bi, blk in enumerate(params[f"layer{li + 1}"]):
            s = stride if bi == 0 else 1
            midp = _round_up(mid, 128)
            blocks.append({
                "c1": _prep_conv(blk["c1"], ch, "matmul"),
                "c2": _prep_conv(blk["c2"], midp, "taps" if s == 1 else "matmul"),
                "c3": _prep_conv(blk["c3"], midp, "matmul"),
                "down": (None if blk["down"] is None
                         else _prep_conv(blk["down"], ch, "matmul")),
            })
            ch = _round_up(mid * 4, 128)
        prep[f"layer{li + 1}"] = blocks
    in_ch, ncls = params["fc"]["w"].shape
    ncp = _round_up(ncls, 128)
    wfc = jnp.pad(params["fc"]["w"], ((0, ch - in_ch), (0, ncp - ncls)))
    bfc = jnp.pad(params["fc"]["b"], (0, ncp - ncls))
    prep["fc"] = {"w": wfc.astype(MATMUL_DTYPE),
                  "b": bfc.reshape(1, ncp).astype(jnp.float32)}
    return prep


# ----------------------------------------------------------------------------------
# Raw parameter init (inference-mode BatchNorm statistics)
# ----------------------------------------------------------------------------------
def _conv_bn_init(key, kh, kw, cin, cout, use_bias):
    kw_, kb, kg, kbe, km, kv = jax.random.split(key, 6)
    fan_in = kh * kw * cin
    w = jax.random.normal(kw_, (kh, kw, cin, cout), jnp.float32) * jnp.sqrt(1.0 / fan_in)
    b = (0.02 * jax.random.normal(kb, (cout,), jnp.float32)
         if use_bias else jnp.zeros((cout,), jnp.float32))
    return {
        "w": w, "b": b,
        "gamma": 1.0 + 0.05 * jax.random.normal(kg, (cout,), jnp.float32),
        "beta": 0.05 * jax.random.normal(kbe, (cout,), jnp.float32),
        "mean": 0.05 * jax.random.normal(km, (cout,), jnp.float32),
        "var": jax.random.uniform(kv, (cout,), jnp.float32, 0.9, 1.1),
    }


def _block_init(key, cin, mid, has_down):
    k1, k2, k3, k4 = jax.random.split(key, 4)
    return {
        "c1": _conv_bn_init(k1, 1, 1, cin, mid, True),      # Conv 1x1 (+bias) + BN
        "c2": _conv_bn_init(k2, 3, 3, mid, mid, True),      # Conv 3x3 stride s + BN
        "c3": _conv_bn_init(k3, 1, 1, mid, mid * 4, True),  # Conv 1x1 + BN
        "down": _conv_bn_init(k4, 1, 1, cin, mid * 4, False) if has_down else None,
    }


def init_resnet_params(key, image_channels, layers, num_classes):
    keys = jax.random.split(key, 2 + len(layers))
    params = {"conv1": _conv_bn_init(keys[0], 7, 7, image_channels, 64, False)}
    in_ch = 64
    for li, (nblocks, (mid, stride)) in enumerate(zip(layers, LAYER_CFG)):
        bkeys = jax.random.split(keys[1 + li], nblocks)
        blocks = []
        for bi in range(nblocks):
            s = stride if bi == 0 else 1
            has_down = (bi == 0) and (s != 1 or in_ch != mid * 4)
            blocks.append(_block_init(bkeys[bi], in_ch, mid, has_down))
            in_ch = mid * 4
        params[f"layer{li + 1}"] = blocks
    kfw, kfb = jax.random.split(keys[1 + len(layers)])
    params["fc"] = {
        "w": jax.random.normal(kfw, (in_ch, num_classes), jnp.float32) * jnp.sqrt(1.0 / in_ch),
        "b": 0.05 * jax.random.normal(kfb, (num_classes,), jnp.float32),
    }
    return params


# ----------------------------------------------------------------------------------
# Forward passes: Pallas and pure-JAX reference
# ----------------------------------------------------------------------------------
def _block_forward_pallas(x, blk, stride):
    if blk["down"] is None:
        identity = x
    else:
        identity = conv_im2col_pallas(x, blk["down"], 1, 1, stride, 0)
    h = conv1x1_pallas(x, blk["c1"])                 # no ReLU between convs (per spec)
    if stride == 1:
        h = conv3x3_s1_pallas(h, blk["c2"])          # in-kernel 9-tap accumulation
    else:
        # TODO(synk): the two stride-2 3x3 convs (smallest spatial maps) still use
        # im2col glue; extend the tap kernel with stride handling to drop it.
        h = conv_im2col_pallas(h, blk["c2"], 3, 3, stride, 1)
    # residual add + ReLU fused into the last conv's matmul epilogue
    return conv1x1_pallas(h, blk["c3"], activation="relu", residual=identity)


def resnet_forward_pallas(x_nchw, prep, num_classes):
    x = jnp.transpose(x_nchw, (0, 2, 3, 1)).astype(MATMUL_DTYPE)   # NHWC bf16
    x = conv_im2col_pallas(x, prep["conv1"], 7, 7, 2, 3, activation="relu")
    x = maxpool2d_pallas(x)
    for li, (mid, stride) in enumerate(LAYER_CFG):
        for bi, blk in enumerate(prep[f"layer{li + 1}"]):
            x = _block_forward_pallas(x, blk, stride if bi == 0 else 1)
    return avgpool_fc_sigmoid_pallas(x, prep["fc"], num_classes)


def resnet_forward_reference(x_nchw, params):
    """Pure-JAX f32 reference with the same (inference-BN) semantics."""
    x = jnp.transpose(x_nchw, (0, 2, 3, 1)).astype(jnp.float32)

    def conv_bn(x, p, stride, pad):
        y = jax.lax.conv_general_dilated(
            x, p["w"], (stride, stride), [(pad, pad), (pad, pad)],
            dimension_numbers=("NHWC", "HWIO", "NHWC"),
            precision=jax.lax.Precision.HIGHEST)
        y = y + p["b"]
        return (y - p["mean"]) * jax.lax.rsqrt(p["var"] + BN_EPS) * p["gamma"] + p["beta"]

    x = jnp.maximum(conv_bn(x, params["conv1"], 2, 3), 0.0)
    x = jax.lax.reduce_window(x, -jnp.inf, jax.lax.max,
                              (1, 3, 3, 1), (1, 2, 2, 1),
                              ((0, 0), (1, 1), (1, 1), (0, 0)))
    for li, (mid, stride) in enumerate(LAYER_CFG):
        for bi, blk in enumerate(params[f"layer{li + 1}"]):
            s = stride if bi == 0 else 1
            identity = x if blk["down"] is None else conv_bn(x, blk["down"], s, 0)
            h = conv_bn(x, blk["c1"], 1, 0)
            h = conv_bn(h, blk["c2"], s, 1)
            h = conv_bn(h, blk["c3"], 1, 0)
            x = jnp.maximum(h + identity, 0.0)
    x = jnp.mean(x, axis=(1, 2))
    return jax.nn.sigmoid(x @ params["fc"]["w"] + params["fc"]["b"])


if __name__ == "__main__":
    B, C_IMG, H, W = 2, 3, 32, 32
    NUM_CLASSES = 2
    LAYERS = (1, 1, 1)   # one bottleneck block per stage (small demo config)

    key = jax.random.PRNGKey(0)
    kx, kp = jax.random.split(key)
    x = jax.random.normal(kx, (B, C_IMG, H, W), jnp.float32)
    params = init_resnet_params(kp, C_IMG, LAYERS, NUM_CLASSES)

    # One-time prep: BN folding, channel padding, bf16 cast (outside the forward).
    prep = prepare_params(params, C_IMG)

    fwd = jax.jit(functools.partial(resnet_forward_pallas, num_classes=NUM_CLASSES))
    out = jax.block_until_ready(fwd(x, prep))

    ref = resnet_forward_reference(x, params)
    assert out.shape == (B, NUM_CLASSES), out.shape
    assert bool(jnp.all(jnp.isfinite(out)))
    # bf16 MXU inputs vs. f32 reference -> slightly looser tolerance than pure-f32.
    assert jnp.allclose(out, ref, atol=2e-2, rtol=2e-2), (out, ref)

    print("KERNEL_OK")
</pallas_src>

<mosaic_0001>
module attributes {stable_mosaic.version = 11 : i64} {
  func.func @_matmul_kernel(%arg0: i32, %arg1: i32, %arg2: memref<256x147xbf16, #tpu.memory_space<vmem>>, %arg3: memref<147x128xbf16, #tpu.memory_space<vmem>>, %arg4: memref<1x128xf32, #tpu.memory_space<vmem>>, %arg5: memref<256x128xbf16, #tpu.memory_space<vmem>>) attributes {dimension_semantics = [#tpu.dimension_semantics<parallel>, #tpu.dimension_semantics<parallel>], iteration_bounds = array<i64: 2, 1>, scalar_prefetch = 0 : i64, scratch_operands = 0 : i64, tpu.core_type = #tpu.core_type<tc>, window_params = [{transform_indices = @transform_0, window_bounds = array<i64: 256, 147>}, {transform_indices = @transform_1, window_bounds = array<i64: 147, 128>}, {transform_indices = @transform_2, window_bounds = array<i64: 1, 128>}, {transform_indices = @transform_3, window_bounds = array<i64: 256, 128>}]} {
    %c0 = arith.constant 0 : index
    %c0_0 = arith.constant 0 : index
    %0 = vector.load %arg2[%c0, %c0_0] : memref<256x147xbf16, #tpu.memory_space<vmem>>, vector<256x147xbf16>
    %c0_1 = arith.constant 0 : index
    %c0_2 = arith.constant 0 : index
    %1 = vector.load %arg3[%c0_1, %c0_2] : memref<147x128xbf16, #tpu.memory_space<vmem>>, vector<147x128xbf16>
    %cst = arith.constant dense<0.000000e+00> : vector<256x128xf32>
    %2 = tpu.matmul %0, %1, %cst {dimension_numbers = #tpu.dot_dimension_numbers<[1], [0], [0], [1], [0, 0, 1, 1], [], []>} : vector<256x147xbf16>, vector<147x128xbf16>, vector<256x128xf32> -> vector<256x128xf32>
    %c0_3 = arith.constant 0 : index
    %c0_4 = arith.constant 0 : index
    %3 = vector.load %arg4[%c0_3, %c0_4] : memref<1x128xf32, #tpu.memory_space<vmem>>, vector<1x128xf32>
    %4 = vector.broadcast %3 : vector<1x128xf32> to vector<256x128xf32>
    %5 = arith.addf %2, %4 : vector<256x128xf32>
    %cst_5 = arith.constant 0.000000e+00 : f32
    %6 = vector.broadcast %cst_5 : f32 to vector<256x128xf32>
    %7 = arith.maximumf %5, %6 : vector<256x128xf32>
    %8 = arith.truncf %7 : vector<256x128xf32> to vector<256x128xbf16>
    %c0_6 = arith.constant 0 : index
    %c0_7 = arith.constant 0 : index
    %9 = vector.load %arg5[%c0_6, %c0_7] : memref<256x128xbf16, #tpu.memory_space<vmem>>, vector<256x128xbf16>
    tpu.vector_store %arg5[%c0_6, %c0_7], %8 {strides = array<i32>} : memref<256x128xbf16, #tpu.memory_space<vmem>>, vector<256x128xbf16>,
    return
  }
  func.func @transform_0(%arg0: i32, %arg1: i32) -> (i32, i32) {
    %c0_i32 = arith.constant 0 : i32
    %c0_i32_0 = arith.constant 0 : i32
    return %arg0, %c0_i32 : i32, i32
  }
  func.func @transform_1(%arg0: i32, %arg1: i32) -> (i32, i32) {
    %c0_i32 = arith.constant 0 : i32
    %c0_i32_0 = arith.constant 0 : i32
    return %c0_i32, %arg1 : i32, i32
  }
  func.func @transform_2(%arg0: i32, %arg1: i32) -> (i32, i32) {
    %c0_i32 = arith.constant 0 : i32
    %c0_i32_0 = arith.constant 0 : i32
    return %c0_i32, %arg1 : i32, i32
  }
  func.func @transform_3(%arg0: i32, %arg1: i32) -> (i32, i32) {
    %c0_i32 = arith.constant 0 : i32
    return %arg0, %arg1 : i32, i32
  }
}

module attributes {stable_mosaic.version = 11 : i64} {
  func.func @_max3_kernel(%arg0: i32, %arg1: memref<3x128x128xbf16, #tpu.memory_space<vmem>>, %arg2: memref<128x128xbf16, #tpu.memory_space<vmem>>) attributes {dimension_semantics = [#tpu.dimension_semantics<parallel>], iteration_bounds = array<i64: 2>, scalar_prefetch = 0 : i64, scratch_operands = 0 : i64, tpu.core_type = #tpu.core_type<tc>, window_params = [{transform_indices = @transform_0, window_bounds = array<i64: 3, 128, 128>}, {transform_indices = @transform_1, window_bounds = array<i64: 128, 128>}]} {
    %c0 = arith.constant 0 : index
    %c0_0 = arith.constant 0 : index
    %c0_1 = arith.constant 0 : index
    %0 = vector.load %arg1[%c0, %c0_0, %c0_1] : memref<3x128x128xbf16, #tpu.memory_space<vmem>>, vector<1x128x128xbf16>
    %1 = vector.shape_cast %0 : vector<1x128x128xbf16> to vector<128x128xbf16>
    %c1 = arith.constant 1 : index
    %c0_2 = arith.constant 0 : index
    %c0_3 = arith.constant 0 : index
    %2 = vector.load %arg1[%c1, %c0_2, %c0_3] : memref<3x128x128xbf16, #tpu.memory_space<vmem>>, vector<1x128x128xbf16>
    %3 = vector.shape_cast %2 : vector<1x128x128xbf16> to vector<128x128xbf16>
    %4 = arith.maximumf %1, %3 : vector<128x128xbf16>
    %c2 = arith.constant 2 : index
    %c0_4 = arith.constant 0 : index
    %c0_5 = arith.constant 0 : index
    %5 = vector.load %arg1[%c2, %c0_4, %c0_5] : memref<3x128x128xbf16, #tpu.memory_space<vmem>>, vector<1x128x128xbf16>
    %6 = vector.shape_cast %5 : vector<1x128x128xbf16> to vector<128x128xbf16>
    %7 = arith.maximumf %4, %6 : vector<128x128xbf16>
    %c0_6 = arith.constant 0 : index
    %c0_7 = arith.constant 0 : index
    %8 = vector.load %arg2[%c0_6, %c0_7] : memref<128x128xbf16, #tpu.memory_space<vmem>>, vector<128x128xbf16>
    tpu.vector_store %arg2[%c0_6, %c0_7], %7 {strides = array<i32>} : memref<128x128xbf16, #tpu.memory_space<vmem>>, vector<128x128xbf16>,
    return
  }
  func.func @transform_0(%arg0: i32) -> (i32, i32, i32) {
    %c0_i32 = arith.constant 0 : i32
    %c0_i32_0 = arith.constant 0 : i32
    %c0_i32_1 = arith.constant 0 : i32
    return %c0_i32, %arg0, %c0_i32_0 : i32, i32, i32
  }
  func.func @transform_1(%arg0: i32) -> (i32, i32) {
    %c0_i32 = arith.constant 0 : i32
    %c0_i32_0 = arith.constant 0 : i32
    return %arg0, %c0_i32 : i32, i32
  }
}

module attributes {stable_mosaic.version = 11 : i64} {
  func.func @_max3_kernel(%arg0: i32, %arg1: memref<3x64x128xbf16, #tpu.memory_space<vmem>>, %arg2: memref<64x128xbf16, #tpu.memory_space<vmem>>) attributes {dimension_semantics = [#tpu.dimension_semantics<parallel>], iteration_bounds = array<i64: 2>, scalar_prefetch = 0 : i64, scratch_operands = 0 : i64, tpu.core_type = #tpu.core_type<tc>, window_params = [{transform_indices = @transform_0, window_bounds = array<i64: 3, 64, 128>}, {transform_indices = @transform_1, window_bounds = array<i64: 64, 128>}]} {
    %c0 = arith.constant 0 : index
    %c0_0 = arith.constant 0 : index
    %c0_1 = arith.constant 0 : index
    %0 = vector.load %arg1[%c0, %c0_0, %c0_1] : memref<3x64x128xbf16, #tpu.memory_space<vmem>>, vector<1x64x128xbf16>
    %1 = vector.shape_cast %0 : vector<1x64x128xbf16> to vector<64x128xbf16>
    %c1 = arith.constant 1 : index
    %c0_2 = arith.constant 0 : index
    %c0_3 = arith.constant 0 : index
    %2 = vector.load %arg1[%c1, %c0_2, %c0_3] : memref<3x64x128xbf16, #tpu.memory_space<vmem>>, vector<1x64x128xbf16>
    %3 = vector.shape_cast %2 : vector<1x64x128xbf16> to vector<64x128xbf16>
    %4 = arith.maximumf %1, %3 : vector<64x128xbf16>
    %c2 = arith.constant 2 : index
    %c0_4 = arith.constant 0 : index
    %c0_5 = arith.constant 0 : index
    %5 = vector.load %arg1[%c2, %c0_4, %c0_5] : memref<3x64x128xbf16, #tpu.memory_space<vmem>>, vector<1x64x128xbf16>
    %6 = vector.shape_cast %5 : vector<1x64x128xbf16> to vector<64x128xbf16>
    %7 = arith.maximumf %4, %6 : vector<64x128xbf16>
    %c0_6 = arith.constant 0 : index
    %c0_7 = arith.constant 0 : index
    %8 = vector.load %arg2[%c0_6, %c0_7] : memref<64x128xbf16, #tpu.memory_space<vmem>>, vector<64x128xbf16>
    tpu.vector_store %arg2[%c0_6, %c0_7], %7 {strides = array<i32>} : memref<64x128xbf16, #tpu.memory_space<vmem>>, vector<64x128xbf16>,
    return
  }
  func.func @transform_0(%arg0: i32) -> (i32, i32, i32) {
    %c0_i32 = arith.constant 0 : i32
    %c0_i32_0 = arith.constant 0 : i32
    %c0_i32_1 = arith.constant 0 : i32
    return %c0_i32, %arg0, %c0_i32_0 : i32, i32, i32
  }
  func.func @transform_1(%arg0: i32) -> (i32, i32) {
    %c0_i32 = arith.constant 0 : i32
    %c0_i32_0 = arith.constant 0 : i32
    return %arg0, %c0_i32 : i32, i32
  }
}

module attributes {stable_mosaic.version = 11 : i64} {
  func.func @_matmul_kernel(%arg0: i32, %arg1: i32, %arg2: memref<64x128xbf16, #tpu.memory_space<vmem>>, %arg3: memref<128x128xbf16, #tpu.memory_space<vmem>>, %arg4: memref<1x128xf32, #tpu.memory_space<vmem>>, %arg5: memref<64x128xbf16, #tpu.memory_space<vmem>>) attributes {dimension_semantics = [#tpu.dimension_semantics<parallel>, #tpu.dimension_semantics<parallel>], iteration_bounds = array<i64: 2, 1>, scalar_prefetch = 0 : i64, scratch_operands = 0 : i64, tpu.core_type = #tpu.core_type<tc>, window_params = [{transform_indices = @transform_0, window_bounds = array<i64: 64, 128>}, {transform_indices = @transform_1, window_bounds = array<i64: 128, 128>}, {transform_indices = @transform_2, window_bounds = array<i64: 1, 128>}, {transform_indices = @transform_3, window_bounds = array<i64: 64, 128>}]} {
    %c0 = arith.constant 0 : index
    %c0_0 = arith.constant 0 : index
    %0 = vector.load %arg2[%c0, %c0_0] : memref<64x128xbf16, #tpu.memory_space<vmem>>, vector<64x128xbf16>
    %c0_1 = arith.constant 0 : index
    %c0_2 = arith.constant 0 : index
    %1 = vector.load %arg3[%c0_1, %c0_2] : memref<128x128xbf16, #tpu.memory_space<vmem>>, vector<128x128xbf16>
    %cst = arith.constant dense<0.000000e+00> : vector<64x128xf32>
    %2 = tpu.matmul %0, %1, %cst {dimension_numbers = #tpu.dot_dimension_numbers<[1], [0], [0], [1], [0, 0, 1, 1], [], []>} : vector<64x128xbf16>, vector<128x128xbf16>, vector<64x128xf32> -> vector<64x128xf32>
    %c0_3 = arith.constant 0 : index
    %c0_4 = arith.constant 0 : index
    %3 = vector.load %arg4[%c0_3, %c0_4] : memref<1x128xf32, #tpu.memory_space<vmem>>, vector<1x128xf32>
    %4 = vector.broadcast %3 : vector<1x128xf32> to vector<64x128xf32>
    %5 = arith.addf %2, %4 : vector<64x128xf32>
    %6 = arith.truncf %5 : vector<64x128xf32> to vector<64x128xbf16>
    %c0_5 = arith.constant 0 : index
    %c0_6 = arith.constant 0 : index
    %7 = vector.load %arg5[%c0_5, %c0_6] : memref<64x128xbf16, #tpu.memory_space<vmem>>, vector<64x128xbf16>
    tpu.vector_store %arg5[%c0_5, %c0_6], %6 {strides = array<i32>} : memref<64x128xbf16, #tpu.memory_space<vmem>>, vector<64x128xbf16>,
    return
  }
  func.func @transform_0(%arg0: i32, %arg1: i32) -> (i32, i32) {
    %c0_i32 = arith.constant 0 : i32
    %c0_i32_0 = arith.constant 0 : i32
    return %arg0, %c0_i32 : i32, i32
  }
  func.func @transform_1(%arg0: i32, %arg1: i32) -> (i32, i32) {
    %c0_i32 = arith.constant 0 : i32
    %c0_i32_0 = arith.constant 0 : i32
    return %c0_i32, %arg1 : i32, i32
  }
  func.func @transform_2(%arg0: i32, %arg1: i32) -> (i32, i32) {
    %c0_i32 = arith.constant 0 : i32
    %c0_i32_0 = arith.constant 0 : i32
    return %c0_i32, %arg1 : i32, i32
  }
  func.func @transform_3(%arg0: i32, %arg1: i32) -> (i32, i32) {
    %c0_i32 = arith.constant 0 : i32
    return %arg0, %arg1 : i32, i32
  }
}

module attributes {stable_mosaic.version = 11 : i64} {
  func.func @_matmul_kernel(%arg0: i32, %arg1: i32, %arg2: memref<64x128xbf16, #tpu.memory_space<vmem>>, %arg3: memref<128x256xbf16, #tpu.memory_space<vmem>>, %arg4: memref<1x256xf32, #tpu.memory_space<vmem>>, %arg5: memref<64x256xbf16, #tpu.memory_space<vmem>>) attributes {dimension_semantics = [#tpu.dimension_semantics<parallel>, #tpu.dimension_semantics<parallel>], iteration_bounds = array<i64: 2, 1>, scalar_prefetch = 0 : i64, scratch_operands = 0 : i64, tpu.core_type = #tpu.core_type<tc>, window_params = [{transform_indices = @transform_0, window_bounds = array<i64: 64, 128>}, {transform_indices = @transform_1, window_bounds = array<i64: 128, 256>}, {transform_indices = @transform_2, window_bounds = array<i64: 1, 256>}, {transform_indices = @transform_3, window_bounds = array<i64: 64, 256>}]} {
    %c0 = arith.constant 0 : index
    %c0_0 = arith.constant 0 : index
    %0 = vector.load %arg2[%c0, %c0_0] : memref<64x128xbf16, #tpu.memory_space<vmem>>, vector<64x128xbf16>
    %c0_1 = arith.constant 0 : index
    %c0_2 = arith.constant 0 : index
    %1 = vector.load %arg3[%c0_1, %c0_2] : memref<128x256xbf16, #tpu.memory_space<vmem>>, vector<128x256xbf16>
    %cst = arith.constant dense<0.000000e+00> : vector<64x256xf32>
    %2 = tpu.matmul %0, %1, %cst {dimension_numbers = #tpu.dot_dimension_numbers<[1], [0], [0], [1], [0, 0, 1, 1], [], []>} : vector<64x128xbf16>, vector<128x256xbf16>, vector<64x256xf32> -> vector<64x256xf32>
    %c0_3 = arith.constant 0 : index
    %c0_4 = arith.constant 0 : index
    %3 = vector.load %arg4[%c0_3, %c0_4] : memref<1x256xf32, #tpu.memory_space<vmem>>, vector<1x256xf32>
    %4 = vector.broadcast %3 : vector<1x256xf32> to vector<64x256xf32>
    %5 = arith.addf %2, %4 : vector<64x256xf32>
    %6 = arith.truncf %5 : vector<64x256xf32> to vector<64x256xbf16>
    %c0_5 = arith.constant 0 : index
    %c0_6 = arith.constant 0 : index
    %7 = vector.load %arg5[%c0_5, %c0_6] : memref<64x256xbf16, #tpu.memory_space<vmem>>, vector<64x256xbf16>
    tpu.vector_store %arg5[%c0_5, %c0_6], %6 {strides = array<i32>} : memref<64x256xbf16, #tpu.memory_space<vmem>>, vector<64x256xbf16>,
    return
  }
  func.func @transform_0(%arg0: i32, %arg1: i32) -> (i32, i32) {
    %c0_i32 = arith.constant 0 : i32
    %c0_i32_0 = arith.constant 0 : i32
    return %arg0, %c0_i32 : i32, i32
  }
  func.func @transform_1(%arg0: i32, %arg1: i32) -> (i32, i32) {
    %c0_i32 = arith.constant 0 : i32
    %c0_i32_0 = arith.constant 0 : i32
    return %c0_i32, %arg1 : i32, i32
  }
  func.func @transform_2(%arg0: i32, %arg1: i32) -> (i32, i32) {
    %c0_i32 = arith.constant 0 : i32
    %c0_i32_0 = arith.constant 0 : i32
    return %c0_i32, %arg1 : i32, i32
  }
  func.func @transform_3(%arg0: i32, %arg1: i32) -> (i32, i32) {
    %c0_i32 = arith.constant 0 : i32
    return %arg0, %arg1 : i32, i32
  }
}

module attributes {stable_mosaic.version = 11 : i64} {
  func.func @_conv3x3_s1_kernel(%arg0: i32, %arg1: memref<1x10x10x128xbf16, #tpu.memory_space<vmem>>, %arg2: memref<9x128x128xbf16, #tpu.memory_space<vmem>>, %arg3: memref<1x128xf32, #tpu.memory_space<vmem>>, %arg4: memref<1x8x8x128xbf16, #tpu.memory_space<vmem>>) attributes {dimension_semantics = [#tpu.dimension_semantics<parallel>], iteration_bounds = array<i64: 2>, scalar_prefetch = 0 : i64, scratch_operands = 0 : i64, tpu.core_type = #tpu.core_type<tc>, window_params = [{transform_indices = @transform_0, window_bounds = array<i64: 1, 10, 10, 128>}, {pipeline_mode = #tpu.pipeline_mode<synchronous>, transform_indices = @transform_1, window_bounds = array<i64: 9, 128, 128>}, {pipeline_mode = #tpu.pipeline_mode<synchronous>, transform_indices = @transform_2, window_bounds = array<i64: 1, 128>}, {transform_indices = @transform_3, window_bounds = array<i64: 1, 8, 8, 128>}]} {
    %cst = arith.constant 0.000000e+00 : f32
    %0 = vector.broadcast %cst : f32 to vector<64x128xf32>
    %c0 = arith.constant 0 : index
    %c0_0 = arith.constant 0 : index
    %c0_1 = arith.constant 0 : index
    %c0_2 = arith.constant 0 : index
    %1 = vector.load %arg1[%c0, %c0_0, %c0_1, %c0_2] : memref<1x10x10x128xbf16, #tpu.memory_space<vmem>>, vector<1x8x8x128xbf16>
    %2 = vector.shape_cast %1 : vector<1x8x8x128xbf16> to vector<8x8x128xbf16>
    %3 = vector.shape_cast %2 : vector<8x8x128xbf16> to vector<64x128xbf16>
    %c0_3 = arith.constant 0 : index
    %c0_4 = arith.constant 0 : index
    %c0_5 = arith.constant 0 : index
    %4 = vector.load %arg2[%c0_3, %c0_4, %c0_5] : memref<9x128x128xbf16, #tpu.memory_space<vmem>>, vector<1x128x128xbf16>
    %5 = vector.shape_cast %4 : vector<1x128x128xbf16> to vector<128x128xbf16>
    %cst_6 = arith.constant dense<0.000000e+00> : vector<64x128xf32>
    %6 = tpu.matmul %3, %5, %cst_6 {dimension_numbers = #tpu.dot_dimension_numbers<[1], [0], [0], [1], [0, 0, 1, 1], [], []>} : vector<64x128xbf16>, vector<128x128xbf16>, vector<64x128xf32> -> vector<64x128xf32>
    %7 = arith.addf %0, %6 : vector<64x128xf32>
    %c0_7 = arith.constant 0 : index
    %c0_8 = arith.constant 0 : index
    %c1 = arith.constant 1 : index
    %c0_9 = arith.constant 0 : index
    %8 = vector.load %arg1[%c0_7, %c0_8, %c1, %c0_9] : memref<1x10x10x128xbf16, #tpu.memory_space<vmem>>, vector<1x8x8x128xbf16>
    %9 = vector.shape_cast %8 : vector<1x8x8x128xbf16> to vector<8x8x128xbf16>
    %10 = vector.shape_cast %9 : vector<8x8x128xbf16> to vector<64x128xbf16>
    %c1_10 = arith.constant 1 : index
    %c0_11 = arith.constant 0 : index
    %c0_12 = arith.constant 0 : index
    %11 = vector.load %arg2[%c1_10, %c0_11, %c0_12] : memref<9x128x128xbf16, #tpu.memory_space<vmem>>, vector<1x128x128xbf16>
    %12 = vector.shape_cast %11 : vector<1x128x128xbf16> to vector<128x128xbf16>
    %cst_13 = arith.constant dense<0.000000e+00> : vector<64x128xf32>
    %13 = tpu.matmul %10, %12, %cst_13 {dimension_numbers = #tpu.dot_dimension_numbers<[1], [0], [0], [1], [0, 0, 1, 1], [], []>} : vector<64x128xbf16>, vector<128x128xbf16>, vector<64x128xf32> -> vector<64x128xf32>
    %14 = arith.addf %7, %13 : vector<64x128xf32>
    %c0_14 = arith.constant 0 : index
    %c0_15 = arith.constant 0 : index
    %c2 = arith.constant 2 : index
    %c0_16 = arith.constant 0 : index
    %15 = vector.load %arg1[%c0_14, %c0_15, %c2, %c0_16] : memref<1x10x10x128xbf16, #tpu.memory_space<vmem>>, vector<1x8x8x128xbf16>
    %16 = vector.shape_cast %15 : vector<1x8x8x128xbf16> to vector<8x8x128xbf16>
    %17 = vector.shape_cast %16 : vector<8x8x128xbf16> to vector<64x128xbf16>
    %c2_17 = arith.constant 2 : index
    %c0_18 = arith.constant 0 : index
    %c0_19 = arith.constant 0 : index
    %18 = vector.load %arg2[%c2_17, %c0_18, %c0_19] : memref<9x128x128xbf16, #tpu.memory_space<vmem>>, vector<1x128x128xbf16>
    %19 = vector.shape_cast %18 : vector<1x128x128xbf16> to vector<128x128xbf16>
    %cst_20 = arith.constant dense<0.000000e+00> : vector<64x128xf32>
    %20 = tpu.matmul %17, %19, %cst_20 {dimension_numbers = #tpu.dot_dimension_numbers<[1], [0], [0], [1], [0, 0, 1, 1], [], []>} : vector<64x128xbf16>, vector<128x128xbf16>, vector<64x128xf32> -> vector<64x128xf32>
    %21 = arith.addf %14, %20 : vector<64x128xf32>
    %c0_21 = arith.constant 0 : index
    %c1_22 = arith.constant 1 : index
    %c0_23 = arith.constant 0 : index
    %c0_24 = arith.constant 0 : index
    %22 = vector.load %arg1[%c0_21, %c1_22, %c0_23, %c0_24] : memref<1x10x10x128xbf16, #tpu.memory_space<vmem>>, vector<1x8x8x128xbf16>
    %23 = vector.shape_cast %22 : vector<1x8x8x128xbf16> to vector<8x8x128xbf16>
    %24 = vector.shape_cast %23 : vector<8x8x128xbf16> to vector<64x128xbf16>
    %c3 = arith.constant 3 : index
    %c0_25 = arith.constant 0 : index
    %c0_26 = arith.constant 0 : index
    %25 = vector.load %arg2[%c3, %c0_25, %c0_26] : memref<9x128x128xbf16, #tpu.memory_space<vmem>>, vector<1x128x128xbf16>
    %26 = vector.shape_cast %25 : vector<1x128x128xbf16> to vector<128x128xbf16>
    %cst_27 = arith.constant dense<0.000000e+00> : vector<64x128xf32>
    %27 = tpu.matmul %24, %26, %cst_27 {dimension_numbers = #tpu.dot_dimension_numbers<[1], [0], [0], [1], [0, 0, 1, 1], [], []>} : vector<64x128xbf16>, vector<128x128xbf16>, vector<64x128xf32> -> vector<64x128xf32>
    %28 = arith.addf %21, %27 : vector<64x128xf32>
    %c0_28 = arith.constant 0 : index
    %c1_29 = arith.constant 1 : index
    %c1_30 = arith.constant 1 : index
    %c0_31 = arith.constant 0 : index
    %29 = vector.load %arg1[%c0_28, %c1_29, %c1_30, %c0_31] : memref<1x10x10x128xbf16, #tpu.memory_space<vmem>>, vector<1x8x8x128xbf16>
    %30 = vector.shape_cast %29 : vector<1x8x8x128xbf16> to vector<8x8x128xbf16>
    %31 = vector.shape_cast %30 : vector<8x8x128xbf16> to vector<64x128xbf16>
    %c4 = arith.constant 4 : index
    %c0_32 = arith.constant 0 : index
    %c0_33 = arith.constant 0 : index
    %32 = vector.load %arg2[%c4, %c0_32, %c0_33] : memref<9x128x128xbf16, #tpu.memory_space<vmem>>, vector<1x128x128xbf16>
    %33 = vector.shape_cast %32 : vector<1x128x128xbf16> to vector<128x128xbf16>
    %cst_34 = arith.constant dense<0.000000e+00> : vector<64x128xf32>
    %34 = tpu.matmul %31, %33, %cst_34 {dimension_numbers = #tpu.dot_dimension_numbers<[1], [0], [0], [1], [0, 0, 1, 1], [], []>} : vector<64x128xbf16>, vector<128x128xbf16>, vector<64x128xf32> -> vector<64x128xf32>
    %35 = arith.addf %28, %34 : vector<64x128xf32>
    %c0_35 = arith.constant 0 : index
    %c1_36 = arith.constant 1 : index
    %c2_37 = arith.constant 2 : index
    %c0_38 = arith.constant 0 : index
    %36 = vector.load %arg1[%c0_35, %c1_36, %c2_37, %c0_38] : memref<1x10x10x128xbf16, #tpu.memory_space<vmem>>, vector<1x8x8x128xbf16>
    %37 = vector.shape_cast %36 : vector<1x8x8x128xbf16> to vector<8x8x128xbf16>
    %38 = vector.shape_cast %37 : vector<8x8x128xbf16> to vector<64x128xbf16>
    %c5 = arith.constant 5 : index
    %c0_39 = arith.constant 0 : index
    %c0_40 = arith.constant 0 : index
    %39 = vector.load %arg2[%c5, %c0_39, %c0_40] : memref<9x128x128xbf16, #tpu.memory_space<vmem>>, vector<1x128x128xbf16>
    %40 = vector.shape_cast %39 : vector<1x128x128xbf16> to vector<128x128xbf16>
    %cst_41 = arith.constant dense<0.000000e+00> : vector<64x128xf32>
    %41 = tpu.matmul %38, %40, %cst_41 {dimension_numbers = #tpu.dot_dimension_numbers<[1], [0], [0], [1], [0, 0, 1, 1], [], []>} : vector<64x128xbf16>, vector<128x128xbf16>, vector<64x128xf32> -> vector<64x128xf32>
    %42 = arith.addf %35, %41 : vector<64x128xf32>
    %c0_42 = arith.constant 0 : index
    %c2_43 = arith.constant 2 : index
    %c0_44 = arith.constant 0 : index
    %c0_45 = arith.constant 0 : index
    %43 = vector.load %arg1[%c0_42, %c2_43, %c0_44, %c0_45] : memref<1x10x10x128xbf16, #tpu.memory_space<vmem>>, vector<1x8x8x128xbf16>
    %44 = vector.shape_cast %43 : vector<1x8x8x128xbf16> to vector<8x8x128xbf16>
    %45 = vector.shape_cast %44 : vector<8x8x128xbf16> to vector<64x128xbf16>
    %c6 = arith.constant 6 : index
    %c0_46 = arith.constant 0 : index
    %c0_47 = arith.constant 0 : index
    %46 = vector.load %arg2[%c6, %c0_46, %c0_47] : memref<9x128x128xbf16, #tpu.memory_space<vmem>>, vector<1x128x128xbf16>
    %47 = vector.shape_cast %46 : vector<1x128x128xbf16> to vector<128x128xbf16>
    %cst_48 = arith.constant dense<0.000000e+00> : vector<64x128xf32>
    %48 = tpu.matmul %45, %47, %cst_48 {dimension_numbers = #tpu.dot_dimension_numbers<[1], [0], [0], [1], [0, 0, 1, 1], [], []>} : vector<64x128xbf16>, vector<128x128xbf16>, vector<64x128xf32> -> vector<64x128xf32>
    %49 = arith.addf %42, %48 : vector<64x128xf32>
    %c0_49 = arith.constant 0 : index
    %c2_50 = arith.constant 2 : index
    %c1_51 = arith.constant 1 : index
    %c0_52 = arith.constant 0 : index
    %50 = vector.load %arg1[%c0_49, %c2_50, %c1_51, %c0_52] : memref<1x10x10x128xbf16, #tpu.memory_space<vmem>>, vector<1x8x8x128xbf16>
    %51 = vector.shape_cast %50 : vector<1x8x8x128xbf16> to vector<8x8x128xbf16>
    %52 = vector.shape_cast %51 : vector<8x8x128xbf16> to vector<64x128xbf16>
    %c7 = arith.constant 7 : index
    %c0_53 = arith.constant 0 : index
    %c0_54 = arith.constant 0 : index
    %53 = vector.load %arg2[%c7, %c0_53, %c0_54] : memref<9x128x128xbf16, #tpu.memory_space<vmem>>, vector<1x128x128xbf16>
    %54 = vector.shape_cast %53 : vector<1x128x128xbf16> to vector<128x128xbf16>
    %cst_55 = arith.constant dense<0.000000e+00> : vector<64x128xf32>
    %55 = tpu.matmul %52, %54, %cst_55 {dimension_numbers = #tpu.dot_dimension_numbers<[1], [0], [0], [1], [0, 0, 1, 1], [], []>} : vector<64x128xbf16>, vector<128x128xbf16>, vector<64x128xf32> -> vector<64x128xf32>
    %56 = arith.addf %49, %55 : vector<64x128xf32>
    %c0_56 = arith.constant 0 : index
    %c2_57 = arith.constant 2 : index
    %c2_58 = arith.constant 2 : index
    %c0_59 = arith.constant 0 : index
    %57 = vector.load %arg1[%c0_56, %c2_57, %c2_58, %c0_59] : memref<1x10x10x128xbf16, #tpu.memory_space<vmem>>, vector<1x8x8x128xbf16>
    %58 = vector.shape_cast %57 : vector<1x8x8x128xbf16> to vector<8x8x128xbf16>
    %59 = vector.shape_cast %58 : vector<8x8x128xbf16> to vector<64x128xbf16>
    %c8 = arith.constant 8 : index
    %c0_60 = arith.constant 0 : index
    %c0_61 = arith.constant 0 : index
    %60 = vector.load %arg2[%c8, %c0_60, %c0_61] : memref<9x128x128xbf16, #tpu.memory_space<vmem>>, vector<1x128x128xbf16>
    %61 = vector.shape_cast %60 : vector<1x128x128xbf16> to vector<128x128xbf16>
    %cst_62 = arith.constant dense<0.000000e+00> : vector<64x128xf32>
    %62 = tpu.matmul %59, %61, %cst_62 {dimension_numbers = #tpu.dot_dimension_numbers<[1], [0], [0], [1], [0, 0, 1, 1], [], []>} : vector<64x128xbf16>, vector<128x128xbf16>, vector<64x128xf32> -> vector<64x128xf32>
    %63 = arith.addf %56, %62 : vector<64x128xf32>
    %c0_63 = arith.constant 0 : index
    %c0_64 = arith.constant 0 : index
    %64 = vector.load %arg3[%c0_63, %c0_64] : memref<1x128xf32, #tpu.memory_space<vmem>>, vector<1x128xf32>
    %65 = vector.broadcast %64 : vector<1x128xf32> to vector<64x128xf32>
    %66 = arith.addf %63, %65 : vector<64x128xf32>
    %67 = vector.shape_cast %66 : vector<64x128xf32> to vector<8x8x128xf32>
    %68 = arith.truncf %67 : vector<8x8x128xf32> to vector<8x8x128xbf16>
    %c0_65 = arith.constant 0 : index
    %c0_66 = arith.constant 0 : index
    %c0_67 = arith.constant 0 : index
    %c0_68 = arith.constant 0 : index
    %69 = vector.load %arg4[%c0_65, %c0_66, %c0_67, %c0_68] : memref<1x8x8x128xbf16, #tpu.memory_space<vmem>>, vector<1x8x8x128xbf16>
    %70 = vector.shape_cast %69 : vector<1x8x8x128xbf16> to vector<8x8x128xbf16>
    %71 = vector.shape_cast %68 : vector<8x8x128xbf16> to vector<1x8x8x128xbf16>
    tpu.vector_store %arg4[%c0_65, %c0_66, %c0_67, %c0_68], %71 {strides = array<i32>} : memref<1x8x8x128xbf16, #tpu.memory_space<vmem>>, vector<1x8x8x128xbf16>,
    return
  }
  func.func @transform_0(%arg0: i32) -> (i32, i32, i32, i32) {
    %c0_i32 = arith.constant 0 : i32
    %c0_i32_0 = arith.constant 0 : i32
    %c0_i32_1 = arith.constant 0 : i32
    %c0_i32_2 = arith.constant 0 : i32
    return %arg0, %c0_i32, %c0_i32_0, %c0_i32_1 : i32, i32, i32, i32
  }
  func.func @transform_1(%arg0: i32) -> (i32, i32, i32) {
    %c0_i32 = arith.constant 0 : i32
    %c0_i32_0 = arith.constant 0 : i32
    %c0_i32_1 = arith.constant 0 : i32
    %c0_i32_2 = arith.constant 0 : i32
    return %c0_i32, %c0_i32_0, %c0_i32_1 : i32, i32, i32
  }
  func.func @transform_2(%arg0: i32) -> (i32, i32) {
    %c0_i32 = arith.constant 0 : i32
    %c0_i32_0 = arith.constant 0 : i32
    %c0_i32_1 = arith.constant 0 : i32
    return %c0_i32, %c0_i32_0 : i32, i32
  }
  func.func @transform_3(%arg0: i32) -> (i32, i32, i32, i32) {
    %c0_i32 = arith.constant 0 : i32
    %c0_i32_0 = arith.constant 0 : i32
    %c0_i32_1 = arith.constant 0 : i32
    %c0_i32_2 = arith.constant 0 : i32
    return %arg0, %c0_i32, %c0_i32_0, %c0_i32_1 : i32, i32, i32, i32
  }
}

module attributes {stable_mosaic.version = 11 : i64} {
  func.func @_matmul_res_kernel(%arg0: i32, %arg1: i32, %arg2: memref<64x128xbf16, #tpu.memory_space<vmem>>, %arg3: memref<128x256xbf16, #tpu.memory_space<vmem>>, %arg4: memref<1x256xf32, #tpu.memory_space<vmem>>, %arg5: memref<64x256xbf16, #tpu.memory_space<vmem>>, %arg6: memref<64x256xbf16, #tpu.memory_space<vmem>>) attributes {dimension_semantics = [#tpu.dimension_semantics<parallel>, #tpu.dimension_semantics<parallel>], iteration_bounds = array<i64: 2, 1>, scalar_prefetch = 0 : i64, scratch_operands = 0 : i64, tpu.core_type = #tpu.core_type<tc>, window_params = [{transform_indices = @transform_0, window_bounds = array<i64: 64, 128>}, {transform_indices = @transform_1, window_bounds = array<i64: 128, 256>}, {transform_indices = @transform_2, window_bounds = array<i64: 1, 256>}, {transform_indices = @transform_3, window_bounds = array<i64: 64, 256>}, {transform_indices = @transform_4, window_bounds = array<i64: 64, 256>}]} {
    %c0 = arith.constant 0 : index
    %c0_0 = arith.constant 0 : index
    %0 = vector.load %arg2[%c0, %c0_0] : memref<64x128xbf16, #tpu.memory_space<vmem>>, vector<64x128xbf16>
    %c0_1 = arith.constant 0 : index
    %c0_2 = arith.constant 0 : index
    %1 = vector.load %arg3[%c0_1, %c0_2] : memref<128x256xbf16, #tpu.memory_space<vmem>>, vector<128x256xbf16>
    %cst = arith.constant dense<0.000000e+00> : vector<64x256xf32>
    %2 = tpu.matmul %0, %1, %cst {dimension_numbers = #tpu.dot_dimension_numbers<[1], [0], [0], [1], [0, 0, 1, 1], [], []>} : vector<64x128xbf16>, vector<128x256xbf16>, vector<64x256xf32> -> vector<64x256xf32>
    %c0_3 = arith.constant 0 : index
    %c0_4 = arith.constant 0 : index
    %3 = vector.load %arg4[%c0_3, %c0_4] : memref<1x256xf32, #tpu.memory_space<vmem>>, vector<1x256xf32>
    %4 = vector.broadcast %3 : vector<1x256xf32> to vector<64x256xf32>
    %5 = arith.addf %2, %4 : vector<64x256xf32>
    %c0_5 = arith.constant 0 : index
    %c0_6 = arith.constant 0 : index
    %6 = vector.load %arg5[%c0_5, %c0_6] : memref<64x256xbf16, #tpu.memory_space<vmem>>, vector<64x256xbf16>
    %7 = arith.extf %6 : vector<64x256xbf16> to vector<64x256xf32>
    %8 = arith.addf %5, %7 : vector<64x256xf32>
    %cst_7 = arith.constant 0.000000e+00 : f32
    %9 = vector.broadcast %cst_7 : f32 to vector<64x256xf32>
    %10 = arith.maximumf %8, %9 : vector<64x256xf32>
    %11 = arith.truncf %10 : vector<64x256xf32> to vector<64x256xbf16>
    %c0_8 = arith.constant 0 : index
    %c0_9 = arith.constant 0 : index
    %12 = vector.load %arg6[%c0_8, %c0_9] : memref<64x256xbf16, #tpu.memory_space<vmem>>, vector<64x256xbf16>
    tpu.vector_store %arg6[%c0_8, %c0_9], %11 {strides = array<i32>} : memref<64x256xbf16, #tpu.memory_space<vmem>>, vector<64x256xbf16>,
    return
  }
  func.func @transform_0(%arg0: i32, %arg1: i32) -> (i32, i32) {
    %c0_i32 = arith.constant 0 : i32
    %c0_i32_0 = arith.constant 0 : i32
    return %arg0, %c0_i32 : i32, i32
  }
  func.func @transform_1(%arg0: i32, %arg1: i32) -> (i32, i32) {
    %c0_i32 = arith.constant 0 : i32
    %c0_i32_0 = arith.constant 0 : i32
    return %c0_i32, %arg1 : i32, i32
  }
  func.func @transform_2(%arg0: i32, %arg1: i32) -> (i32, i32) {
    %c0_i32 = arith.constant 0 : i32
    %c0_i32_0 = arith.constant 0 : i32
    return %c0_i32, %arg1 : i32, i32
  }
  func.func @transform_3(%arg0: i32, %arg1: i32) -> (i32, i32) {
    %c0_i32 = arith.constant 0 : i32
    return %arg0, %arg1 : i32, i32
  }
  func.func @transform_4(%arg0: i32, %arg1: i32) -> (i32, i32) {
    %c0_i32 = arith.constant 0 : i32
    return %arg0, %arg1 : i32, i32
  }
}

module attributes {stable_mosaic.version = 11 : i64} {
  func.func @_matmul_kernel(%arg0: i32, %arg1: i32, %arg2: memref<16x256xbf16, #tpu.memory_space<vmem>>, %arg3: memref<256x256xbf16, #tpu.memory_space<vmem>>, %arg4: memref<1x256xf32, #tpu.memory_space<vmem>>, %arg5: memref<16x256xbf16, #tpu.memory_space<vmem>>) attributes {dimension_semantics = [#tpu.dimension_semantics<parallel>, #tpu.dimension_semantics<parallel>], iteration_bounds = array<i64: 2, 2>, scalar_prefetch = 0 : i64, scratch_operands = 0 : i64, tpu.core_type = #tpu.core_type<tc>, window_params = [{transform_indices = @transform_0, window_bounds = array<i64: 16, 256>}, {transform_indices = @transform_1, window_bounds = array<i64: 256, 256>}, {transform_indices = @transform_2, window_bounds = array<i64: 1, 256>}, {transform_indices = @transform_3, window_bounds = array<i64: 16, 256>}]} {
    %c0 = arith.constant 0 : index
    %c0_0 = arith.constant 0 : index
    %0 = vector.load %arg2[%c0, %c0_0] : memref<16x256xbf16, #tpu.memory_space<vmem>>, vector<16x256xbf16>
    %c0_1 = arith.constant 0 : index
    %c0_2 = arith.constant 0 : index
    %1 = vector.load %arg3[%c0_1, %c0_2] : memref<256x256xbf16, #tpu.memory_space<vmem>>, vector<256x256xbf16>
    %cst = arith.constant dense<0.000000e+00> : vector<16x256xf32>
    %2 = tpu.matmul %0, %1, %cst {dimension_numbers = #tpu.dot_dimension_numbers<[1], [0], [0], [1], [0, 0, 1, 1], [], []>} : vector<16x256xbf16>, vector<256x256xbf16>, vector<16x256xf32> -> vector<16x256xf32>
    %c0_3 = arith.constant 0 : index
    %c0_4 = arith.constant 0 : index
    %3 = vector.load %arg4[%c0_3, %c0_4] : memref<1x256xf32, #tpu.memory_space<vmem>>, vector<1x256xf32>
    %4 = vector.broadcast %3 : vector<1x256xf32> to vector<16x256xf32>
    %5 = arith.addf %2, %4 : vector<16x256xf32>
    %6 = arith.truncf %5 : vector<16x256xf32> to vector<16x256xbf16>
    %c0_5 = arith.constant 0 : index
    %c0_6 = arith.constant 0 : index
    %7 = vector.load %arg5[%c0_5, %c0_6] : memref<16x256xbf16, #tpu.memory_space<vmem>>, vector<16x256xbf16>
    tpu.vector_store %arg5[%c0_5, %c0_6], %6 {strides = array<i32>} : memref<16x256xbf16, #tpu.memory_space<vmem>>, vector<16x256xbf16>,
    return
  }
  func.func @transform_0(%arg0: i32, %arg1: i32) -> (i32, i32) {
    %c0_i32 = arith.constant 0 : i32
    %c0_i32_0 = arith.constant 0 : i32
    return %arg0, %c0_i32 : i32, i32
  }
  func.func @transform_1(%arg0: i32, %arg1: i32) -> (i32, i32) {
    %c0_i32 = arith.constant 0 : i32
    %c0_i32_0 = arith.constant 0 : i32
    return %c0_i32, %arg1 : i32, i32
  }
  func.func @transform_2(%arg0: i32, %arg1: i32) -> (i32, i32) {
    %c0_i32 = arith.constant 0 : i32
    %c0_i32_0 = arith.constant 0 : i32
    return %c0_i32, %arg1 : i32, i32
  }
  func.func @transform_3(%arg0: i32, %arg1: i32) -> (i32, i32) {
    %c0_i32 = arith.constant 0 : i32
    return %arg0, %arg1 : i32, i32
  }
}

module attributes {stable_mosaic.version = 11 : i64} {
  func.func @_matmul_kernel(%arg0: i32, %arg1: i32, %arg2: memref<64x256xbf16, #tpu.memory_space<vmem>>, %arg3: memref<256x128xbf16, #tpu.memory_space<vmem>>, %arg4: memref<1x128xf32, #tpu.memory_space<vmem>>, %arg5: memref<64x128xbf16, #tpu.memory_space<vmem>>) attributes {dimension_semantics = [#tpu.dimension_semantics<parallel>, #tpu.dimension_semantics<parallel>], iteration_bounds = array<i64: 2, 1>, scalar_prefetch = 0 : i64, scratch_operands = 0 : i64, tpu.core_type = #tpu.core_type<tc>, window_params = [{transform_indices = @transform_0, window_bounds = array<i64: 64, 256>}, {transform_indices = @transform_1, window_bounds = array<i64: 256, 128>}, {transform_indices = @transform_2, window_bounds = array<i64: 1, 128>}, {transform_indices = @transform_3, window_bounds = array<i64: 64, 128>}]} {
    %c0 = arith.constant 0 : index
    %c0_0 = arith.constant 0 : index
    %0 = vector.load %arg2[%c0, %c0_0] : memref<64x256xbf16, #tpu.memory_space<vmem>>, vector<64x256xbf16>
    %c0_1 = arith.constant 0 : index
    %c0_2 = arith.constant 0 : index
    %1 = vector.load %arg3[%c0_1, %c0_2] : memref<256x128xbf16, #tpu.memory_space<vmem>>, vector<256x128xbf16>
    %cst = arith.constant dense<0.000000e+00> : vector<64x128xf32>
    %2 = tpu.matmul %0, %1, %cst {dimension_numbers = #tpu.dot_dimension_numbers<[1], [0], [0], [1], [0, 0, 1, 1], [], []>} : vector<64x256xbf16>, vector<256x128xbf16>, vector<64x128xf32> -> vector<64x128xf32>
    %c0_3 = arith.constant 0 : index
    %c0_4 = arith.constant 0 : index
    %3 = vector.load %arg4[%c0_3, %c0_4] : memref<1x128xf32, #tpu.memory_space<vmem>>, vector<1x128xf32>
    %4 = vector.broadcast %3 : vector<1x128xf32> to vector<64x128xf32>
    %5 = arith.addf %2, %4 : vector<64x128xf32>
    %6 = arith.truncf %5 : vector<64x128xf32> to vector<64x128xbf16>
    %c0_5 = arith.constant 0 : index
    %c0_6 = arith.constant 0 : index
    %7 = vector.load %arg5[%c0_5, %c0_6] : memref<64x128xbf16, #tpu.memory_space<vmem>>, vector<64x128xbf16>
    tpu.vector_store %arg5[%c0_5, %c0_6], %6 {strides = array<i32>} : memref<64x128xbf16, #tpu.memory_space<vmem>>, vector<64x128xbf16>,
    return
  }
  func.func @transform_0(%arg0: i32, %arg1: i32) -> (i32, i32) {
    %c0_i32 = arith.constant 0 : i32
    %c0_i32_0 = arith.constant 0 : i32
    return %arg0, %c0_i32 : i32, i32
  }
  func.func @transform_1(%arg0: i32, %arg1: i32) -> (i32, i32) {
    %c0_i32 = arith.constant 0 : i32
    %c0_i32_0 = arith.constant 0 : i32
    return %c0_i32, %arg1 : i32, i32
  }
  func.func @transform_2(%arg0: i32, %arg1: i32) -> (i32, i32) {
    %c0_i32 = arith.constant 0 : i32
    %c0_i32_0 = arith.constant 0 : i32
    return %c0_i32, %arg1 : i32, i32
  }
  func.func @transform_3(%arg0: i32, %arg1: i32) -> (i32, i32) {
    %c0_i32 = arith.constant 0 : i32
    return %arg0, %arg1 : i32, i32
  }
}

module attributes {stable_mosaic.version = 11 : i64} {
  func.func @_matmul_kernel(%arg0: i32, %arg1: i32, %arg2: memref<16x1152xbf16, #tpu.memory_space<vmem>>, %arg3: memref<1152x128xbf16, #tpu.memory_space<vmem>>, %arg4: memref<1x128xf32, #tpu.memory_space<vmem>>, %arg5: memref<16x128xbf16, #tpu.memory_space<vmem>>) attributes {dimension_semantics = [#tpu.dimension_semantics<parallel>, #tpu.dimension_semantics<parallel>], iteration_bounds = array<i64: 2, 1>, scalar_prefetch = 0 : i64, scratch_operands = 0 : i64, tpu.core_type = #tpu.core_type<tc>, window_params = [{transform_indices = @transform_0, window_bounds = array<i64: 16, 1152>}, {transform_indices = @transform_1, window_bounds = array<i64: 1152, 128>}, {transform_indices = @transform_2, window_bounds = array<i64: 1, 128>}, {transform_indices = @transform_3, window_bounds = array<i64: 16, 128>}]} {
    %c0 = arith.constant 0 : index
    %c0_0 = arith.constant 0 : index
    %0 = vector.load %arg2[%c0, %c0_0] : memref<16x1152xbf16, #tpu.memory_space<vmem>>, vector<16x1152xbf16>
    %c0_1 = arith.constant 0 : index
    %c0_2 = arith.constant 0 : index
    %1 = vector.load %arg3[%c0_1, %c0_2] : memref<1152x128xbf16, #tpu.memory_space<vmem>>, vector<1152x128xbf16>
    %cst = arith.constant dense<0.000000e+00> : vector<16x128xf32>
    %2 = tpu.matmul %0, %1, %cst {dimension_numbers = #tpu.dot_dimension_numbers<[1], [0], [0], [1], [0, 0, 1, 1], [], []>} : vector<16x1152xbf16>, vector<1152x128xbf16>, vector<16x128xf32> -> vector<16x128xf32>
    %c0_3 = arith.constant 0 : index
    %c0_4 = arith.constant 0 : index
    %3 = vector.load %arg4[%c0_3, %c0_4] : memref<1x128xf32, #tpu.memory_space<vmem>>, vector<1x128xf32>
    %4 = vector.broadcast %3 : vector<1x128xf32> to vector<16x128xf32>
    %5 = arith.addf %2, %4 : vector<16x128xf32>
    %6 = arith.truncf %5 : vector<16x128xf32> to vector<16x128xbf16>
    %c0_5 = arith.constant 0 : index
    %c0_6 = arith.constant 0 : index
    %7 = vector.load %arg5[%c0_5, %c0_6] : memref<16x128xbf16, #tpu.memory_space<vmem>>, vector<16x128xbf16>
    tpu.vector_store %arg5[%c0_5, %c0_6], %6 {strides = array<i32>} : memref<16x128xbf16, #tpu.memory_space<vmem>>, vector<16x128xbf16>,
    return
  }
  func.func @transform_0(%arg0: i32, %arg1: i32) -> (i32, i32) {
    %c0_i32 = arith.constant 0 : i32
    %c0_i32_0 = arith.constant 0 : i32
    return %arg0, %c0_i32 : i32, i32
  }
  func.func @transform_1(%arg0: i32, %arg1: i32) -> (i32, i32) {
    %c0_i32 = arith.constant 0 : i32
    %c0_i32_0 = arith.constant 0 : i32
    return %c0_i32, %arg1 : i32, i32
  }
  func.func @transform_2(%arg0: i32, %arg1: i32) -> (i32, i32) {
    %c0_i32 = arith.constant 0 : i32
    %c0_i32_0 = arith.constant 0 : i32
    return %c0_i32, %arg1 : i32, i32
  }
  func.func @transform_3(%arg0: i32, %arg1: i32) -> (i32, i32) {
    %c0_i32 = arith.constant 0 : i32
    return %arg0, %arg1 : i32, i32
  }
}

module attributes {stable_mosaic.version = 11 : i64} {
  func.func @_matmul_res_kernel(%arg0: i32, %arg1: i32, %arg2: memref<16x128xbf16, #tpu.memory_space<vmem>>, %arg3: memref<128x256xbf16, #tpu.memory_space<vmem>>, %arg4: memref<1x256xf32, #tpu.memory_space<vmem>>, %arg5: memref<16x256xbf16, #tpu.memory_space<vmem>>, %arg6: memref<16x256xbf16, #tpu.memory_space<vmem>>) attributes {dimension_semantics = [#tpu.dimension_semantics<parallel>, #tpu.dimension_semantics<parallel>], iteration_bounds = array<i64: 2, 2>, scalar_prefetch = 0 : i64, scratch_operands = 0 : i64, tpu.core_type = #tpu.core_type<tc>, window_params = [{transform_indices = @transform_0, window_bounds = array<i64: 16, 128>}, {transform_indices = @transform_1, window_bounds = array<i64: 128, 256>}, {transform_indices = @transform_2, window_bounds = array<i64: 1, 256>}, {transform_indices = @transform_3, window_bounds = array<i64: 16, 256>}, {transform_indices = @transform_4, window_bounds = array<i64: 16, 256>}]} {
    %c0 = arith.constant 0 : index
    %c0_0 = arith.constant 0 : index
    %0 = vector.load %arg2[%c0, %c0_0] : memref<16x128xbf16, #tpu.memory_space<vmem>>, vector<16x128xbf16>
    %c0_1 = arith.constant 0 : index
    %c0_2 = arith.constant 0 : index
    %1 = vector.load %arg3[%c0_1, %c0_2] : memref<128x256xbf16, #tpu.memory_space<vmem>>, vector<128x256xbf16>
    %cst = arith.constant dense<0.000000e+00> : vector<16x256xf32>
    %2 = tpu.matmul %0, %1, %cst {dimension_numbers = #tpu.dot_dimension_numbers<[1], [0], [0], [1], [0, 0, 1, 1], [], []>} : vector<16x128xbf16>, vector<128x256xbf16>, vector<16x256xf32> -> vector<16x256xf32>
    %c0_3 = arith.constant 0 : index
    %c0_4 = arith.constant 0 : index
    %3 = vector.load %arg4[%c0_3, %c0_4] : memref<1x256xf32, #tpu.memory_space<vmem>>, vector<1x256xf32>
    %4 = vector.broadcast %3 : vector<1x256xf32> to vector<16x256xf32>
    %5 = arith.addf %2, %4 : vector<16x256xf32>
    %c0_5 = arith.constant 0 : index
    %c0_6 = arith.constant 0 : index
    %6 = vector.load %arg5[%c0_5, %c0_6] : memref<16x256xbf16, #tpu.memory_space<vmem>>, vector<16x256xbf16>
    %7 = arith.extf %6 : vector<16x256xbf16> to vector<16x256xf32>
    %8 = arith.addf %5, %7 : vector<16x256xf32>
    %cst_7 = arith.constant 0.000000e+00 : f32
    %9 = vector.broadcast %cst_7 : f32 to vector<16x256xf32>
    %10 = arith.maximumf %8, %9 : vector<16x256xf32>
    %11 = arith.truncf %10 : vector<16x256xf32> to vector<16x256xbf16>
    %c0_8 = arith.constant 0 : index
    %c0_9 = arith.constant 0 : index
    %12 = vector.load %arg6[%c0_8, %c0_9] : memref<16x256xbf16, #tpu.memory_space<vmem>>, vector<16x256xbf16>
    tpu.vector_store %arg6[%c0_8, %c0_9], %11 {strides = array<i32>} : memref<16x256xbf16, #tpu.memory_space<vmem>>, vector<16x256xbf16>,
    return
  }
  func.func @transform_0(%arg0: i32, %arg1: i32) -> (i32, i32) {
    %c0_i32 = arith.constant 0 : i32
    %c0_i32_0 = arith.constant 0 : i32
    return %arg0, %c0_i32 : i32, i32
  }
  func.func @transform_1(%arg0: i32, %arg1: i32) -> (i32, i32) {
    %c0_i32 = arith.constant 0 : i32
    %c0_i32_0 = arith.constant 0 : i32
    return %c0_i32, %arg1 : i32, i32
  }
  func.func @transform_2(%arg0: i32, %arg1: i32) -> (i32, i32) {
    %c0_i32 = arith.constant 0 : i32
    %c0_i32_0 = arith.constant 0 : i32
    return %c0_i32, %arg1 : i32, i32
  }
  func.func @transform_3(%arg0: i32, %arg1: i32) -> (i32, i32) {
    %c0_i32 = arith.constant 0 : i32
    return %arg0, %arg1 : i32, i32
  }
  func.func @transform_4(%arg0: i32, %arg1: i32) -> (i32, i32) {
    %c0_i32 = arith.constant 0 : i32
    return %arg0, %arg1 : i32, i32
  }
}

module attributes {stable_mosaic.version = 11 : i64} {
  func.func @_matmul_kernel(%arg0: i32, %arg1: i32, %arg2: memref<16x512xbf16, #tpu.memory_space<vmem>>, %arg3: memref<512x256xbf16, #tpu.memory_space<vmem>>, %arg4: memref<1x256xf32, #tpu.memory_space<vmem>>, %arg5: memref<16x256xbf16, #tpu.memory_space<vmem>>) attributes {dimension_semantics = [#tpu.dimension_semantics<parallel>, #tpu.dimension_semantics<parallel>], iteration_bounds = array<i64: 2, 1>, scalar_prefetch = 0 : i64, scratch_operands = 0 : i64, tpu.core_type = #tpu.core_type<tc>, window_params = [{transform_indices = @transform_0, window_bounds = array<i64: 16, 512>}, {transform_indices = @transform_1, window_bounds = array<i64: 512, 256>}, {transform_indices = @transform_2, window_bounds = array<i64: 1, 256>}, {transform_indices = @transform_3, window_bounds = array<i64: 16, 256>}]} {
    %c0 = arith.constant 0 : index
    %c0_0 = arith.constant 0 : index
    %0 = vector.load %arg2[%c0, %c0_0] : memref<16x512xbf16, #tpu.memory_space<vmem>>, vector<16x512xbf16>
    %c0_1 = arith.constant 0 : index
    %c0_2 = arith.constant 0 : index
    %1 = vector.load %arg3[%c0_1, %c0_2] : memref<512x256xbf16, #tpu.memory_space<vmem>>, vector<512x256xbf16>
    %cst = arith.constant dense<0.000000e+00> : vector<16x256xf32>
    %2 = tpu.matmul %0, %1, %cst {dimension_numbers = #tpu.dot_dimension_numbers<[1], [0], [0], [1], [0, 0, 1, 1], [], []>} : vector<16x512xbf16>, vector<512x256xbf16>, vector<16x256xf32> -> vector<16x256xf32>
    %c0_3 = arith.constant 0 : index
    %c0_4 = arith.constant 0 : index
    %3 = vector.load %arg4[%c0_3, %c0_4] : memref<1x256xf32, #tpu.memory_space<vmem>>, vector<1x256xf32>
    %4 = vector.broadcast %3 : vector<1x256xf32> to vector<16x256xf32>
    %5 = arith.addf %2, %4 : vector<16x256xf32>
    %6 = arith.truncf %5 : vector<16x256xf32> to vector<16x256xbf16>
    %c0_5 = arith.constant 0 : index
    %c0_6 = arith.constant 0 : index
    %7 = vector.load %arg5[%c0_5, %c0_6] : memref<16x256xbf16, #tpu.memory_space<vmem>>, vector<16x256xbf16>
    tpu.vector_store %arg5[%c0_5, %c0_6], %6 {strides = array<i32>} : memref<16x256xbf16, #tpu.memory_space<vmem>>, vector<16x256xbf16>,
    return
  }
  func.func @transform_0(%arg0: i32, %arg1: i32) -> (i32, i32) {
    %c0_i32 = arith.constant 0 : i32
    %c0_i32_0 = arith.constant 0 : i32
    return %arg0, %c0_i32 : i32, i32
  }
  func.func @transform_1(%arg0: i32, %arg1: i32) -> (i32, i32) {
    %c0_i32 = arith.constant 0 : i32
    %c0_i32_0 = arith.constant 0 : i32
    return %c0_i32, %arg1 : i32, i32
  }
  func.func @transform_2(%arg0: i32, %arg1: i32) -> (i32, i32) {
    %c0_i32 = arith.constant 0 : i32
    %c0_i32_0 = arith.constant 0 : i32
    return %c0_i32, %arg1 : i32, i32
  }
  func.func @transform_3(%arg0: i32, %arg1: i32) -> (i32, i32) {
    %c0_i32 = arith.constant 0 : i32
    return %arg0, %arg1 : i32, i32
  }
}

module attributes {stable_mosaic.version = 11 : i64} {
  func.func @_matmul_kernel(%arg0: i32, %arg1: i32, %arg2: memref<8x512xbf16, #tpu.memory_space<vmem>>, %arg3: memref<512x256xbf16, #tpu.memory_space<vmem>>, %arg4: memref<1x256xf32, #tpu.memory_space<vmem>>, %arg5: memref<8x256xbf16, #tpu.memory_space<vmem>>) attributes {dimension_semantics = [#tpu.dimension_semantics<parallel>, #tpu.dimension_semantics<parallel>], iteration_bounds = array<i64: 1, 4>, scalar_prefetch = 0 : i64, scratch_operands = 0 : i64, tpu.core_type = #tpu.core_type<tc>, window_params = [{transform_indices = @transform_0, window_bounds = array<i64: 8, 512>}, {transform_indices = @transform_1, window_bounds = array<i64: 512, 256>}, {transform_indices = @transform_2, window_bounds = array<i64: 1, 256>}, {transform_indices = @transform_3, window_bounds = array<i64: 8, 256>}]} {
    %c0 = arith.constant 0 : index
    %c0_0 = arith.constant 0 : index
    %0 = vector.load %arg2[%c0, %c0_0] : memref<8x512xbf16, #tpu.memory_space<vmem>>, vector<8x512xbf16>
    %c0_1 = arith.constant 0 : index
    %c0_2 = arith.constant 0 : index
    %1 = vector.load %arg3[%c0_1, %c0_2] : memref<512x256xbf16, #tpu.memory_space<vmem>>, vector<512x256xbf16>
    %cst = arith.constant dense<0.000000e+00> : vector<8x256xf32>
    %2 = tpu.matmul %0, %1, %cst {dimension_numbers = #tpu.dot_dimension_numbers<[1], [0], [0], [1], [0, 0, 1, 1], [], []>} : vector<8x512xbf16>, vector<512x256xbf16>, vector<8x256xf32> -> vector<8x256xf32>
    %c0_3 = arith.constant 0 : index
    %c0_4 = arith.constant 0 : index
    %3 = vector.load %arg4[%c0_3, %c0_4] : memref<1x256xf32, #tpu.memory_space<vmem>>, vector<1x256xf32>
    %4 = vector.broadcast %3 : vector<1x256xf32> to vector<8x256xf32>
    %5 = arith.addf %2, %4 : vector<8x256xf32>
    %6 = arith.truncf %5 : vector<8x256xf32> to vector<8x256xbf16>
    %c0_5 = arith.constant 0 : index
    %c0_6 = arith.constant 0 : index
    %7 = vector.load %arg5[%c0_5, %c0_6] : memref<8x256xbf16, #tpu.memory_space<vmem>>, vector<8x256xbf16>
    tpu.vector_store %arg5[%c0_5, %c0_6], %6 {strides = array<i32>} : memref<8x256xbf16, #tpu.memory_space<vmem>>, vector<8x256xbf16>,
    return
  }
  func.func @transform_0(%arg0: i32, %arg1: i32) -> (i32, i32) {
    %c0_i32 = arith.constant 0 : i32
    %c0_i32_0 = arith.constant 0 : i32
    return %arg0, %c0_i32 : i32, i32
  }
  func.func @transform_1(%arg0: i32, %arg1: i32) -> (i32, i32) {
    %c0_i32 = arith.constant 0 : i32
    %c0_i32_0 = arith.constant 0 : i32
    return %c0_i32, %arg1 : i32, i32
  }
  func.func @transform_2(%arg0: i32, %arg1: i32) -> (i32, i32) {
    %c0_i32 = arith.constant 0 : i32
    %c0_i32_0 = arith.constant 0 : i32
    return %c0_i32, %arg1 : i32, i32
  }
  func.func @transform_3(%arg0: i32, %arg1: i32) -> (i32, i32) {
    %c0_i32 = arith.constant 0 : i32
    return %arg0, %arg1 : i32, i32
  }
}

module attributes {stable_mosaic.version = 11 : i64} {
  func.func @_matmul_kernel(%arg0: i32, %arg1: i32, %arg2: memref<8x2304xbf16, #tpu.memory_space<vmem>>, %arg3: memref<2304x128xbf16, #tpu.memory_space<vmem>>, %arg4: memref<1x128xf32, #tpu.memory_space<vmem>>, %arg5: memref<8x128xbf16, #tpu.memory_space<vmem>>) attributes {dimension_semantics = [#tpu.dimension_semantics<parallel>, #tpu.dimension_semantics<parallel>], iteration_bounds = array<i64: 1, 2>, scalar_prefetch = 0 : i64, scratch_operands = 0 : i64, tpu.core_type = #tpu.core_type<tc>, window_params = [{transform_indices = @transform_0, window_bounds = array<i64: 8, 2304>}, {transform_indices = @transform_1, window_bounds = array<i64: 2304, 128>}, {transform_indices = @transform_2, window_bounds = array<i64: 1, 128>}, {transform_indices = @transform_3, window_bounds = array<i64: 8, 128>}]} {
    %c0 = arith.constant 0 : index
    %c0_0 = arith.constant 0 : index
    %0 = vector.load %arg2[%c0, %c0_0] : memref<8x2304xbf16, #tpu.memory_space<vmem>>, vector<8x2304xbf16>
    %c0_1 = arith.constant 0 : index
    %c0_2 = arith.constant 0 : index
    %1 = vector.load %arg3[%c0_1, %c0_2] : memref<2304x128xbf16, #tpu.memory_space<vmem>>, vector<2304x128xbf16>
    %cst = arith.constant dense<0.000000e+00> : vector<8x128xf32>
    %2 = tpu.matmul %0, %1, %cst {dimension_numbers = #tpu.dot_dimension_numbers<[1], [0], [0], [1], [0, 0, 1, 1], [], []>} : vector<8x2304xbf16>, vector<2304x128xbf16>, vector<8x128xf32> -> vector<8x128xf32>
    %c0_3 = arith.constant 0 : index
    %c0_4 = arith.constant 0 : index
    %3 = vector.load %arg4[%c0_3, %c0_4] : memref<1x128xf32, #tpu.memory_space<vmem>>, vector<1x128xf32>
    %4 = vector.broadcast %3 : vector<1x128xf32> to vector<8x128xf32>
    %5 = arith.addf %2, %4 : vector<8x128xf32>
    %6 = arith.truncf %5 : vector<8x128xf32> to vector<8x128xbf16>
    %c0_5 = arith.constant 0 : index
    %c0_6 = arith.constant 0 : index
    %7 = vector.load %arg5[%c0_5, %c0_6] : memref<8x128xbf16, #tpu.memory_space<vmem>>, vector<8x128xbf16>
    tpu.vector_store %arg5[%c0_5, %c0_6], %6 {strides = array<i32>} : memref<8x128xbf16, #tpu.memory_space<vmem>>, vector<8x128xbf16>,
    return
  }
  func.func @transform_0(%arg0: i32, %arg1: i32) -> (i32, i32) {
    %c0_i32 = arith.constant 0 : i32
    %c0_i32_0 = arith.constant 0 : i32
    return %arg0, %c0_i32 : i32, i32
  }
  func.func @transform_1(%arg0: i32, %arg1: i32) -> (i32, i32) {
    %c0_i32 = arith.constant 0 : i32
    %c0_i32_0 = arith.constant 0 : i32
    return %c0_i32, %arg1 : i32, i32
  }
  func.func @transform_2(%arg0: i32, %arg1: i32) -> (i32, i32) {
    %c0_i32 = arith.constant 0 : i32
    %c0_i32_0 = arith.constant 0 : i32
    return %c0_i32, %arg1 : i32, i32
  }
  func.func @transform_3(%arg0: i32, %arg1: i32) -> (i32, i32) {
    %c0_i32 = arith.constant 0 : i32
    return %arg0, %arg1 : i32, i32
  }
}

module attributes {stable_mosaic.version = 11 : i64} {
  func.func @_matmul_res_kernel(%arg0: i32, %arg1: i32, %arg2: memref<8x256xbf16, #tpu.memory_space<vmem>>, %arg3: memref<256x256xbf16, #tpu.memory_space<vmem>>, %arg4: memref<1x256xf32, #tpu.memory_space<vmem>>, %arg5: memref<8x256xbf16, #tpu.memory_space<vmem>>, %arg6: memref<8x256xbf16, #tpu.memory_space<vmem>>) attributes {dimension_semantics = [#tpu.dimension_semantics<parallel>, #tpu.dimension_semantics<parallel>], iteration_bounds = array<i64: 1, 4>, scalar_prefetch = 0 : i64, scratch_operands = 0 : i64, tpu.core_type = #tpu.core_type<tc>, window_params = [{transform_indices = @transform_0, window_bounds = array<i64: 8, 256>}, {transform_indices = @transform_1, window_bounds = array<i64: 256, 256>}, {transform_indices = @transform_2, window_bounds = array<i64: 1, 256>}, {transform_indices = @transform_3, window_bounds = array<i64: 8, 256>}, {transform_indices = @transform_4, window_bounds = array<i64: 8, 256>}]} {
    %c0 = arith.constant 0 : index
    %c0_0 = arith.constant 0 : index
    %0 = vector.load %arg2[%c0, %c0_0] : memref<8x256xbf16, #tpu.memory_space<vmem>>, vector<8x256xbf16>
    %c0_1 = arith.constant 0 : index
    %c0_2 = arith.constant 0 : index
    %1 = vector.load %arg3[%c0_1, %c0_2] : memref<256x256xbf16, #tpu.memory_space<vmem>>, vector<256x256xbf16>
    %cst = arith.constant dense<0.000000e+00> : vector<8x256xf32>
    %2 = tpu.matmul %0, %1, %cst {dimension_numbers = #tpu.dot_dimension_numbers<[1], [0], [0], [1], [0, 0, 1, 1], [], []>} : vector<8x256xbf16>, vector<256x256xbf16>, vector<8x256xf32> -> vector<8x256xf32>
    %c0_3 = arith.constant 0 : index
    %c0_4 = arith.constant 0 : index
    %3 = vector.load %arg4[%c0_3, %c0_4] : memref<1x256xf32, #tpu.memory_space<vmem>>, vector<1x256xf32>
    %4 = vector.broadcast %3 : vector<1x256xf32> to vector<8x256xf32>
    %5 = arith.addf %2, %4 : vector<8x256xf32>
    %c0_5 = arith.constant 0 : index
    %c0_6 = arith.constant 0 : index
    %6 = vector.load %arg5[%c0_5, %c0_6] : memref<8x256xbf16, #tpu.memory_space<vmem>>, vector<8x256xbf16>
    %7 = arith.extf %6 : vector<8x256xbf16> to vector<8x256xf32>
    %8 = arith.addf %5, %7 : vector<8x256xf32>
    %cst_7 = arith.constant 0.000000e+00 : f32
    %9 = vector.broadcast %cst_7 : f32 to vector<8x256xf32>
    %10 = arith.maximumf %8, %9 : vector<8x256xf32>
    %11 = arith.truncf %10 : vector<8x256xf32> to vector<8x256xbf16>
    %c0_8 = arith.constant 0 : index
    %c0_9 = arith.constant 0 : index
    %12 = vector.load %arg6[%c0_8, %c0_9] : memref<8x256xbf16, #tpu.memory_space<vmem>>, vector<8x256xbf16>
    tpu.vector_store %arg6[%c0_8, %c0_9], %11 {strides = array<i32>} : memref<8x256xbf16, #tpu.memory_space<vmem>>, vector<8x256xbf16>,
    return
  }
  func.func @transform_0(%arg0: i32, %arg1: i32) -> (i32, i32) {
    %c0_i32 = arith.constant 0 : i32
    %c0_i32_0 = arith.constant 0 : i32
    return %arg0, %c0_i32 : i32, i32
  }
  func.func @transform_1(%arg0: i32, %arg1: i32) -> (i32, i32) {
    %c0_i32 = arith.constant 0 : i32
    %c0_i32_0 = arith.constant 0 : i32
    return %c0_i32, %arg1 : i32, i32
  }
  func.func @transform_2(%arg0: i32, %arg1: i32) -> (i32, i32) {
    %c0_i32 = arith.constant 0 : i32
    %c0_i32_0 = arith.constant 0 : i32
    return %c0_i32, %arg1 : i32, i32
  }
  func.func @transform_3(%arg0: i32, %arg1: i32) -> (i32, i32) {
    %c0_i32 = arith.constant 0 : i32
    return %arg0, %arg1 : i32, i32
  }
  func.func @transform_4(%arg0: i32, %arg1: i32) -> (i32, i32) {
    %c0_i32 = arith.constant 0 : i32
    return %arg0, %arg1 : i32, i32
  }
}

module attributes {stable_mosaic.version = 11 : i64} {
  func.func @_avgpool_fc_kernel(%arg0: i32, %arg1: memref<2x4x1024xbf16, #tpu.memory_space<vmem>>, %arg2: memref<1024x128xbf16, #tpu.memory_space<vmem>>, %arg3: memref<1x128xf32, #tpu.memory_space<vmem>>, %arg4: memref<2x128xf32, #tpu.memory_space<vmem>>) attributes {dimension_semantics = [#tpu.dimension_semantics<arbitrary>], iteration_bounds = array<i64: 1>, scalar_prefetch = 0 : i64, scratch_operands = 0 : i64, tpu.core_type = #tpu.core_type<tc>, window_params = [{pipeline_mode = #tpu.pipeline_mode<synchronous>, transform_indices = @transform_0, window_bounds = array<i64: 2, 4, 1024>}, {pipeline_mode = #tpu.pipeline_mode<synchronous>, transform_indices = @transform_1, window_bounds = array<i64: 1024, 128>}, {pipeline_mode = #tpu.pipeline_mode<synchronous>, transform_indices = @transform_2, window_bounds = array<i64: 1, 128>}, {pipeline_mode = #tpu.pipeline_mode<synchronous>, transform_indices = @transform_3, window_bounds = array<i64: 2, 128>}]} {
    %c0 = arith.constant 0 : index
    %c0_0 = arith.constant 0 : index
    %c0_1 = arith.constant 0 : index
    %0 = vector.load %arg1[%c0, %c0_0, %c0_1] : memref<2x4x1024xbf16, #tpu.memory_space<vmem>>, vector<2x4x1024xbf16>
    %1 = arith.extf %0 : vector<2x4x1024xbf16> to vector<2x4x1024xf32>
    %cst = arith.constant dense<0.000000e+00> : vector<2x1024xf32>
    %2 = vector.multi_reduction <add>, %1, %cst [1] : vector<2x4x1024xf32> to vector<2x1024xf32>
    %cst_2 = arith.constant 4.000000e+00 : f32
    %3 = vector.broadcast %cst_2 : f32 to vector<2x1024xf32>
    %4 = arith.divf %2, %3 : vector<2x1024xf32>
    %5 = arith.truncf %4 : vector<2x1024xf32> to vector<2x1024xbf16>
    %c0_3 = arith.constant 0 : index
    %c0_4 = arith.constant 0 : index
    %6 = vector.load %arg2[%c0_3, %c0_4] : memref<1024x128xbf16, #tpu.memory_space<vmem>>, vector<1024x128xbf16>
    %cst_5 = arith.constant dense<0.000000e+00> : vector<2x128xf32>
    %7 = tpu.matmul %5, %6, %cst_5 {dimension_numbers = #tpu.dot_dimension_numbers<[1], [0], [0], [1], [0, 0, 1, 1], [], []>} : vector<2x1024xbf16>, vector<1024x128xbf16>, vector<2x128xf32> -> vector<2x128xf32>
    %c0_6 = arith.constant 0 : index
    %c0_7 = arith.constant 0 : index
    %8 = vector.load %arg3[%c0_6, %c0_7] : memref<1x128xf32, #tpu.memory_space<vmem>>, vector<1x128xf32>
    %9 = vector.broadcast %8 : vector<1x128xf32> to vector<2x128xf32>
    %10 = arith.addf %7, %9 : vector<2x128xf32>
    %cst_8 = arith.constant 0.000000e+00 : f32
    %11 = vector.broadcast %cst_8 : f32 to vector<2x128xf32>
    %12 = arith.subf %11, %10 : vector<2x128xf32>
    %13 = math.exp %12 : vector<2x128xf32>
    %cst_9 = arith.constant 1.000000e+00 : f32
    %14 = vector.broadcast %cst_9 : f32 to vector<2x128xf32>
    %15 = arith.addf %14, %13 : vector<2x128xf32>
    %cst_10 = arith.constant 1.000000e+00 : f32
    %16 = vector.broadcast %cst_10 : f32 to vector<2x128xf32>
    %17 = arith.divf %16, %15 : vector<2x128xf32>
    %c0_11 = arith.constant 0 : index
    %c0_12 = arith.constant 0 : index
    %18 = vector.load %arg4[%c0_11, %c0_12] : memref<2x128xf32, #tpu.memory_space<vmem>>, vector<2x128xf32>
    tpu.vector_store %arg4[%c0_11, %c0_12], %17 {strides = array<i32>} : memref<2x128xf32, #tpu.memory_space<vmem>>, vector<2x128xf32>,
    return
  }
  func.func @transform_0(%arg0: i32) -> (i32, i32, i32) {
    %c0_i32 = arith.constant 0 : i32
    %c0_i32_0 = arith.constant 0 : i32
    %c0_i32_1 = arith.constant 0 : i32
    %c0_i32_2 = arith.constant 0 : i32
    return %c0_i32, %c0_i32_0, %c0_i32_1 : i32, i32, i32
  }
  func.func @transform_1(%arg0: i32) -> (i32, i32) {
    %c0_i32 = arith.constant 0 : i32
    %c0_i32_0 = arith.constant 0 : i32
    %c0_i32_1 = arith.constant 0 : i32
    return %c0_i32, %c0_i32_0 : i32, i32
  }
  func.func @transform_2(%arg0: i32) -> (i32, i32) {
    %c0_i32 = arith.constant 0 : i32
    %c0_i32_0 = arith.constant 0 : i32
    %c0_i32_1 = arith.constant 0 : i32
    return %c0_i32, %c0_i32_0 : i32, i32
  }
  func.func @transform_3(%arg0: i32) -> (i32, i32) {
    %c0_i32 = arith.constant 0 : i32
    %c0_i32_0 = arith.constant 0 : i32
    %c0_i32_1 = arith.constant 0 : i32
    return %c0_i32, %c0_i32_0 : i32, i32
  }
}

</mosaic_0001>

<bundles_post_ra>
// kernel: resnet_forward_pallas.17
= control target key start
LH: loop header
LB: loop body
LE: loop exit
PB: predicated region body
PF: predicated region fallthrough
CT: control target
= control target key end

     0   :  { %s668_s6 = smov 0   ;;  %s670_s7 = smov 0   ;;  %s832_s0 = inlined_call_operand.vmem [shape: bf16[3,256,128], index: 0, kind: input, shape index: {}]   ;;  %s833_s1 = inlined_call_operand.vmem [shape: bf16[256,128], index: 1, kind: output, shape index: {}]  }
   0x1   :  { %s672_s8 = smov 0  }
   0x2 LB: > { %s509_s9 = sadd.s32 4294967295, %s656_s8   ;;  %s685_s10 = sadd.s32 1, %s656_s8   ;;  %s656_s8 = sphi %s672_s8, %s836_s8   ;;  %s652_s7 = sphi %s670_s7, %s835_s7   ;;  %s648_s6 = sphi %s668_s6, %s834_s6  }
   0x3   : > { %s15_s11 = ssub.s32 %s656_s8, %s685_s10  ;;  %s18_s12 = sadd.s32 1, %s652_s7 }
   0x4   : > { %p16_p0 = scmp.eq.s32.totalorder %s15_s11, 0  ;;  %p25_p1 = scmp.ne.s32.totalorder %s652_s7, %s648_s6 }
   0x5   : > { %p26_p2 = scmp.eq.s32.totalorder %s656_s8, 0  ;;  %p512_p4 = scmp.ge.s32.totalorder %s656_s8, 2 }
   0x6   : > { %s694_s13 = scalar_select %p16_p0, %s652_s7, %s18_s12  }
   0x7   : > { %p27_p3 = por %p26_p2, %p25_p1  ;;  %77 = sbr.rel (%p512_p4) target bundleno = 31 (0x1f), region = 16 }
   0xe   : > { %80 = sbr.rel (!%p27_p3) target bundleno = 31 (0x1f), region = 20  ;;  %s82_s14 = sand.u32 (%p27_p3), 1, %s652_s7  }
   0xf   : > { %s552_s15 = sshll.u32 (%p27_p3), %s656_s8, 6  ;;  %s608_s16 = smul.u32 (%p27_p3), 192, %s82_s14 }
  0x10   : > { %s702_s19 = scalar_lea.vmem (%p27_p3), %s832_s0, %s552_s15 }
  0x11   : > { %v103_v0 = vld [vmem:[%s702_s19] sm:$0xff] (%p27_p3)   ;;  %v107_v1 = vld [vmem:[%s702_s19 + $0x8] sm:$0xff] (%p27_p3)   ;;  %v111_v2 = vld [vmem:[%s702_s19 + $0x10] sm:$0xff] (%p27_p3)   ;;  %s710_s20 = scalar_lea.vmem (%p27_p3), [#allocation2], %s608_s16 }
  0x12   : > { %v115_v3 = vld [vmem:[%s702_s19 + $0x18] sm:$0xff] (%p27_p3)   ;;  %v119_v4 = vld [vmem:[%s702_s19 + $0x20] sm:$0xff] (%p27_p3)   ;;  %v123_v5 = vld [vmem:[%s702_s19 + $0x28] sm:$0xff] (%p27_p3)   ;;  %104 = vst [vmem:[%s710_s20] sm:$0xff] (%p27_p3), %v103_v0  }
  0x13   : > { %108 = vst [vmem:[%s710_s20 + $0x8] sm:$0xff] (%p27_p3), %v107_v1   ;;  %112 = vst [vmem:[%s710_s20 + $0x10] sm:$0xff] (%p27_p3), %v111_v2   ;;  %v127_v6 = vld [vmem:[%s702_s19 + $0x30] sm:$0xff] (%p27_p3)   ;;  %v131_v7 = vld [vmem:[%s702_s19 + $0x38] sm:$0xff] (%p27_p3)  }
  0x14   : > { %116 = vst [vmem:[%s710_s20 + $0x18] sm:$0xff] (%p27_p3), %v115_v3   ;;  %120 = vst [vmem:[%s710_s20 + $0x20] sm:$0xff] (%p27_p3), %v119_v4   ;;  %v135_v8 = vld [vmem:[%s702_s19 + $0x80] sm:$0xff] (%p27_p3)   ;;  %v139_v9 = vld [vmem:[%s702_s19 + $0x88] sm:$0xff] (%p27_p3)  }
  0x15   : > { %124 = vst [vmem:[%s710_s20 + $0x28] sm:$0xff] %v123_v5   ;;  %128 = vst [vmem:[%s710_s20 + $0x30] sm:$0xff] %v127_v6   ;;  %v143_v10 = vld [vmem:[%s702_s19 + $0x90] sm:$0xff]   ;;  %v147_v11 = vld [vmem:[%s702_s19 + $0x98] sm:$0xff]  }
  0x16   : > { %132 = vst [vmem:[%s710_s20 + $0x38] sm:$0xff] %v131_v7   ;;  %136 = vst [vmem:[%s710_s20 + $0x40] sm:$0xff] %v135_v8   ;;  %v151_v12 = vld [vmem:[%s702_s19 + $0xa0] sm:$0xff]   ;;  %v155_v13 = vld [vmem:[%s702_s19 + $0xa8] sm:$0xff]  }
  0x17   : > { %140 = vst [vmem:[%s710_s20 + $0x48] sm:$0xff] %v139_v9   ;;  %144 = vst [vmem:[%s710_s20 + $0x50] sm:$0xff] %v143_v10   ;;  %v159_v14 = vld [vmem:[%s702_s19 + $0xb0] sm:$0xff]   ;;  %v163_v15 = vld [vmem:[%s702_s19 + $0xb8] sm:$0xff]  }
  0x18   : > { %148 = vst [vmem:[%s710_s20 + $0x58] sm:$0xff] %v147_v11   ;;  %152 = vst [vmem:[%s710_s20 + $0x60] sm:$0xff] %v151_v12   ;;  %v167_v16 = vld [vmem:[%s702_s19 + $0x100] sm:$0xff]   ;;  %v171_v17 = vld [vmem:[%s702_s19 + $0x108] sm:$0xff]  }
  0x19   : > { %156 = vst [vmem:[%s710_s20 + $0x68] sm:$0xff] %v155_v13   ;;  %160 = vst [vmem:[%s710_s20 + $0x70] sm:$0xff] %v159_v14   ;;  %v175_v18 = vld [vmem:[%s702_s19 + $0x110] sm:$0xff]   ;;  %v179_v19 = vld [vmem:[%s702_s19 + $0x118] sm:$0xff]  }
  0x1a   : > { %164 = vst [vmem:[%s710_s20 + $0x78] sm:$0xff] %v163_v15   ;;  %168 = vst [vmem:[%s710_s20 + $0x80] sm:$0xff] %v167_v16   ;;  %v183_v20 = vld [vmem:[%s702_s19 + $0x120] sm:$0xff]   ;;  %v187_v21 = vld [vmem:[%s702_s19 + $0x128] sm:$0xff]  }
  0x1b   : > { %172 = vst [vmem:[%s710_s20 + $0x88] sm:$0xff] %v171_v17   ;;  %176 = vst [vmem:[%s710_s20 + $0x90] sm:$0xff] %v175_v18   ;;  %v191_v22 = vld [vmem:[%s702_s19 + $0x130] sm:$0xff]   ;;  %v195_v23 = vld [vmem:[%s702_s19 + $0x138] sm:$0xff]  }
  0x1c   : > { %180 = vst [vmem:[%s710_s20 + $0x98] sm:$0xff] %v179_v19   ;;  %184 = vst [vmem:[%s710_s20 + $0xa0] sm:$0xff] %v183_v20  }
  0x1d   : > { %188 = vst [vmem:[%s710_s20 + $0xa8] sm:$0xff] %v187_v21   ;;  %192 = vst [vmem:[%s710_s20 + $0xb0] sm:$0xff] %v191_v22  }
  0x1e   : > { %196 = vst [vmem:[%s710_s20 + $0xb8] sm:$0xff] %v195_v23  }
  0x1f PF: > { %p515_p5 = scmp.ge.s32.totalorder %s656_s8, 1  ;;  %p316_p6 = scmp.lt.s32.totalorder %s656_s8, 3 }
  0x21   : > { %p317_p7 = pnand %p515_p5, %p316_p6 }
  0x22   : > { %s323_s21 = sand.u32 (!%p317_p7), 1, %s648_s6   ;;  %s516_s22 = sshll.u32 (!%p317_p7), %s509_s9, 4 }
  0x23   : > { %320 = sbr.rel (%p317_p7) target bundleno = 64 (0x40), region = 61  ;;  %p344_p8 = scmp.lt.s32.totalorder (!%p317_p7), %s516_s22, 31 }
  0x24   : > { %s609_s23 = smul.u32 (!%p317_p7), 192, %s323_s21 }
  0x26   : > { %s759_s24 = scalar_lea.vmem (!%p317_p7), [#allocation2], %s609_s23 }
  0x27   : > { %v349_v24 = vld [vmem:[%s759_s24] sm:$0xf] (!%p317_p7)  ;;  %v350_v25 = vld [vmem:[%s759_s24 + $0x4] sm:$0xf] (!%p317_p7)  ;;  %v351_v32 = vld [vmem:[%s759_s24 + $0x8] sm:$0xf] (!%p317_p7) }
  0x28   : > { %v518_v26 = vld [vmem:[%s759_s24 + $0x40] sm:$0xf] (!%p317_p7)  ;;  %v519_v27 = vld [vmem:[%s759_s24 + $0x44] sm:$0xf] (!%p317_p7)  ;;  %v352_v33 = vld [vmem:[%s759_s24 + $0xc] sm:$0xf] (!%p317_p7) }
  0x29   : > { %v534_v28 = vld [vmem:[%s759_s24 + $0x80] sm:$0xf] (!%p317_p7)  ;;  %v382_v29 = vmax.bf16 (!%p317_p7), %v518_v26, %v349_v24  ;;  %v383_v30 = vmax.bf16 (!%p317_p7), %v519_v27, %v350_v25  ;;  %v535_v31 = vld [vmem:[%s759_s24 + $0x84] sm:$0xf] (!%p317_p7)  ;;  %v520_v34 = vld [vmem:[%s759_s24 + $0x48] sm:$0xf] (!%p317_p7) }
  0x2a   : > { %s838_s22 = smov (!%p344_p8, %s516_s22), 31  ;;  %v521_v35 = vld [vmem:[%s759_s24 + $0x4c] sm:$0xf]  ;;  %v384_v38 = vmax.bf16 %v520_v34, %v351_v32  ;;  %v536_v40 = vld [vmem:[%s759_s24 + $0x88] sm:$0xf] }
  0x2b   : > { %s517_s25 = sshll.u32 %s838_s22, 2  ;;  %v415_v36 = vmax.bf16 %v534_v28, %v382_v29  ;;  %v416_v37 = vmax.bf16 %v535_v31, %v383_v30  ;;  %v385_v39 = vmax.bf16 %v521_v35, %v352_v33  ;;  %v537_v41 = vld [vmem:[%s759_s24 + $0x8c] sm:$0xf]  ;;  %v353_v42 = vld [vmem:[%s759_s24 + $0x10] sm:$0xf] }
  0x2c   : > { %s777_s28 = scalar_lea.vmem %s833_s1, %s517_s25  ;;  %v354_v43 = vld [vmem:[%s759_s24 + $0x14] sm:$0xf]  ;;  %v522_v44 = vld [vmem:[%s759_s24 + $0x50] sm:$0xf]  ;;  %v417_v47 = vmax.bf16 %v536_v40, %v384_v38  ;;  %v355_v52 = vld [vmem:[%s759_s24 + $0x18] sm:$0xf] }
  0x2d   : > { %v523_v45 = vld [vmem:[%s759_s24 + $0x54] sm:$0xf]  ;;  %v593_v46 = vcombine.low %v415_v36, %v416_v37  ;;  %v418_v48 = vmax.bf16 %v537_v41, %v385_v39  ;;  %v386_v49 = vmax.bf16 %v522_v44, %v353_v42  ;;  %v538_v50 = vld [vmem:[%s759_s24 + $0x90] sm:$0xf]  ;;  %v356_v54 = vld [vmem:[%s759_s24 + $0x1c] sm:$0xf] }
  0x2e   : > { %v539_v51 = vld [vmem:[%s759_s24 + $0x94] sm:$0xf]  ;;  %v387_v53 = vmax.bf16 %v523_v45, %v354_v43  ;;  %v524_v55 = vld [vmem:[%s759_s24 + $0x58] sm:$0xf]  ;;  %v525_v56 = vld [vmem:[%s759_s24 + $0x5c] sm:$0xf] }
  0x2f   : > { %557 = vst [vmem:[%s777_s28] sm:$0xff] %v593_v46   ;;  %v594_v57 = vcombine.low %v417_v47, %v418_v48  ;;  %v419_v58 = vmax.bf16 %v538_v50, %v386_v49  ;;  %v388_v59 = vmax.bf16 %v524_v55, %v355_v52  ;;  %v389_v60 = vmax.bf16 %v525_v56, %v356_v54  ;;  %v540_v61 = vld [vmem:[%s759_s24 + $0x98] sm:$0xf]  ;;  %v541_v62 = vld [vmem:[%s759_s24 + $0x9c] sm:$0xf]  ;;  %v357_v63 = vld [vmem:[%s759_s24 + $0x20] sm:$0xf] }
  0x30   : > { %v420_v0 = vmax.bf16 %v539_v51, %v387_v53  ;;  %v358_v1 = vld [vmem:[%s759_s24 + $0x24] sm:$0xf]  ;;  %v526_v2 = vld [vmem:[%s759_s24 + $0x60] sm:$0xf]  ;;  %v359_v10 = vld [vmem:[%s759_s24 + $0x28] sm:$0xf] }
  0x31   : > { %v527_v3 = vld [vmem:[%s759_s24 + $0x64] sm:$0xf]  ;;  %595 = vst [vmem:[%s777_s28 + $0x8] sm:$0xff] %v594_v57   ;;  %v421_v4 = vmax.bf16 %v540_v61, %v388_v59  ;;  %v422_v5 = vmax.bf16 %v541_v62, %v389_v60  ;;  %v390_v6 = vmax.bf16 %v526_v2, %v357_v63  ;;  %v542_v8 = vld [vmem:[%s759_s24 + $0xa0] sm:$0xf] }
  0x32   : > { %v391_v7 = vmax.bf16 %v527_v3, %v358_v1  ;;  %v543_v9 = vld [vmem:[%s759_s24 + $0xa4] sm:$0xf]  ;;  %v596_v11 = vcombine.low %v419_v58, %v420_v0  ;;  %v360_v12 = vld [vmem:[%s759_s24 + $0x2c] sm:$0xf]  ;;  %v528_v13 = vld [vmem:[%s759_s24 + $0x68] sm:$0xf] }
  0x33   : > { %v529_v14 = vld [vmem:[%s759_s24 + $0x6c] sm:$0xf]  ;;  %v598_v15 = vcombine.low %v421_v4, %v422_v5  ;;  %v423_v16 = vmax.bf16 %v542_v8, %v390_v6  ;;  %v392_v18 = vmax.bf16 %v528_v13, %v359_v10  ;;  %v544_v19 = vld [vmem:[%s759_s24 + $0xa8] sm:$0xf]  ;;  %v361_v21 = vld [vmem:[%s759_s24 + $0x30] sm:$0xf] }
  0x34   : > { %v424_v17 = vmax.bf16 %v543_v9, %v391_v7  ;;  %v545_v20 = vld [vmem:[%s759_s24 + $0xac] sm:$0xf]  ;;  %597 = vst [vmem:[%s777_s28 + $0x10] sm:$0xff] %v596_v11   ;;  %v393_v22 = vmax.bf16 %v529_v14, %v360_v12  ;;  %v362_v23 = vld [vmem:[%s759_s24 + $0x34] sm:$0xf] }
  0x35   : > { %v530_v24 = vld [vmem:[%s759_s24 + $0x70] sm:$0xf]  ;;  %v531_v25 = vld [vmem:[%s759_s24 + $0x74] sm:$0xf]  ;;  %599 = vst [vmem:[%s777_s28 + $0x18] sm:$0xff] %v598_v15   ;;  %v425_v27 = vmax.bf16 %v544_v19, %v392_v18 }
  0x36   : > { %v600_v26 = vcombine.low %v423_v16, %v424_v17  ;;  %v394_v28 = vmax.bf16 %v530_v24, %v361_v21  ;;  %v395_v29 = vmax.bf16 %v531_v25, %v362_v23  ;;  %v546_v30 = vld [vmem:[%s759_s24 + $0xb0] sm:$0xf]  ;;  %v547_v31 = vld [vmem:[%s759_s24 + $0xb4] sm:$0xf]  ;;  %v363_v32 = vld [vmem:[%s759_s24 + $0x38] sm:$0xf]  ;;  %v426_v33 = vmax.bf16 %v545_v20, %v393_v22 }
  0x37   : > { %v364_v34 = vld [vmem:[%s759_s24 + $0x3c] sm:$0xf]  ;;  %v532_v35 = vld [vmem:[%s759_s24 + $0x78] sm:$0xf] }
  0x38   : > { %v533_v36 = vld [vmem:[%s759_s24 + $0x7c] sm:$0xf]  ;;  %601 = vst [vmem:[%s777_s28 + $0x20] sm:$0xff] %v600_v26   ;;  %v427_v37 = vmax.bf16 %v546_v30, %v394_v28  ;;  %v428_v38 = vmax.bf16 %v547_v31, %v395_v29  ;;  %v396_v39 = vmax.bf16 %v532_v35, %v363_v32  ;;  %v548_v41 = vld [vmem:[%s759_s24 + $0xb8] sm:$0xf]  ;;  %v602_v43 = vcombine.low %v425_v27, %v426_v33 }
  0x39   : > { %v397_v40 = vmax.bf16 %v533_v36, %v364_v34  ;;  %v549_v42 = vld [vmem:[%s759_s24 + $0xbc] sm:$0xf] }
  0x3a   : > { %v604_v44 = vcombine.low %v427_v37, %v428_v38  ;;  %v429_v45 = vmax.bf16 %v548_v41, %v396_v39  ;;  %603 = vst [vmem:[%s777_s28 + $0x28] sm:$0xff] %v602_v43  }
  0x3b   : > { %v430_v46 = vmax.bf16 %v549_v42, %v397_v40 }
  0x3c   : > { %605 = vst [vmem:[%s777_s28 + $0x30] sm:$0xff] %v604_v44  }
  0x3d   : > { %v606_v47 = vcombine.low %v429_v45, %v430_v46 }
  0x3f   : > { %607 = vst [vmem:[%s777_s28 + $0x38] sm:$0xff] %v606_v47  }
  0x40 PF: > { %p8_p9 = scmp.ge.s32.totalorder %s685_s10, 4   ;;  %s834_s6 = smov %s652_s7 }
  0x41   : > { %s835_s7 = smov %s694_s13  ;;  %s836_s8 = smov %s685_s10 }
  0x42   :  { %10 = sbr.rel (!%p8_p9) target bundleno = 2 (0x2), region = 102 }

// kernel: resnet_forward_pallas.16
= control target key start
LH: loop header
LB: loop body
LE: loop exit
PB: predicated region body
PF: predicated region fallthrough
CT: control target
= control target key end

     0   :  { %s1382_s12 = smov 0   ;;  %s1384_s13 = smov 0   ;;  %s1554_s0 = inlined_call_operand.vmem [shape: bf16[512,147], index: 0, kind: input, shape index: {}]   ;;  %s1555_s1 = inlined_call_operand.vmem [shape: bf16[147,128], index: 1, kind: input, shape index: {}]   ;;  %s1556_s2 = inlined_call_operand.vmem [shape: f32[1,128], index: 2, kind: input, shape index: {}]   ;;  %s1557_s3 = inlined_call_operand.vmem [shape: bf16[512,128], index: 3, kind: output, shape index: {}]  }
   0x1   :  { %s1386_s14 = smov 0  }
   0x2 LB: > { %s25_s15 = sadd.s32 1, %s1354_s13  ;;  %p1005_p0 = scmp.ge.s32.totalorder %s1358_s14, 1  ;;  %s1358_s14 = sphi %s1386_s14, %s13_s14   ;;  %s1354_s13 = sphi %s1384_s13, %s1559_s13   ;;  %s1350_s12 = sphi %s1382_s12, %s1558_s12  }
   0x3   : > { %p27_p1 = scmp.ge.s32.totalorder %s25_s15, 2  ;;  %p170_p2 = scmp.lt.s32.totalorder %s1358_s14, 3 }
   0x5   : > { %s1561_s15 = smov (%p27_p1, %s25_s15), 0  ;;  %p171_p3 = pnand %p1005_p0, %p170_p2 }
   0x6   : > { %v1278_v0 = vld [vmem:[%s1555_s1] sm:$0xff] (!%p171_p3)   ;;  %v1360_v1 = vmov (!%p171_p3), 0   ;;  %v1279_v2 = vld [vmem:[%s1555_s1 + $0x8] sm:$0xff] (!%p171_p3)   ;;  %v1280_v3 = vld [vmem:[%s1555_s1 + $0x10] sm:$0xff] (!%p171_p3)   ;;  %s1006_s22 = sshll.u32 (!%p171_p3), %s1350_s12, 5  ;;  %vm488_vm0 = vcmask (!%p171_p3), 154624  }
   0x7   : > { %174 = sbr.rel (%p171_p3) target bundleno = 324 (0x144), region = 32  ;;  %544 = vmatprep.subr.bf16.mxu0 (!%p171_p3), %v1360_v1  ;;  %1232 = vmatprep.subr.bf16.mxu1 (!%p171_p3), %v1360_v1  ;;  %p206_p4 = scmp.lt.s32.totalorder (!%p171_p3), %s1006_s22, 63  ;;  %v1281_v4 = vld [vmem:[%s1555_s1 + $0x18] sm:$0xff] (!%p171_p3)   ;;  %v1282_v5 = vld [vmem:[%s1555_s1 + $0x20] sm:$0xff] (!%p171_p3)   ;;  %v1283_v8 = vld [vmem:[%s1555_s1 + $0x28] sm:$0xff] (!%p171_p3)   ;;  %vm537_vm1 = vcmask (!%p171_p3), 1040384  }
   0x8   : > { %545 = vmatpush1.bf16.msra.mxu0 (!%p171_p3), %v1278_v0  ;;  %1242 = vmatpush1.bf16.msra.mxu1 (!%p171_p3), %v1278_v0  ;;  %v1284_v9 = vld [vmem:[%s1555_s1 + $0x30] sm:$0xff] (!%p171_p3)   ;;  %v1285_v10 = vld [vmem:[%s1555_s1 + $0x38] sm:$0xff] (!%p171_p3)   ;;  %vm538_vm2 = vcmask (!%p171_p3), 1041408   ;;  %v1361_v11 = vmov (!%p171_p3), 65535   ;;  %v1286_v13 = vld [vmem:[%s1555_s1 + $0x40] sm:$0xff] (!%p171_p3)  }
   0x9   : > { %546 = vmatprep.subr.bf16.mxu0 (!%p171_p3), %v1360_v1  ;;  %1233 = vmatprep.subr.bf16.mxu1 (!%p171_p3), %v1360_v1  ;;  %v539_v12 = vsel (!%p171_p3), %vm537_vm1, 4294967295, %v1361_v11  ;;  %v1287_v14 = vld [vmem:[%s1555_s1 + $0x48] ss:$0 sps:$4 sm:$0x33] (!%p171_p3)   ;;  %v1489_v47 = vld [vmem:[%s1556_s2] ss:$0 sm:$0xff] (!%p171_p3) }
   0xa   : > { %v540_v15 = vsel (!%p171_p3), %vm538_vm2, %v539_v12, 0 }
   0xb   : > { %v542_v16 = vand.u32 (!%p171_p3), %v1287_v14, %v540_v15 }
   0xc   : > { %547 = vmatpush1.bf16.msra.mxu0 (!%p171_p3), %v1279_v2  ;;  %1243 = vmatpush1.bf16.msra.mxu1 (!%p171_p3), %v1279_v2 }
   0xd   : > { %548 = vmatprep.subr.bf16.mxu0 (!%p171_p3), %v1360_v1  ;;  %1234 = vmatprep.subr.bf16.mxu1 (!%p171_p3), %v1360_v1 }
   0xe   : > { %s1563_s22 = smov (!%p206_p4, %s1006_s22), 63 }
   0xf   : > { %s1104_s25 = sshll.u32 %s1563_s22, 3  ;;  %s1010_s19 = sshll.u32 %s1563_s22, 2 }
  0x10   : > { %549 = vmatpush1.bf16.msra.mxu0 %v1280_v3  ;;  %1244 = vmatpush1.bf16.msra.mxu1 %v1280_v3  ;;  %s1418_s28 = scalar_lea.vmem %s1554_s0, %s1104_s25  ;;  %s1499_s23 = scalar_lea.vmem %s1557_s3, %s1010_s19 }
  0x11   : > { %550 = vmatprep.subr.bf16.mxu0 %v1360_v1  ;;  %1235 = vmatprep.subr.bf16.mxu1 %v1360_v1  ;;  %v1290_v6 = vld [vmem:[%s1418_s28 + $0x4] ss:$8 sps:$4 sm:$0xff]   ;;  %v1288_v17 = vld [vmem:[%s1418_s28] ss:$8 sps:$4 sm:$0xff]   ;;  %v1294_v19 = vld [vmem:[%s1418_s28 + $0x14] ss:$8 sps:$4 sm:$0xff]  }
  0x12   : > { %v1293_v7 = vld [vmem:[%s1418_s28 + $0x84] ss:$8 sps:$4 sm:$0xff]   ;;  %1054 = vmatprep.mubr.msk.bf16.mxu0 %vm488_vm0, %v1290_v6  ;;  %v1291_v18 = vld [vmem:[%s1418_s28 + $0x80] ss:$8 sps:$4 sm:$0xff]   ;;  %v1296_v20 = vld [vmem:[%s1418_s28 + $0x94] ss:$8 sps:$4 sm:$0xff]  }
  0x13   : > { %1062 = vmatprep.mubr.msk.bf16.mxu1 %vm488_vm0, %v1293_v7  ;;  %v1298_v21 = vld [vmem:[%s1418_s28 + $0x10] ss:$8 sps:$4 sm:$0xff]   ;;  %v1300_v23 = vld [vmem:[%s1418_s28 + $0x24] ss:$8 sps:$4 sm:$0xff]   ;;  %v1304_v25 = vld [vmem:[%s1418_s28 + $0x20] ss:$8 sps:$4 sm:$0xff]  }
  0x14   : > { %551 = vmatpush1.bf16.msra.mxu0 %v1281_v4  ;;  %1245 = vmatpush1.bf16.msra.mxu1 %v1281_v4  ;;  %v1299_v22 = vld [vmem:[%s1418_s28 + $0x90] ss:$8 sps:$4 sm:$0xff]   ;;  %v1302_v24 = vld [vmem:[%s1418_s28 + $0xa4] ss:$8 sps:$4 sm:$0xff]   ;;  %v1305_v26 = vld [vmem:[%s1418_s28 + $0xa0] ss:$8 sps:$4 sm:$0xff]  }
  0x15   : > { %552 = vmatprep.subr.bf16.mxu0 %v1360_v1  ;;  %1236 = vmatprep.subr.bf16.mxu1 %v1360_v1  ;;  %v1306_v27 = vld [vmem:[%s1418_s28 + $0x34] ss:$8 sps:$4 sm:$0xff]   ;;  %v1310_v29 = vld [vmem:[%s1418_s28 + $0x30] ss:$8 sps:$4 sm:$0xff]   ;;  %v1312_v31 = vld [vmem:[%s1418_s28 + $0x44] ss:$8 sps:$4 sm:$0xff]  }
  0x16   : > { %v1308_v28 = vld [vmem:[%s1418_s28 + $0xb4] ss:$8 sps:$4 sm:$0xff]   ;;  %v1311_v30 = vld [vmem:[%s1418_s28 + $0xb0] ss:$8 sps:$4 sm:$0xff]   ;;  %v1314_v32 = vld [vmem:[%s1418_s28 + $0xc4] ss:$8 sps:$4 sm:$0xff]  }
  0x17   : > { %v1316_v33 = vld [vmem:[%s1418_s28 + $0x40] ss:$8 sps:$4 sm:$0xff]   ;;  %v1318_v35 = vld [vmem:[%s1418_s28 + $0x54] ss:$8 sps:$4 sm:$0xff]   ;;  %v1322_v37 = vld [vmem:[%s1418_s28 + $0x50] ss:$8 sps:$4 sm:$0xff]  }
  0x18   : > { %553 = vmatpush1.bf16.msra.mxu0 %v1282_v5  ;;  %1246 = vmatpush1.bf16.msra.mxu1 %v1282_v5  ;;  %v1317_v34 = vld [vmem:[%s1418_s28 + $0xc0] ss:$8 sps:$4 sm:$0xff]   ;;  %v1320_v36 = vld [vmem:[%s1418_s28 + $0xd4] ss:$8 sps:$4 sm:$0xff]   ;;  %v1323_v38 = vld [vmem:[%s1418_s28 + $0xd0] ss:$8 sps:$4 sm:$0xff]  }
  0x19   : > { %554 = vmatprep.subr.bf16.mxu0 %v1360_v1  ;;  %1237 = vmatprep.subr.bf16.mxu1 %v1360_v1  ;;  %v1324_v39 = vld [vmem:[%s1418_s28 + $0x64] ss:$8 sps:$4 sm:$0xff]   ;;  %v1328_v41 = vld [vmem:[%s1418_s28 + $0x60] ss:$8 sps:$4 sm:$0xff]   ;;  %v1330_v43 = vld [vmem:[%s1418_s28 + $0x74] ss:$8 sps:$4 sm:$0xff]  }
  0x1a   : > { %v1326_v40 = vld [vmem:[%s1418_s28 + $0xe4] ss:$8 sps:$4 sm:$0xff]   ;;  %v1329_v42 = vld [vmem:[%s1418_s28 + $0xe0] ss:$8 sps:$4 sm:$0xff]   ;;  %v1332_v44 = vld [vmem:[%s1418_s28 + $0xf4] ss:$8 sps:$4 sm:$0xff]  }
  0x1b   : > { %v1334_v45 = vld [vmem:[%s1418_s28 + $0x70] ss:$8 sps:$4 sm:$0xff]  }
  0x1c   : > { %555 = vmatpush1.bf16.msra.mxu0 %v1283_v8  ;;  %1247 = vmatpush1.bf16.msra.mxu1 %v1283_v8  ;;  %v1335_v46 = vld [vmem:[%s1418_s28 + $0xf0] ss:$8 sps:$4 sm:$0xff]  }
  0x1d   : > { %556 = vmatprep.subr.bf16.mxu0 %v1360_v1  ;;  %1238 = vmatprep.subr.bf16.mxu1 %v1360_v1 }
  0x20   : > { %557 = vmatpush1.bf16.msra.mxu0 %v1284_v9  ;;  %1248 = vmatpush1.bf16.msra.mxu1 %v1284_v9 }
  0x21   : > { %558 = vmatprep.subr.bf16.mxu0 %v1360_v1  ;;  %1239 = vmatprep.subr.bf16.mxu1 %v1360_v1 }
  0x24   : > { %559 = vmatpush1.bf16.msra.mxu0 %v1285_v10  ;;  %1249 = vmatpush1.bf16.msra.mxu1 %v1285_v10 }
  0x25   : > { %560 = vmatprep.subr.bf16.mxu0 %v1360_v1  ;;  %1240 = vmatprep.subr.bf16.mxu1 %v1360_v1 }
  0x28   : > { %561 = vmatpush1.bf16.msra.mxu0 %v1286_v13  ;;  %1250 = vmatpush1.bf16.msra.mxu1 %v1286_v13 }
  0x29   : > { %562 = vmatprep.subr.bf16.mxu0 %v1360_v1  ;;  %1241 = vmatprep.subr.bf16.mxu1 %v1360_v1 }
  0x2c   : > { %563 = vmatpush1.bf16.msra.mxu0 %v542_v16  ;;  %1251 = vmatpush1.bf16.msra.mxu1 %v542_v16 }
  0x2f   : > { %577 = vmatmul.mubr.bf16.vlgmr.msra.gmra.mrb[0].mxu0 %v1288_v17  ;;  %641 = vmatmul.mubr.bf16.vlgmr.msra.gmra.mrb[0].mxu1 %v1291_v18 }
  0x30   : > { %1055 = vmatprep.mubr.msk.bf16.mxu0 %vm488_vm0, %v1294_v19  ;;  %1063 = vmatprep.mubr.msk.bf16.mxu1 %vm488_vm0, %v1296_v20 }
  0x37   : > { %585 = vmatmul.mubr.bf16.gmra.mrb[4].mxu0 %v1298_v21  ;;  %649 = vmatmul.mubr.bf16.gmra.mrb[4].mxu1 %v1299_v22 }
  0x38   : > { %1056 = vmatprep.mubr.msk.bf16.mxu0 %vm488_vm0, %v1300_v23  ;;  %1064 = vmatprep.mubr.msk.bf16.mxu1 %vm488_vm0, %v1302_v24 }
  0x3f   : > { %593 = vmatmul.mubr.bf16.gmra.mrb[8].mxu0 %v1304_v25  ;;  %657 = vmatmul.mubr.bf16.gmra.mrb[8].mxu1 %v1305_v26 }
  0x40   : > { %1057 = vmatprep.mubr.msk.bf16.mxu0 %vm488_vm0, %v1306_v27  ;;  %1065 = vmatprep.mubr.msk.bf16.mxu1 %vm488_vm0, %v1308_v28 }
  0x47   : > { %601 = vmatmul.mubr.bf16.gmra.mrb[12].mxu0 %v1310_v29  ;;  %665 = vmatmul.mubr.bf16.gmra.mrb[12].mxu1 %v1311_v30 }
  0x48   : > { %1058 = vmatprep.mubr.msk.bf16.mxu0 %vm488_vm0, %v1312_v31  ;;  %1066 = vmatprep.mubr.msk.bf16.mxu1 %vm488_vm0, %v1314_v32 }
  0x4f   : > { %609 = vmatmul.mubr.bf16.gmra.mrb[16].mxu0 %v1316_v33  ;;  %673 = vmatmul.mubr.bf16.gmra.mrb[16].mxu1 %v1317_v34 }
  0x50   : > { %1059 = vmatprep.mubr.msk.bf16.mxu0 %vm488_vm0, %v1318_v35  ;;  %1067 = vmatprep.mubr.msk.bf16.mxu1 %vm488_vm0, %v1320_v36 }
  0x57   : > { %617 = vmatmul.mubr.bf16.gmra.mrb[20].mxu0 %v1322_v37  ;;  %681 = vmatmul.mubr.bf16.gmra.mrb[20].mxu1 %v1323_v38 }
  0x58   : > { %1060 = vmatprep.mubr.msk.bf16.mxu0 %vm488_vm0, %v1324_v39  ;;  %1068 = vmatprep.mubr.msk.bf16.mxu1 %vm488_vm0, %v1326_v40 }
  0x5f   : > { %625 = vmatmul.mubr.bf16.gmra.mrb[24].mxu0 %v1328_v41  ;;  %689 = vmatmul.mubr.bf16.gmra.mrb[24].mxu1 %v1329_v42 }
  0x60   : > { %1061 = vmatprep.mubr.msk.bf16.mxu0 %vm488_vm0, %v1330_v43  ;;  %1069 = vmatprep.mubr.msk.bf16.mxu1 %vm488_vm0, %v1332_v44 }
  0x67   : > { %633 = vmatmul.mubr.bf16.gmra.mrb[28].mxu0 %v1334_v45  ;;  %697 = vmatmul.mubr.bf16.gmra.mrb[28].mxu1 %v1335_v46 }
 0x102   : > { %v578_v48 = vpop.f32.mrb[0].mxu0  ;;  %v642_v49 = vpop.f32.mrb[0].mxu1 }
 0x103   : > { %v579_v50 = vadd.f32 %v1489_v47, %v578_v48  ;;  %v643_v51 = vadd.f32 %v1489_v47, %v642_v49  ;;  %v580_v52 = vpop.f32.mrb[1].mxu0  ;;  %v644_v53 = vpop.f32.mrb[1].mxu1 }
 0x104   : > { %v581_v54 = vpop.f32.mrb[2].mxu0  ;;  %v645_v55 = vpop.f32.mrb[2].mxu1 }
 0x105   : > { %v582_v56 = vadd.f32 %v1489_v47, %v581_v54  ;;  %v646_v57 = vadd.f32 %v1489_v47, %v645_v55  ;;  %v583_v58 = vpop.f32.mrb[3].mxu0  ;;  %v647_v59 = vpop.f32.mrb[3].mxu1  ;;  %v705_v60 = vmax.f32 %v579_v50, 0.0  ;;  %v721_v61 = vmax.f32 %v643_v51, 0.0 }
 0x107   : > { %v706_v62 = vmax.f32 %v582_v56, 0.0  ;;  %v722_v63 = vmax.f32 %v646_v57, 0.0 }
 0x109   : > { %v1140_v0 = vpack.c.bf16 %v706_v62, %v705_v60  ;;  %v1180_v1 = vpack.c.bf16 %v722_v63, %v721_v61 }
 0x10a   : > { %v586_v2 = vpop.f32.mrb[4].mxu0  ;;  %v650_v3 = vpop.f32.mrb[4].mxu1 }
 0x10b   : > { %1141 = vst [vmem:[%s1499_s23] sm:$0xff] %v1140_v0   ;;  %1224 = vst [vmem:[%s1499_s23 + $0x40] sm:$0xff] %v1180_v1   ;;  %v587_v4 = vadd.f32 %v1489_v47, %v586_v2  ;;  %v651_v5 = vadd.f32 %v1489_v47, %v650_v3  ;;  %v588_v6 = vpop.f32.mrb[5].mxu0  ;;  %v652_v7 = vpop.f32.mrb[5].mxu1 }
 0x10c   : > { %v589_v8 = vpop.f32.mrb[6].mxu0  ;;  %v653_v9 = vpop.f32.mrb[6].mxu1 }
 0x10d   : > { %v590_v10 = vadd.f32 %v1489_v47, %v589_v8  ;;  %v654_v11 = vadd.f32 %v1489_v47, %v653_v9  ;;  %v591_v12 = vpop.f32.mrb[7].mxu0  ;;  %v655_v13 = vpop.f32.mrb[7].mxu1  ;;  %v707_v14 = vmax.f32 %v587_v4, 0.0  ;;  %v723_v15 = vmax.f32 %v651_v5, 0.0 }
 0x10f   : > { %v708_v16 = vmax.f32 %v590_v10, 0.0  ;;  %v724_v17 = vmax.f32 %v654_v11, 0.0 }
 0x111   : > { %v1145_v18 = vpack.c.bf16 %v708_v16, %v707_v14  ;;  %v1185_v19 = vpack.c.bf16 %v724_v17, %v723_v15 }
 0x112   : > { %v594_v20 = vpop.f32.mrb[8].mxu0  ;;  %v658_v21 = vpop.f32.mrb[8].mxu1 }
 0x113   : > { %1217 = vst [vmem:[%s1499_s23 + $0x8] sm:$0xff] %v1145_v18   ;;  %1225 = vst [vmem:[%s1499_s23 + $0x48] sm:$0xff] %v1185_v19   ;;  %v595_v22 = vadd.f32 %v1489_v47, %v594_v20  ;;  %v659_v23 = vadd.f32 %v1489_v47, %v658_v21  ;;  %v596_v24 = vpop.f32.mrb[9].mxu0  ;;  %v660_v25 = vpop.f32.mrb[9].mxu1 }
 0x114   : > { %v597_v26 = vpop.f32.mrb[10].mxu0  ;;  %v661_v27 = vpop.f32.mrb[10].mxu1 }
 0x115   : > { %v598_v28 = vadd.f32 %v1489_v47, %v597_v26  ;;  %v662_v29 = vadd.f32 %v1489_v47, %v661_v27  ;;  %v599_v30 = vpop.f32.mrb[11].mxu0  ;;  %v663_v31 = vpop.f32.mrb[11].mxu1  ;;  %v709_v32 = vmax.f32 %v595_v22, 0.0  ;;  %v725_v33 = vmax.f32 %v659_v23, 0.0 }
 0x117   : > { %v710_v34 = vmax.f32 %v598_v28, 0.0  ;;  %v726_v35 = vmax.f32 %v662_v29, 0.0 }
 0x119   : > { %v1150_v36 = vpack.c.bf16 %v710_v34, %v709_v32  ;;  %v1190_v37 = vpack.c.bf16 %v726_v35, %v725_v33 }
 0x11a   : > { %v602_v38 = vpop.f32.mrb[12].mxu0  ;;  %v666_v39 = vpop.f32.mrb[12].mxu1 }
 0x11b   : > { %1218 = vst [vmem:[%s1499_s23 + $0x10] sm:$0xff] %v1150_v36   ;;  %1226 = vst [vmem:[%s1499_s23 + $0x50] sm:$0xff] %v1190_v37   ;;  %v603_v40 = vadd.f32 %v1489_v47, %v602_v38  ;;  %v667_v41 = vadd.f32 %v1489_v47, %v666_v39  ;;  %v604_v42 = vpop.f32.mrb[13].mxu0  ;;  %v668_v43 = vpop.f32.mrb[13].mxu1 }
 0x11c   : > { %v605_v44 = vpop.f32.mrb[14].mxu0  ;;  %v669_v45 = vpop.f32.mrb[14].mxu1 }
 0x11d   : > { %v606_v46 = vadd.f32 %v1489_v47, %v605_v44  ;;  %v670_v48 = vadd.f32 %v1489_v47, %v669_v45  ;;  %v607_v49 = vpop.f32.mrb[15].mxu0  ;;  %v671_v50 = vpop.f32.mrb[15].mxu1  ;;  %v711_v51 = vmax.f32 %v603_v40, 0.0  ;;  %v727_v52 = vmax.f32 %v667_v41, 0.0 }
 0x11f   : > { %v712_v53 = vmax.f32 %v606_v46, 0.0  ;;  %v728_v54 = vmax.f32 %v670_v48, 0.0 }
 0x121   : > { %v1155_v55 = vpack.c.bf16 %v712_v53, %v711_v51  ;;  %v1195_v56 = vpack.c.bf16 %v728_v54, %v727_v52 }
 0x122   : > { %v610_v57 = vpop.f32.mrb[16].mxu0  ;;  %v674_v58 = vpop.f32.mrb[16].mxu1 }
 0x123   : > { %1219 = vst [vmem:[%s1499_s23 + $0x18] sm:$0xff] %v1155_v55   ;;  %1227 = vst [vmem:[%s1499_s23 + $0x58] sm:$0xff] %v1195_v56   ;;  %v611_v59 = vadd.f32 %v1489_v47, %v610_v57  ;;  %v675_v60 = vadd.f32 %v1489_v47, %v674_v58  ;;  %v612_v61 = vpop.f32.mrb[17].mxu0  ;;  %v676_v62 = vpop.f32.mrb[17].mxu1 }
 0x124   : > { %v613_v63 = vpop.f32.mrb[18].mxu0  ;;  %v677_v0 = vpop.f32.mrb[18].mxu1 }
 0x125   : > { %v614_v1 = vadd.f32 %v1489_v47, %v613_v63  ;;  %v678_v2 = vadd.f32 %v1489_v47, %v677_v0  ;;  %v615_v3 = vpop.f32.mrb[19].mxu0  ;;  %v679_v4 = vpop.f32.mrb[19].mxu1  ;;  %v713_v5 = vmax.f32 %v611_v59, 0.0  ;;  %v729_v6 = vmax.f32 %v675_v60, 0.0 }
 0x127   : > { %v714_v7 = vmax.f32 %v614_v1, 0.0  ;;  %v730_v8 = vmax.f32 %v678_v2, 0.0 }
 0x129   : > { %v1160_v9 = vpack.c.bf16 %v714_v7, %v713_v5  ;;  %v1200_v10 = vpack.c.bf16 %v730_v8, %v729_v6 }
 0x12a   : > { %v618_v11 = vpop.f32.mrb[20].mxu0  ;;  %v682_v12 = vpop.f32.mrb[20].mxu1 }
 0x12b   : > { %1220 = vst [vmem:[%s1499_s23 + $0x20] sm:$0xff] %v1160_v9   ;;  %1228 = vst [vmem:[%s1499_s23 + $0x60] sm:$0xff] %v1200_v10   ;;  %v619_v13 = vadd.f32 %v1489_v47, %v618_v11  ;;  %v683_v14 = vadd.f32 %v1489_v47, %v682_v12  ;;  %v620_v15 = vpop.f32.mrb[21].mxu0  ;;  %v684_v16 = vpop.f32.mrb[21].mxu1 }
 0x12c   : > { %v621_v17 = vpop.f32.mrb[22].mxu0  ;;  %v685_v18 = vpop.f32.mrb[22].mxu1 }
 0x12d   : > { %v622_v19 = vadd.f32 %v1489_v47, %v621_v17  ;;  %v686_v20 = vadd.f32 %v1489_v47, %v685_v18  ;;  %v623_v21 = vpop.f32.mrb[23].mxu0  ;;  %v687_v22 = vpop.f32.mrb[23].mxu1  ;;  %v715_v23 = vmax.f32 %v619_v13, 0.0  ;;  %v731_v24 = vmax.f32 %v683_v14, 0.0 }
 0x12f   : > { %v716_v25 = vmax.f32 %v622_v19, 0.0  ;;  %v732_v26 = vmax.f32 %v686_v20, 0.0 }
 0x131   : > { %v1165_v27 = vpack.c.bf16 %v716_v25, %v715_v23  ;;  %v1205_v28 = vpack.c.bf16 %v732_v26, %v731_v24 }
 0x132   : > { %v626_v29 = vpop.f32.mrb[24].mxu0  ;;  %v690_v30 = vpop.f32.mrb[24].mxu1 }
 0x133   : > { %1221 = vst [vmem:[%s1499_s23 + $0x28] sm:$0xff] %v1165_v27   ;;  %1229 = vst [vmem:[%s1499_s23 + $0x68] sm:$0xff] %v1205_v28   ;;  %v627_v31 = vadd.f32 %v1489_v47, %v626_v29  ;;  %v691_v32 = vadd.f32 %v1489_v47, %v690_v30  ;;  %v628_v33 = vpop.f32.mrb[25].mxu0  ;;  %v692_v34 = vpop.f32.mrb[25].mxu1 }
 0x134   : > { %v629_v35 = vpop.f32.mrb[26].mxu0  ;;  %v693_v36 = vpop.f32.mrb[26].mxu1 }
 0x135   : > { %v630_v37 = vadd.f32 %v1489_v47, %v629_v35  ;;  %v694_v38 = vadd.f32 %v1489_v47, %v693_v36  ;;  %v631_v39 = vpop.f32.mrb[27].mxu0  ;;  %v695_v40 = vpop.f32.mrb[27].mxu1  ;;  %v717_v41 = vmax.f32 %v627_v31, 0.0  ;;  %v733_v42 = vmax.f32 %v691_v32, 0.0 }
 0x137   : > { %v718_v43 = vmax.f32 %v630_v37, 0.0  ;;  %v734_v44 = vmax.f32 %v694_v38, 0.0 }
 0x139   : > { %v1170_v45 = vpack.c.bf16 %v718_v43, %v717_v41  ;;  %v1210_v46 = vpack.c.bf16 %v734_v44, %v733_v42 }
 0x13a   : > { %v634_v48 = vpop.f32.mrb[28].mxu0  ;;  %v698_v49 = vpop.f32.mrb[28].mxu1 }
 0x13b   : > { %1222 = vst [vmem:[%s1499_s23 + $0x30] sm:$0xff] %v1170_v45   ;;  %1230 = vst [vmem:[%s1499_s23 + $0x70] sm:$0xff] %v1210_v46   ;;  %v635_v50 = vadd.f32 %v1489_v47, %v634_v48  ;;  %v699_v51 = vadd.f32 %v1489_v47, %v698_v49  ;;  %v636_v52 = vpop.f32.mrb[29].mxu0  ;;  %v700_v53 = vpop.f32.mrb[29].mxu1 }
 0x13c   : > { %v637_v54 = vpop.f32.mrb[30].mxu0  ;;  %v701_v55 = vpop.f32.mrb[30].mxu1 }
 0x13d   : > { %v638_v56 = vadd.f32 %v1489_v47, %v637_v54  ;;  %v702_v57 = vadd.f32 %v1489_v47, %v701_v55  ;;  %v639_v58 = vpop.f32.mrb[31].mxu0  ;;  %v703_v59 = vpop.f32.mrb[31].mxu1  ;;  %v719_v60 = vmax.f32 %v635_v50, 0.0  ;;  %v735_v61 = vmax.f32 %v699_v51, 0.0 }
 0x13f   : > { %v720_v62 = vmax.f32 %v638_v56, 0.0  ;;  %v736_v63 = vmax.f32 %v702_v57, 0.0 }
 0x141   : > { %v1175_v0 = vpack.c.bf16 %v720_v62, %v719_v60  ;;  %v1215_v1 = vpack.c.bf16 %v736_v63, %v735_v61 }
 0x143   : > { %1223 = vst [vmem:[%s1499_s23 + $0x38] sm:$0xff] %v1175_v0   ;;  %1231 = vst [vmem:[%s1499_s23 + $0x78] sm:$0xff] %v1215_v1  }
 0x144 PF: > { %s13_s14 = sadd.s32 1, %s1358_s14   ;;  %s1558_s12 = smov %s1354_s13 }
 0x145   : > { %p10_p5 = scmp.ge.s32.totalorder %s13_s14, 4   ;;  %s1559_s13 = smov %s1561_s15 }
 0x147   :  { %12 = sbr.rel (!%p10_p5) target bundleno = 2 (0x2), region = 68 }

// kernel: resnet_forward_pallas.18
= control target key start
LH: loop header
LB: loop body
LE: loop exit
PB: predicated region body
PF: predicated region fallthrough
CT: control target
= control target key end

     0   :  { %s480_s6 = smov 0   ;;  %s482_s7 = smov 0   ;;  %s558_s0 = inlined_call_operand.vmem [shape: bf16[3,128,128], index: 0, kind: input, shape index: {}]   ;;  %s559_s1 = inlined_call_operand.vmem [shape: bf16[128,128], index: 1, kind: output, shape index: {}]  }
   0x1   :  { %s484_s8 = smov 0  }
   0x2 LB: > { %s365_s9 = sadd.s32 4294967295, %s468_s8   ;;  %s497_s10 = sadd.s32 1, %s468_s8   ;;  %s468_s8 = sphi %s484_s8, %s562_s8   ;;  %s464_s7 = sphi %s482_s7, %s561_s7   ;;  %s460_s6 = sphi %s480_s6, %s560_s6  }
   0x3   : > { %s15_s11 = ssub.s32 %s468_s8, %s497_s10  ;;  %s18_s12 = sadd.s32 1, %s464_s7 }
   0x4   : > { %p16_p0 = scmp.eq.s32.totalorder %s15_s11, 0  ;;  %p25_p1 = scmp.ne.s32.totalorder %s464_s7, %s460_s6 }
   0x5   : > { %p26_p2 = scmp.eq.s32.totalorder %s468_s8, 0  ;;  %p368_p4 = scmp.ge.s32.totalorder %s468_s8, 2 }
   0x6   : > { %s506_s13 = scalar_select %p16_p0, %s464_s7, %s18_s12  }
   0x7   : > { %p27_p3 = por %p26_p2, %p25_p1  ;;  %77 = sbr.rel (%p368_p4) target bundleno = 25 (0x19), region = 16 }
   0xe   : > { %80 = sbr.rel (!%p27_p3) target bundleno = 25 (0x19), region = 20  ;;  %s82_s14 = sand.u32 (%p27_p3), 1, %s464_s7  }
   0xf   : > { %s392_s15 = sshll.u32 (%p27_p3), %s468_s8, 5  ;;  %s420_s16 = smul.u32 (%p27_p3), 96, %s82_s14 }
  0x10   : > { %s87_s19 = scalar_lea.vmem (%p27_p3), %s558_s0, %s392_s15 }
  0x11   : > { %v103_v0 = vld [vmem:[%s87_s19] sm:$0xff] (%p27_p3)   ;;  %v107_v1 = vld [vmem:[%s87_s19 + $0x8] sm:$0xff] (%p27_p3)   ;;  %v111_v2 = vld [vmem:[%s87_s19 + $0x10] sm:$0xff] (%p27_p3)   ;;  %s84_s20 = scalar_lea.vmem (%p27_p3), [#allocation2], %s420_s16 }
  0x12   : > { %v115_v3 = vld [vmem:[%s87_s19 + $0x18] sm:$0xff] (%p27_p3)   ;;  %v119_v4 = vld [vmem:[%s87_s19 + $0x40] sm:$0xff] (%p27_p3)   ;;  %v123_v5 = vld [vmem:[%s87_s19 + $0x48] sm:$0xff] (%p27_p3)   ;;  %104 = vst [vmem:[%s84_s20] sm:$0xff] (%p27_p3), %v103_v0  }
  0x13   : > { %108 = vst [vmem:[%s84_s20 + $0x8] sm:$0xff] (%p27_p3), %v107_v1   ;;  %112 = vst [vmem:[%s84_s20 + $0x10] sm:$0xff] (%p27_p3), %v111_v2   ;;  %v127_v6 = vld [vmem:[%s87_s19 + $0x50] sm:$0xff] (%p27_p3)   ;;  %v131_v7 = vld [vmem:[%s87_s19 + $0x58] sm:$0xff] (%p27_p3)  }
  0x14   : > { %116 = vst [vmem:[%s84_s20 + $0x18] sm:$0xff] (%p27_p3), %v115_v3   ;;  %120 = vst [vmem:[%s84_s20 + $0x20] sm:$0xff] (%p27_p3), %v119_v4   ;;  %v135_v8 = vld [vmem:[%s87_s19 + $0x80] sm:$0xff] (%p27_p3)   ;;  %v139_v9 = vld [vmem:[%s87_s19 + $0x88] sm:$0xff] (%p27_p3)  }
  0x15   : > { %124 = vst [vmem:[%s84_s20 + $0x28] sm:$0xff] %v123_v5   ;;  %128 = vst [vmem:[%s84_s20 + $0x30] sm:$0xff] %v127_v6   ;;  %v143_v10 = vld [vmem:[%s87_s19 + $0x90] sm:$0xff]   ;;  %v147_v11 = vld [vmem:[%s87_s19 + $0x98] sm:$0xff]  }
  0x16   : > { %132 = vst [vmem:[%s84_s20 + $0x38] sm:$0xff] %v131_v7   ;;  %136 = vst [vmem:[%s84_s20 + $0x40] sm:$0xff] %v135_v8  }
  0x17   : > { %140 = vst [vmem:[%s84_s20 + $0x48] sm:$0xff] %v139_v9   ;;  %144 = vst [vmem:[%s84_s20 + $0x50] sm:$0xff] %v143_v10  }
  0x18   : > { %148 = vst [vmem:[%s84_s20 + $0x58] sm:$0xff] %v147_v11  }
  0x19 PF: > { %p371_p5 = scmp.ge.s32.totalorder %s468_s8, 1  ;;  %p220_p6 = scmp.lt.s32.totalorder %s468_s8, 3 }
  0x1b   : > { %p221_p7 = pnand %p371_p5, %p220_p6 }
  0x1c   : > { %s227_s21 = sand.u32 (!%p221_p7), 1, %s460_s6   ;;  %s372_s22 = sshll.u32 (!%p221_p7), %s365_s9, 3 }
  0x1d   : > { %224 = sbr.rel (%p221_p7) target bundleno = 48 (0x30), region = 61  ;;  %p248_p8 = scmp.lt.s32.totalorder (!%p221_p7), %s372_s22, 15 }
  0x1e   : > { %s421_s23 = smul.u32 (!%p221_p7), 96, %s227_s21 }
  0x20   : > { %s519_s24 = scalar_lea.vmem (!%p221_p7), [#allocation2], %s421_s23 }
  0x21   : > { %v253_v12 = vld [vmem:[%s519_s24] sm:$0xf] (!%p221_p7)  ;;  %v254_v13 = vld [vmem:[%s519_s24 + $0x4] sm:$0xf] (!%p221_p7)  ;;  %v255_v20 = vld [vmem:[%s519_s24 + $0x8] sm:$0xf] (!%p221_p7) }
  0x22   : > { %v374_v14 = vld [vmem:[%s519_s24 + $0x20] sm:$0xf] (!%p221_p7)  ;;  %v375_v15 = vld [vmem:[%s519_s24 + $0x24] sm:$0xf] (!%p221_p7)  ;;  %v256_v21 = vld [vmem:[%s519_s24 + $0xc] sm:$0xf] (!%p221_p7) }
  0x23   : > { %v382_v16 = vld [vmem:[%s519_s24 + $0x40] sm:$0xf] (!%p221_p7)  ;;  %v270_v17 = vmax.bf16 (!%p221_p7), %v374_v14, %v253_v12  ;;  %v271_v18 = vmax.bf16 (!%p221_p7), %v375_v15, %v254_v13  ;;  %v383_v19 = vld [vmem:[%s519_s24 + $0x44] sm:$0xf] (!%p221_p7)  ;;  %v376_v22 = vld [vmem:[%s519_s24 + $0x28] sm:$0xf] (!%p221_p7) }
  0x24   : > { %s564_s22 = smov (!%p248_p8, %s372_s22), 15  ;;  %v377_v23 = vld [vmem:[%s519_s24 + $0x2c] sm:$0xf]  ;;  %v272_v26 = vmax.bf16 %v376_v22, %v255_v20  ;;  %v384_v28 = vld [vmem:[%s519_s24 + $0x48] sm:$0xf] }
  0x25   : > { %s373_s25 = sshll.u32 %s564_s22, 2  ;;  %v287_v24 = vmax.bf16 %v382_v16, %v270_v17  ;;  %v288_v25 = vmax.bf16 %v383_v19, %v271_v18  ;;  %v273_v27 = vmax.bf16 %v377_v23, %v256_v21  ;;  %v385_v29 = vld [vmem:[%s519_s24 + $0x4c] sm:$0xf]  ;;  %v257_v30 = vld [vmem:[%s519_s24 + $0x10] sm:$0xf] }
  0x26   : > { %s251_s28 = scalar_lea.vmem %s559_s1, %s373_s25  ;;  %v258_v31 = vld [vmem:[%s519_s24 + $0x14] sm:$0xf]  ;;  %v378_v32 = vld [vmem:[%s519_s24 + $0x30] sm:$0xf]  ;;  %v289_v35 = vmax.bf16 %v384_v28, %v272_v26  ;;  %v259_v40 = vld [vmem:[%s519_s24 + $0x18] sm:$0xf] }
  0x27   : > { %v379_v33 = vld [vmem:[%s519_s24 + $0x34] sm:$0xf]  ;;  %v413_v34 = vcombine.low %v287_v24, %v288_v25  ;;  %v290_v36 = vmax.bf16 %v385_v29, %v273_v27  ;;  %v274_v37 = vmax.bf16 %v378_v32, %v257_v30  ;;  %v386_v38 = vld [vmem:[%s519_s24 + $0x50] sm:$0xf]  ;;  %v260_v42 = vld [vmem:[%s519_s24 + $0x1c] sm:$0xf] }
  0x28   : > { %v387_v39 = vld [vmem:[%s519_s24 + $0x54] sm:$0xf]  ;;  %v275_v41 = vmax.bf16 %v379_v33, %v258_v31  ;;  %v380_v43 = vld [vmem:[%s519_s24 + $0x38] sm:$0xf]  ;;  %v381_v44 = vld [vmem:[%s519_s24 + $0x3c] sm:$0xf] }
  0x29   : > { %397 = vst [vmem:[%s251_s28] sm:$0xff] %v413_v34   ;;  %v414_v45 = vcombine.low %v289_v35, %v290_v36  ;;  %v291_v46 = vmax.bf16 %v386_v38, %v274_v37  ;;  %v276_v47 = vmax.bf16 %v380_v43, %v259_v40  ;;  %v277_v48 = vmax.bf16 %v381_v44, %v260_v42  ;;  %v388_v49 = vld [vmem:[%s519_s24 + $0x58] sm:$0xf]  ;;  %v389_v50 = vld [vmem:[%s519_s24 + $0x5c] sm:$0xf] }
  0x2a   : > { %v292_v51 = vmax.bf16 %v387_v39, %v275_v41 }
  0x2b   : > { %415 = vst [vmem:[%s251_s28 + $0x8] sm:$0xff] %v414_v45   ;;  %v293_v52 = vmax.bf16 %v388_v49, %v276_v47  ;;  %v294_v53 = vmax.bf16 %v389_v50, %v277_v48 }
  0x2c   : > { %v416_v54 = vcombine.low %v291_v46, %v292_v51 }
  0x2d   : > { %v418_v55 = vcombine.low %v293_v52, %v294_v53 }
  0x2e   : > { %417 = vst [vmem:[%s251_s28 + $0x10] sm:$0xff] %v416_v54  }
  0x2f   : > { %419 = vst [vmem:[%s251_s28 + $0x18] sm:$0xff] %v418_v55  }
  0x30 PF: > { %p8_p9 = scmp.ge.s32.totalorder %s497_s10, 4   ;;  %s560_s6 = smov %s464_s7 }
  0x31   : > { %s561_s7 = smov %s506_s13  ;;  %s562_s8 = smov %s497_s10 }
  0x32   :  { %10 = sbr.rel (!%p8_p9) target bundleno = 2 (0x2), region = 102 }

// kernel: resnet_forward_pallas.20
= control target key start
LH: loop header
LB: loop body
LE: loop exit
PB: predicated region body
PF: predicated region fallthrough
CT: control target
= control target key end

     0   :  { %s733_s12 = smov 0   ;;  %s735_s13 = smov 0   ;;  %s806_s0 = inlined_call_operand.vmem [shape: bf16[128,128], index: 0, kind: input, shape index: {}]   ;;  %s807_s1 = inlined_call_operand.vmem [shape: bf16[128,128], index: 1, kind: input, shape index: {}]   ;;  %s808_s2 = inlined_call_operand.vmem [shape: f32[1,128], index: 2, kind: input, shape index: {}]   ;;  %s809_s3 = inlined_call_operand.vmem [shape: bf16[128,128], index: 3, kind: output, shape index: {}]  }
   0x1   :  { %s737_s14 = smov 0  }
   0x2 LB: > { %s25_s15 = sadd.s32 1, %s707_s13  ;;  %p542_p0 = scmp.ge.s32.totalorder %s711_s14, 1  ;;  %s711_s14 = sphi %s737_s14, %s13_s14   ;;  %s707_s13 = sphi %s735_s13, %s811_s13   ;;  %s703_s12 = sphi %s733_s12, %s810_s12  }
   0x3   : > { %p27_p1 = scmp.ge.s32.totalorder %s25_s15, 2  ;;  %p169_p2 = scmp.lt.s32.totalorder %s711_s14, 3 }
   0x5   : > { %s813_s15 = smov (%p27_p1, %s25_s15), 0  ;;  %p170_p3 = pnand %p542_p0, %p169_p2 }
   0x6   : > { %v677_v0 = vld [vmem:[%s807_s1] sm:$0xff] (!%p170_p3)   ;;  %s543_s18 = sshll.u32 (!%p170_p3), %s703_s12, 3  ;;  %v678_v1 = vld [vmem:[%s807_s1 + $0x8] sm:$0xff] (!%p170_p3)   ;;  %v679_v2 = vld [vmem:[%s807_s1 + $0x10] sm:$0xff] (!%p170_p3)  }
   0x7   : > { %173 = sbr.rel (%p170_p3) target bundleno = 259 (0x103), region = 32  ;;  %p204_p4 = scmp.lt.s32.totalorder (!%p170_p3), %s543_s18, 15  ;;  %613 = vmatprep.subr.bf16.mxu0 (!%p170_p3), %v677_v0  ;;  %637 = vmatprep.subr.bf16.mxu1 (!%p170_p3), %v677_v0  ;;  %v680_v3 = vld [vmem:[%s807_s1 + $0x18] sm:$0xff] (!%p170_p3)   ;;  %v681_v6 = vld [vmem:[%s807_s1 + $0x20] sm:$0xff] (!%p170_p3)   ;;  %v682_v7 = vld [vmem:[%s807_s1 + $0x28] sm:$0xff] (!%p170_p3)  }
   0x8   : > { %614 = vmatpush3.bf16.msra.mxu0 (!%p170_p3), %v677_v0  ;;  %645 = vmatpush3.bf16.msra.mxu1 (!%p170_p3), %v677_v0  ;;  %v683_v8 = vld [vmem:[%s807_s1 + $0x30] sm:$0xff] (!%p170_p3)   ;;  %v684_v9 = vld [vmem:[%s807_s1 + $0x38] sm:$0xff] (!%p170_p3)   ;;  %v547_v13 = vld [vmem:[%s808_s2] ss:$0 sm:$0xff] (!%p170_p3) }
   0x9   : > { %615 = vmatprep.subr.bf16.mxu0 (!%p170_p3), %v678_v1  ;;  %638 = vmatprep.subr.bf16.mxu1 (!%p170_p3), %v678_v1 }
   0xc   : > { %616 = vmatpush3.bf16.msra.mxu0 (!%p170_p3), %v678_v1  ;;  %646 = vmatpush3.bf16.msra.mxu1 (!%p170_p3), %v678_v1 }
   0xd   : > { %617 = vmatprep.subr.bf16.mxu0 (!%p170_p3), %v679_v2  ;;  %639 = vmatprep.subr.bf16.mxu1 (!%p170_p3), %v679_v2 }
   0xe   : > { %s815_s18 = smov (!%p204_p4, %s543_s18), 15 }
   0xf   : > { %s544_s23 = sshll.u32 %s815_s18, 2 }
  0x10   : > { %s768_s26 = scalar_lea.vmem %s806_s0, %s544_s23  ;;  %618 = vmatpush3.bf16.msra.mxu0 %v679_v2  ;;  %647 = vmatpush3.bf16.msra.mxu1 %v679_v2  ;;  %s223_s17 = scalar_lea.vmem %s809_s3, %s544_s23 }
  0x11   : > { %v685_v4 = vld [vmem:[%s768_s26] sm:$0xff]   ;;  %v686_v5 = vld [vmem:[%s768_s26 + $0x10] sm:$0xff]   ;;  %619 = vmatprep.subr.bf16.mxu0 %v680_v3  ;;  %640 = vmatprep.subr.bf16.mxu1 %v680_v3  ;;  %v687_v10 = vld [vmem:[%s768_s26 + $0x8] sm:$0xff]  }
  0x12   : > { %629 = vmatprep.mubr.bf16.mxu0 %v685_v4  ;;  %633 = vmatprep.mubr.bf16.mxu1 %v686_v5  ;;  %v688_v11 = vld [vmem:[%s768_s26 + $0x18] sm:$0xff]  }
  0x14   : > { %620 = vmatpush3.bf16.msra.mxu0 %v680_v3  ;;  %648 = vmatpush3.bf16.msra.mxu1 %v680_v3 }
  0x15   : > { %621 = vmatprep.subr.bf16.mxu0 %v681_v6  ;;  %641 = vmatprep.subr.bf16.mxu1 %v681_v6 }
  0x18   : > { %622 = vmatpush3.bf16.msra.mxu0 %v681_v6  ;;  %649 = vmatpush3.bf16.msra.mxu1 %v681_v6 }
  0x19   : > { %623 = vmatprep.subr.bf16.mxu0 %v682_v7  ;;  %642 = vmatprep.subr.bf16.mxu1 %v682_v7 }
  0x1c   : > { %624 = vmatpush3.bf16.msra.mxu0 %v682_v7  ;;  %650 = vmatpush3.bf16.msra.mxu1 %v682_v7 }
  0x1d   : > { %625 = vmatprep.subr.bf16.mxu0 %v683_v8  ;;  %643 = vmatprep.subr.bf16.mxu1 %v683_v8 }
  0x20   : > { %626 = vmatpush3.bf16.msra.mxu0 %v683_v8  ;;  %651 = vmatpush3.bf16.msra.mxu1 %v683_v8 }
  0x21   : > { %627 = vmatprep.subr.bf16.mxu0 %v684_v9  ;;  %644 = vmatprep.subr.bf16.mxu1 %v684_v9 }
  0x24   : > { %628 = vmatpush3.bf16.msra.mxu0 %v684_v9  ;;  %652 = vmatpush3.bf16.msra.mxu1 %v684_v9 }
  0x27   : > { %630 = vmatmul.mubr.bf16.vlgmr.msra.gmra.mrb[0].mxu0 %v687_v10  ;;  %634 = vmatmul.mubr.bf16.vlgmr.msra.gmra.mrb[0].mxu1 %v688_v11 }
  0xfa   : > { %v631_v12 = vpop.f32.mrb[0].mxu0  ;;  %v635_v14 = vpop.f32.mrb[0].mxu1 }
  0xfb   : > { %v363_v15 = vpop.f32.mrb[1].mxu0  ;;  %v379_v16 = vpop.f32.mrb[1].mxu1  ;;  %v372_v19 = vadd.f32 %v631_v12, %v547_v13  ;;  %v388_v20 = vadd.f32 %v635_v14, %v547_v13 }
  0xfc   : > { %v632_v17 = vpop.f32.mrb[2].mxu0  ;;  %v636_v18 = vpop.f32.mrb[2].mxu1  ;;  %v364_v25 = vadd.f32 %v547_v13, %v363_v15  ;;  %v380_v26 = vadd.f32 %v547_v13, %v379_v16 }
  0xfd   : > { %v375_v21 = vadd.f32 %v632_v17, %v547_v13  ;;  %v391_v22 = vadd.f32 %v636_v18, %v547_v13  ;;  %v366_v23 = vpop.f32.mrb[3].mxu0  ;;  %v382_v24 = vpop.f32.mrb[3].mxu1 }
  0xfe   : > { %v367_v27 = vadd.f32 %v547_v13, %v366_v23  ;;  %v383_v28 = vadd.f32 %v547_v13, %v382_v24 }
  0xff   : > { %v586_v29 = vpack.c.bf16 %v375_v21, %v372_v19  ;;  %v596_v30 = vpack.c.bf16 %v391_v22, %v388_v20 }
 0x100   : > { %v581_v31 = vpack.c.bf16 %v367_v27, %v364_v25  ;;  %v591_v32 = vpack.c.bf16 %v383_v28, %v380_v26 }
 0x101   : > { %598 = vst [vmem:[%s223_s17 + $0x8] sm:$0xff] %v586_v29   ;;  %600 = vst [vmem:[%s223_s17 + $0x18] sm:$0xff] %v596_v30  }
 0x102   : > { %582 = vst [vmem:[%s223_s17] sm:$0xff] %v581_v31   ;;  %599 = vst [vmem:[%s223_s17 + $0x10] sm:$0xff] %v591_v32  }
 0x103 PF: > { %s13_s14 = sadd.s32 1, %s711_s14   ;;  %s810_s12 = smov %s707_s13 }
 0x104   : > { %p10_p5 = scmp.ge.s32.totalorder %s13_s14, 4   ;;  %s811_s13 = smov %s813_s15 }
 0x106   :  { %12 = sbr.rel (!%p10_p5) target bundleno = 2 (0x2), region = 68 }

// kernel: resnet_forward_pallas.19
= control target key start
LH: loop header
LB: loop body
LE: loop exit
PB: predicated region body
PF: predicated region fallthrough
CT: control target
= control target key end

     0   :  { %s786_s12 = smov 0   ;;  %s788_s13 = smov 0   ;;  %s890_s0 = inlined_call_operand.vmem [shape: bf16[128,128], index: 0, kind: input, shape index: {}]   ;;  %s891_s1 = inlined_call_operand.vmem [shape: bf16[128,256], index: 1, kind: input, shape index: {}]   ;;  %s892_s2 = inlined_call_operand.vmem [shape: f32[1,256], index: 2, kind: input, shape index: {}]   ;;  %s893_s3 = inlined_call_operand.vmem [shape: bf16[128,256], index: 3, kind: output, shape index: {}]  }
   0x1   :  { %s790_s14 = smov 0  }
   0x2 LB: > { %s25_s15 = sadd.s32 1, %s759_s13  ;;  %p627_p0 = scmp.ge.s32.totalorder %s763_s14, 1  ;;  %s763_s14 = sphi %s790_s14, %s13_s14   ;;  %s759_s13 = sphi %s788_s13, %s895_s13   ;;  %s755_s12 = sphi %s786_s12, %s894_s12  }
   0x3   : > { %p27_p1 = scmp.ge.s32.totalorder %s25_s15, 2  ;;  %p173_p2 = scmp.lt.s32.totalorder %s763_s14, 3 }
   0x5   : > { %s897_s15 = smov (%p27_p1, %s25_s15), 0  ;;  %p174_p3 = pnand %p627_p0, %p173_p2 }
   0x6   : > { %v713_v0 = vld [vmem:[%s891_s1 + $0x4] ss:$8 sps:$4 sm:$0xff] (!%p174_p3)   ;;  %s628_s18 = sshll.u32 (!%p174_p3), %s755_s12, 3  ;;  %v715_v1 = vld [vmem:[%s891_s1] ss:$8 sps:$4 sm:$0xff] (!%p174_p3)   ;;  %v765_v2 = vmov (!%p174_p3), 0   ;;  %v267_v21 = vlaneseq (!%p174_p3) }
   0x7   : > { %177 = sbr.rel (%p174_p3) target bundleno = 268 (0x10c), region = 32  ;;  %413 = vmatprep.mubr.bf16.mxu0 (!%p174_p3), %v765_v2  ;;  %433 = vmatprep.mubr.bf16.mxu1 (!%p174_p3), %v765_v2  ;;  %p212_p4 = scmp.lt.s32.totalorder (!%p174_p3), %s628_s18, 15  ;;  %v716_v3 = vld [vmem:[%s891_s1 + $0x14] ss:$8 sps:$4 sm:$0xff] (!%p174_p3)   ;;  %v718_v4 = vld [vmem:[%s891_s1 + $0x10] ss:$8 sps:$4 sm:$0xff] (!%p174_p3)  }
   0x8   : > { %381 = vmatprep.subr.bf16.mxu0 (!%p174_p3), %v713_v0  ;;  %672 = vmatprep.subr.bf16.mxu1 (!%p174_p3), %v713_v0  ;;  %v719_v5 = vld [vmem:[%s891_s1 + $0x24] ss:$8 sps:$4 sm:$0xff] (!%p174_p3)   ;;  %v721_v6 = vld [vmem:[%s891_s1 + $0x20] ss:$8 sps:$4 sm:$0xff] (!%p174_p3)   ;;  %v722_v7 = vld [vmem:[%s891_s1 + $0x34] ss:$8 sps:$4 sm:$0xff] (!%p174_p3)  }
   0x9   : > { %382 = vmatpush1.bf16.msra.mxu0 (!%p174_p3), %v715_v1  ;;  %680 = vmatpush1.bf16.msra.mxu1 (!%p174_p3), %v715_v1  ;;  %v724_v8 = vld [vmem:[%s891_s1 + $0x30] ss:$8 sps:$4 sm:$0xff] (!%p174_p3)   ;;  %v725_v9 = vld [vmem:[%s891_s1 + $0x44] ss:$8 sps:$4 sm:$0xff] (!%p174_p3)   ;;  %v727_v10 = vld [vmem:[%s891_s1 + $0x40] ss:$8 sps:$4 sm:$0xff] (!%p174_p3)  }
   0xa   : > { %383 = vmatprep.subr.bf16.mxu0 (!%p174_p3), %v716_v3  ;;  %673 = vmatprep.subr.bf16.mxu1 (!%p174_p3), %v716_v3  ;;  %v728_v11 = vld [vmem:[%s891_s1 + $0x54] ss:$8 sps:$4 sm:$0xff] (!%p174_p3)   ;;  %v730_v12 = vld [vmem:[%s891_s1 + $0x50] ss:$8 sps:$4 sm:$0xff] (!%p174_p3)   ;;  %v731_v13 = vld [vmem:[%s891_s1 + $0x64] ss:$8 sps:$4 sm:$0xff] (!%p174_p3)  }
   0xb   : > { %v733_v14 = vld [vmem:[%s891_s1 + $0x60] ss:$8 sps:$4 sm:$0xff] (!%p174_p3)   ;;  %v734_v15 = vld [vmem:[%s891_s1 + $0x74] ss:$8 sps:$4 sm:$0xff] (!%p174_p3)   ;;  %v736_v16 = vld [vmem:[%s891_s1 + $0x70] ss:$8 sps:$4 sm:$0xff] (!%p174_p3)  }
   0xc   : > { %v268_v22 = vshrl.u32 (!%p174_p3), %v267_v21, 7  ;;  %v265_v24 = vld [vmem:[%s892_s2] sm:$0x3] (!%p174_p3) }
   0xd   : > { %384 = vmatpush1.bf16.msra.mxu0 (!%p174_p3), %v718_v4  ;;  %681 = vmatpush1.bf16.msra.mxu1 (!%p174_p3), %v718_v4 }
   0xe   : > { %s899_s18 = smov (!%p212_p4, %s628_s18), 15  ;;  %385 = vmatprep.subr.bf16.mxu0 %v719_v5  ;;  %674 = vmatprep.subr.bf16.mxu1 %v719_v5  ;;  %v269_v23 = vsub.s32 0, %v268_v22  ;;  %v273_v25 = vsub.s32 1, %v268_v22 }
   0xf   : > { %s629_s27 = sshll.u32 %s899_s18, 2  ;;  %s663_s5 = sshll.u32 %s899_s18, 3 }
  0x10   : > { %s831_s7 = scalar_lea.vmem %s890_s0, %s629_s27  ;;  %v270_v26 = vrot.slane %v265_v24, %v269_v23  ;;  %v274_v27 = vrot.slane %v265_v24, %v273_v25  ;;  %s871_s8 = scalar_lea.vmem %s893_s3, %s663_s5 }
  0x11   : > { %386 = vmatpush1.bf16.msra.mxu0 %v721_v6  ;;  %682 = vmatpush1.bf16.msra.mxu1 %v721_v6  ;;  %v737_v17 = vld [vmem:[%s831_s7] sm:$0xff]   ;;  %v738_v18 = vld [vmem:[%s831_s7 + $0x10] sm:$0xff]   ;;  %v739_v19 = vld [vmem:[%s831_s7 + $0x8] sm:$0xff]  }
  0x12   : > { %387 = vmatprep.subr.bf16.mxu0 %v722_v7  ;;  %675 = vmatprep.subr.bf16.mxu1 %v722_v7  ;;  %v740_v20 = vld [vmem:[%s831_s7 + $0x18] sm:$0xff]  }
  0x15   : > { %388 = vmatpush1.bf16.msra.mxu0 %v724_v8  ;;  %683 = vmatpush1.bf16.msra.mxu1 %v724_v8 }
  0x16   : > { %389 = vmatprep.subr.bf16.mxu0 %v725_v9  ;;  %676 = vmatprep.subr.bf16.mxu1 %v725_v9 }
  0x19   : > { %390 = vmatpush1.bf16.msra.mxu0 %v727_v10  ;;  %684 = vmatpush1.bf16.msra.mxu1 %v727_v10 }
  0x1a   : > { %391 = vmatprep.subr.bf16.mxu0 %v728_v11  ;;  %677 = vmatprep.subr.bf16.mxu1 %v728_v11 }
  0x1d   : > { %392 = vmatpush1.bf16.msra.mxu0 %v730_v12  ;;  %685 = vmatpush1.bf16.msra.mxu1 %v730_v12 }
  0x1e   : > { %393 = vmatprep.subr.bf16.mxu0 %v731_v13  ;;  %678 = vmatprep.subr.bf16.mxu1 %v731_v13 }
  0x21   : > { %394 = vmatpush1.bf16.msra.mxu0 %v733_v14  ;;  %686 = vmatpush1.bf16.msra.mxu1 %v733_v14 }
  0x22   : > { %395 = vmatprep.subr.bf16.mxu0 %v734_v15  ;;  %679 = vmatprep.subr.bf16.mxu1 %v734_v15 }
  0x25   : > { %396 = vmatpush1.bf16.msra.mxu0 %v736_v16  ;;  %687 = vmatpush1.bf16.msra.mxu1 %v736_v16 }
  0x28   : > { %414 = vmatmul.mubr.bf16.vlgmr.msra.gmra.mrb[0].mxu0 %v737_v17  ;;  %434 = vmatmul.mubr.bf16.vlgmr.msra.gmra.mrb[0].mxu1 %v738_v18 }
  0x29   : > { %423 = vmatprep.mubr.bf16.mxu0 %v765_v2  ;;  %443 = vmatprep.mubr.bf16.mxu1 %v765_v2 }
  0x30   : > { %424 = vmatmul.mubr.bf16.gmra.mrb[4].mxu0 %v739_v19  ;;  %444 = vmatmul.mubr.bf16.gmra.mrb[4].mxu1 %v740_v20 }
  0xfb   : > { %v415_v28 = vpop.f32.mrb[0].mxu0  ;;  %v435_v29 = vpop.f32.mrb[0].mxu1 }
  0xfc   : > { %v416_v30 = vadd.f32 %v415_v28, %v270_v26  ;;  %v436_v31 = vadd.f32 %v435_v29, %v270_v26  ;;  %v417_v32 = vpop.f32.mrb[1].mxu0  ;;  %v437_v33 = vpop.f32.mrb[1].mxu1 }
  0xfd   : > { %v418_v34 = vadd.f32 %v417_v32, %v274_v27  ;;  %v438_v35 = vadd.f32 %v437_v33, %v274_v27  ;;  %v419_v36 = vpop.f32.mrb[2].mxu0  ;;  %v439_v37 = vpop.f32.mrb[2].mxu1 }
  0xfe   : > { %v420_v38 = vadd.f32 %v419_v36, %v270_v26  ;;  %v440_v39 = vadd.f32 %v439_v37, %v270_v26  ;;  %v421_v40 = vpop.f32.mrb[3].mxu0  ;;  %v441_v41 = vpop.f32.mrb[3].mxu1 }
  0xff   : > { %v664_v42 = vpack.c.bf16 %v418_v34, %v416_v30  ;;  %v668_v43 = vpack.c.bf16 %v438_v35, %v436_v31  ;;  %v422_v44 = vadd.f32 %v421_v40, %v274_v27  ;;  %v442_v45 = vadd.f32 %v441_v41, %v274_v27 }
 0x101   : > { %502 = vst [vmem:[%s871_s8] sm:$0xff] %v664_v42  ;;  %506 = vst [vmem:[%s871_s8 + $0x20] sm:$0xff] %v668_v43  ;;  %v665_v46 = vpack.c.bf16 %v422_v44, %v420_v38  ;;  %v669_v47 = vpack.c.bf16 %v442_v45, %v440_v39 }
 0x103   : > { %503 = vst [vmem:[%s871_s8 + $0x8] sm:$0xff] %v665_v46  ;;  %507 = vst [vmem:[%s871_s8 + $0x28] sm:$0xff] %v669_v47  ;;  %v425_v48 = vpop.f32.mrb[4].mxu0  ;;  %v445_v49 = vpop.f32.mrb[4].mxu1 }
 0x104   : > { %v426_v50 = vadd.f32 %v425_v48, %v270_v26  ;;  %v446_v51 = vadd.f32 %v445_v49, %v270_v26  ;;  %v427_v52 = vpop.f32.mrb[5].mxu0  ;;  %v447_v53 = vpop.f32.mrb[5].mxu1 }
 0x105   : > { %v428_v54 = vadd.f32 %v427_v52, %v274_v27  ;;  %v448_v55 = vadd.f32 %v447_v53, %v274_v27  ;;  %v429_v56 = vpop.f32.mrb[6].mxu0  ;;  %v449_v57 = vpop.f32.mrb[6].mxu1 }
 0x106   : > { %v430_v58 = vadd.f32 %v429_v56, %v270_v26  ;;  %v450_v59 = vadd.f32 %v449_v57, %v270_v26  ;;  %v431_v60 = vpop.f32.mrb[7].mxu0  ;;  %v451_v61 = vpop.f32.mrb[7].mxu1 }
 0x107   : > { %v666_v62 = vpack.c.bf16 %v428_v54, %v426_v50  ;;  %v670_v63 = vpack.c.bf16 %v448_v55, %v446_v51  ;;  %v432_v0 = vadd.f32 %v431_v60, %v274_v27  ;;  %v452_v1 = vadd.f32 %v451_v61, %v274_v27 }
 0x109   : > { %504 = vst [vmem:[%s871_s8 + $0x10] sm:$0xff] %v666_v62  ;;  %508 = vst [vmem:[%s871_s8 + $0x30] sm:$0xff] %v670_v63  ;;  %v667_v2 = vpack.c.bf16 %v432_v0, %v430_v58  ;;  %v671_v3 = vpack.c.bf16 %v452_v1, %v450_v59 }
 0x10b   : > { %505 = vst [vmem:[%s871_s8 + $0x18] sm:$0xff] %v667_v2  ;;  %509 = vst [vmem:[%s871_s8 + $0x38] sm:$0xff] %v671_v3 }
 0x10c PF: > { %s13_s14 = sadd.s32 1, %s763_s14   ;;  %s894_s12 = smov %s759_s13 }
 0x10d   : > { %p10_p5 = scmp.ge.s32.totalorder %s13_s14, 4   ;;  %s895_s13 = smov %s897_s15 }
 0x10f   :  { %12 = sbr.rel (!%p10_p5) target bundleno = 2 (0x2), region = 68 }

// kernel: resnet_forward_pallas.22
= control target key start
LH: loop header
LB: loop body
LE: loop exit
PB: predicated region body
PF: predicated region fallthrough
CT: control target
= control target key end

     0   :  { %s937_s15 = smov 0   ;;  %s939_s16 = smov 0   ;;  %s1086_s0 = inlined_call_operand.vmem [shape: bf16[128,128], index: 0, kind: input, shape index: {}]   ;;  %s1087_s1 = inlined_call_operand.vmem [shape: bf16[128,256], index: 1, kind: input, shape index: {}]   ;;  %s1088_s2 = inlined_call_operand.vmem [shape: f32[1,256], index: 2, kind: input, shape index: {}]   ;;  %s1089_s3 = inlined_call_operand.vmem [shape: bf16[128,256], index: 3, kind: input, shape index: {}]   ;;  %s1090_s4 = inlined_call_operand.vmem [shape: bf16[128,256], index: 4, kind: output, shape index: {}]  }
   0x1   :  { %s941_s17 = smov 0  }
   0x2 LB: > { %s26_s18 = sadd.s32 1, %s905_s16  ;;  %p769_p0 = scmp.ge.s32.totalorder %s909_s17, 1  ;;  %s909_s17 = sphi %s941_s17, %s14_s17   ;;  %s905_s16 = sphi %s939_s16, %s1092_s16   ;;  %s901_s15 = sphi %s937_s15, %s1091_s15  }
   0x3   : > { %p28_p1 = scmp.ge.s32.totalorder %s26_s18, 2  ;;  %p217_p2 = scmp.lt.s32.totalorder %s909_s17, 3 }
   0x5   : > { %s1094_s18 = smov (%p28_p1, %s26_s18), 0  ;;  %p218_p3 = pnand %p769_p0, %p217_p2 }
   0x6   : > { %v859_v0 = vld [vmem:[%s1087_s1 + $0x4] ss:$8 sps:$4 sm:$0xff] (!%p218_p3)   ;;  %s770_s21 = sshll.u32 (!%p218_p3), %s901_s15, 3  ;;  %v861_v1 = vld [vmem:[%s1087_s1] ss:$8 sps:$4 sm:$0xff] (!%p218_p3)   ;;  %v911_v2 = vmov (!%p218_p3), 0   ;;  %v335_v21 = vlaneseq (!%p218_p3) }
   0x7   : > { %221 = sbr.rel (%p218_p3) target bundleno = 273 (0x111), region = 36  ;;  %481 = vmatprep.mubr.bf16.mxu0 (!%p218_p3), %v911_v2  ;;  %501 = vmatprep.mubr.bf16.mxu1 (!%p218_p3), %v911_v2  ;;  %p268_p4 = scmp.lt.s32.totalorder (!%p218_p3), %s770_s21, 15  ;;  %v862_v3 = vld [vmem:[%s1087_s1 + $0x14] ss:$8 sps:$4 sm:$0xff] (!%p218_p3)   ;;  %v864_v4 = vld [vmem:[%s1087_s1 + $0x10] ss:$8 sps:$4 sm:$0xff] (!%p218_p3)  }
   0x8   : > { %449 = vmatprep.subr.bf16.mxu0 (!%p218_p3), %v859_v0  ;;  %818 = vmatprep.subr.bf16.mxu1 (!%p218_p3), %v859_v0  ;;  %v865_v5 = vld [vmem:[%s1087_s1 + $0x24] ss:$8 sps:$4 sm:$0xff] (!%p218_p3)   ;;  %v867_v6 = vld [vmem:[%s1087_s1 + $0x20] ss:$8 sps:$4 sm:$0xff] (!%p218_p3)   ;;  %v868_v7 = vld [vmem:[%s1087_s1 + $0x34] ss:$8 sps:$4 sm:$0xff] (!%p218_p3)  }
   0x9   : > { %450 = vmatpush1.bf16.msra.mxu0 (!%p218_p3), %v861_v1  ;;  %826 = vmatpush1.bf16.msra.mxu1 (!%p218_p3), %v861_v1  ;;  %v870_v8 = vld [vmem:[%s1087_s1 + $0x30] ss:$8 sps:$4 sm:$0xff] (!%p218_p3)   ;;  %v871_v9 = vld [vmem:[%s1087_s1 + $0x44] ss:$8 sps:$4 sm:$0xff] (!%p218_p3)   ;;  %v873_v10 = vld [vmem:[%s1087_s1 + $0x40] ss:$8 sps:$4 sm:$0xff] (!%p218_p3)  }
   0xa   : > { %451 = vmatprep.subr.bf16.mxu0 (!%p218_p3), %v862_v3  ;;  %819 = vmatprep.subr.bf16.mxu1 (!%p218_p3), %v862_v3  ;;  %v874_v11 = vld [vmem:[%s1087_s1 + $0x54] ss:$8 sps:$4 sm:$0xff] (!%p218_p3)   ;;  %v876_v12 = vld [vmem:[%s1087_s1 + $0x50] ss:$8 sps:$4 sm:$0xff] (!%p218_p3)   ;;  %v877_v13 = vld [vmem:[%s1087_s1 + $0x64] ss:$8 sps:$4 sm:$0xff] (!%p218_p3)  }
   0xb   : > { %v879_v14 = vld [vmem:[%s1087_s1 + $0x60] ss:$8 sps:$4 sm:$0xff] (!%p218_p3)   ;;  %v880_v15 = vld [vmem:[%s1087_s1 + $0x74] ss:$8 sps:$4 sm:$0xff] (!%p218_p3)   ;;  %v882_v16 = vld [vmem:[%s1087_s1 + $0x70] ss:$8 sps:$4 sm:$0xff] (!%p218_p3)  }
   0xc   : > { %v336_v22 = vshrl.u32 (!%p218_p3), %v335_v21, 7  ;;  %v333_v24 = vld [vmem:[%s1088_s2] sm:$0x3] (!%p218_p3) }
   0xd   : > { %452 = vmatpush1.bf16.msra.mxu0 (!%p218_p3), %v864_v4  ;;  %827 = vmatpush1.bf16.msra.mxu1 (!%p218_p3), %v864_v4 }
   0xe   : > { %s1096_s21 = smov (!%p268_p4, %s770_s21), 15  ;;  %453 = vmatprep.subr.bf16.mxu0 %v865_v5  ;;  %820 = vmatprep.subr.bf16.mxu1 %v865_v5  ;;  %v337_v23 = vsub.s32 0, %v336_v22  ;;  %v341_v25 = vsub.s32 1, %v336_v22 }
   0xf   : > { %s771_s30 = sshll.u32 %s1096_s21, 2  ;;  %s808_s8 = sshll.u32 %s1096_s21, 3 }
  0x10   : > { %s982_s11 = scalar_lea.vmem %s1086_s0, %s771_s30  ;;  %s1021_s12 = scalar_lea.vmem %s1089_s3, %s808_s8  ;;  %v1028_v28 = vrot.slane %v333_v24, %v337_v23  ;;  %v1032_v31 = vrot.slane %v333_v24, %v341_v25 }
  0x11   : > { %454 = vmatpush1.bf16.msra.mxu0 %v867_v6  ;;  %828 = vmatpush1.bf16.msra.mxu1 %v867_v6  ;;  %v883_v17 = vld [vmem:[%s982_s11] sm:$0xff]   ;;  %v884_v18 = vld [vmem:[%s982_s11 + $0x10] sm:$0xff]   ;;  %v885_v19 = vld [vmem:[%s982_s11 + $0x8] sm:$0xff]   ;;  %s1059_s19 = scalar_lea.vmem %s1090_s4, %s808_s8 }
  0x12   : > { %455 = vmatprep.subr.bf16.mxu0 %v868_v7  ;;  %821 = vmatprep.subr.bf16.mxu1 %v868_v7  ;;  %v886_v20 = vld [vmem:[%s982_s11 + $0x18] sm:$0xff]   ;;  %v522_v26 = vld [vmem:[%s1021_s12] sm:$0xff]  ;;  %v523_v29 = vld [vmem:[%s1021_s12 + $0x8] sm:$0xff] }
  0x13   : > { %v526_v27 = vld [vmem:[%s1021_s12 + $0x20] sm:$0xff]  ;;  %v527_v30 = vld [vmem:[%s1021_s12 + $0x28] sm:$0xff]  ;;  %v1035_v32 = vld [vmem:[%s1021_s12 + $0x10] sm:$0xff]  ;;  %v530_v34 = vunpack.c.l.bf16 %v522_v26  ;;  %v531_v36 = vunpack.c.h.bf16 %v522_v26  ;;  %v532_v40 = vunpack.c.l.bf16 %v523_v29  ;;  %v533_v42 = vunpack.c.h.bf16 %v523_v29 }
  0x14   : > { %v1038_v33 = vld [vmem:[%s1021_s12 + $0x30] sm:$0xff]  ;;  %v538_v35 = vunpack.c.l.bf16 %v526_v27  ;;  %v539_v37 = vunpack.c.h.bf16 %v526_v27  ;;  %v540_v41 = vunpack.c.l.bf16 %v527_v30  ;;  %v541_v43 = vunpack.c.h.bf16 %v527_v30  ;;  %v529_v3 = vld [vmem:[%s1021_s12 + $0x38] sm:$0xff] }
  0x15   : > { %456 = vmatpush1.bf16.msra.mxu0 %v870_v8  ;;  %829 = vmatpush1.bf16.msra.mxu1 %v870_v8  ;;  %v534_v48 = vunpack.c.l.bf16 %v1035_v32  ;;  %v542_v49 = vunpack.c.l.bf16 %v1038_v33  ;;  %v535_v54 = vunpack.c.h.bf16 %v1035_v32  ;;  %v543_v55 = vunpack.c.h.bf16 %v1038_v33 }
  0x16   : > { %457 = vmatprep.subr.bf16.mxu0 %v871_v9  ;;  %822 = vmatprep.subr.bf16.mxu1 %v871_v9  ;;  %v545_v27 = vunpack.c.h.bf16 %v529_v3 }
  0x19   : > { %458 = vmatpush1.bf16.msra.mxu0 %v873_v10  ;;  %830 = vmatpush1.bf16.msra.mxu1 %v873_v10 }
  0x1a   : > { %459 = vmatprep.subr.bf16.mxu0 %v874_v11  ;;  %823 = vmatprep.subr.bf16.mxu1 %v874_v11 }
  0x1d   : > { %460 = vmatpush1.bf16.msra.mxu0 %v876_v12  ;;  %831 = vmatpush1.bf16.msra.mxu1 %v876_v12 }
  0x1e   : > { %461 = vmatprep.subr.bf16.mxu0 %v877_v13  ;;  %824 = vmatprep.subr.bf16.mxu1 %v877_v13 }
  0x21   : > { %462 = vmatpush1.bf16.msra.mxu0 %v879_v14  ;;  %832 = vmatpush1.bf16.msra.mxu1 %v879_v14 }
  0x22   : > { %463 = vmatprep.subr.bf16.mxu0 %v880_v15  ;;  %825 = vmatprep.subr.bf16.mxu1 %v880_v15  ;;  %v544_v15 = vunpack.c.l.bf16 %v529_v3 }
  0x25   : > { %464 = vmatpush1.bf16.msra.mxu0 %v882_v16  ;;  %833 = vmatpush1.bf16.msra.mxu1 %v882_v16 }
  0x28   : > { %482 = vmatmul.mubr.bf16.vlgmr.msra.gmra.mrb[0].mxu0 %v883_v17  ;;  %502 = vmatmul.mubr.bf16.vlgmr.msra.gmra.mrb[0].mxu1 %v884_v18 }
  0x29   : > { %491 = vmatprep.mubr.bf16.mxu0 %v911_v2  ;;  %511 = vmatprep.mubr.bf16.mxu1 %v911_v2  ;;  %v525_v2 = vld [vmem:[%s1021_s12 + $0x18] sm:$0xff] }
  0x2a   : > { %v536_v14 = vunpack.c.l.bf16 %v525_v2  ;;  %v537_v26 = vunpack.c.h.bf16 %v525_v2 }
  0x30   : > { %492 = vmatmul.mubr.bf16.gmra.mrb[4].mxu0 %v885_v19  ;;  %512 = vmatmul.mubr.bf16.gmra.mrb[4].mxu1 %v886_v20 }
  0xfb   : > { %v483_v38 = vpop.f32.mrb[0].mxu0  ;;  %v503_v39 = vpop.f32.mrb[0].mxu1 }
  0xfc   : > { %v484_v44 = vadd.f32 %v483_v38, %v1028_v28  ;;  %v504_v45 = vadd.f32 %v503_v39, %v1028_v28  ;;  %v485_v46 = vpop.f32.mrb[1].mxu0  ;;  %v505_v47 = vpop.f32.mrb[1].mxu1 }
  0xfd   : > { %v486_v50 = vadd.f32 %v485_v46, %v1032_v31  ;;  %v506_v51 = vadd.f32 %v505_v47, %v1032_v31  ;;  %v487_v52 = vpop.f32.mrb[2].mxu0  ;;  %v507_v53 = vpop.f32.mrb[2].mxu1 }
  0xfe   : > { %v546_v56 = vadd.f32 %v530_v34, %v484_v44  ;;  %v554_v57 = vadd.f32 %v538_v35, %v504_v45  ;;  %v488_v58 = vadd.f32 %v487_v52, %v1028_v28  ;;  %v508_v59 = vadd.f32 %v507_v53, %v1028_v28  ;;  %v489_v60 = vpop.f32.mrb[3].mxu0  ;;  %v509_v61 = vpop.f32.mrb[3].mxu1 }
  0xff   : > { %v547_v62 = vadd.f32 %v531_v36, %v486_v50  ;;  %v555_v63 = vadd.f32 %v539_v37, %v506_v51  ;;  %v490_v0 = vadd.f32 %v489_v60, %v1032_v31  ;;  %v510_v1 = vadd.f32 %v509_v61, %v1032_v31 }
 0x100   : > { %v562_v4 = vmax.f32 %v546_v56, 0.0  ;;  %v570_v5 = vmax.f32 %v554_v57, 0.0  ;;  %v548_v6 = vadd.f32 %v532_v40, %v488_v58  ;;  %v556_v7 = vadd.f32 %v540_v41, %v508_v59 }
 0x101   : > { %v563_v8 = vmax.f32 %v547_v62, 0.0  ;;  %v571_v9 = vmax.f32 %v555_v63, 0.0  ;;  %v549_v10 = vadd.f32 %v533_v42, %v490_v0  ;;  %v557_v11 = vadd.f32 %v541_v43, %v510_v1 }
 0x102   : > { %v564_v12 = vmax.f32 %v548_v6, 0.0  ;;  %v572_v13 = vmax.f32 %v556_v7, 0.0 }
 0x103   : > { %v810_v16 = vpack.c.bf16 %v563_v8, %v562_v4  ;;  %v814_v17 = vpack.c.bf16 %v571_v9, %v570_v5  ;;  %v565_v18 = vmax.f32 %v549_v10, 0.0  ;;  %v573_v19 = vmax.f32 %v557_v11, 0.0  ;;  %v493_v20 = vpop.f32.mrb[4].mxu0  ;;  %v513_v21 = vpop.f32.mrb[4].mxu1 }
 0x104   : > { %v494_v22 = vadd.f32 %v493_v20, %v1028_v28  ;;  %v514_v23 = vadd.f32 %v513_v21, %v1028_v28  ;;  %v495_v24 = vpop.f32.mrb[5].mxu0  ;;  %v515_v25 = vpop.f32.mrb[5].mxu1 }
 0x105   : > { %626 = vst [vmem:[%s1059_s19] sm:$0xff] %v810_v16  ;;  %630 = vst [vmem:[%s1059_s19 + $0x20] sm:$0xff] %v814_v17  ;;  %v811_v29 = vpack.c.bf16 %v565_v18, %v564_v12  ;;  %v815_v30 = vpack.c.bf16 %v573_v19, %v572_v13  ;;  %v496_v32 = vadd.f32 %v495_v24, %v1032_v31  ;;  %v497_v34 = vpop.f32.mrb[6].mxu0  ;;  %v517_v35 = vpop.f32.mrb[6].mxu1 }
 0x106   : > { %v516_v33 = vadd.f32 %v515_v25, %v1032_v31  ;;  %v550_v36 = vadd.f32 %v534_v48, %v494_v22  ;;  %v558_v37 = vadd.f32 %v542_v49, %v514_v23  ;;  %v498_v38 = vadd.f32 %v497_v34, %v1028_v28  ;;  %v499_v40 = vpop.f32.mrb[7].mxu0  ;;  %v519_v41 = vpop.f32.mrb[7].mxu1 }
 0x107   : > { %v518_v39 = vadd.f32 %v517_v35, %v1028_v28  ;;  %627 = vst [vmem:[%s1059_s19 + $0x8] sm:$0xff] %v811_v29  ;;  %631 = vst [vmem:[%s1059_s19 + $0x28] sm:$0xff] %v815_v30  ;;  %v551_v42 = vadd.f32 %v535_v54, %v496_v32  ;;  %v500_v44 = vadd.f32 %v499_v40, %v1032_v31 }
 0x108   : > { %v559_v43 = vadd.f32 %v543_v55, %v516_v33  ;;  %v520_v45 = vadd.f32 %v519_v41, %v1032_v31  ;;  %v566_v46 = vmax.f32 %v550_v36, 0.0  ;;  %v574_v47 = vmax.f32 %v558_v37, 0.0 }
 0x109   : > { %v552_v48 = vadd.f32 %v536_v14, %v498_v38  ;;  %v560_v49 = vadd.f32 %v544_v15, %v518_v39  ;;  %v567_v50 = vmax.f32 %v551_v42, 0.0  ;;  %v553_v51 = vadd.f32 %v537_v26, %v500_v44 }
 0x10a   : > { %v575_v28 = vmax.f32 %v559_v43, 0.0  ;;  %v561_v52 = vadd.f32 %v545_v27, %v520_v45 }
 0x10b   : > { %v568_v53 = vmax.f32 %v552_v48, 0.0  ;;  %v576_v56 = vmax.f32 %v560_v49, 0.0  ;;  %v812_v54 = vpack.c.bf16 %v567_v50, %v566_v46  ;;  %v569_v57 = vmax.f32 %v553_v51, 0.0 }
 0x10c   : > { %v816_v55 = vpack.c.bf16 %v575_v28, %v574_v47  ;;  %v577_v58 = vmax.f32 %v561_v52, 0.0 }
 0x10d   : > { %628 = vst [vmem:[%s1059_s19 + $0x10] sm:$0xff] %v812_v54  ;;  %v813_v31 = vpack.c.bf16 %v569_v57, %v568_v53 }
 0x10e   : > { %632 = vst [vmem:[%s1059_s19 + $0x30] sm:$0xff] %v816_v55  ;;  %v817_v59 = vpack.c.bf16 %v577_v58, %v576_v56 }
 0x10f   : > { %629 = vst [vmem:[%s1059_s19 + $0x18] sm:$0xff] %v813_v31 }
 0x110   : > { %633 = vst [vmem:[%s1059_s19 + $0x38] sm:$0xff] %v817_v59 }
 0x111 PF: > { %s14_s17 = sadd.s32 1, %s909_s17   ;;  %s1091_s15 = smov %s905_s16 }
 0x112   : > { %p11_p5 = scmp.ge.s32.totalorder %s14_s17, 4   ;;  %s1092_s16 = smov %s1094_s18 }
 0x114   :  { %13 = sbr.rel (!%p11_p5) target bundleno = 2 (0x2), region = 75 }

// kernel: resnet_forward_pallas.23
= control target key start
LH: loop header
LB: loop body
LE: loop exit
PB: predicated region body
PF: predicated region fallthrough
CT: control target
= control target key end

     0   :  { %s1076_s12 = smov 0   ;;  %s1078_s13 = smov 0   ;;  %s1307_s0 = inlined_call_operand.vmem [shape: bf16[32,256], index: 0, kind: input, shape index: {}]   ;;  %s1308_s1 = inlined_call_operand.vmem [shape: bf16[256,512], index: 1, kind: input, shape index: {}]   ;;  %s1309_s2 = inlined_call_operand.vmem [shape: f32[1,512], index: 2, kind: input, shape index: {}]   ;;  %s1310_s3 = inlined_call_operand.vmem [shape: bf16[32,512], index: 3, kind: output, shape index: {}]  }
   0x1   :  { %s1080_s14 = smov 0   ;;  %s1082_s15 = smov 0  }
   0x2   :  { %s1084_s16 = smov 0   ;;  %s1086_s17 = smov 0  }
   0x3   :  { %s1088_s18 = smov 0   ;;  %s1090_s19 = smov 0  }
   0x4   :  { %s1092_s20 = smov 0  }
   0x5 LB: > { %s799_s21 = sadd.s32 4294967295, %s1054_s20   ;;  %s22_s22 = sadd.s32 1, %s1046_s18  ;;  %s1054_s20 = sphi %s1092_s20, %s13_s20   ;;  %s1050_s19 = sphi %s1090_s19, %s1319_s19   ;;  %s1046_s18 = sphi %s1088_s18, %s1318_s18   ;;  %s1042_s17 = sphi %s1086_s17, %s1317_s17   ;;  %s1038_s16 = sphi %s1084_s16, %s1316_s16   ;;  %s1034_s15 = sphi %s1082_s15, %s1315_s15   ;;  %s1030_s14 = sphi %s1080_s14, %s1314_s14   ;;  %s1026_s13 = sphi %s1078_s13, %s1313_s13   ;;  %s1022_s12 = sphi %s1076_s12, %s1312_s12  }
   0x6   : > { %p23_p0 = scmp.ge.s32.totalorder %s22_s22, 2  ;;  %s25_s23 = sadd.s32 1, %s1050_s19 }
   0x7   : > { %s58_s24 = sadd.s32 1, %s1034_s15  ;;  %p65_p1 = scmp.ne.s32.totalorder %s1034_s15, %s1030_s14 }
   0x8   : > { %s1321_s22 = smov (%p23_p0, %s22_s22), 0  ;;  %s1323_s23 = smov (!%p23_p0, %s25_s23), %s1050_s19 }
   0x9   : > { %s55_s25 = ssub.s32 %s1046_s18, %s1321_s22  ;;  %p66_p2 = scmp.eq.s32.totalorder %s1054_s20, 0 }
   0xa   : > { %p27_p3 = scmp.ge.s32.totalorder %s1323_s23, 2  ;;  %p56_p4 = scmp.eq.s32.totalorder %s55_s25, 0 }
   0xb   : > { %p67_p5 = por %p66_p2, %p65_p1  ;;  %s112_s26 = sadd.s32 1, %s1026_s13 }
   0xc   : > { %s1325_s23 = smov (%p27_p3, %s1323_s23), 0  ;;  %p122_p6 = scmp.ne.s32.totalorder %s1026_s13, %s1022_s12 }
   0xd   : > { %s1137_s27 = scalar_select %p56_p4, %s1034_s15, %s58_s24  }
   0xe   : > { %s107_s28 = ssub.s32 %s1050_s19, %s1325_s23  ;;  %p123_p7 = scmp.eq.s32.totalorder %s799_s21, 3 }
   0xf   : > { %s109_s29 = sor.u32 %s107_s28, %s55_s25  ;;  %p802_p10 = scmp.ge.s32.totalorder %s1054_s20, 4 }
  0x10   : > { %p110_p8 = scmp.eq.s32.totalorder %s109_s29, 0  ;;  %p1143_p9 = por %p123_p7, %p122_p6 }
  0x11   : > { %145 = sbr.rel (%p802_p10) target bundleno = 44 (0x2c), region = 16 }
  0x12   : > { %s1148_s4 = scalar_select %p110_p8, %s1026_s13, %s112_s26  }
  0x18   : > { %158 = sbr.rel (!%p67_p5) target bundleno = 44 (0x2c), region = 24  ;;  %s160_s5 = sand.u32 (%p67_p5), 1, %s1034_s15  }
  0x19   : > { %s856_s6 = sshll.u32 (%p67_p5), %s1046_s18, 3  ;;  %s803_s7 = sshll.u32 (%p67_p5), %s160_s5, 8 }
  0x1a   : > { %s1156_s10 = scalar_lea.vmem (%p67_p5), %s1308_s1, %s856_s6  ;;  %s1161_s11 = scalar_lea.vmem (%p67_p5), [#allocation2], %s803_s7 }
  0x1b   : > { %v255_v0 = vld [vmem:[%s1156_s10] sm:$0xff] (%p67_p5)  ;;  %v257_v1 = vld [vmem:[%s1156_s10 + $0x10] sm:$0xff] (%p67_p5) }
  0x1c   : > { %v259_v2 = vld [vmem:[%s1156_s10 + $0x20] sm:$0xff] (%p67_p5)  ;;  %256 = vst [vmem:[%s1161_s11] sm:$0xff] (%p67_p5), %v255_v0  ;;  %258 = vst [vmem:[%s1161_s11 + $0x8] sm:$0xff] (%p67_p5), %v257_v1  ;;  %v261_v3 = vld [vmem:[%s1156_s10 + $0x30] sm:$0xff] (%p67_p5) }
  0x1d   : > { %260 = vst [vmem:[%s1161_s11 + $0x10] sm:$0xff] (%p67_p5), %v259_v2  ;;  %v263_v4 = vld [vmem:[%s1156_s10 + $0x40] sm:$0xff] (%p67_p5)  ;;  %v265_v5 = vld [vmem:[%s1156_s10 + $0x50] sm:$0xff] (%p67_p5)  ;;  %262 = vst [vmem:[%s1161_s11 + $0x18] sm:$0xff] (%p67_p5), %v261_v3 }
  0x1e   : > { %264 = vst [vmem:[%s1161_s11 + $0x20] sm:$0xff] (%p67_p5), %v263_v4  ;;  %266 = vst [vmem:[%s1161_s11 + $0x28] sm:$0xff] (%p67_p5), %v265_v5  ;;  %v267_v6 = vld [vmem:[%s1156_s10 + $0x60] sm:$0xff] (%p67_p5)  ;;  %v269_v7 = vld [vmem:[%s1156_s10 + $0x70] sm:$0xff] (%p67_p5) }
  0x1f   : > { %v271_v8 = vld [vmem:[%s1156_s10 + $0x80] sm:$0xff]  ;;  %268 = vst [vmem:[%s1161_s11 + $0x30] sm:$0xff] %v267_v6  ;;  %270 = vst [vmem:[%s1161_s11 + $0x38] sm:$0xff] %v269_v7  ;;  %v273_v9 = vld [vmem:[%s1156_s10 + $0x90] sm:$0xff] }
  0x20   : > { %272 = vst [vmem:[%s1161_s11 + $0x40] sm:$0xff] %v271_v8  ;;  %v275_v10 = vld [vmem:[%s1156_s10 + $0xa0] sm:$0xff]  ;;  %v277_v11 = vld [vmem:[%s1156_s10 + $0xb0] sm:$0xff]  ;;  %274 = vst [vmem:[%s1161_s11 + $0x48] sm:$0xff] %v273_v9 }
  0x21   : > { %276 = vst [vmem:[%s1161_s11 + $0x50] sm:$0xff] %v275_v10  ;;  %278 = vst [vmem:[%s1161_s11 + $0x58] sm:$0xff] %v277_v11  ;;  %v279_v12 = vld [vmem:[%s1156_s10 + $0xc0] sm:$0xff]  ;;  %v281_v13 = vld [vmem:[%s1156_s10 + $0xd0] sm:$0xff] }
  0x22   : > { %v283_v14 = vld [vmem:[%s1156_s10 + $0xe0] sm:$0xff]  ;;  %280 = vst [vmem:[%s1161_s11 + $0x60] sm:$0xff] %v279_v12  ;;  %282 = vst [vmem:[%s1161_s11 + $0x68] sm:$0xff] %v281_v13  ;;  %v285_v15 = vld [vmem:[%s1156_s10 + $0xf0] sm:$0xff] }
  0x23   : > { %284 = vst [vmem:[%s1161_s11 + $0x70] sm:$0xff] %v283_v14  ;;  %v287_v16 = vld [vmem:[%s1156_s10 + $0x100] sm:$0xff]  ;;  %v289_v17 = vld [vmem:[%s1156_s10 + $0x110] sm:$0xff]  ;;  %286 = vst [vmem:[%s1161_s11 + $0x78] sm:$0xff] %v285_v15 }
  0x24   : > { %288 = vst [vmem:[%s1161_s11 + $0x80] sm:$0xff] %v287_v16  ;;  %290 = vst [vmem:[%s1161_s11 + $0x88] sm:$0xff] %v289_v17  ;;  %v291_v18 = vld [vmem:[%s1156_s10 + $0x120] sm:$0xff]  ;;  %v293_v19 = vld [vmem:[%s1156_s10 + $0x130] sm:$0xff] }
  0x25   : > { %v295_v20 = vld [vmem:[%s1156_s10 + $0x140] sm:$0xff]  ;;  %292 = vst [vmem:[%s1161_s11 + $0x90] sm:$0xff] %v291_v18  ;;  %294 = vst [vmem:[%s1161_s11 + $0x98] sm:$0xff] %v293_v19  ;;  %v297_v21 = vld [vmem:[%s1156_s10 + $0x150] sm:$0xff] }
  0x26   : > { %296 = vst [vmem:[%s1161_s11 + $0xa0] sm:$0xff] %v295_v20  ;;  %v299_v22 = vld [vmem:[%s1156_s10 + $0x160] sm:$0xff]  ;;  %v301_v23 = vld [vmem:[%s1156_s10 + $0x170] sm:$0xff]  ;;  %298 = vst [vmem:[%s1161_s11 + $0xa8] sm:$0xff] %v297_v21 }
  0x27   : > { %300 = vst [vmem:[%s1161_s11 + $0xb0] sm:$0xff] %v299_v22  ;;  %302 = vst [vmem:[%s1161_s11 + $0xb8] sm:$0xff] %v301_v23  ;;  %v303_v24 = vld [vmem:[%s1156_s10 + $0x180] sm:$0xff]  ;;  %v305_v25 = vld [vmem:[%s1156_s10 + $0x190] sm:$0xff] }
  0x28   : > { %v307_v26 = vld [vmem:[%s1156_s10 + $0x1a0] sm:$0xff]  ;;  %304 = vst [vmem:[%s1161_s11 + $0xc0] sm:$0xff] %v303_v24  ;;  %306 = vst [vmem:[%s1161_s11 + $0xc8] sm:$0xff] %v305_v25  ;;  %v309_v27 = vld [vmem:[%s1156_s10 + $0x1b0] sm:$0xff] }
  0x29   : > { %308 = vst [vmem:[%s1161_s11 + $0xd0] sm:$0xff] %v307_v26  ;;  %v311_v28 = vld [vmem:[%s1156_s10 + $0x1c0] sm:$0xff]  ;;  %v313_v29 = vld [vmem:[%s1156_s10 + $0x1d0] sm:$0xff]  ;;  %310 = vst [vmem:[%s1161_s11 + $0xd8] sm:$0xff] %v309_v27 }
  0x2a   : > { %312 = vst [vmem:[%s1161_s11 + $0xe0] sm:$0xff] %v311_v28  ;;  %314 = vst [vmem:[%s1161_s11 + $0xe8] sm:$0xff] %v313_v29  ;;  %v315_v30 = vld [vmem:[%s1156_s10 + $0x1e0] sm:$0xff]  ;;  %v317_v31 = vld [vmem:[%s1156_s10 + $0x1f0] sm:$0xff] }
  0x2b   : > { %316 = vst [vmem:[%s1161_s11 + $0xf0] sm:$0xff] %v315_v30  ;;  %318 = vst [vmem:[%s1161_s11 + $0xf8] sm:$0xff] %v317_v31 }
  0x2c PF: > { %p806_p11 = scmp.ge.s32.totalorder %s1054_s20, 1  ;;  %p331_p12 = scmp.lt.s32.totalorder %s1054_s20, 5 }
  0x2e   : > { %p332_p13 = pnand %p806_p11, %p331_p12 }
  0x2f   : > { %s338_s21 = sand.u32 (!%p332_p13), 1, %s1030_s14   ;;  %s809_s14 = sshll.u32 (!%p332_p13), %s1042_s17, 1  ;;  %v421_v2 = vlaneseq (!%p332_p13) }
  0x30   : > { %335 = sbr.rel (%p332_p13) target bundleno = 343 (0x157), region = 66  ;;  %s807_s24 = sshll.u32 (!%p332_p13), %s338_s21, 8 }
  0x31   : > { %s1227_s25 = scalar_lea.vmem (!%p332_p13), [#allocation2], %s807_s24  ;;  %p371_p0 = scmp.lt.s32.totalorder (!%p332_p13), %s809_s14, 3  ;;  %v422_v3 = vshrl.u32 (!%p332_p13), %v421_v2, 7 }
  0x32   : > { %v933_v32 = vld [vmem:[%s1227_s25 + $0x4] ss:$8 sps:$4 sm:$0xff] (!%p332_p13)   ;;  %v935_v33 = vld [vmem:[%s1227_s25] ss:$8 sps:$4 sm:$0xff] (!%p332_p13)   ;;  %v936_v34 = vld [vmem:[%s1227_s25 + $0x14] ss:$8 sps:$4 sm:$0xff] (!%p332_p13)  }
  0x33   : > { %601 = vmatprep.subr.bf16.mxu0 (!%p332_p13), %v933_v32  ;;  %v938_v35 = vld [vmem:[%s1227_s25 + $0x10] ss:$8 sps:$4 sm:$0xff] (!%p332_p13)   ;;  %v939_v36 = vld [vmem:[%s1227_s25 + $0x24] ss:$8 sps:$4 sm:$0xff] (!%p332_p13)   ;;  %v941_v37 = vld [vmem:[%s1227_s25 + $0x20] ss:$8 sps:$4 sm:$0xff] (!%p332_p13)  }
  0x34   : > { %602 = vmatpush1.bf16.msra.mxu0 (!%p332_p13), %v935_v33  ;;  %v942_v38 = vld [vmem:[%s1227_s25 + $0x34] ss:$8 sps:$4 sm:$0xff] (!%p332_p13)   ;;  %v944_v39 = vld [vmem:[%s1227_s25 + $0x30] ss:$8 sps:$4 sm:$0xff] (!%p332_p13)   ;;  %v945_v40 = vld [vmem:[%s1227_s25 + $0x44] ss:$8 sps:$4 sm:$0xff] (!%p332_p13)  }
  0x35   : > { %603 = vmatprep.subr.bf16.mxu0 (!%p332_p13), %v936_v34  ;;  %v947_v41 = vld [vmem:[%s1227_s25 + $0x40] ss:$8 sps:$4 sm:$0xff] (!%p332_p13)   ;;  %v948_v42 = vld [vmem:[%s1227_s25 + $0x54] ss:$8 sps:$4 sm:$0xff] (!%p332_p13)   ;;  %v950_v43 = vld [vmem:[%s1227_s25 + $0x50] ss:$8 sps:$4 sm:$0xff] (!%p332_p13)  }
  0x36   : > { %v951_v44 = vld [vmem:[%s1227_s25 + $0x64] ss:$8 sps:$4 sm:$0xff] (!%p332_p13)   ;;  %v953_v46 = vld [vmem:[%s1227_s25 + $0x60] ss:$8 sps:$4 sm:$0xff] (!%p332_p13)   ;;  %v954_v47 = vld [vmem:[%s1227_s25 + $0x74] ss:$8 sps:$4 sm:$0xff] (!%p332_p13)  }
  0x37   : > { %s1327_s14 = smov (!%p371_p0, %s809_s14), 3  ;;  %v956_v48 = vld [vmem:[%s1227_s25 + $0x70] ss:$8 sps:$4 sm:$0xff]   ;;  %v957_v49 = vld [vmem:[%s1227_s25 + $0x84] ss:$8 sps:$4 sm:$0xff]   ;;  %s812_s6 = sshll.u32 %s1038_s16, 1 }
  0x38   : > { %604 = vmatpush1.bf16.msra.mxu0 %v938_v35  ;;  %s857_s26 = sshll.u32 %s1327_s14, 3  ;;  %v959_v50 = vld [vmem:[%s1227_s25 + $0x80] ss:$8 sps:$4 sm:$0xff]   ;;  %v960_v51 = vld [vmem:[%s1227_s25 + $0x94] ss:$8 sps:$4 sm:$0xff]   ;;  %p379_p1 = scmp.lt.s32.totalorder %s812_s6, 3 }
  0x39   : > { %605 = vmatprep.subr.bf16.mxu0 %v939_v36  ;;  %s1245_s5 = scalar_lea.vmem %s1307_s0, %s857_s26  ;;  %v962_v52 = vld [vmem:[%s1227_s25 + $0x90] ss:$8 sps:$4 sm:$0xff]   ;;  %v963_v53 = vld [vmem:[%s1227_s25 + $0xa4] ss:$8 sps:$4 sm:$0xff]   ;;  %v965_v54 = vld [vmem:[%s1227_s25 + $0xa0] ss:$8 sps:$4 sm:$0xff]  }
  0x3a   : > { %v983_v45 = vld [vmem:[%s1245_s5 + $0x4] ss:$8 sps:$4 sm:$0xff]   ;;  %v966_v55 = vld [vmem:[%s1227_s25 + $0xb4] ss:$8 sps:$4 sm:$0xff]   ;;  %v968_v56 = vld [vmem:[%s1227_s25 + $0xb0] ss:$8 sps:$4 sm:$0xff]  }
  0x3b   : > { %633 = vmatprep.mubr.bf16.mxu0 %v983_v45  ;;  %v969_v57 = vld [vmem:[%s1227_s25 + $0xc4] ss:$8 sps:$4 sm:$0xff]   ;;  %v971_v58 = vld [vmem:[%s1227_s25 + $0xc0] ss:$8 sps:$4 sm:$0xff]   ;;  %v972_v59 = vld [vmem:[%s1227_s25 + $0xd4] ss:$8 sps:$4 sm:$0xff]  }
  0x3c   : > { %606 = vmatpush1.bf16.msra.mxu0 %v941_v37  ;;  %v974_v60 = vld [vmem:[%s1227_s25 + $0xd0] ss:$8 sps:$4 sm:$0xff]   ;;  %v975_v61 = vld [vmem:[%s1227_s25 + $0xe4] ss:$8 sps:$4 sm:$0xff]   ;;  %v977_v62 = vld [vmem:[%s1227_s25 + $0xe0] ss:$8 sps:$4 sm:$0xff]  }
  0x3d   : > { %607 = vmatprep.subr.bf16.mxu0 %v942_v38  ;;  %v978_v63 = vld [vmem:[%s1227_s25 + $0xf4] ss:$8 sps:$4 sm:$0xff]   ;;  %v980_v0 = vld [vmem:[%s1227_s25 + $0xf0] ss:$8 sps:$4 sm:$0xff]   ;;  %v981_v1 = vld [vmem:[%s1245_s5] ss:$8 sps:$4 sm:$0xff]  }
  0x3e   : > { %s380_s7 = scalar_select %p379_p1, %s812_s6, 3  ;;  %v423_v4 = vsub.s32 0, %v422_v3  ;;  %v427_v6 = vsub.s32 1, %v422_v3 }
  0x3f   : > { %s367_s11 = sand.u32 1, %s1022_s12   ;;  %s860_s12 = sshll.u32 (%p1143_p9), %s1042_s17, 3 }
  0x40   : > { %608 = vmatpush1.bf16.msra.mxu0 %v944_v39  ;;  %s381_s10 = scalar_lea.vmem %s1309_s2, %s380_s7  ;;  %s808_s21 = sshll.u32 %s367_s11, 4 }
  0x41   : > { %609 = vmatprep.subr.bf16.mxu0 %v945_v40  ;;  %v419_v5 = vld [vmem:[%s381_s10] sm:$0x3]  ;;  %s369_s16 = scalar_lea.vmem [#allocation3], %s808_s21  ;;  %s668_s24 = sadd.s32 (%p1143_p9), %s860_s12, %s812_s6 }
  0x42   : > { %v424_v7 = vrot.slane %v419_v5, %v423_v4  ;;  %v428_v8 = vrot.slane %v419_v5, %v427_v6  ;;  %s853_s25 = sshll.u32 (%p1143_p9), %s668_s24, 2 }
  0x43   : > { %s670_s28 = scalar_lea.vmem (%p1143_p9), %s1310_s3, %s853_s25 }
  0x44   : > { %610 = vmatpush1.bf16.msra.mxu0 %v947_v41 }
  0x45   : > { %611 = vmatprep.subr.bf16.mxu0 %v948_v42 }
  0x48   : > { %612 = vmatpush1.bf16.msra.mxu0 %v950_v43 }
  0x49   : > { %613 = vmatprep.subr.bf16.mxu0 %v951_v44 }
  0x4c   : > { %614 = vmatpush1.bf16.msra.mxu0 %v953_v46 }
  0x4d   : > { %615 = vmatprep.subr.bf16.mxu0 %v954_v47 }
  0x50   : > { %616 = vmatpush1.bf16.msra.mxu0 %v956_v48 }
  0x51   : > { %617 = vmatprep.subr.bf16.mxu0 %v957_v49 }
  0x54   : > { %618 = vmatpush1.bf16.msra.mxu0 %v959_v50 }
  0x55   : > { %619 = vmatprep.subr.bf16.mxu0 %v960_v51 }
  0x58   : > { %620 = vmatpush1.bf16.msra.mxu0 %v962_v52 }
  0x59   : > { %621 = vmatprep.subr.bf16.mxu0 %v963_v53 }
  0x5c   : > { %622 = vmatpush1.bf16.msra.mxu0 %v965_v54 }
  0x5d   : > { %623 = vmatprep.subr.bf16.mxu0 %v966_v55 }
  0x60   : > { %624 = vmatpush1.bf16.msra.mxu0 %v968_v56 }
  0x61   : > { %625 = vmatprep.subr.bf16.mxu0 %v969_v57 }
  0x64   : > { %626 = vmatpush1.bf16.msra.mxu0 %v971_v58 }
  0x65   : > { %627 = vmatprep.subr.bf16.mxu0 %v972_v59 }
  0x68   : > { %628 = vmatpush1.bf16.msra.mxu0 %v974_v60 }
  0x69   : > { %629 = vmatprep.subr.bf16.mxu0 %v975_v61 }
  0x6c   : > { %630 = vmatpush1.bf16.msra.mxu0 %v977_v62 }
  0x6d   : > { %631 = vmatprep.subr.bf16.mxu0 %v978_v63 }
  0x70   : > { %632 = vmatpush1.bf16.msra.mxu0 %v980_v0 }
  0x73   : > { %634 = vmatmul.mubr.bf16.vlgmr.msra.gmra.mrb[0].mxu0 %v981_v1 }
 0x146   : > { %v635_v9 = vpop.f32.mrb[0].mxu0 }
 0x147   : > { %v636_v10 = vadd.f32 %v635_v9, %v424_v7  ;;  %v637_v11 = vpop.f32.mrb[1].mxu0 }
 0x148   : > { %v638_v12 = vadd.f32 %v637_v11, %v428_v8  ;;  %v639_v13 = vpop.f32.mrb[2].mxu0  ;;  %664 = sbr.rel (!%p1143_p9) target bundleno = 343 (0x157), region = 74 }
 0x149   : > { %v640_v14 = vadd.f32 %v639_v13, %v424_v7  ;;  %v641_v15 = vpop.f32.mrb[3].mxu0 }
 0x14a   : > { %v858_v16 = vpack.c.bf16 %v638_v12, %v636_v10  ;;  %v642_v17 = vadd.f32 %v641_v15, %v428_v8 }
 0x14c   : > { %656 = vst [vmem:[%s369_s16] sm:$0xff] %v858_v16  ;;  %v859_v18 = vpack.c.bf16 %v642_v17, %v640_v14 }
 0x14e   : > { %657 = vst [vmem:[%s369_s16 + $0x8] sm:$0xff] %v859_v18 }
 0x153   : > { %v700_v19 = vld [vmem:[%s369_s16] sm:$0xff] }
 0x154   : > { %701 = vst [vmem:[%s670_s28] sm:$0xff] %v700_v19 }
 0x155   : > { %v702_v20 = vld [vmem:[%s369_s16 + $0x8] sm:$0xff] }
 0x156   : > { %703 = vst [vmem:[%s670_s28 + $0x10] sm:$0xff] %v702_v20 }
 0x157 PF: > { %s13_s20 = sadd.s32 1, %s1054_s20   ;;  %s1312_s12 = smov %s1026_s13 }
 0x158   : > { %p10_p2 = scmp.ge.s32.totalorder %s13_s20, 6   ;;  %s1313_s13 = smov %s1148_s4 }
 0x159   : > { %s1314_s14 = smov %s1034_s15  ;;  %s1315_s15 = smov %s1137_s27 }
 0x15a   : > { %s1316_s16 = smov %s1046_s18  ;;  %s1317_s17 = smov %s1050_s19 }
 0x15b   : > { %s1318_s18 = smov %s1321_s22  ;;  %s1319_s19 = smov %s1325_s23 }
 0x15c   :  { %12 = sbr.rel (!%p10_p2) target bundleno = 5 (0x5), region = 149 }

// kernel: resnet_forward_pallas.24
= control target key start
LH: loop header
LB: loop body
LE: loop exit
PB: predicated region body
PF: predicated region fallthrough
CT: control target
= control target key end

     0   :  { %s850_s12 = smov 0   ;;  %s852_s13 = smov 0   ;;  %s948_s0 = inlined_call_operand.vmem [shape: bf16[128,256], index: 0, kind: input, shape index: {}]   ;;  %s949_s1 = inlined_call_operand.vmem [shape: bf16[256,128], index: 1, kind: input, shape index: {}]   ;;  %s950_s2 = inlined_call_operand.vmem [shape: f32[1,128], index: 2, kind: input, shape index: {}]   ;;  %s951_s3 = inlined_call_operand.vmem [shape: bf16[128,128], index: 3, kind: output, shape index: {}]  }
   0x1   :  { %s854_s14 = smov 0  }
   0x2 LB: > { %s25_s15 = sadd.s32 1, %s824_s13  ;;  %p625_p0 = scmp.ge.s32.totalorder %s828_s14, 1  ;;  %s828_s14 = sphi %s854_s14, %s13_s14   ;;  %s824_s13 = sphi %s852_s13, %s953_s13   ;;  %s820_s12 = sphi %s850_s12, %s952_s12  }
   0x3   : > { %p27_p1 = scmp.ge.s32.totalorder %s25_s15, 2  ;;  %p170_p2 = scmp.lt.s32.totalorder %s828_s14, 3 }
   0x5   : > { %s955_s15 = smov (%p27_p1, %s25_s15), 0  ;;  %p171_p3 = pnand %p625_p0, %p170_p2 }
   0x6   : > { %v778_v0 = vld [vmem:[%s949_s1 + $0x40] sm:$0xff] (!%p171_p3)   ;;  %s626_s18 = sshll.u32 (!%p171_p3), %s820_s12, 3  ;;  %v780_v2 = vld [vmem:[%s949_s1 + $0x48] sm:$0xff] (!%p171_p3)   ;;  %v782_v4 = vld [vmem:[%s949_s1 + $0x50] sm:$0xff] (!%p171_p3)  }
   0x7   : > { %174 = sbr.rel (%p171_p3) target bundleno = 269 (0x10d), region = 32  ;;  %v779_v1 = vld [vmem:[%s949_s1] sm:$0xff] (!%p171_p3)   ;;  %698 = vmatprep.subr.bf16.mxu0 (!%p171_p3), %v778_v0  ;;  %738 = vmatprep.subr.bf16.mxu1 (!%p171_p3), %v778_v0  ;;  %v781_v3 = vld [vmem:[%s949_s1 + $0x8] sm:$0xff] (!%p171_p3)   ;;  %p206_p4 = scmp.lt.s32.totalorder (!%p171_p3), %s626_s18, 15  ;;  %v783_v5 = vld [vmem:[%s949_s1 + $0x10] sm:$0xff] (!%p171_p3)  }
   0x8   : > { %699 = vmatpush3.bf16.msra.mxu0 (!%p171_p3), %v779_v1  ;;  %746 = vmatpush3.bf16.msra.mxu1 (!%p171_p3), %v779_v1  ;;  %v784_v6 = vld [vmem:[%s949_s1 + $0x58] sm:$0xff] (!%p171_p3)   ;;  %v786_v8 = vld [vmem:[%s949_s1 + $0x60] sm:$0xff] (!%p171_p3)   ;;  %v788_v10 = vld [vmem:[%s949_s1 + $0x68] sm:$0xff] (!%p171_p3)  }
   0x9   : > { %700 = vmatprep.subr.bf16.mxu0 (!%p171_p3), %v780_v2  ;;  %739 = vmatprep.subr.bf16.mxu1 (!%p171_p3), %v780_v2  ;;  %v785_v7 = vld [vmem:[%s949_s1 + $0x18] sm:$0xff] (!%p171_p3)   ;;  %v787_v9 = vld [vmem:[%s949_s1 + $0x20] sm:$0xff] (!%p171_p3)   ;;  %v789_v13 = vld [vmem:[%s949_s1 + $0x28] sm:$0xff] (!%p171_p3)  }
   0xa   : > { %v790_v14 = vld [vmem:[%s949_s1 + $0x70] sm:$0xff] (!%p171_p3)   ;;  %v792_v16 = vld [vmem:[%s949_s1 + $0x78] sm:$0xff] (!%p171_p3)   ;;  %v631_v32 = vld [vmem:[%s950_s2] ss:$0 sm:$0xff] (!%p171_p3) }
   0xb   : > { %v791_v15 = vld [vmem:[%s949_s1 + $0x30] sm:$0xff] (!%p171_p3)   ;;  %v793_v17 = vld [vmem:[%s949_s1 + $0x38] sm:$0xff] (!%p171_p3)  }
   0xc   : > { %701 = vmatpush3.bf16.msra.mxu0 (!%p171_p3), %v781_v3  ;;  %747 = vmatpush3.bf16.msra.mxu1 (!%p171_p3), %v781_v3 }
   0xd   : > { %702 = vmatprep.subr.bf16.mxu0 (!%p171_p3), %v782_v4  ;;  %740 = vmatprep.subr.bf16.mxu1 (!%p171_p3), %v782_v4 }
   0xe   : > { %s957_s18 = smov (!%p206_p4, %s626_s18), 15 }
   0xf   : > { %s666_s6 = sshll.u32 %s957_s18, 3  ;;  %s630_s5 = sshll.u32 %s957_s18, 2 }
  0x10   : > { %703 = vmatpush3.bf16.msra.mxu0 %v783_v5  ;;  %748 = vmatpush3.bf16.msra.mxu1 %v783_v5  ;;  %s901_s11 = scalar_lea.vmem %s948_s0, %s666_s6  ;;  %s226_s8 = scalar_lea.vmem %s951_s3, %s630_s5 }
  0x11   : > { %704 = vmatprep.subr.bf16.mxu0 %v784_v6  ;;  %741 = vmatprep.subr.bf16.mxu1 %v784_v6  ;;  %v796_v11 = vld [vmem:[%s901_s11 + $0x4] ss:$8 sps:$4 sm:$0xff]   ;;  %v794_v18 = vld [vmem:[%s901_s11] ss:$8 sps:$4 sm:$0xff]   ;;  %v800_v20 = vld [vmem:[%s901_s11 + $0x14] ss:$8 sps:$4 sm:$0xff]  }
  0x12   : > { %v799_v12 = vld [vmem:[%s901_s11 + $0x24] ss:$8 sps:$4 sm:$0xff]   ;;  %444 = vmatprep.mubr.bf16.mxu0 %v796_v11  ;;  %v797_v19 = vld [vmem:[%s901_s11 + $0x20] ss:$8 sps:$4 sm:$0xff]   ;;  %v802_v21 = vld [vmem:[%s901_s11 + $0x34] ss:$8 sps:$4 sm:$0xff]  }
  0x13   : > { %460 = vmatprep.mubr.bf16.mxu1 %v799_v12  ;;  %v804_v22 = vld [vmem:[%s901_s11 + $0x10] ss:$8 sps:$4 sm:$0xff]  }
  0x14   : > { %705 = vmatpush3.bf16.msra.mxu0 %v785_v7  ;;  %749 = vmatpush3.bf16.msra.mxu1 %v785_v7  ;;  %v805_v23 = vld [vmem:[%s901_s11 + $0x30] ss:$8 sps:$4 sm:$0xff]  }
  0x15   : > { %706 = vmatprep.subr.bf16.mxu0 %v786_v8  ;;  %742 = vmatprep.subr.bf16.mxu1 %v786_v8 }
  0x18   : > { %707 = vmatpush3.bf16.msra.mxu0 %v787_v9  ;;  %750 = vmatpush3.bf16.msra.mxu1 %v787_v9 }
  0x19   : > { %708 = vmatprep.subr.bf16.mxu0 %v788_v10  ;;  %743 = vmatprep.subr.bf16.mxu1 %v788_v10 }
  0x1c   : > { %709 = vmatpush3.bf16.msra.mxu0 %v789_v13  ;;  %751 = vmatpush3.bf16.msra.mxu1 %v789_v13 }
  0x1d   : > { %710 = vmatprep.subr.bf16.mxu0 %v790_v14  ;;  %744 = vmatprep.subr.bf16.mxu1 %v790_v14 }
  0x20   : > { %711 = vmatpush3.bf16.msra.mxu0 %v791_v15  ;;  %752 = vmatpush3.bf16.msra.mxu1 %v791_v15 }
  0x21   : > { %712 = vmatprep.subr.bf16.mxu0 %v792_v16  ;;  %745 = vmatprep.subr.bf16.mxu1 %v792_v16 }
  0x24   : > { %713 = vmatpush3.bf16.msra.mxu0 %v793_v17  ;;  %753 = vmatpush3.bf16.msra.mxu1 %v793_v17 }
  0x27   : > { %445 = vmatmul.mubr.bf16.vlgmr.msra.gmra.mrb[0].mxu0 %v794_v18  ;;  %461 = vmatmul.mubr.bf16.vlgmr.msra.gmra.mrb[0].mxu1 %v797_v19 }
  0x28   : > { %452 = vmatprep.mubr.bf16.mxu0 %v800_v20  ;;  %468 = vmatprep.mubr.bf16.mxu1 %v802_v21 }
  0x2f   : > { %453 = vmatmul.mubr.bf16.gmra.mrb[4].mxu0 %v804_v22  ;;  %469 = vmatmul.mubr.bf16.gmra.mrb[4].mxu1 %v805_v23 }
  0xfa   : > { %v714_v24 = vpop.f32.mrb[0].mxu0  ;;  %v726_v25 = vpop.f32.mrb[0].mxu1 }
  0xfb   : > { %v715_v26 = vpop.f32.mrb[1].mxu0  ;;  %v727_v27 = vpop.f32.mrb[1].mxu1 }
  0xfc   : > { %v716_v28 = vadd.f32 %v715_v26, %v714_v24  ;;  %v728_v29 = vadd.f32 %v727_v27, %v726_v25  ;;  %v717_v30 = vpop.f32.mrb[2].mxu0  ;;  %v729_v31 = vpop.f32.mrb[2].mxu1 }
  0xfd   : > { %v718_v33 = vpop.f32.mrb[3].mxu0  ;;  %v730_v34 = vpop.f32.mrb[3].mxu1 }
  0xfe   : > { %v719_v35 = vadd.f32 %v718_v33, %v717_v30  ;;  %v731_v36 = vadd.f32 %v730_v34, %v729_v31  ;;  %v447_v37 = vadd.f32 %v716_v28, %v631_v32  ;;  %v463_v38 = vadd.f32 %v728_v29, %v631_v32 }
 0x100   : > { %v450_v39 = vadd.f32 %v719_v35, %v631_v32  ;;  %v466_v40 = vadd.f32 %v731_v36, %v631_v32 }
 0x102   : > { %v678_v41 = vpack.c.bf16 %v450_v39, %v447_v37  ;;  %v688_v42 = vpack.c.bf16 %v466_v40, %v463_v38  ;;  %v720_v43 = vpop.f32.mrb[4].mxu0  ;;  %v732_v44 = vpop.f32.mrb[4].mxu1 }
 0x103   : > { %v721_v45 = vpop.f32.mrb[5].mxu0  ;;  %v733_v46 = vpop.f32.mrb[5].mxu1 }
 0x104   : > { %679 = vst [vmem:[%s226_s8] sm:$0xff] %v678_v41   ;;  %696 = vst [vmem:[%s226_s8 + $0x10] sm:$0xff] %v688_v42   ;;  %v722_v47 = vadd.f32 %v721_v45, %v720_v43  ;;  %v734_v48 = vadd.f32 %v733_v46, %v732_v44  ;;  %v723_v49 = vpop.f32.mrb[6].mxu0  ;;  %v735_v50 = vpop.f32.mrb[6].mxu1 }
 0x105   : > { %v724_v51 = vpop.f32.mrb[7].mxu0  ;;  %v736_v52 = vpop.f32.mrb[7].mxu1 }
 0x106   : > { %v725_v53 = vadd.f32 %v724_v51, %v723_v49  ;;  %v737_v54 = vadd.f32 %v736_v52, %v735_v50  ;;  %v455_v55 = vadd.f32 %v722_v47, %v631_v32  ;;  %v471_v56 = vadd.f32 %v734_v48, %v631_v32 }
 0x108   : > { %v458_v57 = vadd.f32 %v725_v53, %v631_v32  ;;  %v474_v58 = vadd.f32 %v737_v54, %v631_v32 }
 0x10a   : > { %v683_v59 = vpack.c.bf16 %v458_v57, %v455_v55  ;;  %v693_v60 = vpack.c.bf16 %v474_v58, %v471_v56 }
 0x10c   : > { %695 = vst [vmem:[%s226_s8 + $0x8] sm:$0xff] %v683_v59   ;;  %697 = vst [vmem:[%s226_s8 + $0x18] sm:$0xff] %v693_v60  }
 0x10d PF: > { %s13_s14 = sadd.s32 1, %s828_s14   ;;  %s952_s12 = smov %s824_s13 }
 0x10e   : > { %p10_p5 = scmp.ge.s32.totalorder %s13_s14, 4   ;;  %s953_s13 = smov %s955_s15 }
 0x110   :  { %12 = sbr.rel (!%p10_p5) target bundleno = 2 (0x2), region = 68 }

// kernel: resnet_forward_pallas.21
= control target key start
LH: loop header
LB: loop body
LE: loop exit
PB: predicated region body
PF: predicated region fallthrough
CT: control target
= control target key end

     0   :  { %s3111_s12 = smov 0   ;;  %s3683_s0 = inlined_call_operand.vmem [shape: bf16[2,10,10,128], index: 0, kind: input, shape index: {}]   ;;  %s3684_s1 = inlined_call_operand.vmem [shape: bf16[9,128,128], index: 1, kind: input, shape index: {}]   ;;  %s3685_s2 = inlined_call_operand.vmem [shape: f32[1,128], index: 2, kind: input, shape index: {}]   ;;  %s3686_s3 = inlined_call_operand.vmem [shape: bf16[2,8,8,128], index: 3, kind: output, shape index: {}]  }
   0x1 LB: > { %s2227_s13 = sadd.s32 4294967295, %s3089_s12   ;;  %p2231_p0 = scmp.ge.s32.totalorder %s3089_s12, 1  ;;  %s3089_s12 = sphi %s3111_s12, %s13_s12  }
   0x2   : > { %p137_p1 = scmp.lt.s32.totalorder %s3089_s12, 3 }
   0x4   : > { %p138_p2 = pnand %p2231_p0, %p137_p1 }
   0x5   : > { %v2999_v0 = vld [vmem:[%s3684_s1 + $0x40] sm:$0xff] (!%p138_p2)   ;;  %p161_p3 = scmp.lt.s32.totalorder (!%p138_p2), %s2227_s13, 1  ;;  %v3001_v2 = vld [vmem:[%s3684_s1 + $0x48] sm:$0xff] (!%p138_p2)   ;;  %v3003_v4 = vld [vmem:[%s3684_s1 + $0x50] sm:$0xff] (!%p138_p2)   ;;  %vm204_vm0 = vsmask.f32 (!%p138_p2), 3328 }
   0x6   : > { %141 = sbr.rel (%p138_p2) target bundleno = 394 (0x18a), region = 32  ;;  %v3000_v1 = vld [vmem:[%s3684_s1 + $0x100] sm:$0xff] (!%p138_p2)   ;;  %2694 = vmatprep.subr.bf16.mxu1 (!%p138_p2), %v2999_v0  ;;  %v3002_v3 = vld [vmem:[%s3684_s1 + $0x108] sm:$0xff] (!%p138_p2)   ;;  %v3004_v5 = vld [vmem:[%s3684_s1 + $0x110] sm:$0xff] (!%p138_p2)   ;;  %vm205_vm1 = vsmask.f32 (!%p138_p2), 7440 }
   0x7   : > { %2790 = vmatprep.subr.bf16.mxu0 (!%p138_p2), %v3000_v1  ;;  %2695 = vmatpush3.bf16.msra.mxu1 (!%p138_p2), %v2999_v0  ;;  %v3005_v6 = vld [vmem:[%s3684_s1 + $0x58] sm:$0xff] (!%p138_p2)   ;;  %v3007_v8 = vld [vmem:[%s3684_s1 + $0x60] sm:$0xff] (!%p138_p2)   ;;  %v3009_v10 = vld [vmem:[%s3684_s1 + $0x68] sm:$0xff] (!%p138_p2)   ;;  %vm626_vm3 = vcmask (!%p138_p2), 1042432   ;;  %vm627_vm4 = vcmask (!%p138_p2), 1046532  }
   0x8   : > { %2791 = vmatpush3.bf16.msra.mxu0 (!%p138_p2), %v3000_v1  ;;  %2696 = vmatprep.subr.bf16.mxu1 (!%p138_p2), %v3001_v2  ;;  %v3006_v7 = vld [vmem:[%s3684_s1 + $0x118] sm:$0xff] (!%p138_p2)   ;;  %v3008_v9 = vld [vmem:[%s3684_s1 + $0x120] sm:$0xff] (!%p138_p2)   ;;  %v3010_v14 = vld [vmem:[%s3684_s1 + $0x128] sm:$0xff] (!%p138_p2)  }
   0x9   : > { %2792 = vmatprep.subr.bf16.mxu0 (!%p138_p2), %v3002_v3  ;;  %v3011_v22 = vld [vmem:[%s3684_s1 + $0x70] sm:$0xff] (!%p138_p2)   ;;  %v3013_v37 = vld [vmem:[%s3684_s1 + $0x78] sm:$0xff] (!%p138_p2)   ;;  %vm3200_vm2 = vmor (!%p138_p2), %vm204_vm0, %vm205_vm1 }
   0xa   : > { %v3012_v23 = vld [vmem:[%s3684_s1 + $0x130] sm:$0xff] (!%p138_p2)   ;;  %v3014_v47 = vld [vmem:[%s3684_s1 + $0x138] sm:$0xff] (!%p138_p2)   ;;  %v3015_v63 = vld [vmem:[%s3684_s1] sm:$0xff] (!%p138_p2)  }
   0xb   : > { %2697 = vmatpush3.bf16.msra.mxu1 (!%p138_p2), %v3001_v2  ;;  %v3232_v1 = vld [vmem:[%s3684_s1 + $0x140] sm:$0xff] (!%p138_p2)   ;;  %vm3374_vm5 = vmor (!%p138_p2), %vm626_vm3, %vm627_vm4 }
   0xc   : > { %2793 = vmatpush3.bf16.msra.mxu0 (!%p138_p2), %v3002_v3  ;;  %2698 = vmatprep.subr.bf16.mxu1 (!%p138_p2), %v3003_v4  ;;  %v3079_v38 = vld [vmem:[%s3684_s1 + $0x220] sm:$0xff] (!%p138_p2)  }
   0xd   : > { %s3692_s13 = smov (!%p161_p3, %s2227_s13), 1  ;;  %2794 = vmatprep.subr.bf16.mxu0 %v3004_v5 }
   0xe   : > { %s2990_s30 = smul.u32 80, %s3692_s13  ;;  %s2562_s18 = sshll.u32 %s3692_s13, 5 }
   0xf   : > { %2699 = vmatpush3.bf16.msra.mxu1 %v3003_v4  ;;  %s170_s21 = scalar_lea.vmem %s3686_s3, %s2562_s18 }
  0x10   : > { %2795 = vmatpush3.bf16.msra.mxu0 %v3004_v5  ;;  %2700 = vmatprep.subr.bf16.mxu1 %v3005_v6  ;;  %s3155_s10 = scalar_lea.vmem %s3683_s0, %s2990_s30 }
  0x11   : > { %2796 = vmatprep.subr.bf16.mxu0 %v3006_v7  ;;  %v3161_v11 = vld [vmem:[%s3155_s10] sm:$0xf]  ;;  %v3164_v12 = vld [vmem:[%s3155_s10 + $0x8] sm:$0xf]  ;;  %v3167_v13 = vld [vmem:[%s3155_s10 + $0x4] sm:$0x1] }
  0x12   : > { %v3173_v15 = vld [vmem:[%s3155_s10 + $0xc] sm:$0x1]  ;;  %v208_v16 = vshrl.u32 %v3161_v11, 16  ;;  %v211_v17 = vshll.u32 %v3161_v11, 16  ;;  %v217_v18 = vshll.u32 %v3167_v13, 16  ;;  %v222_v19 = vshrl.u32 %v3164_v12, 16 }
  0x13   : > { %2701 = vmatpush3.bf16.msra.mxu1 %v3005_v6  ;;  %v225_v20 = vshll.u32 %v3164_v12, 16  ;;  %v231_v21 = vshll.u32 %v3173_v15, 16  ;;  %v2347_v30 = vld [vmem:[%s3155_s10 + $0x8] sm:$0xf]  ;;  %v3189_v31 = vld [vmem:[%s3155_s10 + $0xc] sm:$0x1] }
  0x14   : > { %2797 = vmatpush3.bf16.msra.mxu0 %v3006_v7  ;;  %2702 = vmatprep.subr.bf16.mxu1 %v3007_v8  ;;  %v210_v24 = vrot.slane %v208_v16, 4  ;;  %v213_v25 = vrot.slane %v211_v17, 5  ;;  %v219_v26 = vrot.slane %v217_v18, 5  ;;  %v224_v27 = vrot.slane %v222_v19, 4  ;;  %v2349_v33 = vld [vmem:[%s3155_s10 + $0x10] sm:$0xf] }
  0x15   : > { %2798 = vmatprep.subr.bf16.mxu0 %v3008_v9  ;;  %v227_v28 = vrot.slane %v225_v20, 5  ;;  %v233_v29 = vrot.slane %v231_v21, 5  ;;  %v3193_v34 = vld [vmem:[%s3155_s10 + $0x14] sm:$0x1]  ;;  %v1003_v35 = vshrl.u32 %v2347_v30, 16  ;;  %v1006_v36 = vshll.u32 %v2347_v30, 16 }
  0x16   : > { %v214_v32 = vor.u32 %v213_v25, %v210_v24  ;;  %v1012_v40 = vshll.u32 %v3189_v31, 16  ;;  %v1017_v41 = vshrl.u32 %v2349_v33, 16  ;;  %v1020_v42 = vshll.u32 %v2349_v33, 16  ;;  %v3210_v51 = vld [vmem:[%s3155_s10 + $0x10] sm:$0xf] }
  0x17   : > { %2703 = vmatpush3.bf16.msra.mxu1 %v3007_v8  ;;  %v228_v39 = vor.u32 %v227_v28, %v224_v27  ;;  %v1005_v44 = vrot.slane %v1003_v35, 4  ;;  %v1008_v45 = vrot.slane %v1006_v36, 5  ;;  %v1026_v46 = vshll.u32 %v3193_v34, 16  ;;  %v3215_v55 = vld [vmem:[%s3155_s10 + $0x18] sm:$0xf] }
  0x18   : > { %2799 = vmatpush3.bf16.msra.mxu0 %v3008_v9  ;;  %2704 = vmatprep.subr.bf16.mxu1 %v3009_v10  ;;  %v215_v43 = vrot.slane %v214_v32, 4  ;;  %v1019_v49 = vrot.slane %v1017_v41, 4  ;;  %v1022_v50 = vrot.slane %v1020_v42, 5  ;;  %v1014_v54 = vrot.slane %v1012_v40, 5  ;;  %v3218_v56 = vld [vmem:[%s3155_s10 + $0x14] sm:$0x1] }
  0x19   : > { %2800 = vmatprep.subr.bf16.mxu0 %v3010_v14  ;;  %v229_v48 = vrot.slane %v228_v39, 4  ;;  %v1009_v53 = vor.u32 %v1008_v45, %v1005_v44  ;;  %v1028_v59 = vrot.slane %v1026_v46, 5  ;;  %v3223_v60 = vld [vmem:[%s3155_s10 + $0x1c] sm:$0x1]  ;;  %v236_v61 = vshrl.u32 %v3210_v51, 16 }
  0x1a   : > { %v220_v52 = vsel %vm3200_vm2, %v215_v43, %v219_v26  ;;  %v1023_v58 = vor.u32 %v1022_v50, %v1019_v49  ;;  %v239_v2 = vshll.u32 %v3210_v51, 16  ;;  %v245_v3 = vshll.u32 %v3218_v56, 16  ;;  %v2351_v8 = vld [vmem:[%s3155_s10 + $0x18] sm:$0xf]  ;;  %v3243_v16 = vld [vmem:[%s3155_s10 + $0x1c] sm:$0x1] }
  0x1b   : > { %2705 = vmatpush3.bf16.msra.mxu1 %v3009_v10  ;;  %v234_v57 = vsel %vm3200_vm2, %v229_v48, %v233_v29  ;;  %v1010_v0 = vrot.slane %v1009_v53, 4  ;;  %v238_v5 = vrot.slane %v236_v61, 4  ;;  %v250_v6 = vshrl.u32 %v3215_v55, 16  ;;  %v2353_v17 = vld [vmem:[%s3155_s10 + $0x20] sm:$0xf]  ;;  %v3017_v43 = vld [vmem:[%s3684_s1 + $0x8] sm:$0xff]  }
  0x1c   : > { %2801 = vmatpush3.bf16.msra.mxu0 %v3010_v14  ;;  %2706 = vmatprep.subr.bf16.mxu1 %v3011_v22  ;;  %v2251_v62 = vcombine.low %v220_v52, %v234_v57  ;;  %v1024_v4 = vrot.slane %v1023_v58, 4  ;;  %v253_v7 = vshll.u32 %v3215_v55, 16  ;;  %v241_v10 = vrot.slane %v239_v2, 5  ;;  %v3249_v21 = vld [vmem:[%s3155_s10 + $0x24] sm:$0x1] }
  0x1d   : > { %2802 = vmatprep.subr.bf16.mxu0 %v3012_v23  ;;  %v1015_v9 = vsel %vm3200_vm2, %v1010_v0, %v1014_v54  ;;  %v259_v14 = vshll.u32 %v3223_v60, 16  ;;  %v252_v19 = vrot.slane %v250_v6, 4  ;;  %v247_v24 = vrot.slane %v245_v3, 5  ;;  %v3018_v54 = vld [vmem:[%s3684_s1 + $0x148] sm:$0xff]   ;;  %v3279_v0 = vld [vmem:[%s3155_s10 + $0x24] sm:$0x1] }
  0x1e   : > { %2710 = vmatprep.mubr.bf16.mxu1 %v2251_v62  ;;  %v1029_v18 = vsel %vm3200_vm2, %v1024_v4, %v1028_v59  ;;  %v255_v20 = vrot.slane %v253_v7, 5  ;;  %v1031_v27 = vshrl.u32 %v2351_v8, 16  ;;  %v1034_v28 = vshll.u32 %v2351_v8, 16  ;;  %v3019_v59 = vld [vmem:[%s3684_s1 + $0x10] sm:$0xff]   ;;  %v3273_v62 = vld [vmem:[%s3155_s10 + $0x20] sm:$0xf] }
  0x1f   : > { %2707 = vmatpush3.bf16.msra.mxu1 %v3011_v22  ;;  %v2379_v22 = vcombine.low %v1015_v9, %v1029_v18  ;;  %v261_v25 = vrot.slane %v259_v14, 5  ;;  %v1040_v29 = vshll.u32 %v3243_v16, 16  ;;  %v1045_v32 = vshrl.u32 %v2353_v17, 16  ;;  %v3282_v2 = vld [vmem:[%s3155_s10 + $0x2c] sm:$0x1]  ;;  %v3020_v9 = vld [vmem:[%s3684_s1 + $0x150] sm:$0xff]  }
  0x20   : > { %2803 = vmatpush3.bf16.msra.mxu0 %v3012_v23  ;;  %2708 = vmatprep.subr.bf16.mxu1 %v3013_v37  ;;  %v242_v23 = vor.u32 %v241_v10, %v238_v5  ;;  %v256_v26 = vor.u32 %v255_v20, %v252_v19  ;;  %v1048_v33 = vshll.u32 %v2353_v17, 16  ;;  %v1054_v35 = vshll.u32 %v3249_v21, 16  ;;  %v3021_v10 = vld [vmem:[%s3684_s1 + $0x18] sm:$0xff]  }
  0x21   : > { %2804 = vmatprep.subr.bf16.mxu0 %v3014_v47  ;;  %2806 = vmatprep.mubr.bf16.mxu0 %v2379_v22  ;;  %v1036_v39 = vrot.slane %v1034_v28, 5  ;;  %v1047_v41 = vrot.slane %v1045_v32, 4  ;;  %v1042_v46 = vrot.slane %v1040_v29, 5  ;;  %v1294_v57 = vrot.slane %v3189_v31, 5  ;;  %v3022_v29 = vld [vmem:[%s3684_s1 + $0x158] sm:$0xff]  }
  0x22   : > { %v243_v30 = vrot.slane %v242_v23, 4  ;;  %v257_v36 = vrot.slane %v256_v26, 4  ;;  %v1050_v42 = vrot.slane %v1048_v33, 5  ;;  %v264_v3 = vshrl.u32 %v3273_v62, 16  ;;  %v2355_v23 = vld [vmem:[%s3155_s10 + $0x28] sm:$0xf] }
  0x23   : > { %2709 = vmatpush3.bf16.msra.mxu1 %v3013_v37  ;;  %v1033_v37 = vrot.slane %v1031_v27, 4  ;;  %v267_v4 = vshll.u32 %v3273_v62, 16  ;;  %v273_v5 = vshll.u32 %v3279_v0, 16  ;;  %v287_v8 = vshll.u32 %v3282_v2, 16  ;;  %v3303_v26 = vld [vmem:[%s3155_s10 + $0x34] sm:$0x1] }
  0x24   : > { %2805 = vmatpush3.bf16.msra.mxu0 %v3014_v47  ;;  %2718 = vmatprep.subr.bf16.mxu1 %v3015_v63  ;;  %v248_v40 = vsel %vm3200_vm2, %v243_v30, %v247_v24  ;;  %v262_v44 = vsel %vm3200_vm2, %v257_v36, %v261_v25  ;;  %v1056_v47 = vrot.slane %v1054_v35, 5  ;;  %v1051_v49 = vor.u32 %v1050_v42, %v1047_v41  ;;  %v3299_v24 = vld [vmem:[%s3155_s10 + $0x2c] sm:$0x1]  ;;  %v2357_v25 = vld [vmem:[%s3155_s10 + $0x30] sm:$0xf]  ;;  %v3023_v30 = vld [vmem:[%s3684_s1 + $0x20] sm:$0xff]  }
  0x25   : > { %2814 = vmatprep.subr.bf16.mxu0 %v3232_v1  ;;  %v1037_v45 = vor.u32 %v1036_v39, %v1033_v37  ;;  %v2252_v48 = vcombine.low %v248_v40, %v262_v44  ;;  %v266_v14 = vrot.slane %v264_v3, 4  ;;  %v269_v17 = vrot.slane %v267_v4, 5 }
  0x26   : > { %v1052_v52 = vrot.slane %v1051_v49, 4  ;;  %v275_v18 = vrot.slane %v273_v5, 5  ;;  %v289_v22 = vrot.slane %v287_v8, 5  ;;  %v1059_v27 = vshrl.u32 %v2355_v23, 16  ;;  %v2359_v5 = vld [vmem:[%s3155_s10 + $0x38] sm:$0xf] }
  0x27   : > { %v1038_v50 = vrot.slane %v1037_v45, 4  ;;  %2711 = vmatmul.mubr.bf16.vlgmr.msra.gmra.mrb[0].mxu1 %v2252_v48  ;;  %v1062_v28 = vshll.u32 %v2355_v23, 16  ;;  %v1068_v33 = vshll.u32 %v3299_v24, 16  ;;  %v1073_v35 = vshrl.u32 %v2357_v25, 16 }
  0x28   : > { %2719 = vmatpush3.bf16.msra.mxu1 %v3015_v63  ;;  %v1057_v58 = vsel %vm3200_vm2, %v1052_v52, %v1056_v47  ;;  %v3276_v63 = vld [vmem:[%s3155_s10 + $0x28] sm:$0xf]  ;;  %v1076_v36 = vshll.u32 %v2357_v25, 16  ;;  %v1061_v39 = vrot.slane %v1059_v27, 4  ;;  %v1082_v41 = vshll.u32 %v3303_v26, 16 }
  0x29   : > { %v1043_v53 = vsel %vm3200_vm2, %v1038_v50, %v1042_v46  ;;  %2720 = vmatprep.subr.bf16.mxu1 %v3017_v43  ;;  %v278_v6 = vshrl.u32 %v3276_v63, 16  ;;  %v281_v7 = vshll.u32 %v3276_v63, 16  ;;  %v1064_v40 = vrot.slane %v1062_v28, 5  ;;  %v3314_v46 = vld [vmem:[%s3155_s10 + $0x30] sm:$0xf] }
  0x2a   : > { %v2380_v61 = vcombine.low %v1043_v53, %v1057_v58  ;;  %v1075_v44 = vrot.slane %v1073_v35, 4  ;;  %v1078_v45 = vrot.slane %v1076_v36, 5  ;;  %v1084_v49 = vrot.slane %v1082_v41, 5  ;;  %v3319_v50 = vld [vmem:[%s3155_s10 + $0x38] sm:$0xf] }
  0x2b   : > { %v280_v19 = vrot.slane %v278_v6, 4  ;;  %v283_v20 = vrot.slane %v281_v7, 5  ;;  %v1065_v48 = vor.u32 %v1064_v40, %v1061_v39  ;;  %v3322_v52 = vld [vmem:[%s3155_s10 + $0x34] sm:$0x1]  ;;  %v292_v53 = vshrl.u32 %v3314_v46, 16  ;;  %v3025_v6 = vld [vmem:[%s3684_s1 + $0x28] sm:$0xff]  }
  0x2c   : > { %2807 = vmatmul.mubr.bf16.vlgmr.msra.gmra.mrb[0].mxu0 %v2380_v61  ;;  %2721 = vmatpush3.bf16.msra.mxu1 %v3017_v43  ;;  %v1070_v43 = vrot.slane %v1068_v33, 5  ;;  %v3331_v61 = vld [vmem:[%s3155_s10 + $0x3c] sm:$0x1]  ;;  %v295_v3 = vshll.u32 %v3314_v46, 16  ;;  %v301_v4 = vshll.u32 %v3322_v52, 16  ;;  %v1087_v28 = vshrl.u32 %v2359_v5, 16 }
  0x2d   : > { %2815 = vmatpush3.bf16.msra.mxu0 %v3232_v1  ;;  %2722 = vmatprep.subr.bf16.mxu1 %v3019_v59  ;;  %v270_v1 = vor.u32 %v269_v17, %v266_v14  ;;  %v284_v32 = vor.u32 %v283_v20, %v280_v19  ;;  %v1066_v8 = vrot.slane %v1065_v48, 4  ;;  %v306_v14 = vshrl.u32 %v3319_v50, 16  ;;  %v3341_v17 = vld [vmem:[%s3155_s10 + $0x3c] sm:$0x1]  ;;  %v3349_v27 = vld [vmem:[%s3155_s10 + $0x44] sm:$0x1] }
  0x2e   : > { %2816 = vmatprep.subr.bf16.mxu0 %v3018_v54  ;;  %v297_v19 = vrot.slane %v295_v3, 5  ;;  %v303_v20 = vrot.slane %v301_v4, 5  ;;  %v315_v25 = vshll.u32 %v3331_v61, 16  ;;  %v1090_v36 = vshll.u32 %v2359_v5, 16 }
  0x2f   : > { %v271_v37 = vrot.slane %v270_v1, 4  ;;  %v285_v42 = vrot.slane %v284_v32, 4  ;;  %v1071_v23 = vsel %vm3200_vm2, %v1066_v8, %v1070_v43  ;;  %v308_v1 = vrot.slane %v306_v14, 4 }
  0x30   : > { %2723 = vmatpush3.bf16.msra.mxu1 %v3019_v59  ;;  %v1079_v59 = vor.u32 %v1078_v45, %v1075_v44  ;;  %v317_v40 = vrot.slane %v315_v25, 5  ;;  %v1089_v41 = vrot.slane %v1087_v28, 4  ;;  %v1092_v45 = vrot.slane %v1090_v36, 5  ;;  %v2393_v25 = vld [vmem:[%s3155_s10 + $0x18] sm:$0xe] }
  0x31   : > { %2817 = vmatpush3.bf16.msra.mxu0 %v3018_v54  ;;  %2724 = vmatprep.subr.bf16.mxu1 %v3021_v10  ;;  %v276_v47 = vsel %vm3200_vm2, %v271_v37, %v275_v18  ;;  %v3024_v54 = vld [vmem:[%s3684_s1 + $0x160] sm:$0xff]   ;;  %v290_v58 = vsel %vm3200_vm2, %v285_v42, %v289_v22  ;;  %v309_v22 = vshll.u32 %v3319_v50, 16  ;;  %v3027_v37 = vld [vmem:[%s3684_s1 + $0x30] sm:$0xff]   ;;  %v1096_v42 = vshll.u32 %v3341_v17, 16  ;;  %v3030_v28 = vld [vmem:[%s3684_s1 + $0x178] sm:$0xff]  }
  0x32   : > { %2818 = vmatprep.subr.bf16.mxu0 %v3020_v9  ;;  %v2253_v7 = vcombine.low %v276_v47, %v290_v58  ;;  %v1080_v18 = vrot.slane %v1079_v59, 4  ;;  %v1298_v47 = vrot.slane %v3193_v34, 5  ;;  %v1302_v48 = vrot.slane %v3243_v16, 5  ;;  %v3028_v58 = vld [vmem:[%s3684_s1 + $0x170] sm:$0xff]  }
  0x33   : > { %v311_v35 = vrot.slane %v309_v22, 5  ;;  %v1093_v4 = vor.u32 %v1092_v45, %v1089_v41  ;;  %v1098_v34 = vrot.slane %v1096_v42, 5  ;;  %v1306_v22 = vrot.slane %v3249_v21, 5  ;;  %v3033_v41 = vld [vmem:[%s3684_s1 + $0x180] sm:$0xff]  }
  0x34   : > { %2725 = vmatpush3.bf16.msra.mxu1 %v3021_v10  ;;  %v294_v10 = vrot.slane %v292_v53, 4  ;;  %2714 = vmatprep.mubr.bf16.mxu1 %v2253_v7  ;;  %v1085_v32 = vsel %vm3200_vm2, %v1080_v18, %v1084_v49  ;;  %v1110_v53 = vshll.u32 %v3349_v27, 16  ;;  %v2391_v7 = vld [vmem:[%s3155_s10 + $0x8] sm:$0xe]  ;;  %v2401_v36 = vrot.slane %v2393_v25, 9 }
  0x35   : > { %2819 = vmatpush3.bf16.msra.mxu0 %v3020_v9  ;;  %2726 = vmatprep.subr.bf16.mxu1 %v3023_v30  ;;  %v2361_v9 = vld [vmem:[%s3155_s10 + $0x40] sm:$0xf]  ;;  %v2381_v39 = vcombine.low %v1071_v23, %v1085_v32  ;;  %v312_v44 = vor.u32 %v311_v35, %v308_v1  ;;  %v2399_v14 = vrot.slane %v2391_v7, 9  ;;  %v1094_v18 = vrot.slane %v1093_v4, 4 }
  0x36   : > { %2820 = vmatprep.subr.bf16.mxu0 %v3022_v29  ;;  %v298_v33 = vor.u32 %v297_v19, %v294_v10  ;;  %v1104_v49 = vshll.u32 %v2361_v9, 16  ;;  %v2392_v10 = vld [vmem:[%s3155_s10 + $0x10] sm:$0xe]  ;;  %v2263_v19 = vcombine.low %v3161_v11, %v3164_v12  ;;  %v1112_v1 = vrot.slane %v1110_v53, 5  ;;  %v2394_v12 = vld [vmem:[%s3155_s10 + $0x20] sm:$0xe] }
  0x37   : > { %2810 = vmatprep.mubr.bf16.mxu0 %v2381_v39  ;;  %v313_v3 = vrot.slane %v312_v44, 4  ;;  %v1295_v32 = vsel %vm3374_vm5, %v2399_v14, %v1294_v57  ;;  %v1099_v21 = vsel %vm3200_vm2, %v1094_v18, %v1098_v34  ;;  %v3032_v35 = vld [vmem:[%s3684_s1 + $0x80] sm:$0xff]   ;;  %v1303_v42 = vsel %vm3374_vm5, %v2401_v36, %v1302_v48  ;;  %v3037_v44 = vld [vmem:[%s3684_s1 + $0x90] sm:$0xff]  }
  0x38   : > { %2727 = vmatpush3.bf16.msra.mxu1 %v3023_v30  ;;  %v3026_v30 = vld [vmem:[%s3684_s1 + $0x168] sm:$0xff]   ;;  %v299_v43 = vrot.slane %v298_v33, 4  ;;  %v1106_v16 = vrot.slane %v1104_v49, 5  ;;  %v1310_v45 = vrot.slane %v3299_v24, 5  ;;  %v1318_v53 = vrot.slane %v3341_v17, 5  ;;  %v3041_v18 = vld [vmem:[%s3684_s1 + $0xa0] sm:$0xff]  }
  0x39   : > { %2821 = vmatpush3.bf16.msra.mxu0 %v3022_v29  ;;  %2728 = vmatprep.subr.bf16.mxu1 %v3025_v6  ;;  %v1101_v29 = vshrl.u32 %v2361_v9, 16  ;;  %v1322_v24 = vrot.slane %v3349_v27, 5  ;;  %v635_v34 = vrot.slane %v3173_v15, 5  ;;  %v639_v17 = vrot.slane %v3218_v56, 5  ;;  %v603_v15 = vld [vmem:[%s3155_s10 + $0x8] sm:$0xe] }
  0x3a   : > { %2822 = vmatprep.subr.bf16.mxu0 %v3024_v54  ;;  %v304_v59 = vsel %vm3200_vm2, %v299_v43, %v303_v20  ;;  %v2400_v20 = vrot.slane %v2392_v10, 9  ;;  %v3035_v43 = vld [vmem:[%s3684_s1 + $0x88] sm:$0xff]   ;;  %v3038_v10 = vld [vmem:[%s3684_s1 + $0x190] sm:$0xff]   ;;  %v2276_v14 = vrot.slane %v603_v15, 9  ;;  %v647_v36 = vrot.slane %v3279_v0, 5  ;;  %v3051_v0 = vld [vmem:[%s3684_s1 + $0xc0] sm:$0xff]  }
  0x3b   : > { %v1103_v5 = vrot.slane %v1101_v29, 4  ;;  %v1314_v29 = vrot.slane %v3303_v26, 5  ;;  %v2266_v26 = vcombine.low %v3314_v46, %v3319_v50  ;;  %v3039_v46 = vld [vmem:[%s3684_s1 + $0x98] sm:$0xff]   ;;  %v3056_v15 = vld [vmem:[%s3684_s1 + $0x1c8] sm:$0xff]  }
  0x3c   : > { %2729 = vmatpush3.bf16.msra.mxu1 %v3025_v6  ;;  %v3029_v6 = vld [vmem:[%s3684_s1 + $0x38] sm:$0xff]   ;;  %v1299_v11 = vsel %vm3374_vm5, %v2400_v20, %v1298_v47 }
  0x3d   : > { %2823 = vmatpush3.bf16.msra.mxu0 %v3024_v54  ;;  %2730 = vmatprep.subr.bf16.mxu1 %v3027_v37  ;;  %v318_v54 = vsel %vm3200_vm2, %v313_v3, %v317_v40  ;;  %v1107_v23 = vor.u32 %v1106_v16, %v1103_v5  ;;  %v2423_v57 = vcombine.low %v1295_v32, %v1299_v11  ;;  %v602_v16 = vld [vmem:[%s3155_s10] sm:$0xe]  ;;  %v3040_v20 = vld [vmem:[%s3684_s1 + $0x198] sm:$0xff]  }
  0x3e   : > { %2824 = vmatprep.subr.bf16.mxu0 %v3026_v30  ;;  %v2254_v9 = vcombine.low %v304_v59, %v318_v54  ;;  %v2264_v40 = vcombine.low %v3210_v51, %v3215_v55  ;;  %v2265_v51 = vcombine.low %v3273_v62, %v3276_v63  ;;  %v631_v55 = vrot.slane %v3167_v13, 5  ;;  %v3036_v62 = vld [vmem:[%s3684_s1 + $0x188] sm:$0xff]   ;;  %v2396_v63 = vld [vmem:[%s3155_s10 + $0x30] sm:$0xe]  ;;  %v2398_v59 = vld [vmem:[%s3155_s10 + $0x40] sm:$0xe] }
  0x3f   : > { %v1108_v33 = vrot.slane %v1107_v23, 4  ;;  %v2395_v13 = vld [vmem:[%s3155_s10 + $0x28] sm:$0xe]  ;;  %v2404_v49 = vrot.slane %v2396_v63, 9  ;;  %v2406_v7 = vrot.slane %v2398_v59, 9  ;;  %v2275_v56 = vrot.slane %v602_v16, 9 }
  0x40   : > { %2731 = vmatpush3.bf16.msra.mxu1 %v3027_v37  ;;  %v2402_v37 = vrot.slane %v2394_v12, 9  ;;  %v2403_v48 = vrot.slane %v2395_v13, 9  ;;  %v643_v54 = vrot.slane %v3223_v60, 5  ;;  %v604_v23 = vld [vmem:[%s3155_s10 + $0x10] sm:$0xe] }
  0x41   : > { %2825 = vmatpush3.bf16.msra.mxu0 %v3026_v30  ;;  %2715 = vmatmul.mubr.bf16.gmra.mrb[4].mxu1 %v2254_v9  ;;  %v1113_v31 = vsel %vm3200_vm2, %v1108_v33, %v1112_v1  ;;  %v1315_v4 = vsel %vm3374_vm5, %v2404_v49, %v1314_v29  ;;  %v636_v9 = vsel %vm3374_vm5, %v2276_v14, %v635_v34  ;;  %v605_v60 = vld [vmem:[%s3155_s10 + $0x18] sm:$0xe]  ;;  %v2277_v25 = vrot.slane %v604_v23, 9  ;;  %v3043_v33 = vld [vmem:[%s3684_s1 + $0xa8] sm:$0xff]  }
  0x42   : > { %2826 = vmatprep.subr.bf16.mxu0 %v3028_v58  ;;  %2732 = vmatprep.subr.bf16.mxu1 %v3029_v6  ;;  %v2382_v39 = vcombine.low %v1099_v21, %v1113_v31  ;;  %v1307_v30 = vsel %vm3374_vm5, %v2402_v37, %v1306_v22  ;;  %v1311_v3 = vsel %vm3374_vm5, %v2403_v48, %v1310_v45  ;;  %v3052_v32 = vld [vmem:[%s3155_s10 + $0x10] ss:$8 sps:$4 sm:$0xff]   ;;  %v655_v29 = vrot.slane %v3322_v52, 5  ;;  %v3055_v49 = vld [vmem:[%s3684_s1 + $0xc8] sm:$0xff]  }
  0x43   : > { %2734 = vmatprep.mubr.bf16.mxu1 %v2263_v19  ;;  %v2424_v47 = vcombine.low %v1303_v42, %v1307_v30  ;;  %v2425_v27 = vcombine.low %v1311_v3, %v1315_v4  ;;  %v632_v19 = vsel %vm3374_vm5, %v2275_v56, %v631_v55  ;;  %v640_v11 = vsel %vm3374_vm5, %v2277_v25, %v639_v17  ;;  %v3046_v31 = vld [vmem:[%s3684_s1 + $0xb0] sm:$0xff]   ;;  %v3049_v37 = vld [vmem:[%s3684_s1 + $0xb8] sm:$0xff]   ;;  %v2477_v25 = vld [vmem:[%s3155_s10 + $0x28] sm:$0xf] }
  0x44   : > { %2733 = vmatpush3.bf16.msra.mxu1 %v3029_v6  ;;  %2811 = vmatmul.mubr.bf16.gmra.mrb[4].mxu0 %v2382_v39  ;;  %v1323_v6 = vsel %vm3374_vm5, %v2406_v7, %v1322_v24  ;;  %v2299_v1 = vcombine.low %v632_v19, %v636_v9  ;;  %v606_v39 = vld [vmem:[%s3155_s10 + $0x20] sm:$0xe]  ;;  %v3050_v45 = vld [vmem:[%s3684_s1 + $0x1b8] sm:$0xff]   ;;  %v3513_v24 = vld [vmem:[%s3155_s10 + $0x14] sm:$0x1] }
  0x45   : > { %2827 = vmatpush3.bf16.msra.mxu0 %v3028_v58  ;;  %2742 = vmatprep.subr.bf16.mxu1 %v3032_v35  ;;  %v2397_v58 = vld [vmem:[%s3155_s10 + $0x38] sm:$0xe]  ;;  %v2279_v42 = vrot.slane %v606_v39, 9  ;;  %v1675_v59 = vshll.u32 %v3513_v24, 16  ;;  %v3054_v7 = vld [vmem:[%s3155_s10 + $0x20] ss:$8 sps:$4 sm:$0xff]  }
  0x46   : > { %2828 = vmatprep.subr.bf16.mxu0 %v3030_v28  ;;  %2830 = vmatprep.mubr.bf16.mxu0 %v2423_v57  ;;  %v2405_v5 = vrot.slane %v2397_v58, 9  ;;  %v3044_v57 = vld [vmem:[%s3684_s1 + $0x1a8] sm:$0xff]   ;;  %v2473_v52 = vld [vmem:[%s3155_s10 + $0x18] sm:$0xf]  ;;  %v3058_v9 = vld [vmem:[%s3684_s1 + $0x1d0] sm:$0xff]  }
  0x47   : > { %v1680_v3 = vshrl.u32 %v2473_v52, 16  ;;  %v1683_v4 = vshll.u32 %v2473_v52, 16  ;;  %v3065_v56 = vld [vmem:[%s3155_s10 + $0x30] ss:$8 sps:$4 sm:$0xff]   ;;  %v3064_v52 = vld [vmem:[%s3684_s1 + $0x1e8] sm:$0xff]  }
  0x48   : > { %v1319_v50 = vsel %vm3374_vm5, %v2405_v5, %v1318_v53  ;;  %v2471_v53 = vld [vmem:[%s3155_s10 + $0x10] sm:$0xf]  ;;  %v3059_v23 = vld [vmem:[%s3684_s1 + $0xd8] sm:$0xff]  }
  0x49   : > { %2829 = vmatpush3.bf16.msra.mxu0 %v3030_v28  ;;  %2735 = vmatmul.mubr.bf16.vlgmr.msra.gmra.mrb[0].mxu1 %v2264_v40  ;;  %v2426_v22 = vcombine.low %v1319_v50, %v1323_v6  ;;  %v2278_v28 = vrot.slane %v605_v60, 9  ;;  %v607_v40 = vld [vmem:[%s3155_s10 + $0x28] sm:$0xe]  ;;  %v1669_v58 = vshll.u32 %v2471_v53, 16  ;;  %v1682_v50 = vrot.slane %v1680_v3, 4 }
  0x4a   : > { %2838 = vmatprep.subr.bf16.mxu0 %v3033_v41  ;;  %2743 = vmatpush3.bf16.msra.mxu1 %v3032_v35  ;;  %v3042_v35 = vld [vmem:[%s3684_s1 + $0x1a0] sm:$0xff]   ;;  %v2280_v30 = vrot.slane %v607_v40, 9  ;;  %v1685_v6 = vrot.slane %v1683_v4, 5 }
  0x4b   : > { %2744 = vmatprep.subr.bf16.mxu1 %v3035_v43  ;;  %2738 = vmatprep.mubr.bf16.mxu1 %v2265_v51  ;;  %v644_v12 = vsel %vm3374_vm5, %v2278_v28, %v643_v54  ;;  %v608_v51 = vld [vmem:[%s3155_s10 + $0x30] sm:$0xe]  ;;  %v1671_v16 = vrot.slane %v1669_v58, 5  ;;  %v1677_v54 = vrot.slane %v1675_v59, 5 }
  0x4c   : > { %2831 = vmatmul.mubr.bf16.vlgmr.msra.gmra.mrb[0].mxu0 %v2424_v47  ;;  %v2300_v21 = vcombine.low %v640_v11, %v644_v12  ;;  %v659_v47 = vrot.slane %v3331_v61, 5  ;;  %v2281_v63 = vrot.slane %v608_v51, 9  ;;  %v3517_v61 = vld [vmem:[%s3155_s10 + $0x1c] sm:$0x1]  ;;  %v3067_v11 = vld [vmem:[%s3155_s10 + $0x40] ss:$8 sps:$4 sm:$0xff]  }
  0x4d   : > { %2839 = vmatpush3.bf16.msra.mxu0 %v3033_v41  ;;  %2834 = vmatprep.mubr.bf16.mxu0 %v2425_v27  ;;  %v651_v41 = vrot.slane %v3282_v2, 5  ;;  %v648_v2 = vsel %vm3374_vm5, %v2279_v42, %v647_v36  ;;  %v1689_v5 = vshll.u32 %v3517_v61, 16  ;;  %v2479_v12 = vld [vmem:[%s3155_s10 + $0x30] sm:$0xf]  ;;  %v1711_v36 = vshll.u32 %v2477_v25, 16 }
  0x4e   : > { %2745 = vmatpush3.bf16.msra.mxu1 %v3035_v43  ;;  %2840 = vmatprep.subr.bf16.mxu0 %v3036_v62  ;;  %v3047_v43 = vld [vmem:[%s3684_s1 + $0x1b0] sm:$0xff]   ;;  %v656_v34 = vsel %vm3374_vm5, %v2281_v63, %v655_v29  ;;  %v1722_v40 = vshrl.u32 %v2479_v12, 16  ;;  %v3562_v51 = vld [vmem:[%s3155_s10 + $0x24] sm:$0x1] }
  0x4f   : > { %2746 = vmatprep.subr.bf16.mxu1 %v3037_v44  ;;  %v652_v55 = vsel %vm3374_vm5, %v2280_v30, %v651_v41  ;;  %v1691_v19 = vrot.slane %v1689_v5, 5  ;;  %v1725_v41 = vshll.u32 %v2479_v12, 16  ;;  %v1713_v29 = vrot.slane %v1711_v36, 5  ;;  %v2485_v5 = vld [vmem:[%s3155_s10 + $0x48] sm:$0xf]  ;;  %v3070_v12 = vld [vmem:[%s3684_s1 + $0x1f8] sm:$0xff]  }
  0x50   : > { %v2301_v13 = vcombine.low %v648_v2, %v652_v55  ;;  %v3565_v2 = vld [vmem:[%s3155_s10 + $0x2c] sm:$0x1]  ;;  %v1703_v58 = vshll.u32 %v3562_v51, 16 }
  0x51   : > { %2739 = vmatmul.mubr.bf16.gmra.mrb[4].mxu1 %v2266_v26  ;;  %2841 = vmatpush3.bf16.msra.mxu0 %v3036_v62  ;;  %v3053_v62 = vld [vmem:[%s3684_s1 + $0x1c0] sm:$0xff]   ;;  %v1666_v26 = vshrl.u32 %v2471_v53, 16  ;;  %v1727_v63 = vrot.slane %v1725_v41, 5  ;;  %v1717_v59 = vshll.u32 %v3565_v2, 16 }
  0x52   : > { %2747 = vmatpush3.bf16.msra.mxu1 %v3037_v44  ;;  %2842 = vmatprep.subr.bf16.mxu0 %v3038_v10  ;;  %v609_v44 = vld [vmem:[%s3155_s10 + $0x38] sm:$0xe]  ;;  %v2483_v53 = vld [vmem:[%s3155_s10 + $0x40] sm:$0xf] }
  0x53   : > { %2748 = vmatprep.subr.bf16.mxu1 %v3039_v46  ;;  %2758 = vmatprep.mubr.bf16.mxu1 %v2299_v1  ;;  %v2282_v48 = vrot.slane %v609_v44, 9  ;;  %v1668_v27 = vrot.slane %v1666_v26, 4  ;;  %v2475_v1 = vld [vmem:[%s3155_s10 + $0x20] sm:$0xf]  ;;  %v3066_v26 = vld [vmem:[%s3684_s1 + $0xf0] sm:$0xff]  }
  0x54   : > { %2835 = vmatmul.mubr.bf16.gmra.mrb[4].mxu0 %v2426_v22 }
  0x55   : > { %2843 = vmatpush3.bf16.msra.mxu0 %v3038_v10  ;;  %2854 = vmatprep.mubr.bf16.mxu0 %v3052_v32  ;;  %v660_v17 = vsel %vm3374_vm5, %v2282_v48, %v659_v47  ;;  %v1672_v10 = vor.u32 %v1671_v16, %v1668_v27  ;;  %v3568_v47 = vld [vmem:[%s3155_s10 + $0x34] sm:$0x1]  ;;  %v1753_v27 = vshll.u32 %v2483_v53, 16 }
  0x56   : > { %2749 = vmatpush3.bf16.msra.mxu1 %v3039_v46  ;;  %2844 = vmatprep.subr.bf16.mxu0 %v3040_v20  ;;  %v3057_v46 = vld [vmem:[%s3684_s1 + $0xd0] sm:$0xff]   ;;  %v2302_v14 = vcombine.low %v656_v34, %v660_v17  ;;  %v1731_v3 = vshll.u32 %v3568_v47, 16  ;;  %v1750_v17 = vshrl.u32 %v2483_v53, 16  ;;  %v2516_v53 = vld [vmem:[%s3155_s10 + $0x18] sm:$0xe] }
  0x57   : > { %2750 = vmatprep.subr.bf16.mxu1 %v3041_v18  ;;  %v1673_v22 = vrot.slane %v1672_v10, 4 }
  0x59   : > { %2845 = vmatpush3.bf16.msra.mxu0 %v3040_v20  ;;  %v3071_v20 = vld [vmem:[%s3155_s10 + $0x8] ss:$8 sps:$4 sm:$0xff]   ;;  %v1678_v28 = vsel %vm3200_vm2, %v1673_v22, %v1677_v54 }
  0x5a   : > { %2751 = vmatpush3.bf16.msra.mxu1 %v3041_v18  ;;  %2846 = vmatprep.subr.bf16.mxu0 %v3042_v35  ;;  %v1686_v18 = vor.u32 %v1685_v6, %v1682_v50  ;;  %v1764_v50 = vshrl.u32 %v2485_v5, 16  ;;  %v1767_v6 = vshll.u32 %v2485_v5, 16  ;;  %v2524_v5 = vrot.slane %v2516_v53, 9 }
  0x5b   : > { %2752 = vmatprep.subr.bf16.mxu1 %v3043_v33 }
  0x5c   : > { %v1687_v60 = vrot.slane %v1686_v18, 4  ;;  %v1719_v18 = vrot.slane %v1717_v59, 5  ;;  %v3076_v59 = vld [vmem:[%s3155_s10 + $0x38] ss:$8 sps:$4 sm:$0xff]  }
  0x5d   : > { %2847 = vmatpush3.bf16.msra.mxu0 %v3042_v35  ;;  %v1694_v35 = vshrl.u32 %v2475_v1, 16 }
  0x5e   : > { %2753 = vmatpush3.bf16.msra.mxu1 %v3043_v33  ;;  %2848 = vmatprep.subr.bf16.mxu0 %v3044_v57  ;;  %v1692_v32 = vsel %vm3200_vm2, %v1687_v60, %v1691_v19  ;;  %v3061_v33 = vld [vmem:[%s3684_s1 + $0xe0] sm:$0xff]   ;;  %v3595_v60 = vld [vmem:[%s3155_s10 + $0x4c] sm:$0x1] }
  0x5f   : > { %2754 = vmatprep.subr.bf16.mxu1 %v3046_v31  ;;  %v2503_v39 = vcombine.low %v1678_v28, %v1692_v32  ;;  %v1696_v55 = vrot.slane %v1694_v35, 4  ;;  %v1766_v28 = vrot.slane %v1764_v50, 4  ;;  %v1769_v32 = vrot.slane %v1767_v6, 5  ;;  %v3072_v35 = vld [vmem:[%s3155_s10 + $0x18] ss:$8 sps:$4 sm:$0xff]   ;;  %v3080_v6 = vld [vmem:[%s3684_s1 + $0x228] sm:$0xff]  }
  0x61   : > { %2849 = vmatpush3.bf16.msra.mxu0 %v3044_v57  ;;  %v1708_v57 = vshrl.u32 %v2477_v25, 16  ;;  %v1755_v25 = vrot.slane %v1753_v27, 5 }
  0x62   : > { %2755 = vmatpush3.bf16.msra.mxu1 %v3046_v31  ;;  %2850 = vmatprep.subr.bf16.mxu0 %v3047_v43  ;;  %v1697_v31 = vshll.u32 %v2475_v1, 16  ;;  %v1752_v1 = vrot.slane %v1750_v17, 4 }
  0x63   : > { %2756 = vmatprep.subr.bf16.mxu1 %v3049_v37 }
  0x64   : > { %v1699_v44 = vrot.slane %v1697_v31, 5 }
  0x65   : > { %2851 = vmatpush3.bf16.msra.mxu0 %v3047_v43  ;;  %v3062_v43 = vld [vmem:[%s3684_s1 + $0x1e0] sm:$0xff]  }
  0x66   : > { %2757 = vmatpush3.bf16.msra.mxu1 %v3049_v37  ;;  %2852 = vmatprep.subr.bf16.mxu0 %v3050_v45  ;;  %v3060_v37 = vld [vmem:[%s3684_s1 + $0x1d8] sm:$0xff]  }
  0x67   : > { %2766 = vmatprep.subr.bf16.mxu1 %v3051_v0 }
  0x69   : > { %2759 = vmatmul.mubr.bf16.vlgmr.msra.gmra.mrb[0].mxu1 %v2300_v21  ;;  %2853 = vmatpush3.bf16.msra.mxu0 %v3050_v45  ;;  %v2481_v21 = vld [vmem:[%s3155_s10 + $0x38] sm:$0xf]  ;;  %v1710_v45 = vrot.slane %v1708_v57, 4 }
  0x6a   : > { %2767 = vmatpush3.bf16.msra.mxu1 %v3051_v0  ;;  %2762 = vmatprep.mubr.bf16.mxu1 %v2301_v13  ;;  %v1736_v42 = vshrl.u32 %v2481_v21, 16  ;;  %v1739_v30 = vshll.u32 %v2481_v21, 16  ;;  %v3063_v0 = vld [vmem:[%s3684_s1 + $0xe8] sm:$0xff]   ;;  %v1724_v13 = vrot.slane %v1722_v40, 4  ;;  %v2519_v21 = vld [vmem:[%s3155_s10 + $0x30] sm:$0xe] }
  0x6b   : > { %2768 = vmatprep.subr.bf16.mxu1 %v3055_v49  ;;  %2862 = vmatprep.subr.bf16.mxu0 %v3053_v62  ;;  %v1714_v34 = vor.u32 %v1713_v29, %v1710_v45 }
  0x6c   : > { %2855 = vmatmul.mubr.bf16.vlgmr.msra.gmra.mrb[0].mxu0 %v3054_v7  ;;  %v1738_v48 = vrot.slane %v1736_v42, 4  ;;  %v1700_v7 = vor.u32 %v1699_v44, %v1696_v55  ;;  %v1728_v16 = vor.u32 %v1727_v63, %v1724_v13  ;;  %v1756_v42 = vor.u32 %v1755_v25, %v1752_v1 }
  0x6d   : > { %2863 = vmatpush3.bf16.msra.mxu0 %v3053_v62  ;;  %2858 = vmatprep.mubr.bf16.mxu0 %v3065_v56  ;;  %v3571_v62 = vld [vmem:[%s3155_s10 + $0x3c] sm:$0x1]  ;;  %v3068_v56 = vld [vmem:[%s3684_s1 + $0x1f0] sm:$0xff]   ;;  %v1715_v54 = vrot.slane %v1714_v34, 4  ;;  %v1973_v55 = vrot.slane %v3568_v47, 5  ;;  %v1965_v25 = vrot.slane %v3562_v51, 5 }
  0x6e   : > { %2769 = vmatpush3.bf16.msra.mxu1 %v3055_v49  ;;  %2864 = vmatprep.subr.bf16.mxu0 %v3056_v15  ;;  %v1741_v49 = vrot.slane %v1739_v30, 5  ;;  %v1745_v4 = vshll.u32 %v3571_v62, 16  ;;  %v1701_v10 = vrot.slane %v1700_v7, 4  ;;  %v1729_v19 = vrot.slane %v1728_v16, 4  ;;  %v3078_v16 = vld [vmem:[%s3684_s1 + $0x218] sm:$0xff]  }
  0x6f   : > { %2770 = vmatprep.subr.bf16.mxu1 %v3057_v46  ;;  %v1720_v57 = vsel %vm3200_vm2, %v1715_v54, %v1719_v18  ;;  %v1770_v30 = vor.u32 %v1769_v32, %v1766_v28  ;;  %v1977_v45 = vrot.slane %v3571_v62, 5  ;;  %v1961_v7 = vrot.slane %v3517_v61, 5 }
  0x70   : > { %v1985_v54 = vrot.slane %v3595_v60, 5  ;;  %v1969_v32 = vrot.slane %v3565_v2, 5 }
  0x71   : > { %2763 = vmatmul.mubr.bf16.gmra.mrb[4].mxu1 %v2302_v14  ;;  %2865 = vmatpush3.bf16.msra.mxu0 %v3056_v15  ;;  %v3069_v15 = vld [vmem:[%s3684_s1 + $0xf8] sm:$0xff]   ;;  %v1705_v14 = vrot.slane %v1703_v58, 5  ;;  %v3077_v58 = vld [vmem:[%s3684_s1 + $0x210] sm:$0xff]   ;;  %v1962_v61 = vsel %vm3374_vm5, %v2524_v5, %v1961_v7 }
  0x72   : > { %2771 = vmatpush3.bf16.msra.mxu1 %v3057_v46  ;;  %2782 = vmatprep.mubr.bf16.mxu1 %v3071_v20  ;;  %v1742_v46 = vor.u32 %v1741_v49, %v1738_v48  ;;  %v1733_v20 = vrot.slane %v1731_v3, 5  ;;  %v2515_v49 = vld [vmem:[%s3155_s10 + $0x10] sm:$0xe] }
  0x73   : > { %2772 = vmatprep.subr.bf16.mxu1 %v3059_v23  ;;  %2866 = vmatprep.subr.bf16.mxu0 %v3058_v9  ;;  %v1706_v31 = vsel %vm3200_vm2, %v1701_v10, %v1705_v14  ;;  %v2523_v3 = vrot.slane %v2515_v49, 9  ;;  %v2522_v10 = vld [vmem:[%s3155_s10 + $0x48] sm:$0xe] }
  0x74   : > { %2859 = vmatmul.mubr.bf16.gmra.mrb[4].mxu0 %v3067_v11  ;;  %v1743_v22 = vrot.slane %v1742_v46, 4  ;;  %v3073_v11 = vld [vmem:[%s3684_s1 + $0x200] sm:$0xff]   ;;  %v1734_v40 = vsel %vm3200_vm2, %v1729_v19, %v1733_v20  ;;  %v2504_v29 = vcombine.low %v1706_v31, %v1720_v57  ;;  %v2530_v19 = vrot.slane %v2522_v10, 9  ;;  %v3082_v20 = vld [vmem:[%s3684_s1 + $0x238] sm:$0xff]  }
  0x75   : > { %2867 = vmatpush3.bf16.msra.mxu0 %v3058_v9  ;;  %2878 = vmatprep.mubr.bf16.mxu0 %v2503_v39  ;;  %v1747_v9 = vrot.slane %v1745_v4, 5  ;;  %v3075_v39 = vld [vmem:[%s3155_s10 + $0x28] ss:$8 sps:$4 sm:$0xff]   ;;  %v1957_v4 = vrot.slane %v3513_v24, 5 }
  0x76   : > { %2773 = vmatpush3.bf16.msra.mxu1 %v3059_v23  ;;  %2868 = vmatprep.subr.bf16.mxu0 %v3060_v37  ;;  %v3592_v23 = vld [vmem:[%s3155_s10 + $0x44] sm:$0x1] }
  0x77   : > { %2774 = vmatprep.subr.bf16.mxu1 %v3061_v33  ;;  %v1759_v36 = vshll.u32 %v3592_v23, 16  ;;  %v1748_v41 = vsel %vm3200_vm2, %v1743_v22, %v1747_v9  ;;  %v1958_v24 = vsel %vm3374_vm5, %v2523_v3, %v1957_v4  ;;  %v1981_v14 = vrot.slane %v3592_v23, 5  ;;  %v2517_v22 = vld [vmem:[%s3155_s10 + $0x20] sm:$0xe]  ;;  %v2518_v9 = vld [vmem:[%s3155_s10 + $0x28] sm:$0xe] }
  0x78   : > { %v2505_v13 = vcombine.low %v1734_v40, %v1748_v41  ;;  %v2547_v50 = vcombine.low %v1958_v24, %v1962_v61  ;;  %v1986_v23 = vsel %vm3374_vm5, %v2530_v19, %v1985_v54  ;;  %v2526_v28 = vrot.slane %v2518_v9, 9 }
  0x79   : > { %2869 = vmatpush3.bf16.msra.mxu0 %v3060_v37  ;;  %v1773_v37 = vshll.u32 %v3595_v60, 16  ;;  %v1761_v63 = vrot.slane %v1759_v36, 5  ;;  %v2525_v60 = vrot.slane %v2517_v22, 9 }
  0x7a   : > { %2775 = vmatpush3.bf16.msra.mxu1 %v3061_v33  ;;  %2870 = vmatprep.subr.bf16.mxu0 %v3062_v43  ;;  %v2520_v33 = vld [vmem:[%s3155_s10 + $0x38] sm:$0xe] }
  0x7b   : > { %2776 = vmatprep.subr.bf16.mxu1 %v3063_v0  ;;  %v2528_v44 = vrot.slane %v2520_v33, 9  ;;  %v1775_v48 = vrot.slane %v1773_v37, 5 }
  0x7d   : > { %2871 = vmatpush3.bf16.msra.mxu0 %v3062_v43  ;;  %v3074_v43 = vld [vmem:[%s3684_s1 + $0x208] sm:$0xff]   ;;  %v1978_v62 = vsel %vm3374_vm5, %v2528_v44, %v1977_v45 }
  0x7e   : > { %2777 = vmatpush3.bf16.msra.mxu1 %v3063_v0  ;;  %2872 = vmatprep.subr.bf16.mxu0 %v3064_v52  ;;  %v2527_v0 = vrot.slane %v2519_v21, 9  ;;  %v1970_v21 = vsel %vm3374_vm5, %v2526_v28, %v1969_v32 }
  0x7f   : > { %2778 = vmatprep.subr.bf16.mxu1 %v3066_v26 }
  0x80   : > { %v1974_v47 = vsel %vm3374_vm5, %v2527_v0, %v1973_v55 }
  0x81   : > { %2873 = vmatpush3.bf16.msra.mxu0 %v3064_v52  ;;  %v1757_v52 = vrot.slane %v1756_v42, 4  ;;  %v2549_v34 = vcombine.low %v1974_v47, %v1978_v62 }
  0x82   : > { %2779 = vmatpush3.bf16.msra.mxu1 %v3066_v26  ;;  %2874 = vmatprep.subr.bf16.mxu0 %v3068_v56  ;;  %v1771_v26 = vrot.slane %v1770_v30, 4 }
  0x83   : > { %2780 = vmatprep.subr.bf16.mxu1 %v3069_v15  ;;  %v1762_v17 = vsel %vm3200_vm2, %v1757_v52, %v1761_v63 }
  0x84   : > { %v1776_v27 = vsel %vm3200_vm2, %v1771_v26, %v1775_v48 }
  0x85   : > { %2875 = vmatpush3.bf16.msra.mxu0 %v3068_v56  ;;  %v2506_v46 = vcombine.low %v1762_v17, %v1776_v27  ;;  %v2521_v56 = vld [vmem:[%s3155_s10 + $0x40] sm:$0xe] }
  0x86   : > { %2781 = vmatpush3.bf16.msra.mxu1 %v3069_v15  ;;  %2876 = vmatprep.subr.bf16.mxu0 %v3070_v12  ;;  %v3081_v15 = vld [vmem:[%s3684_s1 + $0x230] sm:$0xff]   ;;  %v2529_v18 = vrot.slane %v2521_v56, 9 }
  0x87   : > { %2910 = vmatprep.subr.bf16.mxu1 %v3073_v11 }
  0x88   : > { %v1982_v1 = vsel %vm3374_vm5, %v2529_v18, %v1981_v14 }
  0x89   : > { %2783 = vmatmul.mubr.bf16.vlgmr.msra.gmra.mrb[0].mxu1 %v3072_v35  ;;  %2877 = vmatpush3.bf16.msra.mxu0 %v3070_v12  ;;  %v1966_v12 = vsel %vm3374_vm5, %v2525_v60, %v1965_v25 }
  0x8a   : > { %2918 = vmatpush3.bf16.msra.mxu1 %v3073_v11  ;;  %2786 = vmatprep.mubr.bf16.mxu1 %v3075_v39  ;;  %v2548_v33 = vcombine.low %v1966_v12, %v1970_v21 }
  0x8b   : > { %2911 = vmatprep.subr.bf16.mxu1 %v3074_v43  ;;  %2886 = vmatprep.subr.bf16.mxu0 %v3073_v11 }
  0x8c   : > { %2879 = vmatmul.mubr.bf16.vlgmr.msra.gmra.mrb[0].mxu0 %v2504_v29 }
  0x8d   : > { %2887 = vmatpush3.bf16.msra.mxu0 %v3073_v11  ;;  %2882 = vmatprep.mubr.bf16.mxu0 %v2505_v13  ;;  %v2550_v11 = vcombine.low %v1982_v1, %v1986_v23  ;;  %v2559_v13 = vld [vmem:[%s3685_s2] ss:$0 sm:$0xff] }
  0x8e   : > { %2919 = vmatpush3.bf16.msra.mxu1 %v3074_v43  ;;  %2888 = vmatprep.subr.bf16.mxu0 %v3074_v43 }
  0x8f   : > { %2912 = vmatprep.subr.bf16.mxu1 %v3077_v58 }
  0x91   : > { %2787 = vmatmul.mubr.bf16.gmra.mrb[4].mxu1 %v3076_v59  ;;  %2889 = vmatpush3.bf16.msra.mxu0 %v3074_v43 }
  0x92   : > { %2920 = vmatpush3.bf16.msra.mxu1 %v3077_v58  ;;  %2906 = vmatprep.mubr.bf16.mxu1 %v2549_v34 }
  0x93   : > { %2913 = vmatprep.subr.bf16.mxu1 %v3078_v16  ;;  %2890 = vmatprep.subr.bf16.mxu0 %v3077_v58 }
  0x94   : > { %2883 = vmatmul.mubr.bf16.gmra.mrb[4].mxu0 %v2506_v46 }
  0x95   : > { %2891 = vmatpush3.bf16.msra.mxu0 %v3077_v58  ;;  %2902 = vmatprep.mubr.bf16.mxu0 %v2547_v50 }
  0x96   : > { %2921 = vmatpush3.bf16.msra.mxu1 %v3078_v16  ;;  %2892 = vmatprep.subr.bf16.mxu0 %v3078_v16 }
  0x97   : > { %2914 = vmatprep.subr.bf16.mxu1 %v3079_v38 }
  0x99   : > { %2893 = vmatpush3.bf16.msra.mxu0 %v3078_v16 }
  0x9a   : > { %2922 = vmatpush3.bf16.msra.mxu1 %v3079_v38  ;;  %2894 = vmatprep.subr.bf16.mxu0 %v3079_v38 }
  0x9b   : > { %2915 = vmatprep.subr.bf16.mxu1 %v3080_v6 }
  0x9d   : > { %2895 = vmatpush3.bf16.msra.mxu0 %v3079_v38 }
  0x9e   : > { %2923 = vmatpush3.bf16.msra.mxu1 %v3080_v6  ;;  %2896 = vmatprep.subr.bf16.mxu0 %v3080_v6 }
  0x9f   : > { %2916 = vmatprep.subr.bf16.mxu1 %v3081_v15 }
  0xa1   : > { %2897 = vmatpush3.bf16.msra.mxu0 %v3080_v6 }
  0xa2   : > { %2924 = vmatpush3.bf16.msra.mxu1 %v3081_v15  ;;  %2898 = vmatprep.subr.bf16.mxu0 %v3081_v15 }
  0xa3   : > { %2917 = vmatprep.subr.bf16.mxu1 %v3082_v20 }
  0xa5   : > { %2899 = vmatpush3.bf16.msra.mxu0 %v3081_v15 }
  0xa6   : > { %2925 = vmatpush3.bf16.msra.mxu1 %v3082_v20  ;;  %2900 = vmatprep.subr.bf16.mxu0 %v3082_v20 }
  0xa9   : > { %2907 = vmatmul.mubr.bf16.vlgmr.msra.gmra.mrb[8].mxu1 %v2550_v11  ;;  %2901 = vmatpush3.bf16.msra.mxu0 %v3082_v20 }
  0xac   : > { %2903 = vmatmul.mubr.bf16.vlgmr.msra.gmra.mrb[0].mxu0 %v2548_v33 }
 0x15c   : > { %v2784_v35 = vpop.f32.mrb[0].mxu1 }
 0x15d   : > { %v947_v51 = vpop.f32.mrb[1].mxu1 }
 0x15e   : > { %v2785_v31 = vpop.f32.mrb[2].mxu1 }
 0x15f   : > { %v950_v57 = vpop.f32.mrb[3].mxu1 }
 0x164   : > { %v2788_v2 = vpop.f32.mrb[4].mxu1 }
 0x165   : > { %v963_v36 = vpop.f32.mrb[5].mxu1 }
 0x166   : > { %v2789_v37 = vpop.f32.mrb[6].mxu1 }
 0x167   : > { %v966_v39 = vpop.f32.mrb[7].mxu1  ;;  %v2884_v40 = vpop.f32.mrb[4].mxu0 }
 0x168   : > { %v2930_v41 = vadd.f32 %v2884_v40, %v2788_v2  ;;  %v1908_v42 = vpop.f32.mrb[5].mxu0 }
 0x169   : > { %v2932_v30 = vadd.f32 %v1908_v42, %v963_v36  ;;  %v2885_v8 = vpop.f32.mrb[6].mxu0 }
 0x16a   : > { %v2934_v43 = vadd.f32 %v2885_v8, %v2789_v37  ;;  %v1911_v0 = vpop.f32.mrb[7].mxu0 }
 0x16b   : > { %v2936_v55 = vadd.f32 %v1911_v0, %v966_v39 }
 0x17c   : > { %v2908_v44 = vpop.f32.mrb[8].mxu1 }
 0x17d   : > { %v2931_v45 = vadd.f32 %v2930_v41, %v2908_v44  ;;  %v2118_v29 = vpop.f32.mrb[9].mxu1 }
 0x17e   : > { %v2933_v63 = vadd.f32 %v2932_v30, %v2118_v29  ;;  %v2909_v48 = vpop.f32.mrb[10].mxu1 }
 0x17f   : > { %v2935_v49 = vadd.f32 %v2934_v43, %v2909_v48  ;;  %v2121_v53 = vpop.f32.mrb[11].mxu1  ;;  %v2904_v26 = vpop.f32.mrb[0].mxu0  ;;  %v2154_v47 = vadd.f32 %v2931_v45, %v2559_v13 }
 0x180   : > { %v2937_v52 = vadd.f32 %v2936_v55, %v2121_v53  ;;  %v2926_v58 = vadd.f32 %v2904_v26, %v2784_v35  ;;  %v2102_v59 = vpop.f32.mrb[1].mxu0  ;;  %v2152_v3 = vadd.f32 %v2933_v63, %v2559_v13 }
 0x181   : > { %v2155_v62 = vadd.f32 %v2935_v49, %v2559_v13  ;;  %v2927_v5 = vadd.f32 %v2102_v59, %v947_v51  ;;  %v2905_v7 = vpop.f32.mrb[2].mxu0 }
 0x182   : > { %v2153_v4 = vadd.f32 %v2937_v52, %v2559_v13  ;;  %v2928_v17 = vadd.f32 %v2905_v7, %v2785_v31  ;;  %v2105_v27 = vpop.f32.mrb[3].mxu0  ;;  %v2150_v61 = vadd.f32 %v2926_v58, %v2559_v13 }
 0x183   : > { %v2581_v34 = vpack.c.bf16 %v2155_v62, %v2154_v47  ;;  %v2929_v24 = vadd.f32 %v2105_v27, %v950_v57  ;;  %v2148_v38 = vadd.f32 %v2927_v5, %v2559_v13 }
 0x184   : > { %v2576_v16 = vpack.c.bf16 %v2153_v4, %v2152_v3  ;;  %v2151_v46 = vadd.f32 %v2928_v17, %v2559_v13 }
 0x185   : > { %2585 = vst [vmem:[%s170_s21 + $0x18] sm:$0xff] %v2581_v34   ;;  %v2149_v50 = vadd.f32 %v2929_v24, %v2559_v13 }
 0x186   : > { %2584 = vst [vmem:[%s170_s21 + $0x10] sm:$0xff] %v2576_v16   ;;  %v2571_v6 = vpack.c.bf16 %v2151_v46, %v2150_v61 }
 0x187   : > { %v2566_v15 = vpack.c.bf16 %v2149_v50, %v2148_v38 }
 0x188   : > { %2583 = vst [vmem:[%s170_s21 + $0x8] sm:$0xff] %v2571_v6  }
 0x189   : > { %2567 = vst [vmem:[%s170_s21] sm:$0xff] %v2566_v15  }
 0x18a PF: > { %s13_s12 = sadd.s32 1, %s3089_s12  }
 0x18b   : > { %p10_p4 = scmp.ge.s32.totalorder %s13_s12, 4  }
 0x18d   :  { %12 = sbr.rel (!%p10_p4) target bundleno = 1 (0x1), region = 72 }

// kernel: resnet_forward_pallas.26
= control target key start
LH: loop header
LB: loop body
LE: loop exit
PB: predicated region body
PF: predicated region fallthrough
CT: control target
= control target key end

     0   :  { %s1007_s15 = smov 0   ;;  %s1009_s16 = smov 0   ;;  %s1195_s0 = inlined_call_operand.vmem [shape: bf16[32,128], index: 0, kind: input, shape index: {}]   ;;  %s1196_s1 = inlined_call_operand.vmem [shape: bf16[128,512], index: 1, kind: input, shape index: {}]   ;;  %s1197_s2 = inlined_call_operand.vmem [shape: f32[1,512], index: 2, kind: input, shape index: {}]   ;;  %s1198_s3 = inlined_call_operand.vmem [shape: bf16[32,512], index: 3, kind: input, shape index: {}]   ;;  %s1199_s4 = inlined_call_operand.vmem [shape: bf16[32,512], index: 4, kind: output, shape index: {}]  }
   0x1   :  { %s1011_s17 = smov 0   ;;  %s1013_s18 = smov 0  }
   0x2   :  { %s1015_s19 = smov 0   ;;  %s1017_s20 = smov 0  }
   0x3   :  { %s1019_s21 = smov 0   ;;  %s1021_s22 = smov 0  }
   0x4   :  { %s1023_s23 = smov 0  }
   0x5 LB: > { %s761_s24 = sadd.s32 4294967295, %s979_s23   ;;  %s23_s25 = sadd.s32 1, %s971_s21  ;;  %s979_s23 = sphi %s1023_s23, %s14_s23   ;;  %s975_s22 = sphi %s1021_s22, %s1210_s22   ;;  %s971_s21 = sphi %s1019_s21, %s1209_s21   ;;  %s967_s20 = sphi %s1017_s20, %s1208_s20   ;;  %s963_s19 = sphi %s1015_s19, %s1207_s19   ;;  %s959_s18 = sphi %s1013_s18, %s1206_s18   ;;  %s955_s17 = sphi %s1011_s17, %s1205_s17   ;;  %s951_s16 = sphi %s1009_s16, %s1204_s16   ;;  %s947_s15 = sphi %s1007_s15, %s1203_s15  }
   0x6   : > { %p24_p0 = scmp.ge.s32.totalorder %s23_s25, 2  ;;  %s26_s26 = sadd.s32 1, %s975_s22 }
   0x7   : > { %s59_s27 = sadd.s32 1, %s959_s18  ;;  %p66_p1 = scmp.ne.s32.totalorder %s959_s18, %s955_s17 }
   0x8   : > { %s1212_s25 = smov (%p24_p0, %s23_s25), 0  ;;  %s1214_s26 = smov (!%p24_p0, %s26_s26), %s975_s22 }
   0x9   : > { %s56_s28 = ssub.s32 %s971_s21, %s1212_s25  ;;  %p67_p2 = scmp.eq.s32.totalorder %s979_s23, 0 }
   0xa   : > { %p28_p3 = scmp.ge.s32.totalorder %s1214_s26, 2  ;;  %p57_p4 = scmp.eq.s32.totalorder %s56_s28, 0 }
   0xb   : > { %p1064_p5 = por %p67_p2, %p66_p1  ;;  %s113_s30 = sadd.s32 1, %s951_s16 }
   0xc   : > { %s1216_s26 = smov (%p28_p3, %s1214_s26), 0  ;;  %p120_p6 = scmp.ne.s32.totalorder %s951_s16, %s947_s15 }
   0xd   : > { %s1072_s5 = scalar_select %p57_p4, %s959_s18, %s59_s27  }
   0xe   : > { %s108_s6 = ssub.s32 %s975_s22, %s1216_s26  ;;  %p152_p7 = scmp.eq.s32.totalorder %s761_s24, 3 }
   0xf   : > { %s110_s7 = sor.u32 %s108_s6, %s56_s28  ;;  %p1078_p9 = por %p120_p6, %p67_p2 }
  0x10   : > { %p111_p8 = scmp.eq.s32.totalorder %s110_s7, 0  ;;  %p1082_p10 = por %p152_p7, %p120_p6 }
  0x11   : > { %p764_p11 = scmp.ge.s32.totalorder %s979_s23, 4 }
  0x12   : > { %s1087_s10 = scalar_select %p111_p8, %s951_s16, %s113_s30  }
  0x13   : > { %174 = sbr.rel (%p764_p11) target bundleno = 46 (0x2e), region = 16 }
  0x1a   : > { %186 = sbr.rel (!%p1064_p5) target bundleno = 38 (0x26), region = 24  ;;  %s188_s11 = sand.u32 (%p1064_p5), 1, %s959_s18  }
  0x1b   : > { %s806_s12 = sshll.u32 (%p1064_p5), %s971_s21, 3  ;;  %s765_s13 = sshll.u32 (%p1064_p5), %s188_s11, 7 }
  0x1c   : > { %s1097_s27 = scalar_lea.vmem (%p1064_p5), %s1196_s1, %s806_s12  ;;  %s190_s28 = scalar_lea.vmem (%p1064_p5), [#allocation2], %s765_s13 }
  0x1d   : > { %v251_v0 = vld [vmem:[%s1097_s27] sm:$0xff] (%p1064_p5)  ;;  %v253_v1 = vld [vmem:[%s1097_s27 + $0x10] sm:$0xff] (%p1064_p5) }
  0x1e   : > { %v255_v2 = vld [vmem:[%s1097_s27 + $0x20] sm:$0xff] (%p1064_p5)  ;;  %252 = vst [vmem:[%s190_s28] sm:$0xff] (%p1064_p5), %v251_v0  ;;  %254 = vst [vmem:[%s190_s28 + $0x8] sm:$0xff] (%p1064_p5), %v253_v1  ;;  %v257_v3 = vld [vmem:[%s1097_s27 + $0x30] sm:$0xff] (%p1064_p5) }
  0x1f   : > { %256 = vst [vmem:[%s190_s28 + $0x10] sm:$0xff] (%p1064_p5), %v255_v2  ;;  %v259_v4 = vld [vmem:[%s1097_s27 + $0x40] sm:$0xff] (%p1064_p5)  ;;  %v261_v5 = vld [vmem:[%s1097_s27 + $0x50] sm:$0xff] (%p1064_p5)  ;;  %258 = vst [vmem:[%s190_s28 + $0x18] sm:$0xff] (%p1064_p5), %v257_v3 }
  0x20   : > { %260 = vst [vmem:[%s190_s28 + $0x20] sm:$0xff] (%p1064_p5), %v259_v4  ;;  %262 = vst [vmem:[%s190_s28 + $0x28] sm:$0xff] (%p1064_p5), %v261_v5  ;;  %v263_v6 = vld [vmem:[%s1097_s27 + $0x60] sm:$0xff] (%p1064_p5)  ;;  %v265_v7 = vld [vmem:[%s1097_s27 + $0x70] sm:$0xff] (%p1064_p5) }
  0x21   : > { %v267_v8 = vld [vmem:[%s1097_s27 + $0x80] sm:$0xff]  ;;  %264 = vst [vmem:[%s190_s28 + $0x30] sm:$0xff] %v263_v6  ;;  %266 = vst [vmem:[%s190_s28 + $0x38] sm:$0xff] %v265_v7  ;;  %v269_v9 = vld [vmem:[%s1097_s27 + $0x90] sm:$0xff] }
  0x22   : > { %268 = vst [vmem:[%s190_s28 + $0x40] sm:$0xff] %v267_v8  ;;  %v271_v10 = vld [vmem:[%s1097_s27 + $0xa0] sm:$0xff]  ;;  %v273_v11 = vld [vmem:[%s1097_s27 + $0xb0] sm:$0xff]  ;;  %270 = vst [vmem:[%s190_s28 + $0x48] sm:$0xff] %v269_v9 }
  0x23   : > { %272 = vst [vmem:[%s190_s28 + $0x50] sm:$0xff] %v271_v10  ;;  %274 = vst [vmem:[%s190_s28 + $0x58] sm:$0xff] %v273_v11  ;;  %v275_v12 = vld [vmem:[%s1097_s27 + $0xc0] sm:$0xff]  ;;  %v277_v13 = vld [vmem:[%s1097_s27 + $0xd0] sm:$0xff] }
  0x24   : > { %v279_v14 = vld [vmem:[%s1097_s27 + $0xe0] sm:$0xff]  ;;  %276 = vst [vmem:[%s190_s28 + $0x60] sm:$0xff] %v275_v12  ;;  %278 = vst [vmem:[%s190_s28 + $0x68] sm:$0xff] %v277_v13  ;;  %v281_v15 = vld [vmem:[%s1097_s27 + $0xf0] sm:$0xff] }
  0x25   : > { %280 = vst [vmem:[%s190_s28 + $0x70] sm:$0xff] %v279_v14  ;;  %282 = vst [vmem:[%s190_s28 + $0x78] sm:$0xff] %v281_v15 }
  0x26 PF: > { %296 = sbr.rel (!%p1078_p9) target bundleno = 46 (0x2e), region = 66  ;;  %s298_s29 = sand.u32 (%p1078_p9), 1, %s951_s16  }
  0x27   : > { %s770_s30 = sshll.u32 (%p1078_p9), %s971_s21, 1  ;;  %s768_s6 = sshll.u32 (%p1078_p9), %s298_s29, 4 }
  0x28   : > { %s807_s7 = sshll.u32 (%p1078_p9), %s975_s22, 3  ;;  %s300_s27 = scalar_lea.vmem (%p1078_p9), [#allocation3], %s768_s6 }
  0x29   : > { %s304_s11 = sadd.s32 (%p1078_p9), %s807_s7, %s770_s30 }
  0x2a   : > { %s772_s12 = sshll.u32 (%p1078_p9), %s304_s11, 2 }
  0x2b   : > { %s306_s24 = scalar_lea.vmem (%p1078_p9), %s1198_s3, %s772_s12 }
  0x2c   : > { %v336_v16 = vld [vmem:[%s306_s24] sm:$0xff] (%p1078_p9)  ;;  %v338_v17 = vld [vmem:[%s306_s24 + $0x10] sm:$0xff] (%p1078_p9) }
  0x2d   : > { %337 = vst [vmem:[%s300_s27] sm:$0xff] %v336_v16  ;;  %339 = vst [vmem:[%s300_s27 + $0x8] sm:$0xff] %v338_v17 }
  0x2e PF: > { %p773_p12 = scmp.ge.s32.totalorder %s979_s23, 1  ;;  %p344_p13 = scmp.lt.s32.totalorder %s979_s23, 5 }
  0x30   : > { %p345_p0 = pnand %p773_p12, %p344_p13 }
  0x31   : > { %s351_s8 = sand.u32 (!%p345_p0), 1, %s955_s17   ;;  %s777_s28 = sshll.u32 (!%p345_p0), %s967_s20, 1  ;;  %v981_v18 = vmov (!%p345_p0), 0   ;;  %v432_v36 = vlaneseq (!%p345_p0) }
  0x32   : > { %348 = sbr.rel (%p345_p0) target bundleno = 317 (0x13d), region = 104  ;;  %s774_s29 = sshll.u32 (!%p345_p0), %s351_s8, 7  ;;  %560 = vmatprep.mubr.bf16.mxu0 (!%p345_p0), %v981_v18 }
  0x33   : > { %p396_p1 = scmp.lt.s32.totalorder (!%p345_p0), %s777_s28, 3  ;;  %s1127_s30 = scalar_lea.vmem (!%p345_p0), [#allocation2], %s774_s29  ;;  %v433_v37 = vshrl.u32 (!%p345_p0), %v432_v36, 7 }
  0x34   : > { %v884_v19 = vld [vmem:[%s1127_s30 + $0x4] ss:$8 sps:$4 sm:$0xff] (!%p345_p0)   ;;  %v886_v20 = vld [vmem:[%s1127_s30] ss:$8 sps:$4 sm:$0xff] (!%p345_p0)   ;;  %v887_v21 = vld [vmem:[%s1127_s30 + $0x14] ss:$8 sps:$4 sm:$0xff] (!%p345_p0)  }
  0x35   : > { %528 = vmatprep.subr.bf16.mxu0 (!%p345_p0), %v884_v19  ;;  %v889_v22 = vld [vmem:[%s1127_s30 + $0x10] ss:$8 sps:$4 sm:$0xff] (!%p345_p0)   ;;  %v890_v23 = vld [vmem:[%s1127_s30 + $0x24] ss:$8 sps:$4 sm:$0xff] (!%p345_p0)   ;;  %v892_v24 = vld [vmem:[%s1127_s30 + $0x20] ss:$8 sps:$4 sm:$0xff] (!%p345_p0)  }
  0x36   : > { %529 = vmatpush1.bf16.msra.mxu0 (!%p345_p0), %v886_v20  ;;  %v893_v25 = vld [vmem:[%s1127_s30 + $0x34] ss:$8 sps:$4 sm:$0xff] (!%p345_p0)   ;;  %v895_v26 = vld [vmem:[%s1127_s30 + $0x30] ss:$8 sps:$4 sm:$0xff] (!%p345_p0)   ;;  %v896_v27 = vld [vmem:[%s1127_s30 + $0x44] ss:$8 sps:$4 sm:$0xff] (!%p345_p0)  }
  0x37   : > { %530 = vmatprep.subr.bf16.mxu0 (!%p345_p0), %v887_v21  ;;  %v898_v28 = vld [vmem:[%s1127_s30 + $0x40] ss:$8 sps:$4 sm:$0xff] (!%p345_p0)   ;;  %v899_v29 = vld [vmem:[%s1127_s30 + $0x54] ss:$8 sps:$4 sm:$0xff] (!%p345_p0)   ;;  %v901_v30 = vld [vmem:[%s1127_s30 + $0x50] ss:$8 sps:$4 sm:$0xff] (!%p345_p0)  }
  0x38   : > { %v902_v31 = vld [vmem:[%s1127_s30 + $0x64] ss:$8 sps:$4 sm:$0xff] (!%p345_p0)   ;;  %v904_v32 = vld [vmem:[%s1127_s30 + $0x60] ss:$8 sps:$4 sm:$0xff] (!%p345_p0)   ;;  %v905_v33 = vld [vmem:[%s1127_s30 + $0x74] ss:$8 sps:$4 sm:$0xff] (!%p345_p0)  }
  0x39   : > { %s1218_s28 = smov (!%p396_p1, %s777_s28), 3  ;;  %v907_v34 = vld [vmem:[%s1127_s30 + $0x70] ss:$8 sps:$4 sm:$0xff]   ;;  %s1149_s12 = sshll.u32 %s963_s19, 1  ;;  %v434_v38 = vsub.s32 0, %v433_v37  ;;  %v438_v40 = vsub.s32 1, %v433_v37 }
  0x3a   : > { %s778_s17 = sshll.u32 %s1218_s28, 2  ;;  %531 = vmatpush1.bf16.msra.mxu0 %v889_v22  ;;  %p403_p2 = scmp.lt.s32.totalorder %s1149_s12, 3 }
  0x3b   : > { %532 = vmatprep.subr.bf16.mxu0 %v890_v23  ;;  %s399_s11 = scalar_lea.vmem %s1195_s0, %s778_s17  ;;  %s358_s13 = sand.u32 1, %s947_s15  }
  0x3c   : > { %v908_v35 = vld [vmem:[%s399_s11] sm:$0xff]   ;;  %s404_s14 = scalar_select %p403_p2, %s1149_s12, 3 }
  0x3d   : > { %s1154_s24 = sshll.u32 %s358_s13, 4  ;;  %s810_s19 = sshll.u32 (%p1082_p10), %s967_s20, 3 }
  0x3e   : > { %533 = vmatpush1.bf16.msra.mxu0 %v892_v24  ;;  %s405_s28 = scalar_lea.vmem %s1197_s2, %s404_s14  ;;  %s360_s29 = scalar_lea.vmem [#allocation3], %s1154_s24 }
  0x3f   : > { %534 = vmatprep.subr.bf16.mxu0 %v893_v25  ;;  %v430_v39 = vld [vmem:[%s405_s28] sm:$0x3]  ;;  %v572_v44 = vld [vmem:[%s360_s29 + $0x8] sm:$0xff]  ;;  %s394_s15 = scalar_lea.vmem [#allocation4], %s1154_s24  ;;  %s609_s30 = sadd.s32 (%p1082_p10), %s810_s19, %s1149_s12 }
  0x40   : > { %v571_v41 = vld [vmem:[%s360_s29] sm:$0xff]  ;;  %v435_v42 = vrot.slane %v430_v39, %v434_v38  ;;  %v439_v43 = vrot.slane %v430_v39, %v438_v40  ;;  %v575_v50 = vunpack.c.l.bf16 %v572_v44  ;;  %v576_v53 = vunpack.c.h.bf16 %v572_v44  ;;  %s803_s17 = sshll.u32 (%p1082_p10), %s609_s30, 2 }
  0x41   : > { %v573_v45 = vunpack.c.l.bf16 %v571_v41  ;;  %v574_v47 = vunpack.c.h.bf16 %v571_v41  ;;  %s611_s11 = scalar_lea.vmem (%p1082_p10), %s1199_s4, %s803_s17 }
  0x42   : > { %535 = vmatpush1.bf16.msra.mxu0 %v895_v26 }
  0x43   : > { %536 = vmatprep.subr.bf16.mxu0 %v896_v27 }
  0x46   : > { %537 = vmatpush1.bf16.msra.mxu0 %v898_v28 }
  0x47   : > { %538 = vmatprep.subr.bf16.mxu0 %v899_v29 }
  0x4a   : > { %539 = vmatpush1.bf16.msra.mxu0 %v901_v30 }
  0x4b   : > { %540 = vmatprep.subr.bf16.mxu0 %v902_v31 }
  0x4e   : > { %541 = vmatpush1.bf16.msra.mxu0 %v904_v32 }
  0x4f   : > { %542 = vmatprep.subr.bf16.mxu0 %v905_v33 }
  0x52   : > { %543 = vmatpush1.bf16.msra.mxu0 %v907_v34 }
  0x55   : > { %561 = vmatmul.mubr.bf16.vlgmr.msra.gmra.mrb[0].mxu0 %v908_v35 }
 0x128   : > { %v562_v46 = vpop.f32.mrb[0].mxu0 }
 0x129   : > { %v563_v48 = vadd.f32 %v562_v46, %v435_v42  ;;  %v564_v49 = vpop.f32.mrb[1].mxu0 }
 0x12a   : > { %v565_v51 = vadd.f32 %v564_v49, %v439_v43  ;;  %v566_v52 = vpop.f32.mrb[2].mxu0 }
 0x12b   : > { %v577_v54 = vadd.f32 %v573_v45, %v563_v48  ;;  %v567_v55 = vadd.f32 %v566_v52, %v435_v42  ;;  %v568_v56 = vpop.f32.mrb[3].mxu0 }
 0x12c   : > { %v578_v57 = vadd.f32 %v574_v47, %v565_v51  ;;  %v569_v58 = vadd.f32 %v568_v56, %v439_v43 }
 0x12d   : > { %v581_v59 = vmax.f32 %v577_v54, 0.0  ;;  %v579_v60 = vadd.f32 %v575_v50, %v567_v55 }
 0x12e   : > { %v582_v61 = vmax.f32 %v578_v57, 0.0  ;;  %v580_v62 = vadd.f32 %v576_v53, %v569_v58  ;;  %605 = sbr.rel (!%p1082_p10) target bundleno = 317 (0x13d), region = 116 }
 0x12f   : > { %v583_v63 = vmax.f32 %v579_v60, 0.0 }
 0x130   : > { %v808_v0 = vpack.c.bf16 %v582_v61, %v581_v59  ;;  %v584_v1 = vmax.f32 %v580_v62, 0.0 }
 0x132   : > { %597 = vst [vmem:[%s394_s15] sm:$0xff] %v808_v0  ;;  %v809_v2 = vpack.c.bf16 %v584_v1, %v583_v63 }
 0x134   : > { %598 = vst [vmem:[%s394_s15 + $0x8] sm:$0xff] %v809_v2 }
 0x139   : > { %v641_v3 = vld [vmem:[%s394_s15] sm:$0xff] }
 0x13a   : > { %642 = vst [vmem:[%s611_s11] sm:$0xff] %v641_v3 }
 0x13b   : > { %v643_v4 = vld [vmem:[%s394_s15 + $0x8] sm:$0xff] }
 0x13c   : > { %644 = vst [vmem:[%s611_s11 + $0x10] sm:$0xff] %v643_v4 }
 0x13d PF: > { %s14_s23 = sadd.s32 1, %s979_s23   ;;  %s1203_s15 = smov %s951_s16 }
 0x13e   : > { %p11_p3 = scmp.ge.s32.totalorder %s14_s23, 6   ;;  %s1204_s16 = smov %s1087_s10 }
 0x13f   : > { %s1205_s17 = smov %s959_s18  ;;  %s1206_s18 = smov %s1072_s5 }
 0x140   : > { %s1207_s19 = smov %s971_s21  ;;  %s1208_s20 = smov %s975_s22 }
 0x141   : > { %s1209_s21 = smov %s1212_s25  ;;  %s1210_s22 = smov %s1216_s26 }
 0x142   :  { %13 = sbr.rel (!%p11_p3) target bundleno = 5 (0x5), region = 199 }

// kernel: resnet_forward_pallas.25
= control target key start
LH: loop header
LB: loop body
LE: loop exit
PB: predicated region body
PF: predicated region fallthrough
CT: control target
= control target key end

     0   :  { %s1564_s12 = smov 0   ;;  %s1566_s13 = smov 0   ;;  %s1834_s0 = inlined_call_operand.vmem [shape: bf16[32,1152], index: 0, kind: input, shape index: {}]   ;;  %s1835_s1 = inlined_call_operand.vmem [shape: bf16[1152,128], index: 1, kind: input, shape index: {}]   ;;  %s1836_s2 = inlined_call_operand.vmem [shape: f32[1,128], index: 2, kind: input, shape index: {}]   ;;  %s1837_s3 = inlined_call_operand.vmem [shape: bf16[32,128], index: 3, kind: output, shape index: {}]  }
   0x1   :  { %s1568_s14 = smov 0  }
   0x2 LB: > { %s25_s15 = sadd.s32 1, %s1536_s13  ;;  %p1191_p0 = scmp.ge.s32.totalorder %s1540_s14, 1  ;;  %s1540_s14 = sphi %s1568_s14, %s13_s14   ;;  %s1536_s13 = sphi %s1566_s13, %s1839_s13   ;;  %s1532_s12 = sphi %s1564_s12, %s1838_s12  }
   0x3   : > { %p27_p1 = scmp.ge.s32.totalorder %s25_s15, 2  ;;  %p170_p2 = scmp.lt.s32.totalorder %s1540_s14, 3 }
   0x5   : > { %s1841_s15 = smov (%p27_p1, %s25_s15), 0  ;;  %p171_p3 = pnand %p1191_p0, %p170_p2 }
   0x6   : > { %v1433_v0 = vld [vmem:[%s1835_s1 + $0x40] sm:$0xff] (!%p171_p3)   ;;  %v1437_v4 = vld [vmem:[%s1835_s1 + $0x48] sm:$0xff] (!%p171_p3)   ;;  %v1441_v8 = vld [vmem:[%s1835_s1 + $0x50] sm:$0xff] (!%p171_p3)   ;;  %s1192_s21 = sshll.u32 (!%p171_p3), %s1532_s12, 1  ;;  %vm1543_vm0 = vmmov (!%p171_p3), 0  }
   0x7   : > { %174 = sbr.rel (%p171_p3) target bundleno = 322 (0x142), region = 32  ;;  %v1434_v1 = vld [vmem:[%s1835_s1] sm:$0xff] (!%p171_p3)   ;;  %1289 = vmatprep.subr.bf16.mxu0 (!%p171_p3), %v1433_v0  ;;  %v1438_v5 = vld [vmem:[%s1835_s1 + $0x8] sm:$0xff] (!%p171_p3)   ;;  %v1442_v9 = vld [vmem:[%s1835_s1 + $0x10] sm:$0xff] (!%p171_p3)   ;;  %p206_p4 = scmp.lt.s32.totalorder (!%p171_p3), %s1192_s21, 3 }
   0x8   : > { %v1435_v2 = vld [vmem:[%s1835_s1 + $0xc0] sm:$0xff] (!%p171_p3)   ;;  %1290 = vmatpush3.bf16.msra.mxu0 (!%p171_p3), %v1434_v1  ;;  %v1439_v6 = vld [vmem:[%s1835_s1 + $0xc8] sm:$0xff] (!%p171_p3)   ;;  %v1443_v10 = vld [vmem:[%s1835_s1 + $0xd0] sm:$0xff] (!%p171_p3)  }
   0x9   : > { %v1436_v3 = vld [vmem:[%s1835_s1 + $0x80] sm:$0xff] (!%p171_p3)   ;;  %1311 = vmatprep.subr.bf16.mxu1 (!%p171_p3), %v1435_v2  ;;  %1291 = vmatprep.subr.bf16.mxu0 (!%p171_p3), %v1437_v4  ;;  %v1440_v7 = vld [vmem:[%s1835_s1 + $0x88] sm:$0xff] (!%p171_p3)   ;;  %v1444_v11 = vld [vmem:[%s1835_s1 + $0x90] sm:$0xff] (!%p171_p3)  }
   0xa   : > { %1312 = vmatpush3.bf16.msra.mxu1 (!%p171_p3), %v1436_v3  ;;  %v1445_v12 = vld [vmem:[%s1835_s1 + $0x58] sm:$0xff] (!%p171_p3)   ;;  %v1449_v16 = vld [vmem:[%s1835_s1 + $0x60] sm:$0xff] (!%p171_p3)   ;;  %v1453_v20 = vld [vmem:[%s1835_s1 + $0x68] sm:$0xff] (!%p171_p3)  }
   0xb   : > { %1313 = vmatprep.subr.bf16.mxu1 (!%p171_p3), %v1439_v6  ;;  %v1446_v13 = vld [vmem:[%s1835_s1 + $0x18] sm:$0xff] (!%p171_p3)   ;;  %v1450_v17 = vld [vmem:[%s1835_s1 + $0x20] sm:$0xff] (!%p171_p3)   ;;  %v1454_v21 = vld [vmem:[%s1835_s1 + $0x28] sm:$0xff] (!%p171_p3)   ;;  %v1542_v6 = vmov (!%p171_p3), 0.0  }
   0xc   : > { %1292 = vmatpush3.bf16.msra.mxu0 (!%p171_p3), %v1438_v5  ;;  %v1447_v14 = vld [vmem:[%s1835_s1 + $0xd8] sm:$0xff] (!%p171_p3)   ;;  %v1451_v18 = vld [vmem:[%s1835_s1 + $0xe0] sm:$0xff] (!%p171_p3)   ;;  %v1455_v22 = vld [vmem:[%s1835_s1 + $0xe8] sm:$0xff] (!%p171_p3)  }
   0xd   : > { %1293 = vmatprep.subr.bf16.mxu0 (!%p171_p3), %v1441_v8  ;;  %v1448_v15 = vld [vmem:[%s1835_s1 + $0x98] sm:$0xff] (!%p171_p3)   ;;  %v1452_v19 = vld [vmem:[%s1835_s1 + $0xa0] sm:$0xff] (!%p171_p3)   ;;  %v1456_v23 = vld [vmem:[%s1835_s1 + $0xa8] sm:$0xff] (!%p171_p3)  }
   0xe   : > { %1314 = vmatpush3.bf16.msra.mxu1 %v1440_v7  ;;  %s1843_s21 = smov (!%p206_p4, %s1192_s21), 3  ;;  %v1457_v24 = vld [vmem:[%s1835_s1 + $0x70] sm:$0xff]   ;;  %v1461_v28 = vld [vmem:[%s1835_s1 + $0x78] sm:$0xff]   ;;  %v1468_v34 = vld [vmem:[%s1835_s1 + $0x140] sm:$0xff]  }
   0xf   : > { %1315 = vmatprep.subr.bf16.mxu1 %v1443_v10  ;;  %s1406_s20 = smul.u32 36, %s1843_s21  ;;  %v1458_v25 = vld [vmem:[%s1835_s1 + $0x30] sm:$0xff]   ;;  %v1462_v29 = vld [vmem:[%s1835_s1 + $0x38] sm:$0xff]   ;;  %v1472_v37 = vld [vmem:[%s1835_s1 + $0x100] sm:$0xff]  }
  0x10   : > { %1294 = vmatpush3.bf16.msra.mxu0 %v1442_v9  ;;  %v1459_v26 = vld [vmem:[%s1835_s1 + $0xf0] sm:$0xff]   ;;  %v1463_v30 = vld [vmem:[%s1835_s1 + $0xf8] sm:$0xff]   ;;  %v1473_v38 = vld [vmem:[%s1835_s1 + $0x1c0] sm:$0xff]  }
  0x11   : > { %1295 = vmatprep.subr.bf16.mxu0 %v1445_v12  ;;  %v1460_v27 = vld [vmem:[%s1835_s1 + $0xb0] sm:$0xff]   ;;  %s1678_s4 = scalar_lea.vmem %s1834_s0, %s1406_s20  ;;  %v1467_v33 = vld [vmem:[%s1835_s1 + $0xb8] sm:$0xff]   ;;  %v1474_v39 = vld [vmem:[%s1835_s1 + $0x180] sm:$0xff]  }
  0x12   : > { %1316 = vmatpush3.bf16.msra.mxu1 %v1444_v11  ;;  %v1464_v31 = vld [vmem:[%s1678_s4] ss:$36 sps:$4 sm:$0xff]   ;;  %v1469_v35 = vld [vmem:[%s1678_s4 + $0x8] ss:$36 sps:$4 sm:$0xff]   ;;  %v1479_v44 = vld [vmem:[%s1835_s1 + $0x150] sm:$0xff]  }
  0x13   : > { %1317 = vmatprep.subr.bf16.mxu1 %v1447_v14  ;;  %v1466_v32 = vld [vmem:[%s1678_s4 + $0x4] ss:$36 sps:$4 sm:$0xff]   ;;  %v1471_v36 = vld [vmem:[%s1678_s4 + $0xc] ss:$36 sps:$4 sm:$0xff]   ;;  %v1483_v48 = vld [vmem:[%s1835_s1 + $0x158] sm:$0xff]  }
  0x14   : > { %1296 = vmatpush3.bf16.msra.mxu0 %v1446_v13  ;;  %900 = vmatprep.mubr.bf16.mxu0 %v1466_v32  ;;  %v1475_v40 = vld [vmem:[%s1835_s1 + $0x148] sm:$0xff]   ;;  %v1480_v45 = vld [vmem:[%s1835_s1 + $0x110] sm:$0xff]   ;;  %v1484_v49 = vld [vmem:[%s1835_s1 + $0x118] sm:$0xff]  }
  0x15   : > { %1297 = vmatprep.subr.bf16.mxu0 %v1449_v16  ;;  %941 = vmatprep.mubr.bf16.mxu1 %v1471_v36  ;;  %v1476_v41 = vld [vmem:[%s1835_s1 + $0x108] sm:$0xff]   ;;  %v1481_v46 = vld [vmem:[%s1835_s1 + $0x1d0] sm:$0xff]   ;;  %v1485_v50 = vld [vmem:[%s1835_s1 + $0x1d8] sm:$0xff]  }
  0x16   : > { %1318 = vmatpush3.bf16.msra.mxu1 %v1448_v15  ;;  %v1477_v42 = vld [vmem:[%s1835_s1 + $0x1c8] sm:$0xff]   ;;  %v1482_v47 = vld [vmem:[%s1835_s1 + $0x190] sm:$0xff]   ;;  %v1486_v51 = vld [vmem:[%s1835_s1 + $0x198] sm:$0xff]  }
  0x17   : > { %1319 = vmatprep.subr.bf16.mxu1 %v1451_v18  ;;  %v1478_v43 = vld [vmem:[%s1835_s1 + $0x188] sm:$0xff]   ;;  %v1487_v52 = vld [vmem:[%s1835_s1 + $0x160] sm:$0xff]   ;;  %v1495_v60 = vld [vmem:[%s1835_s1 + $0x170] sm:$0xff]  }
  0x18   : > { %1298 = vmatpush3.bf16.msra.mxu0 %v1450_v17  ;;  %v1488_v53 = vld [vmem:[%s1835_s1 + $0x120] sm:$0xff]   ;;  %v1491_v56 = vld [vmem:[%s1835_s1 + $0x168] sm:$0xff]   ;;  %v1496_v61 = vld [vmem:[%s1835_s1 + $0x130] sm:$0xff]  }
  0x19   : > { %1299 = vmatprep.subr.bf16.mxu0 %v1453_v20  ;;  %v1489_v54 = vld [vmem:[%s1835_s1 + $0x1e0] sm:$0xff]   ;;  %v1492_v57 = vld [vmem:[%s1835_s1 + $0x128] sm:$0xff]   ;;  %v1497_v62 = vld [vmem:[%s1835_s1 + $0x1f0] sm:$0xff]  }
  0x1a   : > { %1320 = vmatpush3.bf16.msra.mxu1 %v1452_v19  ;;  %v1490_v55 = vld [vmem:[%s1835_s1 + $0x1a0] sm:$0xff]   ;;  %v1493_v58 = vld [vmem:[%s1835_s1 + $0x1e8] sm:$0xff]   ;;  %v1498_v63 = vld [vmem:[%s1835_s1 + $0x1b0] sm:$0xff]  }
  0x1b   : > { %1321 = vmatprep.subr.bf16.mxu1 %v1455_v22  ;;  %v1494_v59 = vld [vmem:[%s1835_s1 + $0x1a8] sm:$0xff]   ;;  %v1499_v0 = vld [vmem:[%s1835_s1 + $0x178] sm:$0xff]   ;;  %v1502_v3 = vld [vmem:[%s1678_s4 + $0x10] ss:$36 sps:$4 sm:$0xff]  }
  0x1c   : > { %1300 = vmatpush3.bf16.msra.mxu0 %v1454_v21  ;;  %v1500_v1 = vld [vmem:[%s1835_s1 + $0x138] sm:$0xff]   ;;  %v1509_v9 = vld [vmem:[%s1835_s1 + $0x200] sm:$0xff]   ;;  %v1510_v10 = vld [vmem:[%s1835_s1 + $0x208] sm:$0xff]  }
  0x1d   : > { %1301 = vmatprep.subr.bf16.mxu0 %v1457_v24  ;;  %v1501_v2 = vld [vmem:[%s1835_s1 + $0x1f8] sm:$0xff]   ;;  %v1511_v11 = vld [vmem:[%s1835_s1 + $0x210] sm:$0xff]   ;;  %v1513_v13 = vld [vmem:[%s1835_s1 + $0x220] sm:$0xff]  }
  0x1e   : > { %1322 = vmatpush3.bf16.msra.mxu1 %v1456_v23  ;;  %v1504_v4 = vld [vmem:[%s1678_s4 + $0x14] ss:$36 sps:$4 sm:$0xff]   ;;  %v1508_v8 = vld [vmem:[%s1678_s4 + $0x1c] ss:$36 sps:$4 sm:$0xff]   ;;  %v1514_v14 = vld [vmem:[%s1835_s1 + $0x228] sm:$0xff]  }
  0x1f   : > { %1323 = vmatprep.subr.bf16.mxu1 %v1459_v26  ;;  %v1505_v5 = vld [vmem:[%s1835_s1 + $0x1b8] sm:$0xff]   ;;  %v1515_v15 = vld [vmem:[%s1835_s1 + $0x230] sm:$0xff]   ;;  %v1517_v17 = vld [vmem:[%s1678_s4 + $0x20] ss:$36 sps:$4 sm:$0xff]  }
  0x20   : > { %1302 = vmatpush3.bf16.msra.mxu0 %v1458_v25  ;;  %v1506_v7 = vld [vmem:[%s1678_s4 + $0x18] ss:$36 sps:$4 sm:$0xff]   ;;  %v1196_v19 = vld [vmem:[%s1836_s2] ss:$0 sm:$0xff]  ;;  %s1195_s4 = sshll.u32 %s1843_s21, 2 }
  0x21   : > { %1303 = vmatprep.subr.bf16.mxu0 %v1461_v28  ;;  %v1512_v12 = vld [vmem:[%s1835_s1 + $0x218] sm:$0xff]   ;;  %s226_s7 = scalar_lea.vmem %s1837_s3, %s1195_s4 }
  0x22   : > { %1324 = vmatpush3.bf16.msra.mxu1 %v1460_v27  ;;  %v1516_v16 = vld [vmem:[%s1835_s1 + $0x238] sm:$0xff]  }
  0x23   : > { %1325 = vmatprep.subr.bf16.mxu1 %v1463_v30 }
  0x24   : > { %1304 = vmatpush3.bf16.msra.mxu0 %v1462_v29 }
  0x25   : > { %1333 = vmatprep.subr.bf16.mxu0 %v1468_v34 }
  0x26   : > { %1326 = vmatpush3.bf16.msra.mxu1 %v1467_v33 }
  0x27   : > { %901 = vmatmul.mubr.bf16.vlgmr.msra.gmra.mrb[0].mxu0 %v1464_v31  ;;  %1355 = vmatprep.subr.bf16.mxu1 %v1473_v38 }
  0x28   : > { %1334 = vmatpush3.bf16.msra.mxu0 %v1472_v37  ;;  %982 = vmatprep.mubr.bf16.mxu0 %v1504_v4 }
  0x29   : > { %942 = vmatmul.mubr.bf16.vlgmr.msra.gmra.mrb[0].mxu1 %v1469_v35  ;;  %1335 = vmatprep.subr.bf16.mxu0 %v1475_v40 }
  0x2a   : > { %1356 = vmatpush3.bf16.msra.mxu1 %v1474_v39  ;;  %1023 = vmatprep.mubr.bf16.mxu1 %v1508_v8 }
  0x2b   : > { %1357 = vmatprep.subr.bf16.mxu1 %v1477_v42 }
  0x2c   : > { %1336 = vmatpush3.bf16.msra.mxu0 %v1476_v41 }
  0x2d   : > { %1337 = vmatprep.subr.bf16.mxu0 %v1479_v44 }
  0x2e   : > { %1358 = vmatpush3.bf16.msra.mxu1 %v1478_v43 }
  0x2f   : > { %1359 = vmatprep.subr.bf16.mxu1 %v1481_v46 }
  0x30   : > { %1338 = vmatpush3.bf16.msra.mxu0 %v1480_v45 }
  0x31   : > { %1339 = vmatprep.subr.bf16.mxu0 %v1483_v48 }
  0x32   : > { %1360 = vmatpush3.bf16.msra.mxu1 %v1482_v47 }
  0x33   : > { %1361 = vmatprep.subr.bf16.mxu1 %v1485_v50 }
  0x34   : > { %1340 = vmatpush3.bf16.msra.mxu0 %v1484_v49 }
  0x35   : > { %1341 = vmatprep.subr.bf16.mxu0 %v1487_v52 }
  0x36   : > { %1362 = vmatpush3.bf16.msra.mxu1 %v1486_v51 }
  0x37   : > { %1363 = vmatprep.subr.bf16.mxu1 %v1489_v54 }
  0x38   : > { %1342 = vmatpush3.bf16.msra.mxu0 %v1488_v53 }
  0x39   : > { %1343 = vmatprep.subr.bf16.mxu0 %v1491_v56 }
  0x3a   : > { %1364 = vmatpush3.bf16.msra.mxu1 %v1490_v55 }
  0x3b   : > { %1365 = vmatprep.subr.bf16.mxu1 %v1493_v58 }
  0x3c   : > { %1344 = vmatpush3.bf16.msra.mxu0 %v1492_v57 }
  0x3d   : > { %1345 = vmatprep.subr.bf16.mxu0 %v1495_v60 }
  0x3e   : > { %1366 = vmatpush3.bf16.msra.mxu1 %v1494_v59 }
  0x3f   : > { %1367 = vmatprep.subr.bf16.mxu1 %v1497_v62 }
  0x40   : > { %1346 = vmatpush3.bf16.msra.mxu0 %v1496_v61 }
  0x41   : > { %1347 = vmatprep.subr.bf16.mxu0 %v1499_v0 }
  0x42   : > { %1368 = vmatpush3.bf16.msra.mxu1 %v1498_v63 }
  0x43   : > { %1369 = vmatprep.subr.bf16.mxu1 %v1501_v2 }
  0x44   : > { %1348 = vmatpush3.bf16.msra.mxu0 %v1500_v1 }
  0x45   : > { %1386 = vmatprep.subr.bf16.mxu0 %v1542_v6 }
  0x46   : > { %1370 = vmatpush3.bf16.msra.mxu1 %v1505_v5 }
  0x47   : > { %983 = vmatmul.mubr.bf16.vlgmr.msra.gmra.mrb[4].mxu0 %v1502_v3 }
  0x48   : > { %1402 = vmatprep.mubr.msk.bf16.mxu0 %vm1543_vm0, %v1542_v6  ;;  %1387 = vmatpush3.bf16.msra.mxu0 %v1509_v9 }
  0x49   : > { %1024 = vmatmul.mubr.bf16.vlgmr.msra.gmra.mrb[4].mxu1 %v1506_v7  ;;  %1388 = vmatprep.subr.bf16.mxu0 %v1542_v6 }
  0x4c   : > { %1389 = vmatpush3.bf16.msra.mxu0 %v1510_v10 }
  0x4d   : > { %1390 = vmatprep.subr.bf16.mxu0 %v1542_v6 }
  0x50   : > { %1391 = vmatpush3.bf16.msra.mxu0 %v1511_v11 }
  0x51   : > { %1392 = vmatprep.subr.bf16.mxu0 %v1542_v6 }
  0x54   : > { %1393 = vmatpush3.bf16.msra.mxu0 %v1512_v12 }
  0x55   : > { %1394 = vmatprep.subr.bf16.mxu0 %v1542_v6 }
  0x58   : > { %1395 = vmatpush3.bf16.msra.mxu0 %v1513_v13 }
  0x59   : > { %1396 = vmatprep.subr.bf16.mxu0 %v1542_v6 }
  0x5c   : > { %1397 = vmatpush3.bf16.msra.mxu0 %v1514_v14 }
  0x5d   : > { %1398 = vmatprep.subr.bf16.mxu0 %v1542_v6 }
  0x60   : > { %1399 = vmatpush3.bf16.msra.mxu0 %v1515_v15 }
  0x61   : > { %1400 = vmatprep.subr.bf16.mxu0 %v1542_v6 }
  0x64   : > { %1401 = vmatpush3.bf16.msra.mxu0 %v1516_v16 }
  0x67   : > { %1403 = vmatmul.mubr.bf16.vlgmr.msra.gmra.mrb[8].mxu0 %v1517_v17 }
  0xfa   : > { %v1305_v18 = vpop.f32.mrb[0].mxu0 }
  0xfb   : > { %v1306_v20 = vpop.f32.mrb[1].mxu0 }
  0xfc   : > { %v1307_v21 = vadd.f32 %v1306_v20, %v1305_v18  ;;  %v1308_v22 = vpop.f32.mrb[2].mxu0  ;;  %v1327_v23 = vpop.f32.mrb[0].mxu1 }
  0xfd   : > { %v1309_v24 = vpop.f32.mrb[3].mxu0  ;;  %v1328_v27 = vpop.f32.mrb[1].mxu1 }
  0xfe   : > { %v903_v25 = vadd.f32 %v1307_v21, %v1196_v19  ;;  %v1310_v26 = vadd.f32 %v1309_v24, %v1308_v22  ;;  %v1329_v28 = vadd.f32 %v1328_v27, %v1327_v23  ;;  %v1330_v29 = vpop.f32.mrb[2].mxu1 }
  0xff   : > { %v1331_v31 = vpop.f32.mrb[3].mxu1 }
 0x100   : > { %v906_v30 = vadd.f32 %v1310_v26, %v1196_v19  ;;  %v944_v32 = vadd.f32 %v1329_v28, %v903_v25  ;;  %v1332_v33 = vadd.f32 %v1331_v31, %v1330_v29 }
 0x102   : > { %v947_v34 = vadd.f32 %v1332_v33, %v906_v30 }
 0x11a   : > { %v1349_v35 = vpop.f32.mrb[4].mxu0 }
 0x11b   : > { %v1350_v36 = vpop.f32.mrb[5].mxu0 }
 0x11c   : > { %v1351_v37 = vadd.f32 %v1350_v36, %v1349_v35  ;;  %v1352_v38 = vpop.f32.mrb[6].mxu0  ;;  %v1371_v39 = vpop.f32.mrb[4].mxu1 }
 0x11d   : > { %v1353_v40 = vpop.f32.mrb[7].mxu0  ;;  %v1372_v43 = vpop.f32.mrb[5].mxu1 }
 0x11e   : > { %v985_v41 = vadd.f32 %v1351_v37, %v944_v32  ;;  %v1354_v42 = vadd.f32 %v1353_v40, %v1352_v38  ;;  %v1373_v44 = vadd.f32 %v1372_v43, %v1371_v39  ;;  %v1374_v45 = vpop.f32.mrb[6].mxu1 }
 0x11f   : > { %v1375_v47 = vpop.f32.mrb[7].mxu1 }
 0x120   : > { %v988_v46 = vadd.f32 %v1354_v42, %v947_v34  ;;  %v1376_v48 = vadd.f32 %v1375_v47, %v1374_v45  ;;  %v1026_v49 = vadd.f32 %v1373_v44, %v985_v41 }
 0x122   : > { %v1029_v50 = vadd.f32 %v1376_v48, %v988_v46 }
 0x13a   : > { %v1066_v51 = vpop.f32.mrb[8].mxu0 }
 0x13b   : > { %v1067_v52 = vadd.f32 %v1066_v51, %v1026_v49  ;;  %v1404_v53 = vpop.f32.mrb[9].mxu0 }
 0x13c   : > { %v1069_v54 = vpop.f32.mrb[10].mxu0 }
 0x13d   : > { %v1070_v55 = vadd.f32 %v1069_v54, %v1029_v50  ;;  %v1405_v56 = vpop.f32.mrb[11].mxu0 }
 0x13f   : > { %v1287_v57 = vpack.c.bf16 %v1070_v55, %v1067_v52 }
 0x141   : > { %1288 = vst [vmem:[%s226_s7] sm:$0xff] %v1287_v57  }
 0x142 PF: > { %s13_s14 = sadd.s32 1, %s1540_s14   ;;  %s1838_s12 = smov %s1536_s13 }
 0x143   : > { %p10_p5 = scmp.ge.s32.totalorder %s13_s14, 4   ;;  %s1839_s13 = smov %s1841_s15 }
 0x145   :  { %12 = sbr.rel (!%p10_p5) target bundleno = 2 (0x2), region = 68 }

// kernel: resnet_forward_pallas.28
= control target key start
LH: loop header
LB: loop body
LE: loop exit
PB: predicated region body
PF: predicated region fallthrough
CT: control target
= control target key end

     0   :  { %s1141_s12 = smov 0   ;;  %s1143_s13 = smov 0   ;;  %s1382_s0 = inlined_call_operand.vmem [shape: bf16[32,512], index: 0, kind: input, shape index: {}]   ;;  %s1383_s1 = inlined_call_operand.vmem [shape: bf16[512,256], index: 1, kind: input, shape index: {}]   ;;  %s1384_s2 = inlined_call_operand.vmem [shape: f32[1,256], index: 2, kind: input, shape index: {}]   ;;  %s1385_s3 = inlined_call_operand.vmem [shape: bf16[32,256], index: 3, kind: output, shape index: {}]  }
   0x1   :  { %s1145_s14 = smov 0  }
   0x2 LB: > { %s25_s15 = sadd.s32 1, %s1115_s13  ;;  %p880_p0 = scmp.ge.s32.totalorder %s1119_s14, 1  ;;  %s1119_s14 = sphi %s1145_s14, %s13_s14   ;;  %s1115_s13 = sphi %s1143_s13, %s1387_s13   ;;  %s1111_s12 = sphi %s1141_s12, %s1386_s12  }
   0x3   : > { %p27_p1 = scmp.ge.s32.totalorder %s25_s15, 2  ;;  %p174_p2 = scmp.lt.s32.totalorder %s1119_s14, 3 }
   0x5   : > { %s1389_s15 = smov (%p27_p1, %s25_s15), 0  ;;  %p175_p3 = pnand %p880_p0, %p174_p2 }
   0x6   : > { %v995_v0 = vld [vmem:[%s1383_s1 + $0x4] ss:$8 sps:$4 sm:$0xff] (!%p175_p3)   ;;  %v999_v2 = vld [vmem:[%s1383_s1] ss:$8 sps:$4 sm:$0xff] (!%p175_p3)   ;;  %v1001_v4 = vld [vmem:[%s1383_s1 + $0x14] ss:$8 sps:$4 sm:$0xff] (!%p175_p3)  }
   0x7   : > { %178 = sbr.rel (%p175_p3) target bundleno = 293 (0x125), region = 32  ;;  %v997_v1 = vld [vmem:[%s1383_s1 + $0x104] ss:$8 sps:$4 sm:$0xff] (!%p175_p3)   ;;  %663 = vmatprep.subr.bf16.mxu1 (!%p175_p3), %v995_v0  ;;  %v1000_v3 = vld [vmem:[%s1383_s1 + $0x100] ss:$8 sps:$4 sm:$0xff] (!%p175_p3)   ;;  %s881_s30 = sshll.u32 (!%p175_p3), %s1111_s12, 1 }
   0x8   : > { %706 = vmatprep.subr.bf16.mxu0 (!%p175_p3), %v997_v1  ;;  %664 = vmatpush1.bf16.msra.mxu1 (!%p175_p3), %v999_v2  ;;  %v1003_v5 = vld [vmem:[%s1383_s1 + $0x114] ss:$8 sps:$4 sm:$0xff] (!%p175_p3)   ;;  %v1005_v6 = vld [vmem:[%s1383_s1 + $0x10] ss:$8 sps:$4 sm:$0xff] (!%p175_p3)   ;;  %v1007_v8 = vld [vmem:[%s1383_s1 + $0x24] ss:$8 sps:$4 sm:$0xff] (!%p175_p3)  }
   0x9   : > { %707 = vmatpush1.bf16.msra.mxu0 (!%p175_p3), %v1000_v3  ;;  %665 = vmatprep.subr.bf16.mxu1 (!%p175_p3), %v1001_v4  ;;  %v1006_v7 = vld [vmem:[%s1383_s1 + $0x110] ss:$8 sps:$4 sm:$0xff] (!%p175_p3)   ;;  %v1009_v9 = vld [vmem:[%s1383_s1 + $0x124] ss:$8 sps:$4 sm:$0xff] (!%p175_p3)   ;;  %v1011_v10 = vld [vmem:[%s1383_s1 + $0x20] ss:$8 sps:$4 sm:$0xff] (!%p175_p3)   ;;  %v313_v4 = vlaneseq (!%p175_p3) }
   0xa   : > { %708 = vmatprep.subr.bf16.mxu0 (!%p175_p3), %v1003_v5  ;;  %v1012_v11 = vld [vmem:[%s1383_s1 + $0x120] ss:$8 sps:$4 sm:$0xff] (!%p175_p3)   ;;  %v1013_v12 = vld [vmem:[%s1383_s1 + $0x34] ss:$8 sps:$4 sm:$0xff] (!%p175_p3)   ;;  %v1017_v14 = vld [vmem:[%s1383_s1 + $0x30] ss:$8 sps:$4 sm:$0xff] (!%p175_p3)  }
   0xb   : > { %v1015_v13 = vld [vmem:[%s1383_s1 + $0x134] ss:$8 sps:$4 sm:$0xff] (!%p175_p3)   ;;  %v1018_v15 = vld [vmem:[%s1383_s1 + $0x130] ss:$8 sps:$4 sm:$0xff] (!%p175_p3)   ;;  %v1019_v16 = vld [vmem:[%s1383_s1 + $0x44] ss:$8 sps:$4 sm:$0xff] (!%p175_p3)  }
   0xc   : > { %666 = vmatpush1.bf16.msra.mxu1 (!%p175_p3), %v1005_v6  ;;  %v1021_v17 = vld [vmem:[%s1383_s1 + $0x144] ss:$8 sps:$4 sm:$0xff] (!%p175_p3)   ;;  %v1023_v18 = vld [vmem:[%s1383_s1 + $0x40] ss:$8 sps:$4 sm:$0xff] (!%p175_p3)   ;;  %v1025_v20 = vld [vmem:[%s1383_s1 + $0x54] ss:$8 sps:$4 sm:$0xff] (!%p175_p3)  }
   0xd   : > { %709 = vmatpush1.bf16.msra.mxu0 (!%p175_p3), %v1006_v7  ;;  %667 = vmatprep.subr.bf16.mxu1 (!%p175_p3), %v1007_v8  ;;  %v1024_v19 = vld [vmem:[%s1383_s1 + $0x140] ss:$8 sps:$4 sm:$0xff] (!%p175_p3)   ;;  %v1027_v21 = vld [vmem:[%s1383_s1 + $0x154] ss:$8 sps:$4 sm:$0xff] (!%p175_p3)   ;;  %v1029_v22 = vld [vmem:[%s1383_s1 + $0x50] ss:$8 sps:$4 sm:$0xff] (!%p175_p3)  }
   0xe   : > { %710 = vmatprep.subr.bf16.mxu0 %v1009_v9  ;;  %v1030_v23 = vld [vmem:[%s1383_s1 + $0x150] ss:$8 sps:$4 sm:$0xff]   ;;  %v1031_v24 = vld [vmem:[%s1383_s1 + $0x64] ss:$8 sps:$4 sm:$0xff]   ;;  %v1035_v26 = vld [vmem:[%s1383_s1 + $0x60] ss:$8 sps:$4 sm:$0xff]  }
   0xf   : > { %v1033_v25 = vld [vmem:[%s1383_s1 + $0x164] ss:$8 sps:$4 sm:$0xff]   ;;  %v1036_v27 = vld [vmem:[%s1383_s1 + $0x160] ss:$8 sps:$4 sm:$0xff]   ;;  %v1037_v28 = vld [vmem:[%s1383_s1 + $0x74] ss:$8 sps:$4 sm:$0xff]  }
  0x10   : > { %668 = vmatpush1.bf16.msra.mxu1 %v1011_v10  ;;  %v1039_v29 = vld [vmem:[%s1383_s1 + $0x174] ss:$8 sps:$4 sm:$0xff]   ;;  %v1041_v30 = vld [vmem:[%s1383_s1 + $0x70] ss:$8 sps:$4 sm:$0xff]   ;;  %v1043_v32 = vld [vmem:[%s1383_s1 + $0x84] ss:$8 sps:$4 sm:$0xff]  }
  0x11   : > { %711 = vmatpush1.bf16.msra.mxu0 %v1012_v11  ;;  %669 = vmatprep.subr.bf16.mxu1 %v1013_v12  ;;  %v1042_v31 = vld [vmem:[%s1383_s1 + $0x170] ss:$8 sps:$4 sm:$0xff]   ;;  %v1045_v33 = vld [vmem:[%s1383_s1 + $0x184] ss:$8 sps:$4 sm:$0xff]   ;;  %p214_p4 = scmp.lt.s32.totalorder %s881_s30, 3  ;;  %v314_v5 = vshrl.u32 %v313_v4, 7 }
  0x12   : > { %712 = vmatprep.subr.bf16.mxu0 %v1015_v13  ;;  %v1047_v34 = vld [vmem:[%s1383_s1 + $0x80] ss:$8 sps:$4 sm:$0xff]   ;;  %v1049_v36 = vld [vmem:[%s1383_s1 + $0x94] ss:$8 sps:$4 sm:$0xff]   ;;  %v1053_v38 = vld [vmem:[%s1383_s1 + $0x90] ss:$8 sps:$4 sm:$0xff]  }
  0x13   : > { %v1048_v35 = vld [vmem:[%s1383_s1 + $0x180] ss:$8 sps:$4 sm:$0xff]   ;;  %v1051_v37 = vld [vmem:[%s1383_s1 + $0x194] ss:$8 sps:$4 sm:$0xff]   ;;  %s1391_s30 = smov (!%p214_p4, %s881_s30), 3  ;;  %v315_v6 = vsub.s32 0, %v314_v5 }
  0x14   : > { %670 = vmatpush1.bf16.msra.mxu1 %v1017_v14  ;;  %v1054_v39 = vld [vmem:[%s1383_s1 + $0x190] ss:$8 sps:$4 sm:$0xff]   ;;  %v1055_v40 = vld [vmem:[%s1383_s1 + $0xa4] ss:$8 sps:$4 sm:$0xff]   ;;  %s959_s5 = sshll.u32 %s1391_s30, 4  ;;  %v319_v8 = vsub.s32 1, %v314_v5 }
  0x15   : > { %713 = vmatpush1.bf16.msra.mxu0 %v1018_v15  ;;  %671 = vmatprep.subr.bf16.mxu1 %v1019_v16  ;;  %v1057_v41 = vld [vmem:[%s1383_s1 + $0x1a4] ss:$8 sps:$4 sm:$0xff]   ;;  %v1059_v42 = vld [vmem:[%s1383_s1 + $0xa0] ss:$8 sps:$4 sm:$0xff]   ;;  %v1061_v44 = vld [vmem:[%s1383_s1 + $0xb4] ss:$8 sps:$4 sm:$0xff]   ;;  %s1303_s17 = scalar_lea.vmem %s1382_s0, %s959_s5 }
  0x16   : > { %714 = vmatprep.subr.bf16.mxu0 %v1021_v17  ;;  %v1060_v43 = vld [vmem:[%s1383_s1 + $0x1a0] ss:$8 sps:$4 sm:$0xff]   ;;  %v1063_v45 = vld [vmem:[%s1383_s1 + $0x1b4] ss:$8 sps:$4 sm:$0xff]   ;;  %v1065_v46 = vld [vmem:[%s1383_s1 + $0xb0] ss:$8 sps:$4 sm:$0xff]  }
  0x17   : > { %v1093_v47 = vld [vmem:[%s1303_s17 + $0x4] ss:$16 sps:$4 sm:$0xff]   ;;  %v1066_v48 = vld [vmem:[%s1383_s1 + $0x1b0] ss:$8 sps:$4 sm:$0xff]   ;;  %v1096_v51 = vld [vmem:[%s1303_s17 + $0xc] ss:$16 sps:$4 sm:$0xff]  }
  0x18   : > { %672 = vmatpush1.bf16.msra.mxu1 %v1023_v18  ;;  %v1067_v49 = vld [vmem:[%s1383_s1 + $0xc4] ss:$8 sps:$4 sm:$0xff]   ;;  %695 = vmatprep.mubr.bf16.mxu1 %v1093_v47  ;;  %v1071_v52 = vld [vmem:[%s1383_s1 + $0xc0] ss:$8 sps:$4 sm:$0xff]   ;;  %v1073_v54 = vld [vmem:[%s1383_s1 + $0xd4] ss:$8 sps:$4 sm:$0xff]  }
  0x19   : > { %715 = vmatpush1.bf16.msra.mxu0 %v1024_v19  ;;  %673 = vmatprep.subr.bf16.mxu1 %v1025_v20  ;;  %v1069_v50 = vld [vmem:[%s1383_s1 + $0x1c4] ss:$8 sps:$4 sm:$0xff]   ;;  %v1072_v53 = vld [vmem:[%s1383_s1 + $0x1c0] ss:$8 sps:$4 sm:$0xff]   ;;  %v1075_v55 = vld [vmem:[%s1383_s1 + $0x1d4] ss:$8 sps:$4 sm:$0xff]  }
  0x1a   : > { %716 = vmatprep.subr.bf16.mxu0 %v1027_v21  ;;  %738 = vmatprep.mubr.bf16.mxu0 %v1096_v51  ;;  %v1077_v56 = vld [vmem:[%s1383_s1 + $0xd0] ss:$8 sps:$4 sm:$0xff]   ;;  %v1079_v58 = vld [vmem:[%s1383_s1 + $0xe4] ss:$8 sps:$4 sm:$0xff]   ;;  %v1083_v60 = vld [vmem:[%s1383_s1 + $0xe0] ss:$8 sps:$4 sm:$0xff]  }
  0x1b   : > { %v1078_v57 = vld [vmem:[%s1383_s1 + $0x1d0] ss:$8 sps:$4 sm:$0xff]   ;;  %v1081_v59 = vld [vmem:[%s1383_s1 + $0x1e4] ss:$8 sps:$4 sm:$0xff]   ;;  %v1084_v61 = vld [vmem:[%s1383_s1 + $0x1e0] ss:$8 sps:$4 sm:$0xff]  }
  0x1c   : > { %674 = vmatpush1.bf16.msra.mxu1 %v1029_v22  ;;  %v1085_v62 = vld [vmem:[%s1383_s1 + $0xf4] ss:$8 sps:$4 sm:$0xff]   ;;  %v1089_v0 = vld [vmem:[%s1383_s1 + $0xf0] ss:$8 sps:$4 sm:$0xff]   ;;  %v311_v7 = vld [vmem:[%s1384_s2] sm:$0x3] }
  0x1d   : > { %717 = vmatpush1.bf16.msra.mxu0 %v1030_v23  ;;  %675 = vmatprep.subr.bf16.mxu1 %v1031_v24  ;;  %v1087_v63 = vld [vmem:[%s1383_s1 + $0x1f4] ss:$8 sps:$4 sm:$0xff]   ;;  %v1090_v1 = vld [vmem:[%s1383_s1 + $0x1f0] ss:$8 sps:$4 sm:$0xff]   ;;  %v316_v9 = vrot.slane %v311_v7, %v315_v6  ;;  %v320_v10 = vrot.slane %v311_v7, %v319_v8 }
  0x1e   : > { %718 = vmatprep.subr.bf16.mxu0 %v1033_v25  ;;  %v1091_v2 = vld [vmem:[%s1303_s17] ss:$16 sps:$4 sm:$0xff]   ;;  %v1094_v3 = vld [vmem:[%s1303_s17 + $0x8] ss:$16 sps:$4 sm:$0xff]   ;;  %s960_s17 = sshll.u32 %s1391_s30, 3 }
  0x1f   : > { %s240_s12 = scalar_lea.vmem %s1385_s3, %s960_s17 }
  0x20   : > { %676 = vmatpush1.bf16.msra.mxu1 %v1035_v26 }
  0x21   : > { %719 = vmatpush1.bf16.msra.mxu0 %v1036_v27  ;;  %677 = vmatprep.subr.bf16.mxu1 %v1037_v28 }
  0x22   : > { %720 = vmatprep.subr.bf16.mxu0 %v1039_v29 }
  0x24   : > { %678 = vmatpush1.bf16.msra.mxu1 %v1041_v30 }
  0x25   : > { %721 = vmatpush1.bf16.msra.mxu0 %v1042_v31  ;;  %679 = vmatprep.subr.bf16.mxu1 %v1043_v32 }
  0x26   : > { %722 = vmatprep.subr.bf16.mxu0 %v1045_v33 }
  0x28   : > { %680 = vmatpush1.bf16.msra.mxu1 %v1047_v34 }
  0x29   : > { %723 = vmatpush1.bf16.msra.mxu0 %v1048_v35  ;;  %681 = vmatprep.subr.bf16.mxu1 %v1049_v36 }
  0x2a   : > { %724 = vmatprep.subr.bf16.mxu0 %v1051_v37 }
  0x2c   : > { %682 = vmatpush1.bf16.msra.mxu1 %v1053_v38 }
  0x2d   : > { %725 = vmatpush1.bf16.msra.mxu0 %v1054_v39  ;;  %683 = vmatprep.subr.bf16.mxu1 %v1055_v40 }
  0x2e   : > { %726 = vmatprep.subr.bf16.mxu0 %v1057_v41 }
  0x30   : > { %684 = vmatpush1.bf16.msra.mxu1 %v1059_v42 }
  0x31   : > { %727 = vmatpush1.bf16.msra.mxu0 %v1060_v43  ;;  %685 = vmatprep.subr.bf16.mxu1 %v1061_v44 }
  0x32   : > { %728 = vmatprep.subr.bf16.mxu0 %v1063_v45 }
  0x34   : > { %686 = vmatpush1.bf16.msra.mxu1 %v1065_v46 }
  0x35   : > { %729 = vmatpush1.bf16.msra.mxu0 %v1066_v48  ;;  %687 = vmatprep.subr.bf16.mxu1 %v1067_v49 }
  0x36   : > { %730 = vmatprep.subr.bf16.mxu0 %v1069_v50 }
  0x38   : > { %688 = vmatpush1.bf16.msra.mxu1 %v1071_v52 }
  0x39   : > { %731 = vmatpush1.bf16.msra.mxu0 %v1072_v53  ;;  %689 = vmatprep.subr.bf16.mxu1 %v1073_v54 }
  0x3a   : > { %732 = vmatprep.subr.bf16.mxu0 %v1075_v55 }
  0x3c   : > { %690 = vmatpush1.bf16.msra.mxu1 %v1077_v56 }
  0x3d   : > { %733 = vmatpush1.bf16.msra.mxu0 %v1078_v57  ;;  %691 = vmatprep.subr.bf16.mxu1 %v1079_v58 }
  0x3e   : > { %734 = vmatprep.subr.bf16.mxu0 %v1081_v59 }
  0x40   : > { %692 = vmatpush1.bf16.msra.mxu1 %v1083_v60 }
  0x41   : > { %735 = vmatpush1.bf16.msra.mxu0 %v1084_v61  ;;  %693 = vmatprep.subr.bf16.mxu1 %v1085_v62 }
  0x42   : > { %736 = vmatprep.subr.bf16.mxu0 %v1087_v63 }
  0x44   : > { %694 = vmatpush1.bf16.msra.mxu1 %v1089_v0 }
  0x45   : > { %737 = vmatpush1.bf16.msra.mxu0 %v1090_v1 }
  0x47   : > { %696 = vmatmul.mubr.bf16.vlgmr.msra.gmra.mrb[0].mxu1 %v1091_v2 }
  0x48   : > { %739 = vmatmul.mubr.bf16.vlgmr.msra.gmra.mrb[0].mxu0 %v1094_v3 }
 0x11a   : > { %v697_v11 = vpop.f32.mrb[0].mxu1 }
 0x11b   : > { %v740_v12 = vpop.f32.mrb[0].mxu0  ;;  %v698_v13 = vadd.f32 %v697_v11, %v316_v9  ;;  %v699_v14 = vpop.f32.mrb[1].mxu1 }
 0x11c   : > { %v742_v15 = vpop.f32.mrb[1].mxu0  ;;  %v700_v16 = vadd.f32 %v699_v14, %v320_v10  ;;  %v701_v17 = vpop.f32.mrb[2].mxu1 }
 0x11d   : > { %v744_v18 = vpop.f32.mrb[2].mxu0  ;;  %v741_v19 = vadd.f32 %v740_v12, %v698_v13  ;;  %v702_v20 = vadd.f32 %v701_v17, %v316_v9  ;;  %v703_v21 = vpop.f32.mrb[3].mxu1 }
 0x11e   : > { %v746_v22 = vpop.f32.mrb[3].mxu0  ;;  %v743_v23 = vadd.f32 %v742_v15, %v700_v16  ;;  %v704_v24 = vadd.f32 %v703_v21, %v320_v10 }
 0x11f   : > { %v745_v25 = vadd.f32 %v744_v18, %v702_v20 }
 0x120   : > { %v961_v26 = vpack.c.bf16 %v743_v23, %v741_v19  ;;  %v747_v27 = vadd.f32 %v746_v22, %v704_v24 }
 0x122   : > { %761 = vst [vmem:[%s240_s12] sm:$0xff] %v961_v26  ;;  %v962_v28 = vpack.c.bf16 %v747_v27, %v745_v25 }
 0x124   : > { %762 = vst [vmem:[%s240_s12 + $0x8] sm:$0xff] %v962_v28 }
 0x125 PF: > { %s13_s14 = sadd.s32 1, %s1119_s14   ;;  %s1386_s12 = smov %s1115_s13 }
 0x126   : > { %p10_p5 = scmp.ge.s32.totalorder %s13_s14, 4   ;;  %s1387_s13 = smov %s1389_s15 }
 0x128   :  { %12 = sbr.rel (!%p10_p5) target bundleno = 2 (0x2), region = 68 }

// kernel: resnet_forward_pallas.27
= control target key start
LH: loop header
LB: loop body
LE: loop exit
PB: predicated region body
PF: predicated region fallthrough
CT: control target
= control target key end

     0   :  { %s1425_s12 = smov 0   ;;  %s1427_s13 = smov 0   ;;  %s1709_s0 = inlined_call_operand.vmem [shape: bf16[8,512], index: 0, kind: input, shape index: {}]   ;;  %s1710_s1 = inlined_call_operand.vmem [shape: bf16[512,1024], index: 1, kind: input, shape index: {}]   ;;  %s1711_s2 = inlined_call_operand.vmem [shape: f32[1,1024], index: 2, kind: input, shape index: {}]   ;;  %s1712_s3 = inlined_call_operand.vmem [shape: bf16[8,1024], index: 3, kind: output, shape index: {}]  }
   0x1   :  { %s1429_s14 = smov 0   ;;  %s1431_s15 = smov 0  }
   0x2   :  { %s1433_s16 = smov 0  }
   0x3 LB: > { %s22_s17 = sadd.s32 1, %s1399_s15  ;;  %p65_p1 = scmp.ne.s32.totalorder %s1391_s13, %s1387_s12  ;;  %s1403_s16 = sphi %s1433_s16, %s13_s16   ;;  %s1399_s15 = sphi %s1431_s15, %s1716_s15   ;;  %s1395_s14 = sphi %s1429_s14, %s1715_s14   ;;  %s1391_s13 = sphi %s1427_s13, %s1714_s13   ;;  %s1387_s12 = sphi %s1425_s12, %s1713_s12  }
   0x4   : > { %p23_p0 = scmp.ge.s32.totalorder %s22_s17, 4  ;;  %p66_p2 = scmp.eq.s32.totalorder %s1403_s16, 0 }
   0x5   : > { %s58_s19 = sadd.s32 1, %s1391_s13  ;;  %p1139_p5 = scmp.ge.s32.totalorder %s1403_s16, 4 }
   0x6   : > { %s1718_s17 = smov (%p23_p0, %s22_s17), 0  ;;  %p67_p3 = por %p66_p2, %p65_p1 }
   0x7   : > { %s55_s18 = ssub.s32 %s1399_s15, %s1718_s17  ;;  %153 = sbr.rel (%p1139_p5) target bundleno = 82 (0x52), region = 20 }
   0x8   : > { %p56_p4 = scmp.eq.s32.totalorder %s55_s18, 0 }
   0xa   : > { %s1460_s20 = scalar_select %p56_p4, %s1391_s13, %s58_s19  }
   0xe   : > { %156 = sbr.rel (!%p67_p3) target bundleno = 82 (0x52), region = 24  ;;  %s158_s21 = sand.u32 (%p67_p3), 1, %s1391_s13  }
   0xf   : > { %s1219_s22 = sshll.u32 (%p67_p3), %s1399_s15, 3  ;;  %s1140_s23 = sshll.u32 (%p67_p3), %s158_s21, 9 }
  0x10   : > { %s1468_s26 = scalar_lea.vmem (%p67_p3), %s1710_s1, %s1219_s22  ;;  %s1473_s27 = scalar_lea.vmem (%p67_p3), [#allocation2], %s1140_s23 }
  0x11   : > { %v317_v0 = vld [vmem:[%s1468_s26] sm:$0xff] (%p67_p3) }
  0x12   : > { %v319_v1 = vld [vmem:[%s1468_s26 + $0x20] sm:$0xff] (%p67_p3)  ;;  %318 = vst [vmem:[%s1473_s27] sm:$0xff] (%p67_p3), %v317_v0 }
  0x13   : > { %v321_v2 = vld [vmem:[%s1468_s26 + $0x40] sm:$0xff] (%p67_p3)  ;;  %320 = vst [vmem:[%s1473_s27 + $0x8] sm:$0xff] (%p67_p3), %v319_v1 }
  0x14   : > { %322 = vst [vmem:[%s1473_s27 + $0x10] sm:$0xff] (%p67_p3), %v321_v2  ;;  %v323_v3 = vld [vmem:[%s1468_s26 + $0x60] sm:$0xff] (%p67_p3) }
  0x15   : > { %v325_v4 = vld [vmem:[%s1468_s26 + $0x80] sm:$0xff]  ;;  %324 = vst [vmem:[%s1473_s27 + $0x18] sm:$0xff] %v323_v3 }
  0x16   : > { %v327_v5 = vld [vmem:[%s1468_s26 + $0xa0] sm:$0xff]  ;;  %326 = vst [vmem:[%s1473_s27 + $0x20] sm:$0xff] %v325_v4 }
  0x17   : > { %328 = vst [vmem:[%s1473_s27 + $0x28] sm:$0xff] %v327_v5  ;;  %v329_v6 = vld [vmem:[%s1468_s26 + $0xc0] sm:$0xff] }
  0x18   : > { %v331_v7 = vld [vmem:[%s1468_s26 + $0xe0] sm:$0xff]  ;;  %330 = vst [vmem:[%s1473_s27 + $0x30] sm:$0xff] %v329_v6 }
  0x19   : > { %v333_v8 = vld [vmem:[%s1468_s26 + $0x100] sm:$0xff]  ;;  %332 = vst [vmem:[%s1473_s27 + $0x38] sm:$0xff] %v331_v7 }
  0x1a   : > { %334 = vst [vmem:[%s1473_s27 + $0x40] sm:$0xff] %v333_v8  ;;  %v335_v9 = vld [vmem:[%s1468_s26 + $0x120] sm:$0xff] }
  0x1b   : > { %v337_v10 = vld [vmem:[%s1468_s26 + $0x140] sm:$0xff]  ;;  %336 = vst [vmem:[%s1473_s27 + $0x48] sm:$0xff] %v335_v9 }
  0x1c   : > { %v339_v11 = vld [vmem:[%s1468_s26 + $0x160] sm:$0xff]  ;;  %338 = vst [vmem:[%s1473_s27 + $0x50] sm:$0xff] %v337_v10 }
  0x1d   : > { %340 = vst [vmem:[%s1473_s27 + $0x58] sm:$0xff] %v339_v11  ;;  %v341_v12 = vld [vmem:[%s1468_s26 + $0x180] sm:$0xff] }
  0x1e   : > { %v343_v13 = vld [vmem:[%s1468_s26 + $0x1a0] sm:$0xff]  ;;  %342 = vst [vmem:[%s1473_s27 + $0x60] sm:$0xff] %v341_v12 }
  0x1f   : > { %v345_v14 = vld [vmem:[%s1468_s26 + $0x1c0] sm:$0xff]  ;;  %344 = vst [vmem:[%s1473_s27 + $0x68] sm:$0xff] %v343_v13 }
  0x20   : > { %346 = vst [vmem:[%s1473_s27 + $0x70] sm:$0xff] %v345_v14  ;;  %v347_v15 = vld [vmem:[%s1468_s26 + $0x1e0] sm:$0xff] }
  0x21   : > { %v349_v16 = vld [vmem:[%s1468_s26 + $0x200] sm:$0xff]  ;;  %348 = vst [vmem:[%s1473_s27 + $0x78] sm:$0xff] %v347_v15 }
  0x22   : > { %v351_v17 = vld [vmem:[%s1468_s26 + $0x220] sm:$0xff]  ;;  %350 = vst [vmem:[%s1473_s27 + $0x80] sm:$0xff] %v349_v16 }
  0x23   : > { %352 = vst [vmem:[%s1473_s27 + $0x88] sm:$0xff] %v351_v17  ;;  %v353_v18 = vld [vmem:[%s1468_s26 + $0x240] sm:$0xff] }
  0x24   : > { %v355_v19 = vld [vmem:[%s1468_s26 + $0x260] sm:$0xff]  ;;  %354 = vst [vmem:[%s1473_s27 + $0x90] sm:$0xff] %v353_v18 }
  0x25   : > { %v357_v20 = vld [vmem:[%s1468_s26 + $0x280] sm:$0xff]  ;;  %356 = vst [vmem:[%s1473_s27 + $0x98] sm:$0xff] %v355_v19 }
  0x26   : > { %358 = vst [vmem:[%s1473_s27 + $0xa0] sm:$0xff] %v357_v20  ;;  %v359_v21 = vld [vmem:[%s1468_s26 + $0x2a0] sm:$0xff] }
  0x27   : > { %v361_v22 = vld [vmem:[%s1468_s26 + $0x2c0] sm:$0xff]  ;;  %360 = vst [vmem:[%s1473_s27 + $0xa8] sm:$0xff] %v359_v21 }
  0x28   : > { %v363_v23 = vld [vmem:[%s1468_s26 + $0x2e0] sm:$0xff]  ;;  %362 = vst [vmem:[%s1473_s27 + $0xb0] sm:$0xff] %v361_v22 }
  0x29   : > { %364 = vst [vmem:[%s1473_s27 + $0xb8] sm:$0xff] %v363_v23  ;;  %v365_v24 = vld [vmem:[%s1468_s26 + $0x300] sm:$0xff] }
  0x2a   : > { %v367_v25 = vld [vmem:[%s1468_s26 + $0x320] sm:$0xff]  ;;  %366 = vst [vmem:[%s1473_s27 + $0xc0] sm:$0xff] %v365_v24 }
  0x2b   : > { %v369_v26 = vld [vmem:[%s1468_s26 + $0x340] sm:$0xff]  ;;  %368 = vst [vmem:[%s1473_s27 + $0xc8] sm:$0xff] %v367_v25 }
  0x2c   : > { %370 = vst [vmem:[%s1473_s27 + $0xd0] sm:$0xff] %v369_v26  ;;  %v371_v27 = vld [vmem:[%s1468_s26 + $0x360] sm:$0xff] }
  0x2d   : > { %v373_v28 = vld [vmem:[%s1468_s26 + $0x380] sm:$0xff]  ;;  %372 = vst [vmem:[%s1473_s27 + $0xd8] sm:$0xff] %v371_v27 }
  0x2e   : > { %v375_v29 = vld [vmem:[%s1468_s26 + $0x3a0] sm:$0xff]  ;;  %374 = vst [vmem:[%s1473_s27 + $0xe0] sm:$0xff] %v373_v28 }
  0x2f   : > { %376 = vst [vmem:[%s1473_s27 + $0xe8] sm:$0xff] %v375_v29  ;;  %v377_v30 = vld [vmem:[%s1468_s26 + $0x3c0] sm:$0xff] }
  0x30   : > { %v379_v31 = vld [vmem:[%s1468_s26 + $0x3e0] sm:$0xff]  ;;  %378 = vst [vmem:[%s1473_s27 + $0xf0] sm:$0xff] %v377_v30 }
  0x31   : > { %v381_v32 = vld [vmem:[%s1468_s26 + $0x400] sm:$0xff]  ;;  %380 = vst [vmem:[%s1473_s27 + $0xf8] sm:$0xff] %v379_v31 }
  0x32   : > { %382 = vst [vmem:[%s1473_s27 + $0x100] sm:$0xff] %v381_v32  ;;  %v383_v33 = vld [vmem:[%s1468_s26 + $0x420] sm:$0xff] }
  0x33   : > { %v385_v34 = vld [vmem:[%s1468_s26 + $0x440] sm:$0xff]  ;;  %384 = vst [vmem:[%s1473_s27 + $0x108] sm:$0xff] %v383_v33 }
  0x34   : > { %v387_v35 = vld [vmem:[%s1468_s26 + $0x460] sm:$0xff]  ;;  %386 = vst [vmem:[%s1473_s27 + $0x110] sm:$0xff] %v385_v34 }
  0x35   : > { %388 = vst [vmem:[%s1473_s27 + $0x118] sm:$0xff] %v387_v35  ;;  %v389_v36 = vld [vmem:[%s1468_s26 + $0x480] sm:$0xff] }
  0x36   : > { %v391_v37 = vld [vmem:[%s1468_s26 + $0x4a0] sm:$0xff]  ;;  %390 = vst [vmem:[%s1473_s27 + $0x120] sm:$0xff] %v389_v36 }
  0x37   : > { %v393_v38 = vld [vmem:[%s1468_s26 + $0x4c0] sm:$0xff]  ;;  %392 = vst [vmem:[%s1473_s27 + $0x128] sm:$0xff] %v391_v37 }
  0x38   : > { %394 = vst [vmem:[%s1473_s27 + $0x130] sm:$0xff] %v393_v38  ;;  %v395_v39 = vld [vmem:[%s1468_s26 + $0x4e0] sm:$0xff] }
  0x39   : > { %v397_v40 = vld [vmem:[%s1468_s26 + $0x500] sm:$0xff]  ;;  %396 = vst [vmem:[%s1473_s27 + $0x138] sm:$0xff] %v395_v39 }
  0x3a   : > { %v399_v41 = vld [vmem:[%s1468_s26 + $0x520] sm:$0xff]  ;;  %398 = vst [vmem:[%s1473_s27 + $0x140] sm:$0xff] %v397_v40 }
  0x3b   : > { %400 = vst [vmem:[%s1473_s27 + $0x148] sm:$0xff] %v399_v41  ;;  %v401_v42 = vld [vmem:[%s1468_s26 + $0x540] sm:$0xff] }
  0x3c   : > { %v403_v43 = vld [vmem:[%s1468_s26 + $0x560] sm:$0xff]  ;;  %402 = vst [vmem:[%s1473_s27 + $0x150] sm:$0xff] %v401_v42 }
  0x3d   : > { %v405_v44 = vld [vmem:[%s1468_s26 + $0x580] sm:$0xff]  ;;  %404 = vst [vmem:[%s1473_s27 + $0x158] sm:$0xff] %v403_v43 }
  0x3e   : > { %406 = vst [vmem:[%s1473_s27 + $0x160] sm:$0xff] %v405_v44  ;;  %v407_v45 = vld [vmem:[%s1468_s26 + $0x5a0] sm:$0xff] }
  0x3f   : > { %v409_v46 = vld [vmem:[%s1468_s26 + $0x5c0] sm:$0xff]  ;;  %408 = vst [vmem:[%s1473_s27 + $0x168] sm:$0xff] %v407_v45 }
  0x40   : > { %v411_v47 = vld [vmem:[%s1468_s26 + $0x5e0] sm:$0xff]  ;;  %410 = vst [vmem:[%s1473_s27 + $0x170] sm:$0xff] %v409_v46 }
  0x41   : > { %412 = vst [vmem:[%s1473_s27 + $0x178] sm:$0xff] %v411_v47  ;;  %v413_v48 = vld [vmem:[%s1468_s26 + $0x600] sm:$0xff] }
  0x42   : > { %v415_v49 = vld [vmem:[%s1468_s26 + $0x620] sm:$0xff]  ;;  %414 = vst [vmem:[%s1473_s27 + $0x180] sm:$0xff] %v413_v48 }
  0x43   : > { %v417_v50 = vld [vmem:[%s1468_s26 + $0x640] sm:$0xff]  ;;  %416 = vst [vmem:[%s1473_s27 + $0x188] sm:$0xff] %v415_v49 }
  0x44   : > { %418 = vst [vmem:[%s1473_s27 + $0x190] sm:$0xff] %v417_v50  ;;  %v419_v51 = vld [vmem:[%s1468_s26 + $0x660] sm:$0xff] }
  0x45   : > { %v421_v52 = vld [vmem:[%s1468_s26 + $0x680] sm:$0xff]  ;;  %420 = vst [vmem:[%s1473_s27 + $0x198] sm:$0xff] %v419_v51 }
  0x46   : > { %v423_v53 = vld [vmem:[%s1468_s26 + $0x6a0] sm:$0xff]  ;;  %422 = vst [vmem:[%s1473_s27 + $0x1a0] sm:$0xff] %v421_v52 }
  0x47   : > { %424 = vst [vmem:[%s1473_s27 + $0x1a8] sm:$0xff] %v423_v53  ;;  %v425_v54 = vld [vmem:[%s1468_s26 + $0x6c0] sm:$0xff] }
  0x48   : > { %v427_v55 = vld [vmem:[%s1468_s26 + $0x6e0] sm:$0xff]  ;;  %426 = vst [vmem:[%s1473_s27 + $0x1b0] sm:$0xff] %v425_v54 }
  0x49   : > { %v429_v56 = vld [vmem:[%s1468_s26 + $0x700] sm:$0xff]  ;;  %428 = vst [vmem:[%s1473_s27 + $0x1b8] sm:$0xff] %v427_v55 }
  0x4a   : > { %430 = vst [vmem:[%s1473_s27 + $0x1c0] sm:$0xff] %v429_v56  ;;  %v431_v57 = vld [vmem:[%s1468_s26 + $0x720] sm:$0xff] }
  0x4b   : > { %v433_v58 = vld [vmem:[%s1468_s26 + $0x740] sm:$0xff]  ;;  %432 = vst [vmem:[%s1473_s27 + $0x1c8] sm:$0xff] %v431_v57 }
  0x4c   : > { %v435_v59 = vld [vmem:[%s1468_s26 + $0x760] sm:$0xff]  ;;  %434 = vst [vmem:[%s1473_s27 + $0x1d0] sm:$0xff] %v433_v58 }
  0x4d   : > { %436 = vst [vmem:[%s1473_s27 + $0x1d8] sm:$0xff] %v435_v59  ;;  %v437_v60 = vld [vmem:[%s1468_s26 + $0x780] sm:$0xff] }
  0x4e   : > { %v439_v61 = vld [vmem:[%s1468_s26 + $0x7a0] sm:$0xff]  ;;  %438 = vst [vmem:[%s1473_s27 + $0x1e0] sm:$0xff] %v437_v60 }
  0x4f   : > { %v441_v62 = vld [vmem:[%s1468_s26 + $0x7c0] sm:$0xff]  ;;  %440 = vst [vmem:[%s1473_s27 + $0x1e8] sm:$0xff] %v439_v61 }
  0x50   : > { %442 = vst [vmem:[%s1473_s27 + $0x1f0] sm:$0xff] %v441_v62  ;;  %v443_v63 = vld [vmem:[%s1468_s26 + $0x7e0] sm:$0xff] }
  0x51   : > { %444 = vst [vmem:[%s1473_s27 + $0x1f8] sm:$0xff] %v443_v63 }
  0x52 PF: > { %p1143_p6 = scmp.ge.s32.totalorder %s1403_s16, 1  ;;  %p457_p7 = scmp.lt.s32.totalorder %s1403_s16, 5 }
  0x54   : > { %p458_p8 = pnand %p1143_p6, %p457_p7 }
  0x55   : > { %s464_s28 = sand.u32 (!%p458_p8), 1, %s1387_s12   ;;  %v1606_v0 = vld [vmem:[%s1709_s0] sm:$0xff] (!%p458_p8)  ;;  %v1611_v1 = vld [vmem:[%s1709_s0 + $0x8] sm:$0xff] (!%p458_p8)  ;;  %s1145_s8 = sshll.u32 (!%p458_p8), %s1395_s14, 1 }
  0x56   : > { %461 = sbr.rel (%p458_p8) target bundleno = 373 (0x175), region = 66  ;;  %s1144_s6 = sshll.u32 (!%p458_p8), %s464_s28, 9  ;;  %v1149_v2 = vcombine.high (!%p458_p8), %v1606_v0, %v1606_v0  ;;  %v1151_v3 = vcombine.high (!%p458_p8), %v1611_v1, %v1611_v1 }
  0x57   : > { %s1617_s7 = scalar_lea.vmem (!%p458_p8), [#allocation2], %s1144_s6  ;;  %p507_p9 = scmp.lt.s32.totalorder (!%p458_p8), %s1145_s8, 7 }
  0x58   : > { %v1265_v4 = vld [vmem:[%s1617_s7 + $0x4] ss:$8 sps:$4 sm:$0xff] (!%p458_p8)   ;;  %965 = vmatprep.mubr.bf16.mxu1 (!%p458_p8), %v1149_v2  ;;  %1006 = vmatprep.mubr.bf16.mxu0 (!%p458_p8), %v1151_v3  ;;  %v1269_v6 = vld [vmem:[%s1617_s7] ss:$8 sps:$4 sm:$0xff] (!%p458_p8)   ;;  %v1271_v8 = vld [vmem:[%s1617_s7 + $0x14] ss:$8 sps:$4 sm:$0xff] (!%p458_p8)  }
  0x59   : > { %v1267_v5 = vld [vmem:[%s1617_s7 + $0x104] ss:$8 sps:$4 sm:$0xff] (!%p458_p8)   ;;  %933 = vmatprep.subr.bf16.mxu1 (!%p458_p8), %v1265_v4  ;;  %v1270_v7 = vld [vmem:[%s1617_s7 + $0x100] ss:$8 sps:$4 sm:$0xff] (!%p458_p8)   ;;  %v1273_v9 = vld [vmem:[%s1617_s7 + $0x114] ss:$8 sps:$4 sm:$0xff] (!%p458_p8)  }
  0x5a   : > { %974 = vmatprep.subr.bf16.mxu0 (!%p458_p8), %v1267_v5  ;;  %934 = vmatpush1.bf16.msra.mxu1 (!%p458_p8), %v1269_v6  ;;  %v1275_v10 = vld [vmem:[%s1617_s7 + $0x10] ss:$8 sps:$4 sm:$0xff] (!%p458_p8)   ;;  %v1277_v12 = vld [vmem:[%s1617_s7 + $0x24] ss:$8 sps:$4 sm:$0xff] (!%p458_p8)   ;;  %v1281_v14 = vld [vmem:[%s1617_s7 + $0x20] ss:$8 sps:$4 sm:$0xff] (!%p458_p8)   ;;  %v1148_v6 = vcombine.low (!%p458_p8), %v1606_v0, %v1606_v0 }
  0x5b   : > { %975 = vmatpush1.bf16.msra.mxu0 (!%p458_p8), %v1270_v7  ;;  %935 = vmatprep.subr.bf16.mxu1 (!%p458_p8), %v1271_v8  ;;  %v1276_v11 = vld [vmem:[%s1617_s7 + $0x110] ss:$8 sps:$4 sm:$0xff] (!%p458_p8)   ;;  %v1279_v13 = vld [vmem:[%s1617_s7 + $0x124] ss:$8 sps:$4 sm:$0xff] (!%p458_p8)   ;;  %v1282_v15 = vld [vmem:[%s1617_s7 + $0x120] ss:$8 sps:$4 sm:$0xff] (!%p458_p8)   ;;  %v1150_v7 = vcombine.low (!%p458_p8), %v1611_v1, %v1611_v1  ;;  %v589_v8 = vlaneseq (!%p458_p8) }
  0x5c   : > { %976 = vmatprep.subr.bf16.mxu0 (!%p458_p8), %v1273_v9  ;;  %v1283_v16 = vld [vmem:[%s1617_s7 + $0x34] ss:$8 sps:$4 sm:$0xff] (!%p458_p8)   ;;  %v1287_v18 = vld [vmem:[%s1617_s7 + $0x30] ss:$8 sps:$4 sm:$0xff] (!%p458_p8)   ;;  %v1289_v20 = vld [vmem:[%s1617_s7 + $0x44] ss:$8 sps:$4 sm:$0xff] (!%p458_p8)  }
  0x5d   : > { %v1285_v17 = vld [vmem:[%s1617_s7 + $0x134] ss:$8 sps:$4 sm:$0xff]   ;;  %v1288_v19 = vld [vmem:[%s1617_s7 + $0x130] ss:$8 sps:$4 sm:$0xff]   ;;  %v1291_v21 = vld [vmem:[%s1617_s7 + $0x144] ss:$8 sps:$4 sm:$0xff]  }
  0x5e   : > { %936 = vmatpush1.bf16.msra.mxu1 %v1275_v10  ;;  %v1293_v22 = vld [vmem:[%s1617_s7 + $0x40] ss:$8 sps:$4 sm:$0xff]   ;;  %v1295_v24 = vld [vmem:[%s1617_s7 + $0x54] ss:$8 sps:$4 sm:$0xff]   ;;  %v1299_v26 = vld [vmem:[%s1617_s7 + $0x50] ss:$8 sps:$4 sm:$0xff]  }
  0x5f   : > { %977 = vmatpush1.bf16.msra.mxu0 %v1276_v11  ;;  %937 = vmatprep.subr.bf16.mxu1 %v1277_v12  ;;  %v1294_v23 = vld [vmem:[%s1617_s7 + $0x140] ss:$8 sps:$4 sm:$0xff]   ;;  %v1297_v25 = vld [vmem:[%s1617_s7 + $0x154] ss:$8 sps:$4 sm:$0xff]   ;;  %v1300_v27 = vld [vmem:[%s1617_s7 + $0x150] ss:$8 sps:$4 sm:$0xff]  }
  0x60   : > { %978 = vmatprep.subr.bf16.mxu0 %v1279_v13  ;;  %v1301_v28 = vld [vmem:[%s1617_s7 + $0x64] ss:$8 sps:$4 sm:$0xff]   ;;  %v1305_v30 = vld [vmem:[%s1617_s7 + $0x60] ss:$8 sps:$4 sm:$0xff]   ;;  %v1307_v32 = vld [vmem:[%s1617_s7 + $0x74] ss:$8 sps:$4 sm:$0xff]  }
  0x61   : > { %v1303_v29 = vld [vmem:[%s1617_s7 + $0x164] ss:$8 sps:$4 sm:$0xff]   ;;  %v1306_v31 = vld [vmem:[%s1617_s7 + $0x160] ss:$8 sps:$4 sm:$0xff]   ;;  %v1309_v33 = vld [vmem:[%s1617_s7 + $0x174] ss:$8 sps:$4 sm:$0xff]  }
  0x62   : > { %938 = vmatpush1.bf16.msra.mxu1 %v1281_v14  ;;  %v1311_v34 = vld [vmem:[%s1617_s7 + $0x70] ss:$8 sps:$4 sm:$0xff]   ;;  %v1313_v36 = vld [vmem:[%s1617_s7 + $0x84] ss:$8 sps:$4 sm:$0xff]   ;;  %v1317_v38 = vld [vmem:[%s1617_s7 + $0x80] ss:$8 sps:$4 sm:$0xff]  }
  0x63   : > { %979 = vmatpush1.bf16.msra.mxu0 %v1282_v15  ;;  %939 = vmatprep.subr.bf16.mxu1 %v1283_v16  ;;  %v1312_v35 = vld [vmem:[%s1617_s7 + $0x170] ss:$8 sps:$4 sm:$0xff]   ;;  %v1315_v37 = vld [vmem:[%s1617_s7 + $0x184] ss:$8 sps:$4 sm:$0xff]   ;;  %v1318_v39 = vld [vmem:[%s1617_s7 + $0x180] ss:$8 sps:$4 sm:$0xff]  }
  0x64   : > { %980 = vmatprep.subr.bf16.mxu0 %v1285_v17  ;;  %v1319_v40 = vld [vmem:[%s1617_s7 + $0x94] ss:$8 sps:$4 sm:$0xff]   ;;  %v1323_v42 = vld [vmem:[%s1617_s7 + $0x90] ss:$8 sps:$4 sm:$0xff]   ;;  %v1325_v44 = vld [vmem:[%s1617_s7 + $0xa4] ss:$8 sps:$4 sm:$0xff]  }
  0x65   : > { %v1321_v41 = vld [vmem:[%s1617_s7 + $0x194] ss:$8 sps:$4 sm:$0xff]   ;;  %v1324_v43 = vld [vmem:[%s1617_s7 + $0x190] ss:$8 sps:$4 sm:$0xff]   ;;  %v1327_v45 = vld [vmem:[%s1617_s7 + $0x1a4] ss:$8 sps:$4 sm:$0xff]  }
  0x66   : > { %940 = vmatpush1.bf16.msra.mxu1 %v1287_v18  ;;  %v1329_v46 = vld [vmem:[%s1617_s7 + $0xa0] ss:$8 sps:$4 sm:$0xff]   ;;  %v1331_v48 = vld [vmem:[%s1617_s7 + $0xb4] ss:$8 sps:$4 sm:$0xff]   ;;  %v1335_v50 = vld [vmem:[%s1617_s7 + $0xb0] ss:$8 sps:$4 sm:$0xff]  }
  0x67   : > { %981 = vmatpush1.bf16.msra.mxu0 %v1288_v19  ;;  %941 = vmatprep.subr.bf16.mxu1 %v1289_v20  ;;  %v1330_v47 = vld [vmem:[%s1617_s7 + $0x1a0] ss:$8 sps:$4 sm:$0xff]   ;;  %v1333_v49 = vld [vmem:[%s1617_s7 + $0x1b4] ss:$8 sps:$4 sm:$0xff]   ;;  %v1336_v51 = vld [vmem:[%s1617_s7 + $0x1b0] ss:$8 sps:$4 sm:$0xff]  }
  0x68   : > { %982 = vmatprep.subr.bf16.mxu0 %v1291_v21  ;;  %v1337_v52 = vld [vmem:[%s1617_s7 + $0xc4] ss:$8 sps:$4 sm:$0xff]   ;;  %v1341_v54 = vld [vmem:[%s1617_s7 + $0xc0] ss:$8 sps:$4 sm:$0xff]   ;;  %v1343_v56 = vld [vmem:[%s1617_s7 + $0xd4] ss:$8 sps:$4 sm:$0xff]  }
  0x69   : > { %v1339_v53 = vld [vmem:[%s1617_s7 + $0x1c4] ss:$8 sps:$4 sm:$0xff]   ;;  %v1342_v55 = vld [vmem:[%s1617_s7 + $0x1c0] ss:$8 sps:$4 sm:$0xff]   ;;  %v1345_v57 = vld [vmem:[%s1617_s7 + $0x1d4] ss:$8 sps:$4 sm:$0xff]  }
  0x6a   : > { %942 = vmatpush1.bf16.msra.mxu1 %v1293_v22  ;;  %v1347_v58 = vld [vmem:[%s1617_s7 + $0xd0] ss:$8 sps:$4 sm:$0xff]   ;;  %v1349_v60 = vld [vmem:[%s1617_s7 + $0xe4] ss:$8 sps:$4 sm:$0xff]   ;;  %v1353_v62 = vld [vmem:[%s1617_s7 + $0xe0] ss:$8 sps:$4 sm:$0xff]  }
  0x6b   : > { %983 = vmatpush1.bf16.msra.mxu0 %v1294_v23  ;;  %943 = vmatprep.subr.bf16.mxu1 %v1295_v24  ;;  %v1348_v59 = vld [vmem:[%s1617_s7 + $0x1d0] ss:$8 sps:$4 sm:$0xff]   ;;  %v1351_v61 = vld [vmem:[%s1617_s7 + $0x1e4] ss:$8 sps:$4 sm:$0xff]   ;;  %v1354_v63 = vld [vmem:[%s1617_s7 + $0x1e0] ss:$8 sps:$4 sm:$0xff]  }
  0x6c   : > { %984 = vmatprep.subr.bf16.mxu0 %v1297_v25  ;;  %v1355_v2 = vld [vmem:[%s1617_s7 + $0xf4] ss:$8 sps:$4 sm:$0xff]   ;;  %v1359_v4 = vld [vmem:[%s1617_s7 + $0xf0] ss:$8 sps:$4 sm:$0xff]   ;;  %s1720_s8 = smov (!%p507_p9, %s1145_s8), 7  ;;  %v590_v9 = vshrl.u32 %v589_v8, 7 }
  0x6d   : > { %v1357_v3 = vld [vmem:[%s1617_s7 + $0x1f4] ss:$8 sps:$4 sm:$0xff]   ;;  %v1360_v5 = vld [vmem:[%s1617_s7 + $0x1f0] ss:$8 sps:$4 sm:$0xff]   ;;  %s509_s11 = scalar_lea.vmem %s1711_s2, %s1720_s8  ;;  %s1147_s12 = sshll.u32 %s1720_s8, 2 }
  0x6e   : > { %944 = vmatpush1.bf16.msra.mxu1 %v1299_v26  ;;  %v591_v10 = vsub.s32 0, %v590_v9  ;;  %v587_v11 = vld [vmem:[%s509_s11] sm:$0x3]  ;;  %v595_v12 = vsub.s32 1, %v590_v9  ;;  %s519_s19 = scalar_lea.vmem %s1712_s3, %s1147_s12 }
  0x6f   : > { %985 = vmatpush1.bf16.msra.mxu0 %v1300_v27  ;;  %945 = vmatprep.subr.bf16.mxu1 %v1301_v28 }
  0x70   : > { %986 = vmatprep.subr.bf16.mxu0 %v1303_v29  ;;  %v592_v0 = vrot.slane %v587_v11, %v591_v10  ;;  %v596_v13 = vrot.slane %v587_v11, %v595_v12 }
  0x72   : > { %946 = vmatpush1.bf16.msra.mxu1 %v1305_v30 }
  0x73   : > { %987 = vmatpush1.bf16.msra.mxu0 %v1306_v31  ;;  %947 = vmatprep.subr.bf16.mxu1 %v1307_v32 }
  0x74   : > { %988 = vmatprep.subr.bf16.mxu0 %v1309_v33 }
  0x76   : > { %948 = vmatpush1.bf16.msra.mxu1 %v1311_v34 }
  0x77   : > { %989 = vmatpush1.bf16.msra.mxu0 %v1312_v35  ;;  %949 = vmatprep.subr.bf16.mxu1 %v1313_v36 }
  0x78   : > { %990 = vmatprep.subr.bf16.mxu0 %v1315_v37 }
  0x7a   : > { %950 = vmatpush1.bf16.msra.mxu1 %v1317_v38 }
  0x7b   : > { %991 = vmatpush1.bf16.msra.mxu0 %v1318_v39  ;;  %951 = vmatprep.subr.bf16.mxu1 %v1319_v40 }
  0x7c   : > { %992 = vmatprep.subr.bf16.mxu0 %v1321_v41 }
  0x7e   : > { %952 = vmatpush1.bf16.msra.mxu1 %v1323_v42 }
  0x7f   : > { %993 = vmatpush1.bf16.msra.mxu0 %v1324_v43  ;;  %953 = vmatprep.subr.bf16.mxu1 %v1325_v44 }
  0x80   : > { %994 = vmatprep.subr.bf16.mxu0 %v1327_v45 }
  0x82   : > { %954 = vmatpush1.bf16.msra.mxu1 %v1329_v46 }
  0x83   : > { %995 = vmatpush1.bf16.msra.mxu0 %v1330_v47  ;;  %955 = vmatprep.subr.bf16.mxu1 %v1331_v48 }
  0x84   : > { %996 = vmatprep.subr.bf16.mxu0 %v1333_v49 }
  0x86   : > { %956 = vmatpush1.bf16.msra.mxu1 %v1335_v50 }
  0x87   : > { %997 = vmatpush1.bf16.msra.mxu0 %v1336_v51  ;;  %957 = vmatprep.subr.bf16.mxu1 %v1337_v52 }
  0x88   : > { %998 = vmatprep.subr.bf16.mxu0 %v1339_v53 }
  0x8a   : > { %958 = vmatpush1.bf16.msra.mxu1 %v1341_v54 }
  0x8b   : > { %999 = vmatpush1.bf16.msra.mxu0 %v1342_v55  ;;  %959 = vmatprep.subr.bf16.mxu1 %v1343_v56 }
  0x8c   : > { %1000 = vmatprep.subr.bf16.mxu0 %v1345_v57 }
  0x8e   : > { %960 = vmatpush1.bf16.msra.mxu1 %v1347_v58 }
  0x8f   : > { %1001 = vmatpush1.bf16.msra.mxu0 %v1348_v59  ;;  %961 = vmatprep.subr.bf16.mxu1 %v1349_v60 }
  0x90   : > { %1002 = vmatprep.subr.bf16.mxu0 %v1351_v61 }
  0x92   : > { %962 = vmatpush1.bf16.msra.mxu1 %v1353_v62 }
  0x93   : > { %1003 = vmatpush1.bf16.msra.mxu0 %v1354_v63  ;;  %963 = vmatprep.subr.bf16.mxu1 %v1355_v2 }
  0x94   : > { %1004 = vmatprep.subr.bf16.mxu0 %v1357_v3 }
  0x96   : > { %964 = vmatpush1.bf16.msra.mxu1 %v1359_v4 }
  0x97   : > { %1005 = vmatpush1.bf16.msra.mxu0 %v1360_v5 }
  0x99   : > { %966 = vmatmul.mubr.bf16.vlgmr.msra.gmra.mrb[0].mxu1 %v1148_v6 }
  0x9a   : > { %1007 = vmatmul.mubr.bf16.vlgmr.msra.gmra.mrb[0].mxu0 %v1150_v7 }
 0x16c   : > { %v967_v14 = vpop.f32.mrb[0].mxu1 }
 0x16d   : > { %v1008_v1 = vpop.f32.mrb[0].mxu0  ;;  %v968_v15 = vadd.f32 %v967_v14, %v592_v0  ;;  %v969_v16 = vpop.f32.mrb[1].mxu1 }
 0x16e   : > { %v1010_v17 = vpop.f32.mrb[1].mxu0  ;;  %v970_v18 = vadd.f32 %v969_v16, %v596_v13  ;;  %v971_v19 = vpop.f32.mrb[2].mxu1 }
 0x16f   : > { %v1012_v20 = vpop.f32.mrb[2].mxu0  ;;  %v1009_v21 = vadd.f32 %v1008_v1, %v968_v15  ;;  %v972_v22 = vpop.f32.mrb[3].mxu1 }
 0x170   : > { %v1013_v23 = vpop.f32.mrb[3].mxu0  ;;  %v1011_v24 = vadd.f32 %v1010_v17, %v970_v18 }
 0x172   : > { %v1220_v25 = vpack.c.bf16 %v1011_v24, %v1009_v21 }
 0x174   : > { %1023 = vst [vmem:[%s519_s19] sm:$0xff] %v1220_v25 }
 0x175 PF: > { %s13_s16 = sadd.s32 1, %s1403_s16   ;;  %s1713_s12 = smov %s1391_s13 }
 0x176   : > { %p10_p10 = scmp.ge.s32.totalorder %s13_s16, 6   ;;  %s1714_s13 = smov %s1460_s20 }
 0x177   : > { %s1715_s14 = smov %s1399_s15  ;;  %s1716_s15 = smov %s1718_s17 }
 0x178   :  { %12 = sbr.rel (!%p10_p10) target bundleno = 3 (0x3), region = 111 }

// kernel: resnet_forward_pallas.30
= control target key start
LH: loop header
LB: loop body
LE: loop exit
PB: predicated region body
PF: predicated region fallthrough
CT: control target
= control target key end

     0   :  { %s1063_s15 = smov 0   ;;  %s1065_s16 = smov 0   ;;  %s1245_s0 = inlined_call_operand.vmem [shape: bf16[8,256], index: 0, kind: input, shape index: {}]   ;;  %s1246_s1 = inlined_call_operand.vmem [shape: bf16[256,1024], index: 1, kind: input, shape index: {}]   ;;  %s1247_s2 = inlined_call_operand.vmem [shape: f32[1,1024], index: 2, kind: input, shape index: {}]   ;;  %s1248_s3 = inlined_call_operand.vmem [shape: bf16[8,1024], index: 3, kind: input, shape index: {}]   ;;  %s1249_s4 = inlined_call_operand.vmem [shape: bf16[8,1024], index: 4, kind: output, shape index: {}]  }
   0x1   :  { %s1067_s17 = smov 0   ;;  %s1069_s18 = smov 0  }
   0x2   :  { %s1071_s19 = smov 0  }
   0x3 LB: > { %s23_s20 = sadd.s32 1, %s1032_s18  ;;  %p66_p1 = scmp.ne.s32.totalorder %s1024_s16, %s1020_s15  ;;  %s1036_s19 = sphi %s1071_s19, %s14_s19   ;;  %s1032_s18 = sphi %s1069_s18, %s1253_s18   ;;  %s1028_s17 = sphi %s1067_s17, %s1252_s17   ;;  %s1024_s16 = sphi %s1065_s16, %s1251_s16   ;;  %s1020_s15 = sphi %s1063_s15, %s1250_s15  }
   0x4   : > { %p24_p0 = scmp.ge.s32.totalorder %s23_s20, 4  ;;  %p67_p2 = scmp.eq.s32.totalorder %s1036_s19, 0 }
   0x5   : > { %s59_s22 = sadd.s32 1, %s1024_s16  ;;  %p858_p5 = scmp.ge.s32.totalorder %s1036_s19, 4 }
   0x6   : > { %s1255_s20 = smov (%p24_p0, %s23_s20), 0  ;;  %p68_p3 = por %p67_p2, %p66_p1 }
   0x7   : > { %s56_s21 = ssub.s32 %s1032_s18, %s1255_s20  ;;  %182 = sbr.rel (%p858_p5) target bundleno = 50 (0x32), region = 20 }
   0x8   : > { %p57_p4 = scmp.eq.s32.totalorder %s56_s21, 0 }
   0xa   : > { %s1098_s23 = scalar_select %p57_p4, %s1024_s16, %s59_s22  }
   0xe   : > { %185 = sbr.rel (!%p68_p3) target bundleno = 50 (0x32), region = 24  ;;  %s187_s24 = sand.u32 (%p68_p3), 1, %s1024_s16  }
   0xf   : > { %s906_s25 = sshll.u32 (%p68_p3), %s1032_s18, 3  ;;  %s859_s26 = sshll.u32 (%p68_p3), %s187_s24, 8 }
  0x10   : > { %s1106_s29 = scalar_lea.vmem (%p68_p3), %s1246_s1, %s906_s25  ;;  %s1111_s30 = scalar_lea.vmem (%p68_p3), [#allocation2], %s859_s26 }
  0x11   : > { %v282_v0 = vld [vmem:[%s1106_s29] sm:$0xff] (%p68_p3) }
  0x12   : > { %v284_v1 = vld [vmem:[%s1106_s29 + $0x20] sm:$0xff] (%p68_p3)  ;;  %283 = vst [vmem:[%s1111_s30] sm:$0xff] (%p68_p3), %v282_v0 }
  0x13   : > { %v286_v2 = vld [vmem:[%s1106_s29 + $0x40] sm:$0xff] (%p68_p3)  ;;  %285 = vst [vmem:[%s1111_s30 + $0x8] sm:$0xff] (%p68_p3), %v284_v1 }
  0x14   : > { %287 = vst [vmem:[%s1111_s30 + $0x10] sm:$0xff] (%p68_p3), %v286_v2  ;;  %v288_v3 = vld [vmem:[%s1106_s29 + $0x60] sm:$0xff] (%p68_p3) }
  0x15   : > { %v290_v4 = vld [vmem:[%s1106_s29 + $0x80] sm:$0xff]  ;;  %289 = vst [vmem:[%s1111_s30 + $0x18] sm:$0xff] %v288_v3 }
  0x16   : > { %v292_v5 = vld [vmem:[%s1106_s29 + $0xa0] sm:$0xff]  ;;  %291 = vst [vmem:[%s1111_s30 + $0x20] sm:$0xff] %v290_v4 }
  0x17   : > { %293 = vst [vmem:[%s1111_s30 + $0x28] sm:$0xff] %v292_v5  ;;  %v294_v6 = vld [vmem:[%s1106_s29 + $0xc0] sm:$0xff] }
  0x18   : > { %v296_v7 = vld [vmem:[%s1106_s29 + $0xe0] sm:$0xff]  ;;  %295 = vst [vmem:[%s1111_s30 + $0x30] sm:$0xff] %v294_v6 }
  0x19   : > { %v298_v8 = vld [vmem:[%s1106_s29 + $0x100] sm:$0xff]  ;;  %297 = vst [vmem:[%s1111_s30 + $0x38] sm:$0xff] %v296_v7 }
  0x1a   : > { %299 = vst [vmem:[%s1111_s30 + $0x40] sm:$0xff] %v298_v8  ;;  %v300_v9 = vld [vmem:[%s1106_s29 + $0x120] sm:$0xff] }
  0x1b   : > { %v302_v10 = vld [vmem:[%s1106_s29 + $0x140] sm:$0xff]  ;;  %301 = vst [vmem:[%s1111_s30 + $0x48] sm:$0xff] %v300_v9 }
  0x1c   : > { %v304_v11 = vld [vmem:[%s1106_s29 + $0x160] sm:$0xff]  ;;  %303 = vst [vmem:[%s1111_s30 + $0x50] sm:$0xff] %v302_v10 }
  0x1d   : > { %305 = vst [vmem:[%s1111_s30 + $0x58] sm:$0xff] %v304_v11  ;;  %v306_v12 = vld [vmem:[%s1106_s29 + $0x180] sm:$0xff] }
  0x1e   : > { %v308_v13 = vld [vmem:[%s1106_s29 + $0x1a0] sm:$0xff]  ;;  %307 = vst [vmem:[%s1111_s30 + $0x60] sm:$0xff] %v306_v12 }
  0x1f   : > { %v310_v14 = vld [vmem:[%s1106_s29 + $0x1c0] sm:$0xff]  ;;  %309 = vst [vmem:[%s1111_s30 + $0x68] sm:$0xff] %v308_v13 }
  0x20   : > { %311 = vst [vmem:[%s1111_s30 + $0x70] sm:$0xff] %v310_v14  ;;  %v312_v15 = vld [vmem:[%s1106_s29 + $0x1e0] sm:$0xff] }
  0x21   : > { %v314_v16 = vld [vmem:[%s1106_s29 + $0x200] sm:$0xff]  ;;  %313 = vst [vmem:[%s1111_s30 + $0x78] sm:$0xff] %v312_v15 }
  0x22   : > { %v316_v17 = vld [vmem:[%s1106_s29 + $0x220] sm:$0xff]  ;;  %315 = vst [vmem:[%s1111_s30 + $0x80] sm:$0xff] %v314_v16 }
  0x23   : > { %317 = vst [vmem:[%s1111_s30 + $0x88] sm:$0xff] %v316_v17  ;;  %v318_v18 = vld [vmem:[%s1106_s29 + $0x240] sm:$0xff] }
  0x24   : > { %v320_v19 = vld [vmem:[%s1106_s29 + $0x260] sm:$0xff]  ;;  %319 = vst [vmem:[%s1111_s30 + $0x90] sm:$0xff] %v318_v18 }
  0x25   : > { %v322_v20 = vld [vmem:[%s1106_s29 + $0x280] sm:$0xff]  ;;  %321 = vst [vmem:[%s1111_s30 + $0x98] sm:$0xff] %v320_v19 }
  0x26   : > { %323 = vst [vmem:[%s1111_s30 + $0xa0] sm:$0xff] %v322_v20  ;;  %v324_v21 = vld [vmem:[%s1106_s29 + $0x2a0] sm:$0xff] }
  0x27   : > { %v326_v22 = vld [vmem:[%s1106_s29 + $0x2c0] sm:$0xff]  ;;  %325 = vst [vmem:[%s1111_s30 + $0xa8] sm:$0xff] %v324_v21 }
  0x28   : > { %v328_v23 = vld [vmem:[%s1106_s29 + $0x2e0] sm:$0xff]  ;;  %327 = vst [vmem:[%s1111_s30 + $0xb0] sm:$0xff] %v326_v22 }
  0x29   : > { %329 = vst [vmem:[%s1111_s30 + $0xb8] sm:$0xff] %v328_v23  ;;  %v330_v24 = vld [vmem:[%s1106_s29 + $0x300] sm:$0xff] }
  0x2a   : > { %v332_v25 = vld [vmem:[%s1106_s29 + $0x320] sm:$0xff]  ;;  %331 = vst [vmem:[%s1111_s30 + $0xc0] sm:$0xff] %v330_v24 }
  0x2b   : > { %v334_v26 = vld [vmem:[%s1106_s29 + $0x340] sm:$0xff]  ;;  %333 = vst [vmem:[%s1111_s30 + $0xc8] sm:$0xff] %v332_v25 }
  0x2c   : > { %335 = vst [vmem:[%s1111_s30 + $0xd0] sm:$0xff] %v334_v26  ;;  %v336_v27 = vld [vmem:[%s1106_s29 + $0x360] sm:$0xff] }
  0x2d   : > { %v338_v28 = vld [vmem:[%s1106_s29 + $0x380] sm:$0xff]  ;;  %337 = vst [vmem:[%s1111_s30 + $0xd8] sm:$0xff] %v336_v27 }
  0x2e   : > { %v340_v29 = vld [vmem:[%s1106_s29 + $0x3a0] sm:$0xff]  ;;  %339 = vst [vmem:[%s1111_s30 + $0xe0] sm:$0xff] %v338_v28 }
  0x2f   : > { %341 = vst [vmem:[%s1111_s30 + $0xe8] sm:$0xff] %v340_v29  ;;  %v342_v30 = vld [vmem:[%s1106_s29 + $0x3c0] sm:$0xff] }
  0x30   : > { %v344_v31 = vld [vmem:[%s1106_s29 + $0x3e0] sm:$0xff]  ;;  %343 = vst [vmem:[%s1111_s30 + $0xf0] sm:$0xff] %v342_v30 }
  0x31   : > { %345 = vst [vmem:[%s1111_s30 + $0xf8] sm:$0xff] %v344_v31 }
  0x32 PF: > { %p862_p6 = scmp.ge.s32.totalorder %s1036_s19, 1  ;;  %p371_p7 = scmp.lt.s32.totalorder %s1036_s19, 5 }
  0x34   : > { %p372_p8 = pnand %p862_p6, %p371_p7 }
  0x35   : > { %s378_s5 = sand.u32 (!%p372_p8), 1, %s1020_s15   ;;  %v1180_v32 = vld [vmem:[%s1245_s0] sm:$0xff] (!%p372_p8)  ;;  %s864_s10 = sshll.u32 (!%p372_p8), %s1028_s17, 1  ;;  %v491_v3 = vlaneseq (!%p372_p8) }
  0x36   : > { %375 = sbr.rel (%p372_p8) target bundleno = 343 (0x157), region = 70  ;;  %s863_s8 = sshll.u32 (!%p372_p8), %s378_s5, 8  ;;  %v870_v33 = vcombine.high (!%p372_p8), %v1180_v32, %v1180_v32  ;;  %v869_v2 = vcombine.low (!%p372_p8), %v1180_v32, %v1180_v32 }
  0x37   : > { %s1184_s9 = scalar_lea.vmem (!%p372_p8), [#allocation2], %s863_s8  ;;  %p432_p9 = scmp.lt.s32.totalorder (!%p372_p8), %s864_s10, 7  ;;  %v492_v4 = vshrl.u32 (!%p372_p8), %v491_v3, 7 }
  0x38   : > { %v948_v34 = vld [vmem:[%s1184_s9 + $0x4] ss:$8 sps:$4 sm:$0xff] (!%p372_p8)   ;;  %700 = vmatprep.mubr.bf16.mxu0 (!%p372_p8), %v870_v33  ;;  %v950_v35 = vld [vmem:[%s1184_s9] ss:$8 sps:$4 sm:$0xff] (!%p372_p8)   ;;  %v951_v36 = vld [vmem:[%s1184_s9 + $0x14] ss:$8 sps:$4 sm:$0xff] (!%p372_p8)  }
  0x39   : > { %668 = vmatprep.subr.bf16.mxu0 (!%p372_p8), %v948_v34  ;;  %v953_v37 = vld [vmem:[%s1184_s9 + $0x10] ss:$8 sps:$4 sm:$0xff] (!%p372_p8)   ;;  %v954_v38 = vld [vmem:[%s1184_s9 + $0x24] ss:$8 sps:$4 sm:$0xff] (!%p372_p8)   ;;  %v956_v39 = vld [vmem:[%s1184_s9 + $0x20] ss:$8 sps:$4 sm:$0xff] (!%p372_p8)  }
  0x3a   : > { %669 = vmatpush1.bf16.msra.mxu0 (!%p372_p8), %v950_v35  ;;  %v957_v40 = vld [vmem:[%s1184_s9 + $0x34] ss:$8 sps:$4 sm:$0xff] (!%p372_p8)   ;;  %v959_v41 = vld [vmem:[%s1184_s9 + $0x30] ss:$8 sps:$4 sm:$0xff] (!%p372_p8)   ;;  %v960_v42 = vld [vmem:[%s1184_s9 + $0x44] ss:$8 sps:$4 sm:$0xff] (!%p372_p8)  }
  0x3b   : > { %670 = vmatprep.subr.bf16.mxu0 (!%p372_p8), %v951_v36  ;;  %v962_v43 = vld [vmem:[%s1184_s9 + $0x40] ss:$8 sps:$4 sm:$0xff] (!%p372_p8)   ;;  %v963_v44 = vld [vmem:[%s1184_s9 + $0x54] ss:$8 sps:$4 sm:$0xff] (!%p372_p8)   ;;  %v965_v45 = vld [vmem:[%s1184_s9 + $0x50] ss:$8 sps:$4 sm:$0xff] (!%p372_p8)  }
  0x3c   : > { %v966_v46 = vld [vmem:[%s1184_s9 + $0x64] ss:$8 sps:$4 sm:$0xff] (!%p372_p8)   ;;  %v968_v47 = vld [vmem:[%s1184_s9 + $0x60] ss:$8 sps:$4 sm:$0xff] (!%p372_p8)   ;;  %v969_v48 = vld [vmem:[%s1184_s9 + $0x74] ss:$8 sps:$4 sm:$0xff] (!%p372_p8)  }
  0x3d   : > { %v971_v49 = vld [vmem:[%s1184_s9 + $0x70] ss:$8 sps:$4 sm:$0xff]   ;;  %v972_v50 = vld [vmem:[%s1184_s9 + $0x84] ss:$8 sps:$4 sm:$0xff]   ;;  %v974_v51 = vld [vmem:[%s1184_s9 + $0x80] ss:$8 sps:$4 sm:$0xff]  }
  0x3e   : > { %671 = vmatpush1.bf16.msra.mxu0 %v953_v37  ;;  %v975_v52 = vld [vmem:[%s1184_s9 + $0x94] ss:$8 sps:$4 sm:$0xff]   ;;  %v977_v53 = vld [vmem:[%s1184_s9 + $0x90] ss:$8 sps:$4 sm:$0xff]   ;;  %v978_v54 = vld [vmem:[%s1184_s9 + $0xa4] ss:$8 sps:$4 sm:$0xff]  }
  0x3f   : > { %672 = vmatprep.subr.bf16.mxu0 %v954_v38  ;;  %v980_v55 = vld [vmem:[%s1184_s9 + $0xa0] ss:$8 sps:$4 sm:$0xff]   ;;  %v981_v56 = vld [vmem:[%s1184_s9 + $0xb4] ss:$8 sps:$4 sm:$0xff]   ;;  %v983_v57 = vld [vmem:[%s1184_s9 + $0xb0] ss:$8 sps:$4 sm:$0xff]  }
  0x40   : > { %v984_v58 = vld [vmem:[%s1184_s9 + $0xc4] ss:$8 sps:$4 sm:$0xff]   ;;  %v986_v59 = vld [vmem:[%s1184_s9 + $0xc0] ss:$8 sps:$4 sm:$0xff]   ;;  %v987_v60 = vld [vmem:[%s1184_s9 + $0xd4] ss:$8 sps:$4 sm:$0xff]  }
  0x41   : > { %v989_v61 = vld [vmem:[%s1184_s9 + $0xd0] ss:$8 sps:$4 sm:$0xff]   ;;  %v990_v62 = vld [vmem:[%s1184_s9 + $0xe4] ss:$8 sps:$4 sm:$0xff]   ;;  %v992_v63 = vld [vmem:[%s1184_s9 + $0xe0] ss:$8 sps:$4 sm:$0xff]  }
  0x42   : > { %673 = vmatpush1.bf16.msra.mxu0 %v956_v39  ;;  %v993_v0 = vld [vmem:[%s1184_s9 + $0xf4] ss:$8 sps:$4 sm:$0xff]   ;;  %v995_v1 = vld [vmem:[%s1184_s9 + $0xf0] ss:$8 sps:$4 sm:$0xff]   ;;  %s1257_s10 = smov (!%p432_p9, %s864_s10), 7  ;;  %v493_v5 = vsub.s32 0, %v492_v4 }
  0x43   : > { %674 = vmatprep.subr.bf16.mxu0 %v957_v40  ;;  %s866_s11 = sshll.u32 %s1257_s10, 2  ;;  %s434_s14 = scalar_lea.vmem %s1247_s2, %s1257_s10  ;;  %v497_v7 = vsub.s32 1, %v492_v4 }
  0x44   : > { %s444_s22 = scalar_lea.vmem %s1248_s3, %s866_s11  ;;  %v489_v6 = vld [vmem:[%s434_s14] sm:$0x3]  ;;  %s454_s25 = scalar_lea.vmem %s1249_s4, %s866_s11 }
  0x45   : > { %v709_v8 = vld [vmem:[%s444_s22] sm:$0xff]  ;;  %v494_v9 = vrot.slane %v489_v6, %v493_v5  ;;  %v498_v10 = vrot.slane %v489_v6, %v497_v7 }
  0x46   : > { %675 = vmatpush1.bf16.msra.mxu0 %v959_v41  ;;  %v710_v11 = vunpack.c.l.bf16 %v709_v8  ;;  %v711_v13 = vunpack.c.h.bf16 %v709_v8 }
  0x47   : > { %676 = vmatprep.subr.bf16.mxu0 %v960_v42 }
  0x4a   : > { %677 = vmatpush1.bf16.msra.mxu0 %v962_v43 }
  0x4b   : > { %678 = vmatprep.subr.bf16.mxu0 %v963_v44 }
  0x4e   : > { %679 = vmatpush1.bf16.msra.mxu0 %v965_v45 }
  0x4f   : > { %680 = vmatprep.subr.bf16.mxu0 %v966_v46 }
  0x52   : > { %681 = vmatpush1.bf16.msra.mxu0 %v968_v47 }
  0x53   : > { %682 = vmatprep.subr.bf16.mxu0 %v969_v48 }
  0x56   : > { %683 = vmatpush1.bf16.msra.mxu0 %v971_v49 }
  0x57   : > { %684 = vmatprep.subr.bf16.mxu0 %v972_v50 }
  0x5a   : > { %685 = vmatpush1.bf16.msra.mxu0 %v974_v51 }
  0x5b   : > { %686 = vmatprep.subr.bf16.mxu0 %v975_v52 }
  0x5e   : > { %687 = vmatpush1.bf16.msra.mxu0 %v977_v53 }
  0x5f   : > { %688 = vmatprep.subr.bf16.mxu0 %v978_v54 }
  0x62   : > { %689 = vmatpush1.bf16.msra.mxu0 %v980_v55 }
  0x63   : > { %690 = vmatprep.subr.bf16.mxu0 %v981_v56 }
  0x66   : > { %691 = vmatpush1.bf16.msra.mxu0 %v983_v57 }
  0x67   : > { %692 = vmatprep.subr.bf16.mxu0 %v984_v58 }
  0x6a   : > { %693 = vmatpush1.bf16.msra.mxu0 %v986_v59 }
  0x6b   : > { %694 = vmatprep.subr.bf16.mxu0 %v987_v60 }
  0x6e   : > { %695 = vmatpush1.bf16.msra.mxu0 %v989_v61 }
  0x6f   : > { %696 = vmatprep.subr.bf16.mxu0 %v990_v62 }
  0x72   : > { %697 = vmatpush1.bf16.msra.mxu0 %v992_v63 }
  0x73   : > { %698 = vmatprep.subr.bf16.mxu0 %v993_v0 }
  0x76   : > { %699 = vmatpush1.bf16.msra.mxu0 %v995_v1 }
  0x79   : > { %701 = vmatmul.mubr.bf16.vlgmr.msra.gmra.mrb[0].mxu0 %v869_v2 }
 0x14c   : > { %v702_v12 = vpop.f32.mrb[0].mxu0 }
 0x14d   : > { %v703_v14 = vadd.f32 %v702_v12, %v494_v9  ;;  %v704_v15 = vpop.f32.mrb[1].mxu0 }
 0x14e   : > { %v705_v16 = vadd.f32 %v704_v15, %v498_v10  ;;  %v706_v17 = vpop.f32.mrb[2].mxu0 }
 0x14f   : > { %v712_v18 = vadd.f32 %v710_v11, %v703_v14  ;;  %v707_v19 = vpop.f32.mrb[3].mxu0 }
 0x150   : > { %v713_v20 = vadd.f32 %v711_v13, %v705_v16 }
 0x151   : > { %v714_v21 = vmax.f32 %v712_v18, 0.0 }
 0x152   : > { %v715_v22 = vmax.f32 %v713_v20, 0.0 }
 0x154   : > { %v907_v23 = vpack.c.bf16 %v715_v22, %v714_v21 }
 0x156   : > { %724 = vst [vmem:[%s454_s25] sm:$0xff] %v907_v23 }
 0x157 PF: > { %s14_s19 = sadd.s32 1, %s1036_s19   ;;  %s1250_s15 = smov %s1024_s16 }
 0x158   : > { %p11_p10 = scmp.ge.s32.totalorder %s14_s19, 6   ;;  %s1251_s16 = smov %s1098_s23 }
 0x159   : > { %s1252_s17 = smov %s1032_s18  ;;  %s1253_s18 = smov %s1255_s20 }
 0x15a   :  { %13 = sbr.rel (!%p11_p10) target bundleno = 3 (0x3), region = 118 }

// kernel: resnet_forward_pallas.31
= control target key start
LH: loop header
LB: loop body
LE: loop exit
PB: predicated region body
PF: predicated region fallthrough
CT: control target
= control target key end

     0   :  { %vm52_vm0 = vcmask 1043456   ;;  %vm365_vm1 = vcmask 1041409   ;;  %s1465_s0 = inlined_call_operand.vmem [shape: bf16[2,4,1024], index: 0, kind: input, shape index: {}]   ;;  %s1466_s1 = inlined_call_operand.vmem [shape: bf16[1024,128], index: 1, kind: input, shape index: {}]   ;;  %s1467_s2 = inlined_call_operand.vmem [shape: f32[1,128], index: 2, kind: input, shape index: {}]   ;;  %s1468_s3 = inlined_call_operand.hbm [shape: f32[2,128], index: 3, kind: output, shape index: {}]  }
   0x1   :  { %v1109_v0 = vld [vmem:[%s1466_s1 + $0x40] sm:$0xff]   ;;  %v1113_v4 = vld [vmem:[%s1466_s1 + $0x48] sm:$0xff]   ;;  %v1117_v8 = vld [vmem:[%s1466_s1 + $0x50] sm:$0xff]  }
   0x2   :  { %v1110_v1 = vld [vmem:[%s1466_s1 + $0xc0] sm:$0xff]   ;;  %1020 = vmatprep.subr.bf16.mxu0 %v1109_v0  ;;  %v1114_v5 = vld [vmem:[%s1466_s1 + $0xc8] sm:$0xff]   ;;  %v1118_v9 = vld [vmem:[%s1466_s1 + $0xd0] sm:$0xff]  }
   0x3   :  { %v1111_v2 = vld [vmem:[%s1466_s1] sm:$0xff]   ;;  %1042 = vmatprep.subr.bf16.mxu1 %v1110_v1  ;;  %v1115_v6 = vld [vmem:[%s1466_s1 + $0x8] sm:$0xff]   ;;  %v1119_v10 = vld [vmem:[%s1466_s1 + $0x10] sm:$0xff]  }
   0x4   :  { %v1112_v3 = vld [vmem:[%s1466_s1 + $0x80] sm:$0xff]   ;;  %1021 = vmatpush3.bf16.msra.mxu0 %v1111_v2  ;;  %v1116_v7 = vld [vmem:[%s1466_s1 + $0x88] sm:$0xff]   ;;  %v1120_v11 = vld [vmem:[%s1466_s1 + $0x90] sm:$0xff]  }
   0x5   :  { %1043 = vmatpush3.bf16.msra.mxu1 %v1112_v3  ;;  %1022 = vmatprep.subr.bf16.mxu0 %v1113_v4  ;;  %v1121_v12 = vld [vmem:[%s1466_s1 + $0x58] sm:$0xff]   ;;  %v1125_v16 = vld [vmem:[%s1466_s1 + $0x60] sm:$0xff]   ;;  %v1129_v20 = vld [vmem:[%s1466_s1 + $0x68] sm:$0xff]  }
   0x6   :  { %1044 = vmatprep.subr.bf16.mxu1 %v1114_v5  ;;  %v1122_v13 = vld [vmem:[%s1466_s1 + $0xd8] sm:$0xff]   ;;  %v1126_v17 = vld [vmem:[%s1466_s1 + $0xe0] sm:$0xff]   ;;  %v1130_v21 = vld [vmem:[%s1466_s1 + $0xe8] sm:$0xff]  }
   0x7   :  { %v1123_v14 = vld [vmem:[%s1466_s1 + $0x18] sm:$0xff]   ;;  %v1127_v18 = vld [vmem:[%s1466_s1 + $0x20] sm:$0xff]   ;;  %v1131_v22 = vld [vmem:[%s1466_s1 + $0x28] sm:$0xff]  }
   0x8   :  { %1023 = vmatpush3.bf16.msra.mxu0 %v1115_v6  ;;  %v1124_v15 = vld [vmem:[%s1466_s1 + $0x98] sm:$0xff]   ;;  %v1128_v19 = vld [vmem:[%s1466_s1 + $0xa0] sm:$0xff]   ;;  %v1132_v23 = vld [vmem:[%s1466_s1 + $0xa8] sm:$0xff]  }
   0x9   :  { %1045 = vmatpush3.bf16.msra.mxu1 %v1116_v7  ;;  %1024 = vmatprep.subr.bf16.mxu0 %v1117_v8  ;;  %v1133_v24 = vld [vmem:[%s1466_s1 + $0x70] sm:$0xff]   ;;  %v1137_v28 = vld [vmem:[%s1466_s1 + $0x78] sm:$0xff]   ;;  %v16_v32 = vld [vmem:[%s1465_s0] sm:$0xff] }
   0xa   :  { %1046 = vmatprep.subr.bf16.mxu1 %v1118_v9  ;;  %v1134_v25 = vld [vmem:[%s1466_s1 + $0xf0] sm:$0xff]   ;;  %v1138_v29 = vld [vmem:[%s1466_s1 + $0xf8] sm:$0xff]   ;;  %v20_v34 = vunpack.c.l.bf16 %v16_v32  ;;  %v21_v36 = vunpack.c.h.bf16 %v16_v32  ;;  %v1141_v38 = vld [vmem:[%s1466_s1 + $0x140] sm:$0xff]  }
   0xb   :  { %v1135_v26 = vld [vmem:[%s1466_s1 + $0x30] sm:$0xff]   ;;  %v1139_v30 = vld [vmem:[%s1466_s1 + $0x38] sm:$0xff]   ;;  %v1142_v39 = vld [vmem:[%s1466_s1 + $0x1c0] sm:$0xff]  }
   0xc   :  { %1025 = vmatpush3.bf16.msra.mxu0 %v1119_v10  ;;  %v1136_v27 = vld [vmem:[%s1466_s1 + $0xb0] sm:$0xff]   ;;  %v1140_v31 = vld [vmem:[%s1466_s1 + $0xb8] sm:$0xff]   ;;  %v36_v40 = vcombine.high %v20_v34, %v20_v34  ;;  %v37_v42 = vcombine.high %v21_v36, %v21_v36  ;;  %v53_v44 = vsel %vm52_vm0, %v20_v34, 0.0  ;;  %v67_v46 = vsel %vm52_vm0, %v21_v36, 0.0 }
   0xd   :  { %1047 = vmatpush3.bf16.msra.mxu1 %v1120_v11  ;;  %1026 = vmatprep.subr.bf16.mxu0 %v1121_v12  ;;  %v18_v33 = vld [vmem:[%s1465_s0 + $0x10] sm:$0xff]  ;;  %v54_v56 = vrot.slane %v53_v44, 4  ;;  %v68_v58 = vrot.slane %v67_v46, 4 }
   0xe   :  { %1048 = vmatprep.subr.bf16.mxu1 %v1122_v13  ;;  %v24_v35 = vunpack.c.l.bf16 %v18_v33  ;;  %v25_v37 = vunpack.c.h.bf16 %v18_v33  ;;  %v60_v48 = vsel %vm52_vm0, %v36_v40, 0.0  ;;  %v74_v50 = vsel %vm52_vm0, %v37_v42, 0.0 }
   0xf   :  { %v61_v52 = vrot.slane %v60_v48, 4  ;;  %v75_v54 = vrot.slane %v74_v50, 4  ;;  %v55_v0 = vadd.f32 %v54_v56, %v53_v44  ;;  %v69_v2 = vadd.f32 %v68_v58, %v67_v46 }
  0x10   :  { %1027 = vmatpush3.bf16.msra.mxu0 %v1123_v14  ;;  %v40_v41 = vcombine.high %v24_v35, %v24_v35  ;;  %v41_v43 = vcombine.high %v25_v37, %v25_v37  ;;  %v109_v45 = vsel %vm52_vm0, %v24_v35, 0.0  ;;  %v123_v47 = vsel %vm52_vm0, %v25_v37, 0.0 }
  0x11   :  { %1049 = vmatpush3.bf16.msra.mxu1 %v1124_v15  ;;  %1028 = vmatprep.subr.bf16.mxu0 %v1125_v16  ;;  %v110_v57 = vrot.slane %v109_v45, 4  ;;  %v124_v59 = vrot.slane %v123_v47, 4  ;;  %v62_v60 = vadd.f32 %v61_v52, %v60_v48  ;;  %v76_v62 = vadd.f32 %v75_v54, %v74_v50 }
  0x12   :  { %1050 = vmatprep.subr.bf16.mxu1 %v1126_v17  ;;  %v116_v49 = vsel %vm52_vm0, %v40_v41, 0.0  ;;  %v130_v51 = vsel %vm52_vm0, %v41_v43, 0.0  ;;  %v56_v8 = vrot.slane %v55_v0, 2  ;;  %v70_v10 = vrot.slane %v69_v2, 2 }
  0x13   :  { %v117_v53 = vrot.slane %v116_v49, 4  ;;  %v131_v55 = vrot.slane %v130_v51, 4  ;;  %v111_v1 = vadd.f32 %v110_v57, %v109_v45  ;;  %v125_v3 = vadd.f32 %v124_v59, %v123_v47 }
  0x14   :  { %1029 = vmatpush3.bf16.msra.mxu0 %v1127_v18  ;;  %v63_v4 = vrot.slane %v62_v60, 2  ;;  %v77_v6 = vrot.slane %v76_v62, 2  ;;  %v57_v16 = vadd.f32 %v56_v8, %v55_v0  ;;  %v71_v18 = vadd.f32 %v70_v10, %v69_v2  ;;  %v1147_v8 = vld [vmem:[%s1466_s1 + $0x108] sm:$0xff]   ;;  %v1149_v10 = vld [vmem:[%s1466_s1 + $0x150] sm:$0xff]  }
  0x15   :  { %1051 = vmatpush3.bf16.msra.mxu1 %v1128_v19  ;;  %1030 = vmatprep.subr.bf16.mxu0 %v1129_v20  ;;  %v118_v61 = vadd.f32 %v117_v53, %v116_v49  ;;  %v132_v63 = vadd.f32 %v131_v55, %v130_v51  ;;  %v112_v9 = vrot.slane %v111_v1, 2  ;;  %v126_v11 = vrot.slane %v125_v3, 2 }
  0x16   :  { %1052 = vmatprep.subr.bf16.mxu1 %v1130_v21  ;;  %v64_v12 = vadd.f32 %v63_v4, %v62_v60  ;;  %v78_v14 = vadd.f32 %v77_v6, %v76_v62  ;;  %v1143_v60 = vld [vmem:[%s1466_s1 + $0x100] sm:$0xff]   ;;  %v1145_v4 = vld [vmem:[%s1466_s1 + $0x148] sm:$0xff]  }
  0x17   :  { %v119_v5 = vrot.slane %v118_v61, 2  ;;  %v133_v7 = vrot.slane %v132_v63, 2  ;;  %v113_v17 = vadd.f32 %v112_v9, %v111_v1  ;;  %v127_v19 = vadd.f32 %v126_v11, %v125_v3  ;;  %v1148_v9 = vld [vmem:[%s1466_s1 + $0x188] sm:$0xff]   ;;  %v1150_v11 = vld [vmem:[%s1466_s1 + $0x1d0] sm:$0xff]  }
  0x18   :  { %1031 = vmatpush3.bf16.msra.mxu0 %v1131_v22  ;;  %v65_v20 = vrot.slane %v64_v12, 1  ;;  %v79_v22 = vrot.slane %v78_v14, 1 }
  0x19   :  { %1053 = vmatpush3.bf16.msra.mxu1 %v1132_v23  ;;  %1032 = vmatprep.subr.bf16.mxu0 %v1133_v24  ;;  %v120_v13 = vadd.f32 %v119_v5, %v118_v61  ;;  %v134_v15 = vadd.f32 %v133_v7, %v132_v63  ;;  %v58_v24 = vrot.slane %v57_v16, 1  ;;  %v1144_v63 = vld [vmem:[%s1466_s1 + $0x180] sm:$0xff]   ;;  %v1146_v7 = vld [vmem:[%s1466_s1 + $0x1c8] sm:$0xff]  }
  0x1a   :  { %1054 = vmatprep.subr.bf16.mxu1 %v1134_v25  ;;  %v114_v25 = vrot.slane %v113_v17, 1 }
  0x1b   :  { %v121_v21 = vrot.slane %v120_v13, 1  ;;  %v135_v23 = vrot.slane %v134_v15, 1  ;;  %v59_v32 = vadd.f32 %v58_v24, %v57_v16  ;;  %v1155_v16 = vld [vmem:[%s1466_s1 + $0x118] sm:$0xff]  }
  0x1c   :  { %1033 = vmatpush3.bf16.msra.mxu0 %v1135_v26  ;;  %v72_v26 = vrot.slane %v71_v18, 1  ;;  %v115_v33 = vadd.f32 %v114_v25, %v113_v17  ;;  %v1156_v17 = vld [vmem:[%s1466_s1 + $0x198] sm:$0xff]  }
  0x1d   :  { %1055 = vmatpush3.bf16.msra.mxu1 %v1136_v27  ;;  %1034 = vmatprep.subr.bf16.mxu0 %v1137_v28  ;;  %v128_v27 = vrot.slane %v127_v19, 1  ;;  %v66_v28 = vadd.f32 %v65_v20, %v64_v12  ;;  %v166_v40 = vmul.f32 0.25, %v59_v32  ;;  %v1151_v12 = vld [vmem:[%s1466_s1 + $0x110] sm:$0xff]   ;;  %v17_v20 = vld [vmem:[%s1465_s0 + $0x8] sm:$0xff] }
  0x1e   :  { %1056 = vmatprep.subr.bf16.mxu1 %v1138_v29  ;;  %v122_v29 = vadd.f32 %v121_v21, %v120_v13  ;;  %v73_v34 = vadd.f32 %v72_v26, %v71_v18  ;;  %v174_v41 = vmul.f32 0.25, %v115_v33  ;;  %v1152_v13 = vld [vmem:[%s1466_s1 + $0x190] sm:$0xff]   ;;  %v1157_v18 = vld [vmem:[%s1466_s1 + $0x160] sm:$0xff]   ;;  %v19_v21 = vld [vmem:[%s1465_s0 + $0x18] sm:$0xff]  ;;  %v23_v24 = vunpack.c.h.bf16 %v17_v20 }
  0x1f   :  { %v129_v35 = vadd.f32 %v128_v27, %v127_v19  ;;  %v167_v36 = vmul.f32 0.25, %v66_v28  ;;  %v182_v48 = vpack.c.bf16 %v166_v40, %v166_v40  ;;  %v1158_v19 = vld [vmem:[%s1466_s1 + $0x1e0] sm:$0xff]   ;;  %v27_v25 = vunpack.c.h.bf16 %v19_v21 }
  0x20   :  { %1035 = vmatpush3.bf16.msra.mxu0 %v1139_v30  ;;  %v80_v30 = vadd.f32 %v79_v22, %v78_v14  ;;  %v175_v37 = vmul.f32 0.25, %v122_v29  ;;  %v168_v42 = vmul.f32 0.25, %v73_v34  ;;  %v190_v49 = vpack.c.bf16 %v174_v41, %v174_v41  ;;  %v1153_v14 = vld [vmem:[%s1466_s1 + $0x158] sm:$0xff]  }
  0x21   :  { %1057 = vmatpush3.bf16.msra.mxu1 %v1140_v31  ;;  %1064 = vmatprep.subr.bf16.mxu0 %v1141_v38  ;;  %v136_v31 = vadd.f32 %v135_v23, %v134_v15  ;;  %v176_v43 = vmul.f32 0.25, %v129_v35  ;;  %v183_v44 = vpack.c.bf16 %v167_v36, %v167_v36  ;;  %v349_v56 = vunpack.c.l.b16 %v182_v48  ;;  %v1154_v15 = vld [vmem:[%s1466_s1 + $0x1d8] sm:$0xff]  }
  0x22   :  { %1086 = vmatprep.subr.bf16.mxu1 %v1142_v39  ;;  %v169_v38 = vmul.f32 0.25, %v80_v30  ;;  %v191_v45 = vpack.c.bf16 %v175_v37, %v175_v37  ;;  %v184_v50 = vpack.c.bf16 %v168_v42, %v168_v42  ;;  %v357_v57 = vunpack.c.l.b16 %v190_v49 }
  0x23   :  { %v177_v39 = vmul.f32 0.25, %v136_v31  ;;  %v192_v51 = vpack.c.bf16 %v176_v43, %v176_v43  ;;  %v350_v52 = vunpack.c.l.b16 %v183_v44  ;;  %v22_v22 = vunpack.c.l.bf16 %v17_v20 }
  0x24   :  { %v185_v46 = vpack.c.bf16 %v169_v38, %v169_v38  ;;  %v358_v53 = vunpack.c.l.b16 %v191_v45  ;;  %v351_v58 = vunpack.c.l.b16 %v184_v50  ;;  %v366_v2 = vsel %vm365_vm1, %v357_v57, %v349_v56 }
  0x25   :  { %v193_v47 = vpack.c.bf16 %v177_v39, %v177_v39  ;;  %v359_v59 = vunpack.c.l.b16 %v192_v51  ;;  %v374_v5 = vpack.c.b16 %v366_v2, %v366_v2  ;;  %v26_v23 = vunpack.c.l.bf16 %v19_v21 }
  0x26   :  { %v352_v54 = vunpack.c.l.b16 %v185_v46  ;;  %v367_v61 = vsel %vm365_vm1, %v358_v53, %v350_v52 }
  0x27   :  { %v360_v55 = vunpack.c.l.b16 %v193_v47  ;;  %v375_v0 = vpack.c.b16 %v367_v61, %v367_v61  ;;  %v368_v3 = vsel %vm365_vm1, %v359_v59, %v351_v58 }
  0x28   :  { %v376_v6 = vpack.c.b16 %v368_v3, %v368_v3 }
  0x29   :  { %v369_v62 = vsel %vm365_vm1, %v360_v55, %v352_v54  ;;  %806 = vmatprep.mubr.bf16.mxu0 %v375_v0 }
  0x2a   :  { %v377_v1 = vpack.c.b16 %v369_v62, %v369_v62  ;;  %807 = vmatmul.mubr.bf16.vlgmr.msra.gmra.mrb[0].mxu0 %v374_v5 }
  0x2b   :  { %1065 = vmatpush3.bf16.msra.mxu0 %v1143_v60 }
  0x2c   :  { %846 = vmatprep.mubr.bf16.mxu1 %v377_v1  ;;  %1066 = vmatprep.subr.bf16.mxu0 %v1145_v4 }
  0x2d   :  { %847 = vmatmul.mubr.bf16.vlgmr.msra.gmra.mrb[0].mxu1 %v376_v6 }
  0x2e   :  { %1087 = vmatpush3.bf16.msra.mxu1 %v1144_v63 }
  0x2f   :  { %1088 = vmatprep.subr.bf16.mxu1 %v1146_v7  ;;  %1067 = vmatpush3.bf16.msra.mxu0 %v1147_v8 }
  0x30   :  { %1068 = vmatprep.subr.bf16.mxu0 %v1149_v10 }
  0x32   :  { %1089 = vmatpush3.bf16.msra.mxu1 %v1148_v9 }
  0x33   :  { %1090 = vmatprep.subr.bf16.mxu1 %v1150_v11  ;;  %1069 = vmatpush3.bf16.msra.mxu0 %v1151_v12 }
  0x34   :  { %1070 = vmatprep.subr.bf16.mxu0 %v1153_v14 }
  0x36   :  { %1091 = vmatpush3.bf16.msra.mxu1 %v1152_v13 }
  0x37   :  { %1092 = vmatprep.subr.bf16.mxu1 %v1154_v15 }
  0x38   :  { %8 = vsyncpa [#allocation3], 0  ;;  %1071 = vmatpush3.bf16.msra.mxu0 %v1155_v16  ;;  %v1159_v26 = vld [vmem:[%s1466_s1 + $0x120] sm:$0xff]   ;;  %v38_v28 = vcombine.high %v22_v22, %v22_v22  ;;  %v42_v29 = vcombine.high %v26_v23, %v26_v23  ;;  %v39_v30 = vcombine.high %v23_v24, %v23_v24  ;;  %v81_v31 = vsel %vm52_vm0, %v22_v22, 0.0  ;;  %v1161_v32 = vld [vmem:[%s1466_s1 + $0x168] sm:$0xff]  }
  0x39   :  { %v1160_v27 = vld [vmem:[%s1466_s1 + $0x1a0] sm:$0xff]   ;;  %1072 = vmatprep.subr.bf16.mxu0 %v1157_v18  ;;  %v1162_v33 = vld [vmem:[%s1466_s1 + $0x1e8] sm:$0xff]   ;;  %v43_v34 = vcombine.high %v27_v25, %v27_v25  ;;  %v82_v35 = vrot.slane %v81_v31, 4  ;;  %v137_v36 = vsel %vm52_vm0, %v26_v23, 0.0  ;;  %v95_v37 = vsel %vm52_vm0, %v23_v24, 0.0  ;;  %v1165_v52 = vld [vmem:[%s1466_s1 + $0x170] sm:$0xff]  }
  0x3a   :  { %1093 = vmatpush3.bf16.msra.mxu1 %v1156_v17  ;;  %v88_v38 = vsel %vm52_vm0, %v38_v28, 0.0  ;;  %v144_v39 = vsel %vm52_vm0, %v42_v29, 0.0  ;;  %v102_v40 = vsel %vm52_vm0, %v39_v30, 0.0  ;;  %v138_v41 = vrot.slane %v137_v36, 4  ;;  %v1163_v46 = vld [vmem:[%s1466_s1 + $0x128] sm:$0xff]   ;;  %v1166_v53 = vld [vmem:[%s1466_s1 + $0x1f0] sm:$0xff]  }
  0x3b   :  { %1094 = vmatprep.subr.bf16.mxu1 %v1158_v19  ;;  %v89_v42 = vrot.slane %v88_v38, 4  ;;  %v145_v43 = vrot.slane %v144_v39, 4  ;;  %v103_v44 = vrot.slane %v102_v40, 4  ;;  %v158_v45 = vsel %vm52_vm0, %v43_v34, 0.0  ;;  %v1164_v47 = vld [vmem:[%s1466_s1 + $0x1a8] sm:$0xff]   ;;  %v1167_v2 = vld [vmem:[%s1466_s1 + $0x130] sm:$0xff]  }
  0x3c   :  { %1073 = vmatpush3.bf16.msra.mxu0 %v1159_v26  ;;  %v159_v48 = vrot.slane %v158_v45, 4  ;;  %v83_v49 = vadd.f32 %v82_v35, %v81_v31  ;;  %v139_v50 = vadd.f32 %v138_v41, %v137_v36  ;;  %v96_v51 = vrot.slane %v95_v37, 4  ;;  %v1168_v3 = vld [vmem:[%s1466_s1 + $0x1b0] sm:$0xff]   ;;  %v1169_v8 = vld [vmem:[%s1466_s1 + $0x178] sm:$0xff]  }
  0x3d   :  { %1074 = vmatprep.subr.bf16.mxu0 %v1161_v32  ;;  %v90_v54 = vadd.f32 %v89_v42, %v88_v38  ;;  %v146_v55 = vadd.f32 %v145_v43, %v144_v39  ;;  %v104_v56 = vadd.f32 %v103_v44, %v102_v40  ;;  %v151_v57 = vsel %vm52_vm0, %v27_v25, 0.0  ;;  %v1170_v9 = vld [vmem:[%s1466_s1 + $0x1f8] sm:$0xff]  }
  0x3e   :  { %1095 = vmatpush3.bf16.msra.mxu1 %v1160_v27  ;;  %v160_v58 = vadd.f32 %v159_v48, %v158_v45  ;;  %v84_v59 = vrot.slane %v83_v49, 2  ;;  %v140_v60 = vrot.slane %v139_v50, 2  ;;  %v97_v61 = vadd.f32 %v96_v51, %v95_v37  ;;  %v1171_v21 = vld [vmem:[%s1466_s1 + $0x138] sm:$0xff]  }
  0x3f   :  { %1096 = vmatprep.subr.bf16.mxu1 %v1162_v33  ;;  %v91_v62 = vrot.slane %v90_v54, 2  ;;  %v147_v63 = vrot.slane %v146_v55, 2  ;;  %v105_v0 = vrot.slane %v104_v56, 2  ;;  %v152_v1 = vrot.slane %v151_v57, 4  ;;  %v1172_v22 = vld [vmem:[%s1466_s1 + $0x1b8] sm:$0xff]  }
  0x40   :  { %1075 = vmatpush3.bf16.msra.mxu0 %v1163_v46  ;;  %v161_v4 = vrot.slane %v160_v58, 2  ;;  %v85_v5 = vadd.f32 %v84_v59, %v83_v49  ;;  %v141_v6 = vadd.f32 %v140_v60, %v139_v50  ;;  %v98_v7 = vrot.slane %v97_v61, 2 }
  0x41   :  { %1076 = vmatprep.subr.bf16.mxu0 %v1165_v52  ;;  %v92_v10 = vadd.f32 %v91_v62, %v90_v54  ;;  %v148_v11 = vadd.f32 %v147_v63, %v146_v55  ;;  %v106_v12 = vadd.f32 %v105_v0, %v104_v56  ;;  %v153_v20 = vadd.f32 %v152_v1, %v151_v57 }
  0x42   :  { %1097 = vmatpush3.bf16.msra.mxu1 %v1164_v47  ;;  %v162_v13 = vadd.f32 %v161_v4, %v160_v58  ;;  %v86_v14 = vrot.slane %v85_v5, 1  ;;  %v142_v15 = vrot.slane %v141_v6, 1  ;;  %v99_v16 = vadd.f32 %v98_v7, %v97_v61 }
  0x43   :  { %1098 = vmatprep.subr.bf16.mxu1 %v1166_v53  ;;  %v93_v17 = vrot.slane %v92_v10, 1  ;;  %v149_v18 = vrot.slane %v148_v11, 1  ;;  %v107_v19 = vrot.slane %v106_v12, 1  ;;  %v154_v30 = vrot.slane %v153_v20, 2 }
  0x44   :  { %1077 = vmatpush3.bf16.msra.mxu0 %v1167_v2  ;;  %v163_v23 = vrot.slane %v162_v13, 1  ;;  %v87_v24 = vadd.f32 %v86_v14, %v85_v5  ;;  %v143_v25 = vadd.f32 %v142_v15, %v141_v6  ;;  %v100_v26 = vrot.slane %v99_v16, 1  ;;  %v955_v6 = vld [vmem:[%s1467_s2] ss:$0 sm:$0xff]  ;;  %s1201_s2 = smov [#allocation2]  }
  0x45   :  { %1078 = vmatprep.subr.bf16.mxu0 %v1169_v8  ;;  %v94_v27 = vadd.f32 %v93_v17, %v92_v10  ;;  %v150_v28 = vadd.f32 %v149_v18, %v148_v11  ;;  %v108_v29 = vadd.f32 %v107_v19, %v106_v12  ;;  %v155_v38 = vadd.f32 %v154_v30, %v153_v20  ;;  %s947_s13 = sshll.u32 %s1201_s2, 4  ;;  %s948_s13 = int_to_ptr.vmem [resolvable:$true] %s947_s13 }
  0x46   :  { %1099 = vmatpush3.bf16.msra.mxu1 %v1168_v3  ;;  %v164_v31 = vadd.f32 %v163_v23, %v162_v13  ;;  %v170_v32 = vmul.f32 0.25, %v87_v24  ;;  %v178_v33 = vmul.f32 0.25, %v143_v25  ;;  %v101_v34 = vadd.f32 %v100_v26, %v99_v16  ;;  %s1177_s14 = scalar_lea.vmem %s948_s13, 32  ;;  %p1182_p1 = scmp.lt.s32.totalorder %s948_s13, %s948_s13 }
  0x47   :  { %1100 = vmatprep.subr.bf16.mxu1 %v1170_v9  ;;  %v171_v35 = vmul.f32 0.25, %v94_v27  ;;  %v179_v36 = vmul.f32 0.25, %v150_v28  ;;  %v173_v37 = vmul.f32 0.25, %v108_v29  ;;  %v156_v46 = vrot.slane %v155_v38, 1  ;;  %p1178_p0 = scmp.ne.s32.totalorder %s948_s13, %s1177_s14  ;;  %p1183_p2 = scmp.lt.s32.totalorder %s1177_s14, %s1177_s14 }
  0x48   :  { %1079 = vmatpush3.bf16.msra.mxu0 %v1171_v21  ;;  %v181_v39 = vmul.f32 0.25, %v164_v31  ;;  %v186_v40 = vpack.c.bf16 %v170_v32, %v170_v32  ;;  %v194_v41 = vpack.c.bf16 %v178_v33, %v178_v33  ;;  %v172_v42 = vmul.f32 0.25, %v101_v34 }
  0x49   :  { %v187_v43 = vpack.c.bf16 %v171_v35, %v171_v35  ;;  %v195_v44 = vpack.c.bf16 %v179_v36, %v179_v36  ;;  %v189_v45 = vpack.c.bf16 %v173_v37, %v173_v37  ;;  %v157_v54 = vadd.f32 %v156_v46, %v155_v38  ;;  %p1184_p3 = por %p1183_p2, %p1182_p1 }
  0x4a   :  { %1101 = vmatpush3.bf16.msra.mxu1 %v1172_v22  ;;  %v197_v47 = vpack.c.bf16 %v181_v39, %v181_v39  ;;  %v353_v48 = vunpack.c.l.b16 %v186_v40  ;;  %v361_v49 = vunpack.c.l.b16 %v194_v41  ;;  %v188_v50 = vpack.c.bf16 %v172_v42, %v172_v42 }
  0x4b   :  { %v354_v51 = vunpack.c.l.b16 %v187_v43  ;;  %v362_v52 = vunpack.c.l.b16 %v195_v44  ;;  %v356_v53 = vunpack.c.l.b16 %v189_v45  ;;  %v180_v59 = vmul.f32 0.25, %v157_v54  ;;  %p1185_p4 = pnand %p1184_p3, %p1178_p0 }
  0x4c   :  { %v364_v55 = vunpack.c.l.b16 %v197_v47  ;;  %v370_v56 = vsel %vm365_vm1, %v361_v49, %v353_v48  ;;  %v355_v0 = vunpack.c.l.b16 %v188_v50 }
  0x4d   :  { %v371_v57 = vsel %vm365_vm1, %v362_v52, %v354_v51  ;;  %v378_v58 = vpack.c.b16 %v370_v56, %v370_v56  ;;  %v196_v63 = vpack.c.bf16 %v180_v59, %v180_v59 }
  0x4e   :  { %v379_v60 = vpack.c.b16 %v371_v57, %v371_v57  ;;  %v373_v61 = vsel %vm365_vm1, %v364_v55, %v356_v53 }
  0x4f   :  { %v381_v62 = vpack.c.b16 %v373_v61, %v373_v61  ;;  %v363_v1 = vunpack.c.l.b16 %v196_v63 }
  0x50   :  { %886 = vmatprep.mubr.bf16.mxu0 %v379_v60 }
  0x51   :  { %926 = vmatprep.mubr.bf16.mxu1 %v381_v62  ;;  %887 = vmatmul.mubr.bf16.vlgmr.msra.gmra.mrb[4].mxu0 %v378_v58  ;;  %v372_v2 = vsel %vm365_vm1, %v363_v1, %v355_v0 }
  0x52   :  { %v380_v3 = vpack.c.b16 %v372_v2, %v372_v2 }
  0x54   :  { %927 = vmatmul.mubr.bf16.vlgmr.msra.gmra.mrb[4].mxu1 %v380_v3 }
  0xfd   :  { %v1036_v4 = vpop.f32.mrb[0].mxu0 }
  0xfe   :  { %v1037_v7 = vpop.f32.mrb[1].mxu0 }
  0xff   :  { %v1038_v9 = vadd.f32 %v1037_v7, %v1036_v4  ;;  %v1039_v11 = vpop.f32.mrb[2].mxu0 }
 0x100   :  { %v1058_v5 = vpop.f32.mrb[0].mxu1  ;;  %v1040_v13 = vpop.f32.mrb[3].mxu0 }
 0x101   :  { %v1059_v8 = vpop.f32.mrb[1].mxu1  ;;  %v809_v15 = vadd.f32 %v1038_v9, %v955_v6 }
 0x102   :  { %v1060_v10 = vadd.f32 %v1059_v8, %v1058_v5  ;;  %v1061_v12 = vpop.f32.mrb[2].mxu1 }
 0x103   :  { %v1062_v14 = vpop.f32.mrb[3].mxu1 }
 0x104   :  { %v849_v16 = vadd.f32 %v1060_v10, %v809_v15 }
 0x124   :  { %v1080_v17 = vpop.f32.mrb[4].mxu0 }
 0x125   :  { %v1081_v18 = vpop.f32.mrb[5].mxu0 }
 0x126   :  { %v1082_v19 = vadd.f32 %v1081_v18, %v1080_v17  ;;  %v1083_v20 = vpop.f32.mrb[6].mxu0 }
 0x127   :  { %v1084_v21 = vpop.f32.mrb[7].mxu0  ;;  %v1102_v23 = vpop.f32.mrb[4].mxu1 }
 0x128   :  { %v889_v22 = vadd.f32 %v1082_v19, %v849_v16  ;;  %v1103_v24 = vpop.f32.mrb[5].mxu1 }
 0x129   :  { %v1104_v25 = vadd.f32 %v1103_v24, %v1102_v23  ;;  %v1105_v26 = vpop.f32.mrb[6].mxu1 }
 0x12a   :  { %v1106_v27 = vpop.f32.mrb[7].mxu1 }
 0x12b   :  { %v929_v28 = vadd.f32 %v1104_v25, %v889_v22 }
 0x12d   :  { %v934_v29 = vsub.f32 0.0, %v929_v28 }
 0x12f   :  { %v935_v30 = vmul.f32 1.442695, %v934_v29 }
 0x131   :  { %1173 = vpow2.f32 %v935_v30 }
 0x13b   :  { %v1174_v31 = vpop.eup %1173 }
 0x13c   :  { %v937_v32 = vadd.f32 1.0, %v1174_v31 }
 0x13e   :  { %1175 = vrcp.f32 %v937_v32 }
 0x148   :  { %v1176_v33 = vpop.eup %1175 }
 0x149   :  { %940 = vst [vmem:[#allocation2] sm:$0x3] %v1176_v33 }
 0x14a   :  { %1188 = shalt.err (!%p1185_p4)
}
 0x14b   :  { %s1189_s16 = scalar_lea.hbm %s1468_s3, 32 }
 0x14c   :  { %p1190_p5 = scmp.ne.s32.totalorder %s1468_s3, %s1189_s16  ;;  %p1193_p6 = scmp.lt.u32.totalorder %s1189_s16, %s1468_s3 }
 0x14e   :  { %p1195_p7 = pnand %p1193_p6, %p1190_p5 }
 0x150   :  { %1198 = shalt.err (!%p1195_p7)
}
 0x151   :  { %950 = dma.vmem_to_hbm [thread:$0]  %s948_s13, 32, %s1468_s3, [#allocation3]  }
 0x152   :  { %1199 = dma.done.wait [#allocation3], 32  }
 0x153   :  { %1200 = vsyncadd [#allocation3], 4294967264 }
 0x154   :  { %954 = vsyncpa [#allocation3], 1 }

// kernel: resnet_forward_pallas.29
= control target key start
LH: loop header
LB: loop body
LE: loop exit
PB: predicated region body
PF: predicated region fallthrough
CT: control target
= control target key end

     0   :  { %s3751_s12 = smov 0   ;;  %s3753_s13 = smov 0   ;;  %s4619_s0 = inlined_call_operand.vmem [shape: bf16[8,2304], index: 0, kind: input, shape index: {}]   ;;  %s4620_s1 = inlined_call_operand.vmem [shape: bf16[2304,256], index: 1, kind: input, shape index: {}]   ;;  %s4621_s2 = inlined_call_operand.vmem [shape: f32[1,256], index: 2, kind: input, shape index: {}]   ;;  %s4622_s3 = inlined_call_operand.vmem [shape: bf16[8,256], index: 3, kind: output, shape index: {}]  }
   0x1   :  { %s3755_s14 = smov 0   ;;  %s3757_s15 = smov 0  }
   0x2   :  { %s3759_s16 = smov 0  }
   0x3 LB: > { %s22_s17 = sadd.s32 1, %s3725_s15  ;;  %p65_p1 = scmp.ne.s32.totalorder %s3717_s13, %s3713_s12  ;;  %s3729_s16 = sphi %s3759_s16, %s13_s16   ;;  %s3725_s15 = sphi %s3757_s15, %s4626_s15   ;;  %s3721_s14 = sphi %s3755_s14, %s4625_s14   ;;  %s3717_s13 = sphi %s3753_s13, %s4624_s13   ;;  %s3713_s12 = sphi %s3751_s12, %s4623_s12  }
   0x4   : > { %p23_p0 = scmp.ge.s32.totalorder %s22_s17, 2  ;;  %p66_p2 = scmp.eq.s32.totalorder %s3729_s16, 0 }
   0x5   : > { %s58_s19 = sadd.s32 1, %s3717_s13  ;;  %p3120_p5 = scmp.ge.s32.totalorder %s3729_s16, 2 }
   0x6   : > { %s4628_s17 = smov (%p23_p0, %s22_s17), 0  ;;  %p67_p3 = por %p66_p2, %p65_p1 }
   0x7   : > { %s55_s18 = ssub.s32 %s3725_s15, %s4628_s17  ;;  %153 = sbr.rel (%p3120_p5) target bundleno = 210 (0xd2), region = 20 }
   0x8   : > { %p56_p4 = scmp.eq.s32.totalorder %s55_s18, 0 }
   0xa   : > { %s3786_s20 = scalar_select %p56_p4, %s3717_s13, %s58_s19  }
   0xe   : > { %156 = sbr.rel (!%p67_p3) target bundleno = 210 (0xd2), region = 24  ;;  %s158_s21 = sand.u32 (%p67_p3), 1, %s3717_s13  }
   0xf   : > { %s3121_s22 = sshll.u32 (%p67_p3), %s3725_s15, 2  ;;  %s3487_s23 = smul.u32 (%p67_p3), 1152, %s158_s21 }
  0x10   : > { %s3794_s26 = scalar_lea.vmem (%p67_p3), %s4620_s1, %s3121_s22 }
  0x11   : > { %v178_v0 = vld [vmem:[%s3794_s26] sm:$0xf] (%p67_p3)  ;;  %v180_v1 = vld [vmem:[%s3794_s26 + $0x8] sm:$0xf] (%p67_p3)  ;;  %v182_v2 = vld [vmem:[%s3794_s26 + $0x10] sm:$0xf] (%p67_p3) }
  0x12   : > { %v184_v3 = vld [vmem:[%s3794_s26 + $0x18] sm:$0xf] (%p67_p3)  ;;  %v186_v4 = vld [vmem:[%s3794_s26 + $0x20] sm:$0xf] (%p67_p3)  ;;  %s3801_s27 = scalar_lea.vmem (%p67_p3), [#allocation2], %s3487_s23 }
  0x13   : > { %179 = vst [vmem:[%s3801_s27] sm:$0xf] (%p67_p3), %v178_v0  ;;  %181 = vst [vmem:[%s3801_s27 + $0x4] sm:$0xf] (%p67_p3), %v180_v1  ;;  %v188_v5 = vld [vmem:[%s3794_s26 + $0x28] sm:$0xf] (%p67_p3) }
  0x14   : > { %183 = vst [vmem:[%s3801_s27 + $0x8] sm:$0xf] (%p67_p3), %v182_v2  ;;  %185 = vst [vmem:[%s3801_s27 + $0xc] sm:$0xf] (%p67_p3), %v184_v3  ;;  %v190_v6 = vld [vmem:[%s3794_s26 + $0x30] sm:$0xf] (%p67_p3) }
  0x15   : > { %187 = vst [vmem:[%s3801_s27 + $0x10] sm:$0xf] %v186_v4  ;;  %v192_v7 = vld [vmem:[%s3794_s26 + $0x38] sm:$0xf]  ;;  %189 = vst [vmem:[%s3801_s27 + $0x14] sm:$0xf] %v188_v5 }
  0x16   : > { %191 = vst [vmem:[%s3801_s27 + $0x18] sm:$0xf] %v190_v6  ;;  %193 = vst [vmem:[%s3801_s27 + $0x1c] sm:$0xf] %v192_v7  ;;  %v194_v8 = vld [vmem:[%s3794_s26 + $0x40] sm:$0xf] }
  0x17   : > { %v196_v9 = vld [vmem:[%s3794_s26 + $0x48] sm:$0xf]  ;;  %v198_v10 = vld [vmem:[%s3794_s26 + $0x50] sm:$0xf]  ;;  %195 = vst [vmem:[%s3801_s27 + $0x20] sm:$0xf] %v194_v8 }
  0x18   : > { %197 = vst [vmem:[%s3801_s27 + $0x24] sm:$0xf] %v196_v9  ;;  %199 = vst [vmem:[%s3801_s27 + $0x28] sm:$0xf] %v198_v10  ;;  %v200_v11 = vld [vmem:[%s3794_s26 + $0x58] sm:$0xf] }
  0x19   : > { %v202_v12 = vld [vmem:[%s3794_s26 + $0x60] sm:$0xf]  ;;  %v204_v13 = vld [vmem:[%s3794_s26 + $0x68] sm:$0xf]  ;;  %201 = vst [vmem:[%s3801_s27 + $0x2c] sm:$0xf] %v200_v11 }
  0x1a   : > { %203 = vst [vmem:[%s3801_s27 + $0x30] sm:$0xf] %v202_v12  ;;  %205 = vst [vmem:[%s3801_s27 + $0x34] sm:$0xf] %v204_v13  ;;  %v206_v14 = vld [vmem:[%s3794_s26 + $0x70] sm:$0xf] }
  0x1b   : > { %v208_v15 = vld [vmem:[%s3794_s26 + $0x78] sm:$0xf]  ;;  %v210_v16 = vld [vmem:[%s3794_s26 + $0x80] sm:$0xf]  ;;  %207 = vst [vmem:[%s3801_s27 + $0x38] sm:$0xf] %v206_v14 }
  0x1c   : > { %209 = vst [vmem:[%s3801_s27 + $0x3c] sm:$0xf] %v208_v15  ;;  %211 = vst [vmem:[%s3801_s27 + $0x40] sm:$0xf] %v210_v16  ;;  %v212_v17 = vld [vmem:[%s3794_s26 + $0x88] sm:$0xf] }
  0x1d   : > { %v214_v18 = vld [vmem:[%s3794_s26 + $0x90] sm:$0xf]  ;;  %v216_v19 = vld [vmem:[%s3794_s26 + $0x98] sm:$0xf]  ;;  %213 = vst [vmem:[%s3801_s27 + $0x44] sm:$0xf] %v212_v17 }
  0x1e   : > { %215 = vst [vmem:[%s3801_s27 + $0x48] sm:$0xf] %v214_v18  ;;  %217 = vst [vmem:[%s3801_s27 + $0x4c] sm:$0xf] %v216_v19  ;;  %v218_v20 = vld [vmem:[%s3794_s26 + $0xa0] sm:$0xf] }
  0x1f   : > { %v220_v21 = vld [vmem:[%s3794_s26 + $0xa8] sm:$0xf]  ;;  %v222_v22 = vld [vmem:[%s3794_s26 + $0xb0] sm:$0xf]  ;;  %219 = vst [vmem:[%s3801_s27 + $0x50] sm:$0xf] %v218_v20 }
  0x20   : > { %221 = vst [vmem:[%s3801_s27 + $0x54] sm:$0xf] %v220_v21  ;;  %223 = vst [vmem:[%s3801_s27 + $0x58] sm:$0xf] %v222_v22  ;;  %v224_v23 = vld [vmem:[%s3794_s26 + $0xb8] sm:$0xf] }
  0x21   : > { %v226_v24 = vld [vmem:[%s3794_s26 + $0xc0] sm:$0xf]  ;;  %v228_v25 = vld [vmem:[%s3794_s26 + $0xc8] sm:$0xf]  ;;  %225 = vst [vmem:[%s3801_s27 + $0x5c] sm:$0xf] %v224_v23 }
  0x22   : > { %227 = vst [vmem:[%s3801_s27 + $0x60] sm:$0xf] %v226_v24  ;;  %229 = vst [vmem:[%s3801_s27 + $0x64] sm:$0xf] %v228_v25  ;;  %v230_v26 = vld [vmem:[%s3794_s26 + $0xd0] sm:$0xf] }
  0x23   : > { %v232_v27 = vld [vmem:[%s3794_s26 + $0xd8] sm:$0xf]  ;;  %v234_v28 = vld [vmem:[%s3794_s26 + $0xe0] sm:$0xf]  ;;  %231 = vst [vmem:[%s3801_s27 + $0x68] sm:$0xf] %v230_v26 }
  0x24   : > { %233 = vst [vmem:[%s3801_s27 + $0x6c] sm:$0xf] %v232_v27  ;;  %235 = vst [vmem:[%s3801_s27 + $0x70] sm:$0xf] %v234_v28  ;;  %v236_v29 = vld [vmem:[%s3794_s26 + $0xe8] sm:$0xf] }
  0x25   : > { %v238_v30 = vld [vmem:[%s3794_s26 + $0xf0] sm:$0xf]  ;;  %v240_v31 = vld [vmem:[%s3794_s26 + $0xf8] sm:$0xf]  ;;  %237 = vst [vmem:[%s3801_s27 + $0x74] sm:$0xf] %v236_v29 }
  0x26   : > { %239 = vst [vmem:[%s3801_s27 + $0x78] sm:$0xf] %v238_v30  ;;  %241 = vst [vmem:[%s3801_s27 + $0x7c] sm:$0xf] %v240_v31  ;;  %v242_v32 = vld [vmem:[%s3794_s26 + $0x100] sm:$0xf] }
  0x27   : > { %v244_v33 = vld [vmem:[%s3794_s26 + $0x108] sm:$0xf]  ;;  %v246_v34 = vld [vmem:[%s3794_s26 + $0x110] sm:$0xf]  ;;  %243 = vst [vmem:[%s3801_s27 + $0x80] sm:$0xf] %v242_v32 }
  0x28   : > { %245 = vst [vmem:[%s3801_s27 + $0x84] sm:$0xf] %v244_v33  ;;  %247 = vst [vmem:[%s3801_s27 + $0x88] sm:$0xf] %v246_v34  ;;  %v248_v35 = vld [vmem:[%s3794_s26 + $0x118] sm:$0xf] }
  0x29   : > { %v250_v36 = vld [vmem:[%s3794_s26 + $0x120] sm:$0xf]  ;;  %v252_v37 = vld [vmem:[%s3794_s26 + $0x128] sm:$0xf]  ;;  %249 = vst [vmem:[%s3801_s27 + $0x8c] sm:$0xf] %v248_v35 }
  0x2a   : > { %251 = vst [vmem:[%s3801_s27 + $0x90] sm:$0xf] %v250_v36  ;;  %253 = vst [vmem:[%s3801_s27 + $0x94] sm:$0xf] %v252_v37  ;;  %v254_v38 = vld [vmem:[%s3794_s26 + $0x130] sm:$0xf] }
  0x2b   : > { %v256_v39 = vld [vmem:[%s3794_s26 + $0x138] sm:$0xf]  ;;  %v258_v40 = vld [vmem:[%s3794_s26 + $0x140] sm:$0xf]  ;;  %255 = vst [vmem:[%s3801_s27 + $0x98] sm:$0xf] %v254_v38 }
  0x2c   : > { %257 = vst [vmem:[%s3801_s27 + $0x9c] sm:$0xf] %v256_v39  ;;  %259 = vst [vmem:[%s3801_s27 + $0xa0] sm:$0xf] %v258_v40  ;;  %v260_v41 = vld [vmem:[%s3794_s26 + $0x148] sm:$0xf] }
  0x2d   : > { %v262_v42 = vld [vmem:[%s3794_s26 + $0x150] sm:$0xf]  ;;  %v264_v43 = vld [vmem:[%s3794_s26 + $0x158] sm:$0xf]  ;;  %261 = vst [vmem:[%s3801_s27 + $0xa4] sm:$0xf] %v260_v41 }
  0x2e   : > { %263 = vst [vmem:[%s3801_s27 + $0xa8] sm:$0xf] %v262_v42  ;;  %265 = vst [vmem:[%s3801_s27 + $0xac] sm:$0xf] %v264_v43  ;;  %v266_v44 = vld [vmem:[%s3794_s26 + $0x160] sm:$0xf] }
  0x2f   : > { %v268_v45 = vld [vmem:[%s3794_s26 + $0x168] sm:$0xf]  ;;  %v270_v46 = vld [vmem:[%s3794_s26 + $0x170] sm:$0xf]  ;;  %267 = vst [vmem:[%s3801_s27 + $0xb0] sm:$0xf] %v266_v44 }
  0x30   : > { %269 = vst [vmem:[%s3801_s27 + $0xb4] sm:$0xf] %v268_v45  ;;  %271 = vst [vmem:[%s3801_s27 + $0xb8] sm:$0xf] %v270_v46  ;;  %v272_v47 = vld [vmem:[%s3794_s26 + $0x178] sm:$0xf] }
  0x31   : > { %v274_v48 = vld [vmem:[%s3794_s26 + $0x180] sm:$0xf]  ;;  %v276_v49 = vld [vmem:[%s3794_s26 + $0x188] sm:$0xf]  ;;  %273 = vst [vmem:[%s3801_s27 + $0xbc] sm:$0xf] %v272_v47 }
  0x32   : > { %275 = vst [vmem:[%s3801_s27 + $0xc0] sm:$0xf] %v274_v48  ;;  %277 = vst [vmem:[%s3801_s27 + $0xc4] sm:$0xf] %v276_v49  ;;  %v278_v50 = vld [vmem:[%s3794_s26 + $0x190] sm:$0xf] }
  0x33   : > { %v280_v51 = vld [vmem:[%s3794_s26 + $0x198] sm:$0xf]  ;;  %v282_v52 = vld [vmem:[%s3794_s26 + $0x1a0] sm:$0xf]  ;;  %279 = vst [vmem:[%s3801_s27 + $0xc8] sm:$0xf] %v278_v50 }
  0x34   : > { %281 = vst [vmem:[%s3801_s27 + $0xcc] sm:$0xf] %v280_v51  ;;  %283 = vst [vmem:[%s3801_s27 + $0xd0] sm:$0xf] %v282_v52  ;;  %v284_v53 = vld [vmem:[%s3794_s26 + $0x1a8] sm:$0xf] }
  0x35   : > { %v286_v54 = vld [vmem:[%s3794_s26 + $0x1b0] sm:$0xf]  ;;  %v288_v55 = vld [vmem:[%s3794_s26 + $0x1b8] sm:$0xf]  ;;  %285 = vst [vmem:[%s3801_s27 + $0xd4] sm:$0xf] %v284_v53 }
  0x36   : > { %287 = vst [vmem:[%s3801_s27 + $0xd8] sm:$0xf] %v286_v54  ;;  %289 = vst [vmem:[%s3801_s27 + $0xdc] sm:$0xf] %v288_v55  ;;  %v290_v56 = vld [vmem:[%s3794_s26 + $0x1c0] sm:$0xf] }
  0x37   : > { %v292_v57 = vld [vmem:[%s3794_s26 + $0x1c8] sm:$0xf]  ;;  %v294_v58 = vld [vmem:[%s3794_s26 + $0x1d0] sm:$0xf]  ;;  %291 = vst [vmem:[%s3801_s27 + $0xe0] sm:$0xf] %v290_v56 }
  0x38   : > { %293 = vst [vmem:[%s3801_s27 + $0xe4] sm:$0xf] %v292_v57  ;;  %295 = vst [vmem:[%s3801_s27 + $0xe8] sm:$0xf] %v294_v58  ;;  %v296_v59 = vld [vmem:[%s3794_s26 + $0x1d8] sm:$0xf] }
  0x39   : > { %v298_v60 = vld [vmem:[%s3794_s26 + $0x1e0] sm:$0xf]  ;;  %v300_v61 = vld [vmem:[%s3794_s26 + $0x1e8] sm:$0xf]  ;;  %297 = vst [vmem:[%s3801_s27 + $0xec] sm:$0xf] %v296_v59 }
  0x3a   : > { %299 = vst [vmem:[%s3801_s27 + $0xf0] sm:$0xf] %v298_v60  ;;  %301 = vst [vmem:[%s3801_s27 + $0xf4] sm:$0xf] %v300_v61  ;;  %v302_v62 = vld [vmem:[%s3794_s26 + $0x1f0] sm:$0xf] }
  0x3b   : > { %v304_v63 = vld [vmem:[%s3794_s26 + $0x1f8] sm:$0xf]  ;;  %v306_v0 = vld [vmem:[%s3794_s26 + $0x200] sm:$0xf]  ;;  %303 = vst [vmem:[%s3801_s27 + $0xf8] sm:$0xf] %v302_v62 }
  0x3c   : > { %305 = vst [vmem:[%s3801_s27 + $0xfc] sm:$0xf] %v304_v63  ;;  %307 = vst [vmem:[%s3801_s27 + $0x100] sm:$0xf] %v306_v0  ;;  %v308_v1 = vld [vmem:[%s3794_s26 + $0x208] sm:$0xf] }
  0x3d   : > { %v310_v2 = vld [vmem:[%s3794_s26 + $0x210] sm:$0xf]  ;;  %v312_v3 = vld [vmem:[%s3794_s26 + $0x218] sm:$0xf]  ;;  %309 = vst [vmem:[%s3801_s27 + $0x104] sm:$0xf] %v308_v1 }
  0x3e   : > { %311 = vst [vmem:[%s3801_s27 + $0x108] sm:$0xf] %v310_v2  ;;  %313 = vst [vmem:[%s3801_s27 + $0x10c] sm:$0xf] %v312_v3  ;;  %v314_v4 = vld [vmem:[%s3794_s26 + $0x220] sm:$0xf] }
  0x3f   : > { %v316_v5 = vld [vmem:[%s3794_s26 + $0x228] sm:$0xf]  ;;  %v318_v6 = vld [vmem:[%s3794_s26 + $0x230] sm:$0xf]  ;;  %315 = vst [vmem:[%s3801_s27 + $0x110] sm:$0xf] %v314_v4 }
  0x40   : > { %317 = vst [vmem:[%s3801_s27 + $0x114] sm:$0xf] %v316_v5  ;;  %319 = vst [vmem:[%s3801_s27 + $0x118] sm:$0xf] %v318_v6  ;;  %v320_v7 = vld [vmem:[%s3794_s26 + $0x238] sm:$0xf] }
  0x41   : > { %v322_v8 = vld [vmem:[%s3794_s26 + $0x240] sm:$0xf]  ;;  %v324_v9 = vld [vmem:[%s3794_s26 + $0x248] sm:$0xf]  ;;  %321 = vst [vmem:[%s3801_s27 + $0x11c] sm:$0xf] %v320_v7 }
  0x42   : > { %323 = vst [vmem:[%s3801_s27 + $0x120] sm:$0xf] %v322_v8  ;;  %325 = vst [vmem:[%s3801_s27 + $0x124] sm:$0xf] %v324_v9  ;;  %v326_v10 = vld [vmem:[%s3794_s26 + $0x250] sm:$0xf] }
  0x43   : > { %v328_v11 = vld [vmem:[%s3794_s26 + $0x258] sm:$0xf]  ;;  %v330_v12 = vld [vmem:[%s3794_s26 + $0x260] sm:$0xf]  ;;  %327 = vst [vmem:[%s3801_s27 + $0x128] sm:$0xf] %v326_v10 }
  0x44   : > { %329 = vst [vmem:[%s3801_s27 + $0x12c] sm:$0xf] %v328_v11  ;;  %331 = vst [vmem:[%s3801_s27 + $0x130] sm:$0xf] %v330_v12  ;;  %v332_v13 = vld [vmem:[%s3794_s26 + $0x268] sm:$0xf] }
  0x45   : > { %v334_v14 = vld [vmem:[%s3794_s26 + $0x270] sm:$0xf]  ;;  %v336_v15 = vld [vmem:[%s3794_s26 + $0x278] sm:$0xf]  ;;  %333 = vst [vmem:[%s3801_s27 + $0x134] sm:$0xf] %v332_v13 }
  0x46   : > { %335 = vst [vmem:[%s3801_s27 + $0x138] sm:$0xf] %v334_v14  ;;  %337 = vst [vmem:[%s3801_s27 + $0x13c] sm:$0xf] %v336_v15  ;;  %v338_v16 = vld [vmem:[%s3794_s26 + $0x280] sm:$0xf] }
  0x47   : > { %v340_v17 = vld [vmem:[%s3794_s26 + $0x288] sm:$0xf]  ;;  %v342_v18 = vld [vmem:[%s3794_s26 + $0x290] sm:$0xf]  ;;  %339 = vst [vmem:[%s3801_s27 + $0x140] sm:$0xf] %v338_v16 }
  0x48   : > { %341 = vst [vmem:[%s3801_s27 + $0x144] sm:$0xf] %v340_v17  ;;  %343 = vst [vmem:[%s3801_s27 + $0x148] sm:$0xf] %v342_v18  ;;  %v344_v19 = vld [vmem:[%s3794_s26 + $0x298] sm:$0xf] }
  0x49   : > { %v346_v20 = vld [vmem:[%s3794_s26 + $0x2a0] sm:$0xf]  ;;  %v348_v21 = vld [vmem:[%s3794_s26 + $0x2a8] sm:$0xf]  ;;  %345 = vst [vmem:[%s3801_s27 + $0x14c] sm:$0xf] %v344_v19 }
  0x4a   : > { %347 = vst [vmem:[%s3801_s27 + $0x150] sm:$0xf] %v346_v20  ;;  %349 = vst [vmem:[%s3801_s27 + $0x154] sm:$0xf] %v348_v21  ;;  %v350_v22 = vld [vmem:[%s3794_s26 + $0x2b0] sm:$0xf] }
  0x4b   : > { %v352_v23 = vld [vmem:[%s3794_s26 + $0x2b8] sm:$0xf]  ;;  %v354_v24 = vld [vmem:[%s3794_s26 + $0x2c0] sm:$0xf]  ;;  %351 = vst [vmem:[%s3801_s27 + $0x158] sm:$0xf] %v350_v22 }
  0x4c   : > { %353 = vst [vmem:[%s3801_s27 + $0x15c] sm:$0xf] %v352_v23  ;;  %355 = vst [vmem:[%s3801_s27 + $0x160] sm:$0xf] %v354_v24  ;;  %v356_v25 = vld [vmem:[%s3794_s26 + $0x2c8] sm:$0xf] }
  0x4d   : > { %v358_v26 = vld [vmem:[%s3794_s26 + $0x2d0] sm:$0xf]  ;;  %v360_v27 = vld [vmem:[%s3794_s26 + $0x2d8] sm:$0xf]  ;;  %357 = vst [vmem:[%s3801_s27 + $0x164] sm:$0xf] %v356_v25 }
  0x4e   : > { %359 = vst [vmem:[%s3801_s27 + $0x168] sm:$0xf] %v358_v26  ;;  %361 = vst [vmem:[%s3801_s27 + $0x16c] sm:$0xf] %v360_v27  ;;  %v362_v28 = vld [vmem:[%s3794_s26 + $0x2e0] sm:$0xf] }
  0x4f   : > { %v364_v29 = vld [vmem:[%s3794_s26 + $0x2e8] sm:$0xf]  ;;  %v366_v30 = vld [vmem:[%s3794_s26 + $0x2f0] sm:$0xf]  ;;  %363 = vst [vmem:[%s3801_s27 + $0x170] sm:$0xf] %v362_v28 }
  0x50   : > { %365 = vst [vmem:[%s3801_s27 + $0x174] sm:$0xf] %v364_v29  ;;  %367 = vst [vmem:[%s3801_s27 + $0x178] sm:$0xf] %v366_v30  ;;  %v368_v31 = vld [vmem:[%s3794_s26 + $0x2f8] sm:$0xf] }
  0x51   : > { %v370_v32 = vld [vmem:[%s3794_s26 + $0x300] sm:$0xf]  ;;  %v372_v33 = vld [vmem:[%s3794_s26 + $0x308] sm:$0xf]  ;;  %369 = vst [vmem:[%s3801_s27 + $0x17c] sm:$0xf] %v368_v31 }
  0x52   : > { %371 = vst [vmem:[%s3801_s27 + $0x180] sm:$0xf] %v370_v32  ;;  %373 = vst [vmem:[%s3801_s27 + $0x184] sm:$0xf] %v372_v33  ;;  %v374_v34 = vld [vmem:[%s3794_s26 + $0x310] sm:$0xf] }
  0x53   : > { %v376_v35 = vld [vmem:[%s3794_s26 + $0x318] sm:$0xf]  ;;  %v378_v36 = vld [vmem:[%s3794_s26 + $0x320] sm:$0xf]  ;;  %375 = vst [vmem:[%s3801_s27 + $0x188] sm:$0xf] %v374_v34 }
  0x54   : > { %377 = vst [vmem:[%s3801_s27 + $0x18c] sm:$0xf] %v376_v35  ;;  %379 = vst [vmem:[%s3801_s27 + $0x190] sm:$0xf] %v378_v36  ;;  %v380_v37 = vld [vmem:[%s3794_s26 + $0x328] sm:$0xf] }
  0x55   : > { %v382_v38 = vld [vmem:[%s3794_s26 + $0x330] sm:$0xf]  ;;  %v384_v39 = vld [vmem:[%s3794_s26 + $0x338] sm:$0xf]  ;;  %381 = vst [vmem:[%s3801_s27 + $0x194] sm:$0xf] %v380_v37 }
  0x56   : > { %383 = vst [vmem:[%s3801_s27 + $0x198] sm:$0xf] %v382_v38  ;;  %385 = vst [vmem:[%s3801_s27 + $0x19c] sm:$0xf] %v384_v39  ;;  %v386_v40 = vld [vmem:[%s3794_s26 + $0x340] sm:$0xf] }
  0x57   : > { %v388_v41 = vld [vmem:[%s3794_s26 + $0x348] sm:$0xf]  ;;  %v390_v42 = vld [vmem:[%s3794_s26 + $0x350] sm:$0xf]  ;;  %387 = vst [vmem:[%s3801_s27 + $0x1a0] sm:$0xf] %v386_v40 }
  0x58   : > { %389 = vst [vmem:[%s3801_s27 + $0x1a4] sm:$0xf] %v388_v41  ;;  %391 = vst [vmem:[%s3801_s27 + $0x1a8] sm:$0xf] %v390_v42  ;;  %v392_v43 = vld [vmem:[%s3794_s26 + $0x358] sm:$0xf] }
  0x59   : > { %v394_v44 = vld [vmem:[%s3794_s26 + $0x360] sm:$0xf]  ;;  %v396_v45 = vld [vmem:[%s3794_s26 + $0x368] sm:$0xf]  ;;  %393 = vst [vmem:[%s3801_s27 + $0x1ac] sm:$0xf] %v392_v43 }
  0x5a   : > { %395 = vst [vmem:[%s3801_s27 + $0x1b0] sm:$0xf] %v394_v44  ;;  %397 = vst [vmem:[%s3801_s27 + $0x1b4] sm:$0xf] %v396_v45  ;;  %v398_v46 = vld [vmem:[%s3794_s26 + $0x370] sm:$0xf] }
  0x5b   : > { %v400_v47 = vld [vmem:[%s3794_s26 + $0x378] sm:$0xf]  ;;  %v402_v48 = vld [vmem:[%s3794_s26 + $0x380] sm:$0xf]  ;;  %399 = vst [vmem:[%s3801_s27 + $0x1b8] sm:$0xf] %v398_v46 }
  0x5c   : > { %401 = vst [vmem:[%s3801_s27 + $0x1bc] sm:$0xf] %v400_v47  ;;  %403 = vst [vmem:[%s3801_s27 + $0x1c0] sm:$0xf] %v402_v48  ;;  %v404_v49 = vld [vmem:[%s3794_s26 + $0x388] sm:$0xf] }
  0x5d   : > { %v406_v50 = vld [vmem:[%s3794_s26 + $0x390] sm:$0xf]  ;;  %v408_v51 = vld [vmem:[%s3794_s26 + $0x398] sm:$0xf]  ;;  %405 = vst [vmem:[%s3801_s27 + $0x1c4] sm:$0xf] %v404_v49 }
  0x5e   : > { %407 = vst [vmem:[%s3801_s27 + $0x1c8] sm:$0xf] %v406_v50  ;;  %409 = vst [vmem:[%s3801_s27 + $0x1cc] sm:$0xf] %v408_v51  ;;  %v410_v52 = vld [vmem:[%s3794_s26 + $0x3a0] sm:$0xf] }
  0x5f   : > { %v412_v53 = vld [vmem:[%s3794_s26 + $0x3a8] sm:$0xf]  ;;  %v414_v54 = vld [vmem:[%s3794_s26 + $0x3b0] sm:$0xf]  ;;  %411 = vst [vmem:[%s3801_s27 + $0x1d0] sm:$0xf] %v410_v52 }
  0x60   : > { %413 = vst [vmem:[%s3801_s27 + $0x1d4] sm:$0xf] %v412_v53  ;;  %415 = vst [vmem:[%s3801_s27 + $0x1d8] sm:$0xf] %v414_v54  ;;  %v416_v55 = vld [vmem:[%s3794_s26 + $0x3b8] sm:$0xf] }
  0x61   : > { %v418_v56 = vld [vmem:[%s3794_s26 + $0x3c0] sm:$0xf]  ;;  %v420_v57 = vld [vmem:[%s3794_s26 + $0x3c8] sm:$0xf]  ;;  %417 = vst [vmem:[%s3801_s27 + $0x1dc] sm:$0xf] %v416_v55 }
  0x62   : > { %419 = vst [vmem:[%s3801_s27 + $0x1e0] sm:$0xf] %v418_v56  ;;  %421 = vst [vmem:[%s3801_s27 + $0x1e4] sm:$0xf] %v420_v57  ;;  %v422_v58 = vld [vmem:[%s3794_s26 + $0x3d0] sm:$0xf] }
  0x63   : > { %v424_v59 = vld [vmem:[%s3794_s26 + $0x3d8] sm:$0xf]  ;;  %v426_v60 = vld [vmem:[%s3794_s26 + $0x3e0] sm:$0xf]  ;;  %423 = vst [vmem:[%s3801_s27 + $0x1e8] sm:$0xf] %v422_v58 }
  0x64   : > { %425 = vst [vmem:[%s3801_s27 + $0x1ec] sm:$0xf] %v424_v59  ;;  %427 = vst [vmem:[%s3801_s27 + $0x1f0] sm:$0xf] %v426_v60  ;;  %v428_v61 = vld [vmem:[%s3794_s26 + $0x3e8] sm:$0xf] }
  0x65   : > { %v430_v62 = vld [vmem:[%s3794_s26 + $0x3f0] sm:$0xf]  ;;  %v432_v63 = vld [vmem:[%s3794_s26 + $0x3f8] sm:$0xf]  ;;  %429 = vst [vmem:[%s3801_s27 + $0x1f4] sm:$0xf] %v428_v61 }
  0x66   : > { %431 = vst [vmem:[%s3801_s27 + $0x1f8] sm:$0xf] %v430_v62  ;;  %433 = vst [vmem:[%s3801_s27 + $0x1fc] sm:$0xf] %v432_v63  ;;  %v434_v0 = vld [vmem:[%s3794_s26 + $0x400] sm:$0xf] }
  0x67   : > { %v436_v1 = vld [vmem:[%s3794_s26 + $0x408] sm:$0xf]  ;;  %v438_v2 = vld [vmem:[%s3794_s26 + $0x410] sm:$0xf]  ;;  %435 = vst [vmem:[%s3801_s27 + $0x200] sm:$0xf] %v434_v0 }
  0x68   : > { %437 = vst [vmem:[%s3801_s27 + $0x204] sm:$0xf] %v436_v1  ;;  %439 = vst [vmem:[%s3801_s27 + $0x208] sm:$0xf] %v438_v2  ;;  %v440_v3 = vld [vmem:[%s3794_s26 + $0x418] sm:$0xf] }
  0x69   : > { %v442_v4 = vld [vmem:[%s3794_s26 + $0x420] sm:$0xf]  ;;  %v444_v5 = vld [vmem:[%s3794_s26 + $0x428] sm:$0xf]  ;;  %441 = vst [vmem:[%s3801_s27 + $0x20c] sm:$0xf] %v440_v3 }
  0x6a   : > { %443 = vst [vmem:[%s3801_s27 + $0x210] sm:$0xf] %v442_v4  ;;  %445 = vst [vmem:[%s3801_s27 + $0x214] sm:$0xf] %v444_v5  ;;  %v446_v6 = vld [vmem:[%s3794_s26 + $0x430] sm:$0xf] }
  0x6b   : > { %v448_v7 = vld [vmem:[%s3794_s26 + $0x438] sm:$0xf]  ;;  %v450_v8 = vld [vmem:[%s3794_s26 + $0x440] sm:$0xf]  ;;  %447 = vst [vmem:[%s3801_s27 + $0x218] sm:$0xf] %v446_v6 }
  0x6c   : > { %449 = vst [vmem:[%s3801_s27 + $0x21c] sm:$0xf] %v448_v7  ;;  %451 = vst [vmem:[%s3801_s27 + $0x220] sm:$0xf] %v450_v8  ;;  %v452_v9 = vld [vmem:[%s3794_s26 + $0x448] sm:$0xf] }
  0x6d   : > { %v454_v10 = vld [vmem:[%s3794_s26 + $0x450] sm:$0xf]  ;;  %v456_v11 = vld [vmem:[%s3794_s26 + $0x458] sm:$0xf]  ;;  %453 = vst [vmem:[%s3801_s27 + $0x224] sm:$0xf] %v452_v9 }
  0x6e   : > { %455 = vst [vmem:[%s3801_s27 + $0x228] sm:$0xf] %v454_v10  ;;  %457 = vst [vmem:[%s3801_s27 + $0x22c] sm:$0xf] %v456_v11  ;;  %v458_v12 = vld [vmem:[%s3794_s26 + $0x460] sm:$0xf] }
  0x6f   : > { %v460_v13 = vld [vmem:[%s3794_s26 + $0x468] sm:$0xf]  ;;  %v462_v14 = vld [vmem:[%s3794_s26 + $0x470] sm:$0xf]  ;;  %459 = vst [vmem:[%s3801_s27 + $0x230] sm:$0xf] %v458_v12 }
  0x70   : > { %461 = vst [vmem:[%s3801_s27 + $0x234] sm:$0xf] %v460_v13  ;;  %463 = vst [vmem:[%s3801_s27 + $0x238] sm:$0xf] %v462_v14  ;;  %v464_v15 = vld [vmem:[%s3794_s26 + $0x478] sm:$0xf] }
  0x71   : > { %v466_v16 = vld [vmem:[%s3794_s26 + $0x480] sm:$0xf]  ;;  %v468_v17 = vld [vmem:[%s3794_s26 + $0x488] sm:$0xf]  ;;  %465 = vst [vmem:[%s3801_s27 + $0x23c] sm:$0xf] %v464_v15 }
  0x72   : > { %467 = vst [vmem:[%s3801_s27 + $0x240] sm:$0xf] %v466_v16  ;;  %469 = vst [vmem:[%s3801_s27 + $0x244] sm:$0xf] %v468_v17  ;;  %v470_v18 = vld [vmem:[%s3794_s26 + $0x490] sm:$0xf] }
  0x73   : > { %v472_v19 = vld [vmem:[%s3794_s26 + $0x498] sm:$0xf]  ;;  %v474_v20 = vld [vmem:[%s3794_s26 + $0x4a0] sm:$0xf]  ;;  %471 = vst [vmem:[%s3801_s27 + $0x248] sm:$0xf] %v470_v18 }
  0x74   : > { %473 = vst [vmem:[%s3801_s27 + $0x24c] sm:$0xf] %v472_v19  ;;  %475 = vst [vmem:[%s3801_s27 + $0x250] sm:$0xf] %v474_v20  ;;  %v476_v21 = vld [vmem:[%s3794_s26 + $0x4a8] sm:$0xf] }
  0x75   : > { %v478_v22 = vld [vmem:[%s3794_s26 + $0x4b0] sm:$0xf]  ;;  %v480_v23 = vld [vmem:[%s3794_s26 + $0x4b8] sm:$0xf]  ;;  %477 = vst [vmem:[%s3801_s27 + $0x254] sm:$0xf] %v476_v21 }
  0x76   : > { %479 = vst [vmem:[%s3801_s27 + $0x258] sm:$0xf] %v478_v22  ;;  %481 = vst [vmem:[%s3801_s27 + $0x25c] sm:$0xf] %v480_v23  ;;  %v482_v24 = vld [vmem:[%s3794_s26 + $0x4c0] sm:$0xf] }
  0x77   : > { %v484_v25 = vld [vmem:[%s3794_s26 + $0x4c8] sm:$0xf]  ;;  %v486_v26 = vld [vmem:[%s3794_s26 + $0x4d0] sm:$0xf]  ;;  %483 = vst [vmem:[%s3801_s27 + $0x260] sm:$0xf] %v482_v24 }
  0x78   : > { %485 = vst [vmem:[%s3801_s27 + $0x264] sm:$0xf] %v484_v25  ;;  %487 = vst [vmem:[%s3801_s27 + $0x268] sm:$0xf] %v486_v26  ;;  %v488_v27 = vld [vmem:[%s3794_s26 + $0x4d8] sm:$0xf] }
  0x79   : > { %v490_v28 = vld [vmem:[%s3794_s26 + $0x4e0] sm:$0xf]  ;;  %v492_v29 = vld [vmem:[%s3794_s26 + $0x4e8] sm:$0xf]  ;;  %489 = vst [vmem:[%s3801_s27 + $0x26c] sm:$0xf] %v488_v27 }
  0x7a   : > { %491 = vst [vmem:[%s3801_s27 + $0x270] sm:$0xf] %v490_v28  ;;  %493 = vst [vmem:[%s3801_s27 + $0x274] sm:$0xf] %v492_v29  ;;  %v494_v30 = vld [vmem:[%s3794_s26 + $0x4f0] sm:$0xf] }
  0x7b   : > { %v496_v31 = vld [vmem:[%s3794_s26 + $0x4f8] sm:$0xf]  ;;  %v498_v32 = vld [vmem:[%s3794_s26 + $0x500] sm:$0xf]  ;;  %495 = vst [vmem:[%s3801_s27 + $0x278] sm:$0xf] %v494_v30 }
  0x7c   : > { %497 = vst [vmem:[%s3801_s27 + $0x27c] sm:$0xf] %v496_v31  ;;  %499 = vst [vmem:[%s3801_s27 + $0x280] sm:$0xf] %v498_v32  ;;  %v500_v33 = vld [vmem:[%s3794_s26 + $0x508] sm:$0xf] }
  0x7d   : > { %v502_v34 = vld [vmem:[%s3794_s26 + $0x510] sm:$0xf]  ;;  %v504_v35 = vld [vmem:[%s3794_s26 + $0x518] sm:$0xf]  ;;  %501 = vst [vmem:[%s3801_s27 + $0x284] sm:$0xf] %v500_v33 }
  0x7e   : > { %503 = vst [vmem:[%s3801_s27 + $0x288] sm:$0xf] %v502_v34  ;;  %505 = vst [vmem:[%s3801_s27 + $0x28c] sm:$0xf] %v504_v35  ;;  %v506_v36 = vld [vmem:[%s3794_s26 + $0x520] sm:$0xf] }
  0x7f   : > { %v508_v37 = vld [vmem:[%s3794_s26 + $0x528] sm:$0xf]  ;;  %v510_v38 = vld [vmem:[%s3794_s26 + $0x530] sm:$0xf]  ;;  %507 = vst [vmem:[%s3801_s27 + $0x290] sm:$0xf] %v506_v36 }
  0x80   : > { %509 = vst [vmem:[%s3801_s27 + $0x294] sm:$0xf] %v508_v37  ;;  %511 = vst [vmem:[%s3801_s27 + $0x298] sm:$0xf] %v510_v38  ;;  %v512_v39 = vld [vmem:[%s3794_s26 + $0x538] sm:$0xf] }
  0x81   : > { %v514_v40 = vld [vmem:[%s3794_s26 + $0x540] sm:$0xf]  ;;  %v516_v41 = vld [vmem:[%s3794_s26 + $0x548] sm:$0xf]  ;;  %513 = vst [vmem:[%s3801_s27 + $0x29c] sm:$0xf] %v512_v39 }
  0x82   : > { %515 = vst [vmem:[%s3801_s27 + $0x2a0] sm:$0xf] %v514_v40  ;;  %517 = vst [vmem:[%s3801_s27 + $0x2a4] sm:$0xf] %v516_v41  ;;  %v518_v42 = vld [vmem:[%s3794_s26 + $0x550] sm:$0xf] }
  0x83   : > { %v520_v43 = vld [vmem:[%s3794_s26 + $0x558] sm:$0xf]  ;;  %v522_v44 = vld [vmem:[%s3794_s26 + $0x560] sm:$0xf]  ;;  %519 = vst [vmem:[%s3801_s27 + $0x2a8] sm:$0xf] %v518_v42 }
  0x84   : > { %521 = vst [vmem:[%s3801_s27 + $0x2ac] sm:$0xf] %v520_v43  ;;  %523 = vst [vmem:[%s3801_s27 + $0x2b0] sm:$0xf] %v522_v44  ;;  %v524_v45 = vld [vmem:[%s3794_s26 + $0x568] sm:$0xf] }
  0x85   : > { %v526_v46 = vld [vmem:[%s3794_s26 + $0x570] sm:$0xf]  ;;  %v528_v47 = vld [vmem:[%s3794_s26 + $0x578] sm:$0xf]  ;;  %525 = vst [vmem:[%s3801_s27 + $0x2b4] sm:$0xf] %v524_v45 }
  0x86   : > { %527 = vst [vmem:[%s3801_s27 + $0x2b8] sm:$0xf] %v526_v46  ;;  %529 = vst [vmem:[%s3801_s27 + $0x2bc] sm:$0xf] %v528_v47  ;;  %v530_v48 = vld [vmem:[%s3794_s26 + $0x580] sm:$0xf] }
  0x87   : > { %v532_v49 = vld [vmem:[%s3794_s26 + $0x588] sm:$0xf]  ;;  %v534_v50 = vld [vmem:[%s3794_s26 + $0x590] sm:$0xf]  ;;  %531 = vst [vmem:[%s3801_s27 + $0x2c0] sm:$0xf] %v530_v48 }
  0x88   : > { %533 = vst [vmem:[%s3801_s27 + $0x2c4] sm:$0xf] %v532_v49  ;;  %535 = vst [vmem:[%s3801_s27 + $0x2c8] sm:$0xf] %v534_v50  ;;  %v536_v51 = vld [vmem:[%s3794_s26 + $0x598] sm:$0xf] }
  0x89   : > { %v538_v52 = vld [vmem:[%s3794_s26 + $0x5a0] sm:$0xf]  ;;  %v540_v53 = vld [vmem:[%s3794_s26 + $0x5a8] sm:$0xf]  ;;  %537 = vst [vmem:[%s3801_s27 + $0x2cc] sm:$0xf] %v536_v51 }
  0x8a   : > { %539 = vst [vmem:[%s3801_s27 + $0x2d0] sm:$0xf] %v538_v52  ;;  %541 = vst [vmem:[%s3801_s27 + $0x2d4] sm:$0xf] %v540_v53  ;;  %v542_v54 = vld [vmem:[%s3794_s26 + $0x5b0] sm:$0xf] }
  0x8b   : > { %v544_v55 = vld [vmem:[%s3794_s26 + $0x5b8] sm:$0xf]  ;;  %v546_v56 = vld [vmem:[%s3794_s26 + $0x5c0] sm:$0xf]  ;;  %543 = vst [vmem:[%s3801_s27 + $0x2d8] sm:$0xf] %v542_v54 }
  0x8c   : > { %545 = vst [vmem:[%s3801_s27 + $0x2dc] sm:$0xf] %v544_v55  ;;  %547 = vst [vmem:[%s3801_s27 + $0x2e0] sm:$0xf] %v546_v56  ;;  %v548_v57 = vld [vmem:[%s3794_s26 + $0x5c8] sm:$0xf] }
  0x8d   : > { %v550_v58 = vld [vmem:[%s3794_s26 + $0x5d0] sm:$0xf]  ;;  %v552_v59 = vld [vmem:[%s3794_s26 + $0x5d8] sm:$0xf]  ;;  %549 = vst [vmem:[%s3801_s27 + $0x2e4] sm:$0xf] %v548_v57 }
  0x8e   : > { %551 = vst [vmem:[%s3801_s27 + $0x2e8] sm:$0xf] %v550_v58  ;;  %553 = vst [vmem:[%s3801_s27 + $0x2ec] sm:$0xf] %v552_v59  ;;  %v554_v60 = vld [vmem:[%s3794_s26 + $0x5e0] sm:$0xf] }
  0x8f   : > { %v556_v61 = vld [vmem:[%s3794_s26 + $0x5e8] sm:$0xf]  ;;  %v558_v62 = vld [vmem:[%s3794_s26 + $0x5f0] sm:$0xf]  ;;  %555 = vst [vmem:[%s3801_s27 + $0x2f0] sm:$0xf] %v554_v60 }
  0x90   : > { %557 = vst [vmem:[%s3801_s27 + $0x2f4] sm:$0xf] %v556_v61  ;;  %559 = vst [vmem:[%s3801_s27 + $0x2f8] sm:$0xf] %v558_v62  ;;  %v560_v63 = vld [vmem:[%s3794_s26 + $0x5f8] sm:$0xf] }
  0x91   : > { %v562_v0 = vld [vmem:[%s3794_s26 + $0x600] sm:$0xf]  ;;  %v564_v1 = vld [vmem:[%s3794_s26 + $0x608] sm:$0xf]  ;;  %561 = vst [vmem:[%s3801_s27 + $0x2fc] sm:$0xf] %v560_v63 }
  0x92   : > { %563 = vst [vmem:[%s3801_s27 + $0x300] sm:$0xf] %v562_v0  ;;  %565 = vst [vmem:[%s3801_s27 + $0x304] sm:$0xf] %v564_v1  ;;  %v566_v2 = vld [vmem:[%s3794_s26 + $0x610] sm:$0xf] }
  0x93   : > { %v568_v3 = vld [vmem:[%s3794_s26 + $0x618] sm:$0xf]  ;;  %v570_v4 = vld [vmem:[%s3794_s26 + $0x620] sm:$0xf]  ;;  %567 = vst [vmem:[%s3801_s27 + $0x308] sm:$0xf] %v566_v2 }
  0x94   : > { %569 = vst [vmem:[%s3801_s27 + $0x30c] sm:$0xf] %v568_v3  ;;  %571 = vst [vmem:[%s3801_s27 + $0x310] sm:$0xf] %v570_v4  ;;  %v572_v5 = vld [vmem:[%s3794_s26 + $0x628] sm:$0xf] }
  0x95   : > { %v574_v6 = vld [vmem:[%s3794_s26 + $0x630] sm:$0xf]  ;;  %v576_v7 = vld [vmem:[%s3794_s26 + $0x638] sm:$0xf]  ;;  %573 = vst [vmem:[%s3801_s27 + $0x314] sm:$0xf] %v572_v5 }
  0x96   : > { %575 = vst [vmem:[%s3801_s27 + $0x318] sm:$0xf] %v574_v6  ;;  %577 = vst [vmem:[%s3801_s27 + $0x31c] sm:$0xf] %v576_v7  ;;  %v578_v8 = vld [vmem:[%s3794_s26 + $0x640] sm:$0xf] }
  0x97   : > { %v580_v9 = vld [vmem:[%s3794_s26 + $0x648] sm:$0xf]  ;;  %v582_v10 = vld [vmem:[%s3794_s26 + $0x650] sm:$0xf]  ;;  %579 = vst [vmem:[%s3801_s27 + $0x320] sm:$0xf] %v578_v8 }
  0x98   : > { %581 = vst [vmem:[%s3801_s27 + $0x324] sm:$0xf] %v580_v9  ;;  %583 = vst [vmem:[%s3801_s27 + $0x328] sm:$0xf] %v582_v10  ;;  %v584_v11 = vld [vmem:[%s3794_s26 + $0x658] sm:$0xf] }
  0x99   : > { %v586_v12 = vld [vmem:[%s3794_s26 + $0x660] sm:$0xf]  ;;  %v588_v13 = vld [vmem:[%s3794_s26 + $0x668] sm:$0xf]  ;;  %585 = vst [vmem:[%s3801_s27 + $0x32c] sm:$0xf] %v584_v11 }
  0x9a   : > { %587 = vst [vmem:[%s3801_s27 + $0x330] sm:$0xf] %v586_v12  ;;  %589 = vst [vmem:[%s3801_s27 + $0x334] sm:$0xf] %v588_v13  ;;  %v590_v14 = vld [vmem:[%s3794_s26 + $0x670] sm:$0xf] }
  0x9b   : > { %v592_v15 = vld [vmem:[%s3794_s26 + $0x678] sm:$0xf]  ;;  %v594_v16 = vld [vmem:[%s3794_s26 + $0x680] sm:$0xf]  ;;  %591 = vst [vmem:[%s3801_s27 + $0x338] sm:$0xf] %v590_v14 }
  0x9c   : > { %593 = vst [vmem:[%s3801_s27 + $0x33c] sm:$0xf] %v592_v15  ;;  %595 = vst [vmem:[%s3801_s27 + $0x340] sm:$0xf] %v594_v16  ;;  %v596_v17 = vld [vmem:[%s3794_s26 + $0x688] sm:$0xf] }
  0x9d   : > { %v598_v18 = vld [vmem:[%s3794_s26 + $0x690] sm:$0xf]  ;;  %v600_v19 = vld [vmem:[%s3794_s26 + $0x698] sm:$0xf]  ;;  %597 = vst [vmem:[%s3801_s27 + $0x344] sm:$0xf] %v596_v17 }
  0x9e   : > { %599 = vst [vmem:[%s3801_s27 + $0x348] sm:$0xf] %v598_v18  ;;  %601 = vst [vmem:[%s3801_s27 + $0x34c] sm:$0xf] %v600_v19  ;;  %v602_v20 = vld [vmem:[%s3794_s26 + $0x6a0] sm:$0xf] }
  0x9f   : > { %v604_v21 = vld [vmem:[%s3794_s26 + $0x6a8] sm:$0xf]  ;;  %v606_v22 = vld [vmem:[%s3794_s26 + $0x6b0] sm:$0xf]  ;;  %603 = vst [vmem:[%s3801_s27 + $0x350] sm:$0xf] %v602_v20 }
  0xa0   : > { %605 = vst [vmem:[%s3801_s27 + $0x354] sm:$0xf] %v604_v21  ;;  %607 = vst [vmem:[%s3801_s27 + $0x358] sm:$0xf] %v606_v22  ;;  %v608_v23 = vld [vmem:[%s3794_s26 + $0x6b8] sm:$0xf] }
  0xa1   : > { %v610_v24 = vld [vmem:[%s3794_s26 + $0x6c0] sm:$0xf]  ;;  %v612_v25 = vld [vmem:[%s3794_s26 + $0x6c8] sm:$0xf]  ;;  %609 = vst [vmem:[%s3801_s27 + $0x35c] sm:$0xf] %v608_v23 }
  0xa2   : > { %611 = vst [vmem:[%s3801_s27 + $0x360] sm:$0xf] %v610_v24  ;;  %613 = vst [vmem:[%s3801_s27 + $0x364] sm:$0xf] %v612_v25  ;;  %v614_v26 = vld [vmem:[%s3794_s26 + $0x6d0] sm:$0xf] }
  0xa3   : > { %v616_v27 = vld [vmem:[%s3794_s26 + $0x6d8] sm:$0xf]  ;;  %v618_v28 = vld [vmem:[%s3794_s26 + $0x6e0] sm:$0xf]  ;;  %615 = vst [vmem:[%s3801_s27 + $0x368] sm:$0xf] %v614_v26 }
  0xa4   : > { %617 = vst [vmem:[%s3801_s27 + $0x36c] sm:$0xf] %v616_v27  ;;  %619 = vst [vmem:[%s3801_s27 + $0x370] sm:$0xf] %v618_v28  ;;  %v620_v29 = vld [vmem:[%s3794_s26 + $0x6e8] sm:$0xf] }
  0xa5   : > { %v622_v30 = vld [vmem:[%s3794_s26 + $0x6f0] sm:$0xf]  ;;  %v624_v31 = vld [vmem:[%s3794_s26 + $0x6f8] sm:$0xf]  ;;  %621 = vst [vmem:[%s3801_s27 + $0x374] sm:$0xf] %v620_v29 }
  0xa6   : > { %623 = vst [vmem:[%s3801_s27 + $0x378] sm:$0xf] %v622_v30  ;;  %625 = vst [vmem:[%s3801_s27 + $0x37c] sm:$0xf] %v624_v31  ;;  %v626_v32 = vld [vmem:[%s3794_s26 + $0x700] sm:$0xf] }
  0xa7   : > { %v628_v33 = vld [vmem:[%s3794_s26 + $0x708] sm:$0xf]  ;;  %v630_v34 = vld [vmem:[%s3794_s26 + $0x710] sm:$0xf]  ;;  %627 = vst [vmem:[%s3801_s27 + $0x380] sm:$0xf] %v626_v32 }
  0xa8   : > { %629 = vst [vmem:[%s3801_s27 + $0x384] sm:$0xf] %v628_v33  ;;  %631 = vst [vmem:[%s3801_s27 + $0x388] sm:$0xf] %v630_v34  ;;  %v632_v35 = vld [vmem:[%s3794_s26 + $0x718] sm:$0xf] }
  0xa9   : > { %v634_v36 = vld [vmem:[%s3794_s26 + $0x720] sm:$0xf]  ;;  %v636_v37 = vld [vmem:[%s3794_s26 + $0x728] sm:$0xf]  ;;  %633 = vst [vmem:[%s3801_s27 + $0x38c] sm:$0xf] %v632_v35 }
  0xaa   : > { %635 = vst [vmem:[%s3801_s27 + $0x390] sm:$0xf] %v634_v36  ;;  %637 = vst [vmem:[%s3801_s27 + $0x394] sm:$0xf] %v636_v37  ;;  %v638_v38 = vld [vmem:[%s3794_s26 + $0x730] sm:$0xf] }
  0xab   : > { %v640_v39 = vld [vmem:[%s3794_s26 + $0x738] sm:$0xf]  ;;  %v642_v40 = vld [vmem:[%s3794_s26 + $0x740] sm:$0xf]  ;;  %639 = vst [vmem:[%s3801_s27 + $0x398] sm:$0xf] %v638_v38 }
  0xac   : > { %641 = vst [vmem:[%s3801_s27 + $0x39c] sm:$0xf] %v640_v39  ;;  %643 = vst [vmem:[%s3801_s27 + $0x3a0] sm:$0xf] %v642_v40  ;;  %v644_v41 = vld [vmem:[%s3794_s26 + $0x748] sm:$0xf] }
  0xad   : > { %v646_v42 = vld [vmem:[%s3794_s26 + $0x750] sm:$0xf]  ;;  %v648_v43 = vld [vmem:[%s3794_s26 + $0x758] sm:$0xf]  ;;  %645 = vst [vmem:[%s3801_s27 + $0x3a4] sm:$0xf] %v644_v41 }
  0xae   : > { %647 = vst [vmem:[%s3801_s27 + $0x3a8] sm:$0xf] %v646_v42  ;;  %649 = vst [vmem:[%s3801_s27 + $0x3ac] sm:$0xf] %v648_v43  ;;  %v650_v44 = vld [vmem:[%s3794_s26 + $0x760] sm:$0xf] }
  0xaf   : > { %v652_v45 = vld [vmem:[%s3794_s26 + $0x768] sm:$0xf]  ;;  %v654_v46 = vld [vmem:[%s3794_s26 + $0x770] sm:$0xf]  ;;  %651 = vst [vmem:[%s3801_s27 + $0x3b0] sm:$0xf] %v650_v44 }
  0xb0   : > { %653 = vst [vmem:[%s3801_s27 + $0x3b4] sm:$0xf] %v652_v45  ;;  %655 = vst [vmem:[%s3801_s27 + $0x3b8] sm:$0xf] %v654_v46  ;;  %v656_v47 = vld [vmem:[%s3794_s26 + $0x778] sm:$0xf] }
  0xb1   : > { %v658_v48 = vld [vmem:[%s3794_s26 + $0x780] sm:$0xf]  ;;  %v660_v49 = vld [vmem:[%s3794_s26 + $0x788] sm:$0xf]  ;;  %657 = vst [vmem:[%s3801_s27 + $0x3bc] sm:$0xf] %v656_v47 }
  0xb2   : > { %659 = vst [vmem:[%s3801_s27 + $0x3c0] sm:$0xf] %v658_v48  ;;  %661 = vst [vmem:[%s3801_s27 + $0x3c4] sm:$0xf] %v660_v49  ;;  %v662_v50 = vld [vmem:[%s3794_s26 + $0x790] sm:$0xf] }
  0xb3   : > { %v664_v51 = vld [vmem:[%s3794_s26 + $0x798] sm:$0xf]  ;;  %v666_v52 = vld [vmem:[%s3794_s26 + $0x7a0] sm:$0xf]  ;;  %663 = vst [vmem:[%s3801_s27 + $0x3c8] sm:$0xf] %v662_v50 }
  0xb4   : > { %665 = vst [vmem:[%s3801_s27 + $0x3cc] sm:$0xf] %v664_v51  ;;  %667 = vst [vmem:[%s3801_s27 + $0x3d0] sm:$0xf] %v666_v52  ;;  %v668_v53 = vld [vmem:[%s3794_s26 + $0x7a8] sm:$0xf] }
  0xb5   : > { %v670_v54 = vld [vmem:[%s3794_s26 + $0x7b0] sm:$0xf]  ;;  %v672_v55 = vld [vmem:[%s3794_s26 + $0x7b8] sm:$0xf]  ;;  %669 = vst [vmem:[%s3801_s27 + $0x3d4] sm:$0xf] %v668_v53 }
  0xb6   : > { %671 = vst [vmem:[%s3801_s27 + $0x3d8] sm:$0xf] %v670_v54  ;;  %673 = vst [vmem:[%s3801_s27 + $0x3dc] sm:$0xf] %v672_v55  ;;  %v674_v56 = vld [vmem:[%s3794_s26 + $0x7c0] sm:$0xf] }
  0xb7   : > { %v676_v57 = vld [vmem:[%s3794_s26 + $0x7c8] sm:$0xf]  ;;  %v678_v58 = vld [vmem:[%s3794_s26 + $0x7d0] sm:$0xf]  ;;  %675 = vst [vmem:[%s3801_s27 + $0x3e0] sm:$0xf] %v674_v56 }
  0xb8   : > { %677 = vst [vmem:[%s3801_s27 + $0x3e4] sm:$0xf] %v676_v57  ;;  %679 = vst [vmem:[%s3801_s27 + $0x3e8] sm:$0xf] %v678_v58  ;;  %v680_v59 = vld [vmem:[%s3794_s26 + $0x7d8] sm:$0xf] }
  0xb9   : > { %v682_v60 = vld [vmem:[%s3794_s26 + $0x7e0] sm:$0xf]  ;;  %v684_v61 = vld [vmem:[%s3794_s26 + $0x7e8] sm:$0xf]  ;;  %681 = vst [vmem:[%s3801_s27 + $0x3ec] sm:$0xf] %v680_v59 }
  0xba   : > { %683 = vst [vmem:[%s3801_s27 + $0x3f0] sm:$0xf] %v682_v60  ;;  %685 = vst [vmem:[%s3801_s27 + $0x3f4] sm:$0xf] %v684_v61  ;;  %v686_v62 = vld [vmem:[%s3794_s26 + $0x7f0] sm:$0xf] }
  0xbb   : > { %v688_v63 = vld [vmem:[%s3794_s26 + $0x7f8] sm:$0xf]  ;;  %v690_v0 = vld [vmem:[%s3794_s26 + $0x800] sm:$0xf]  ;;  %687 = vst [vmem:[%s3801_s27 + $0x3f8] sm:$0xf] %v686_v62 }
  0xbc   : > { %689 = vst [vmem:[%s3801_s27 + $0x3fc] sm:$0xf] %v688_v63  ;;  %691 = vst [vmem:[%s3801_s27 + $0x400] sm:$0xf] %v690_v0  ;;  %v692_v1 = vld [vmem:[%s3794_s26 + $0x808] sm:$0xf] }
  0xbd   : > { %v694_v2 = vld [vmem:[%s3794_s26 + $0x810] sm:$0xf]  ;;  %v696_v3 = vld [vmem:[%s3794_s26 + $0x818] sm:$0xf]  ;;  %693 = vst [vmem:[%s3801_s27 + $0x404] sm:$0xf] %v692_v1 }
  0xbe   : > { %695 = vst [vmem:[%s3801_s27 + $0x408] sm:$0xf] %v694_v2  ;;  %697 = vst [vmem:[%s3801_s27 + $0x40c] sm:$0xf] %v696_v3  ;;  %v698_v4 = vld [vmem:[%s3794_s26 + $0x820] sm:$0xf] }
  0xbf   : > { %v700_v5 = vld [vmem:[%s3794_s26 + $0x828] sm:$0xf]  ;;  %v702_v6 = vld [vmem:[%s3794_s26 + $0x830] sm:$0xf]  ;;  %699 = vst [vmem:[%s3801_s27 + $0x410] sm:$0xf] %v698_v4 }
  0xc0   : > { %701 = vst [vmem:[%s3801_s27 + $0x414] sm:$0xf] %v700_v5  ;;  %703 = vst [vmem:[%s3801_s27 + $0x418] sm:$0xf] %v702_v6  ;;  %v704_v7 = vld [vmem:[%s3794_s26 + $0x838] sm:$0xf] }
  0xc1   : > { %v706_v8 = vld [vmem:[%s3794_s26 + $0x840] sm:$0xf]  ;;  %v708_v9 = vld [vmem:[%s3794_s26 + $0x848] sm:$0xf]  ;;  %705 = vst [vmem:[%s3801_s27 + $0x41c] sm:$0xf] %v704_v7 }
  0xc2   : > { %707 = vst [vmem:[%s3801_s27 + $0x420] sm:$0xf] %v706_v8  ;;  %709 = vst [vmem:[%s3801_s27 + $0x424] sm:$0xf] %v708_v9  ;;  %v710_v10 = vld [vmem:[%s3794_s26 + $0x850] sm:$0xf] }
  0xc3   : > { %v712_v11 = vld [vmem:[%s3794_s26 + $0x858] sm:$0xf]  ;;  %v714_v12 = vld [vmem:[%s3794_s26 + $0x860] sm:$0xf]  ;;  %711 = vst [vmem:[%s3801_s27 + $0x428] sm:$0xf] %v710_v10 }
  0xc4   : > { %713 = vst [vmem:[%s3801_s27 + $0x42c] sm:$0xf] %v712_v11  ;;  %715 = vst [vmem:[%s3801_s27 + $0x430] sm:$0xf] %v714_v12  ;;  %v716_v13 = vld [vmem:[%s3794_s26 + $0x868] sm:$0xf] }
  0xc5   : > { %v718_v14 = vld [vmem:[%s3794_s26 + $0x870] sm:$0xf]  ;;  %v720_v15 = vld [vmem:[%s3794_s26 + $0x878] sm:$0xf]  ;;  %717 = vst [vmem:[%s3801_s27 + $0x434] sm:$0xf] %v716_v13 }
  0xc6   : > { %719 = vst [vmem:[%s3801_s27 + $0x438] sm:$0xf] %v718_v14  ;;  %721 = vst [vmem:[%s3801_s27 + $0x43c] sm:$0xf] %v720_v15  ;;  %v722_v16 = vld [vmem:[%s3794_s26 + $0x880] sm:$0xf] }
  0xc7   : > { %v724_v17 = vld [vmem:[%s3794_s26 + $0x888] sm:$0xf]  ;;  %v726_v18 = vld [vmem:[%s3794_s26 + $0x890] sm:$0xf]  ;;  %723 = vst [vmem:[%s3801_s27 + $0x440] sm:$0xf] %v722_v16 }
  0xc8   : > { %725 = vst [vmem:[%s3801_s27 + $0x444] sm:$0xf] %v724_v17  ;;  %727 = vst [vmem:[%s3801_s27 + $0x448] sm:$0xf] %v726_v18  ;;  %v728_v19 = vld [vmem:[%s3794_s26 + $0x898] sm:$0xf] }
  0xc9   : > { %v730_v20 = vld [vmem:[%s3794_s26 + $0x8a0] sm:$0xf]  ;;  %v732_v21 = vld [vmem:[%s3794_s26 + $0x8a8] sm:$0xf]  ;;  %729 = vst [vmem:[%s3801_s27 + $0x44c] sm:$0xf] %v728_v19 }
  0xca   : > { %731 = vst [vmem:[%s3801_s27 + $0x450] sm:$0xf] %v730_v20  ;;  %733 = vst [vmem:[%s3801_s27 + $0x454] sm:$0xf] %v732_v21  ;;  %v734_v22 = vld [vmem:[%s3794_s26 + $0x8b0] sm:$0xf] }
  0xcb   : > { %v736_v23 = vld [vmem:[%s3794_s26 + $0x8b8] sm:$0xf]  ;;  %v738_v24 = vld [vmem:[%s3794_s26 + $0x8c0] sm:$0xf]  ;;  %735 = vst [vmem:[%s3801_s27 + $0x458] sm:$0xf] %v734_v22 }
  0xcc   : > { %737 = vst [vmem:[%s3801_s27 + $0x45c] sm:$0xf] %v736_v23  ;;  %739 = vst [vmem:[%s3801_s27 + $0x460] sm:$0xf] %v738_v24  ;;  %v740_v25 = vld [vmem:[%s3794_s26 + $0x8c8] sm:$0xf] }
  0xcd   : > { %v742_v26 = vld [vmem:[%s3794_s26 + $0x8d0] sm:$0xf]  ;;  %v744_v27 = vld [vmem:[%s3794_s26 + $0x8d8] sm:$0xf]  ;;  %741 = vst [vmem:[%s3801_s27 + $0x464] sm:$0xf] %v740_v25 }
  0xce   : > { %743 = vst [vmem:[%s3801_s27 + $0x468] sm:$0xf] %v742_v26  ;;  %745 = vst [vmem:[%s3801_s27 + $0x46c] sm:$0xf] %v744_v27  ;;  %v746_v28 = vld [vmem:[%s3794_s26 + $0x8e0] sm:$0xf] }
  0xcf   : > { %v748_v29 = vld [vmem:[%s3794_s26 + $0x8e8] sm:$0xf]  ;;  %v750_v30 = vld [vmem:[%s3794_s26 + $0x8f0] sm:$0xf]  ;;  %747 = vst [vmem:[%s3801_s27 + $0x470] sm:$0xf] %v746_v28 }
  0xd0   : > { %749 = vst [vmem:[%s3801_s27 + $0x474] sm:$0xf] %v748_v29  ;;  %751 = vst [vmem:[%s3801_s27 + $0x478] sm:$0xf] %v750_v30  ;;  %v752_v31 = vld [vmem:[%s3794_s26 + $0x8f8] sm:$0xf] }
  0xd1   : > { %753 = vst [vmem:[%s3801_s27 + $0x47c] sm:$0xf] %v752_v31 }
  0xd2 PF: > { %p3122_p6 = scmp.ge.s32.totalorder %s3729_s16, 1  ;;  %p1357_p7 = scmp.lt.s32.totalorder %s3729_s16, 3 }
  0xd4   : > { %p1358_p8 = pnand %p3122_p6, %p1357_p7 }
  0xd5   : > { %s1364_s28 = sand.u32 (!%p1358_p8), 1, %s3713_s12   ;;  %v4380_v32 = vld [vmem:[%s4619_s0] sm:$0xff] (!%p1358_p8)  ;;  %v4385_v33 = vld [vmem:[%s4619_s0 + $0x8] sm:$0xff] (!%p1358_p8)  ;;  %v4423_v63 = vld [vmem:[%s4619_s0 + $0x10] sm:$0xff] (!%p1358_p8)  ;;  %p1403_p9 = scmp.lt.s32.totalorder (!%p1358_p8), %s3721_s14, 1 }
  0xd6   : > { %1361 = sbr.rel (%p1358_p8) target bundleno = 599 (0x257), region = 69  ;;  %v3126_v34 = vcombine.high (!%p1358_p8), %v4380_v32, %v4380_v32  ;;  %v3128_v35 = vcombine.high (!%p1358_p8), %v4385_v33, %v4385_v33  ;;  %v4430_v2 = vld [vmem:[%s4619_s0 + $0x18] sm:$0xff] (!%p1358_p8)  ;;  %v3125_v5 = vcombine.low (!%p1358_p8), %v4380_v32, %v4380_v32  ;;  %v3130_v7 = vcombine.high (!%p1358_p8), %v4423_v63, %v4423_v63 }
  0xd7   : > { %s3488_s6 = smul.u32 (!%p1358_p8), 1152, %s1364_s28  ;;  %v3127_v9 = vcombine.low (!%p1358_p8), %v4385_v33, %v4385_v33  ;;  %v3132_v11 = vcombine.high (!%p1358_p8), %v4430_v2, %v4430_v2 }
  0xd8   : > { %2678 = vmatprep.mubr.bf16.mxu0 (!%p1358_p8), %v3126_v34  ;;  %2718 = vmatprep.mubr.bf16.mxu1 (!%p1358_p8), %v3128_v35 }
  0xd9   : > { %s4391_s7 = scalar_lea.vmem (!%p1358_p8), [#allocation2], %s3488_s6 }
  0xda   : > { %v3529_v36 = vld [vmem:[%s4391_s7 + $0x40] sm:$0xff] (!%p1358_p8)   ;;  %v3533_v40 = vld [vmem:[%s4391_s7 + $0x48] sm:$0xff] (!%p1358_p8)   ;;  %v3537_v44 = vld [vmem:[%s4391_s7 + $0x50] sm:$0xff] (!%p1358_p8)  }
  0xdb   : > { %v3530_v37 = vld [vmem:[%s4391_s7] sm:$0xff] (!%p1358_p8)   ;;  %3289 = vmatprep.subr.bf16.mxu0 (!%p1358_p8), %v3529_v36  ;;  %v3534_v41 = vld [vmem:[%s4391_s7 + $0x8] sm:$0xff] (!%p1358_p8)   ;;  %v3538_v45 = vld [vmem:[%s4391_s7 + $0x10] sm:$0xff] (!%p1358_p8)  }
  0xdc   : > { %v3531_v38 = vld [vmem:[%s4391_s7 + $0xc0] sm:$0xff] (!%p1358_p8)   ;;  %3290 = vmatpush3.bf16.msra.mxu0 (!%p1358_p8), %v3530_v37  ;;  %v3535_v42 = vld [vmem:[%s4391_s7 + $0xc8] sm:$0xff] (!%p1358_p8)   ;;  %v3539_v46 = vld [vmem:[%s4391_s7 + $0xd0] sm:$0xff] (!%p1358_p8)  }
  0xdd   : > { %v3532_v39 = vld [vmem:[%s4391_s7 + $0x80] sm:$0xff]   ;;  %3311 = vmatprep.subr.bf16.mxu1 %v3531_v38  ;;  %3291 = vmatprep.subr.bf16.mxu0 %v3533_v40  ;;  %v3536_v43 = vld [vmem:[%s4391_s7 + $0x88] sm:$0xff]   ;;  %v3540_v47 = vld [vmem:[%s4391_s7 + $0x90] sm:$0xff]   ;;  %s4630_s14 = smov (!%p1403_p9, %s3721_s14), 1 }
  0xde   : > { %3312 = vmatpush3.bf16.msra.mxu1 %v3532_v39  ;;  %v3541_v48 = vld [vmem:[%s4391_s7 + $0x58] sm:$0xff]   ;;  %v3545_v52 = vld [vmem:[%s4391_s7 + $0x60] sm:$0xff]   ;;  %v3549_v56 = vld [vmem:[%s4391_s7 + $0x68] sm:$0xff]   ;;  %s1405_s30 = scalar_lea.vmem %s4621_s2, %s4630_s14  ;;  %s3123_s4 = sshll.u32 %s4630_s14, 2 }
  0xdf   : > { %3313 = vmatprep.subr.bf16.mxu1 %v3535_v42  ;;  %v3542_v49 = vld [vmem:[%s4391_s7 + $0x18] sm:$0xff]   ;;  %v3546_v53 = vld [vmem:[%s4391_s7 + $0x20] sm:$0xff]   ;;  %v3550_v57 = vld [vmem:[%s4391_s7 + $0x28] sm:$0xff]  }
  0xe0   : > { %3292 = vmatpush3.bf16.msra.mxu0 %v3534_v41  ;;  %v3543_v50 = vld [vmem:[%s4391_s7 + $0xd8] sm:$0xff]   ;;  %v3547_v54 = vld [vmem:[%s4391_s7 + $0xe0] sm:$0xff]   ;;  %v3551_v58 = vld [vmem:[%s4391_s7 + $0xe8] sm:$0xff]  }
  0xe1   : > { %3293 = vmatprep.subr.bf16.mxu0 %v3537_v44  ;;  %v3544_v51 = vld [vmem:[%s4391_s7 + $0x98] sm:$0xff]   ;;  %v3548_v55 = vld [vmem:[%s4391_s7 + $0xa0] sm:$0xff]   ;;  %v3552_v59 = vld [vmem:[%s4391_s7 + $0xa8] sm:$0xff]  }
  0xe2   : > { %3314 = vmatpush3.bf16.msra.mxu1 %v3536_v43  ;;  %v3553_v60 = vld [vmem:[%s4391_s7 + $0x70] sm:$0xff]   ;;  %v3557_v1 = vld [vmem:[%s4391_s7 + $0x78] sm:$0xff]   ;;  %v3563_v8 = vld [vmem:[%s4391_s7 + $0x140] sm:$0xff]   ;;  %v3129_v43 = vcombine.low %v4423_v63, %v4423_v63 }
  0xe3   : > { %3315 = vmatprep.subr.bf16.mxu1 %v3539_v46  ;;  %v3554_v61 = vld [vmem:[%s4391_s7 + $0x30] sm:$0xff]   ;;  %v3558_v3 = vld [vmem:[%s4391_s7 + $0x38] sm:$0xff]   ;;  %v3566_v10 = vld [vmem:[%s4391_s7 + $0x100] sm:$0xff]  }
  0xe4   : > { %3294 = vmatpush3.bf16.msra.mxu0 %v3538_v45  ;;  %v3555_v62 = vld [vmem:[%s4391_s7 + $0xf0] sm:$0xff]   ;;  %v3559_v4 = vld [vmem:[%s4391_s7 + $0xf8] sm:$0xff]   ;;  %v3567_v12 = vld [vmem:[%s4391_s7 + $0x1c0] sm:$0xff]  }
  0xe5   : > { %3295 = vmatprep.subr.bf16.mxu0 %v3541_v48  ;;  %v3556_v0 = vld [vmem:[%s4391_s7 + $0xb0] sm:$0xff]   ;;  %v3562_v6 = vld [vmem:[%s4391_s7 + $0xb8] sm:$0xff]   ;;  %v3568_v13 = vld [vmem:[%s4391_s7 + $0x180] sm:$0xff]  }
  0xe6   : > { %3316 = vmatpush3.bf16.msra.mxu1 %v3540_v47  ;;  %v3569_v14 = vld [vmem:[%s4391_s7 + $0x148] sm:$0xff]   ;;  %v3573_v18 = vld [vmem:[%s4391_s7 + $0x150] sm:$0xff]   ;;  %v3577_v22 = vld [vmem:[%s4391_s7 + $0x158] sm:$0xff]   ;;  %v3131_v47 = vcombine.low %v4430_v2, %v4430_v2 }
  0xe7   : > { %3317 = vmatprep.subr.bf16.mxu1 %v3543_v50  ;;  %v3570_v15 = vld [vmem:[%s4391_s7 + $0x108] sm:$0xff]   ;;  %v3574_v19 = vld [vmem:[%s4391_s7 + $0x110] sm:$0xff]   ;;  %v3578_v23 = vld [vmem:[%s4391_s7 + $0x118] sm:$0xff]  }
  0xe8   : > { %3296 = vmatpush3.bf16.msra.mxu0 %v3542_v49  ;;  %v3571_v16 = vld [vmem:[%s4391_s7 + $0x1c8] sm:$0xff]   ;;  %v3575_v20 = vld [vmem:[%s4391_s7 + $0x1d0] sm:$0xff]   ;;  %v3579_v24 = vld [vmem:[%s4391_s7 + $0x1d8] sm:$0xff]  }
  0xe9   : > { %3297 = vmatprep.subr.bf16.mxu0 %v3545_v52  ;;  %v3572_v17 = vld [vmem:[%s4391_s7 + $0x188] sm:$0xff]   ;;  %v3576_v21 = vld [vmem:[%s4391_s7 + $0x190] sm:$0xff]   ;;  %v3580_v25 = vld [vmem:[%s4391_s7 + $0x198] sm:$0xff]  }
  0xea   : > { %3318 = vmatpush3.bf16.msra.mxu1 %v3544_v51  ;;  %v3581_v26 = vld [vmem:[%s4391_s7 + $0x160] sm:$0xff]   ;;  %v3585_v30 = vld [vmem:[%s4391_s7 + $0x168] sm:$0xff]   ;;  %v3589_v34 = vld [vmem:[%s4391_s7 + $0x170] sm:$0xff]  }
  0xeb   : > { %3319 = vmatprep.subr.bf16.mxu1 %v3547_v54  ;;  %v3582_v27 = vld [vmem:[%s4391_s7 + $0x120] sm:$0xff]   ;;  %v3586_v31 = vld [vmem:[%s4391_s7 + $0x128] sm:$0xff]   ;;  %v3590_v35 = vld [vmem:[%s4391_s7 + $0x130] sm:$0xff]  }
  0xec   : > { %3298 = vmatpush3.bf16.msra.mxu0 %v3546_v53  ;;  %v3583_v28 = vld [vmem:[%s4391_s7 + $0x1e0] sm:$0xff]   ;;  %v3587_v32 = vld [vmem:[%s4391_s7 + $0x1e8] sm:$0xff]   ;;  %v3591_v36 = vld [vmem:[%s4391_s7 + $0x1f0] sm:$0xff]  }
  0xed   : > { %3299 = vmatprep.subr.bf16.mxu0 %v3549_v56  ;;  %v3584_v29 = vld [vmem:[%s4391_s7 + $0x1a0] sm:$0xff]   ;;  %v3588_v33 = vld [vmem:[%s4391_s7 + $0x1a8] sm:$0xff]   ;;  %v3592_v38 = vld [vmem:[%s4391_s7 + $0x1b0] sm:$0xff]  }
  0xee   : > { %3320 = vmatpush3.bf16.msra.mxu1 %v3548_v55  ;;  %v4473_v37 = vld [vmem:[%s4619_s0 + $0x20] sm:$0xff]  ;;  %v3593_v39 = vld [vmem:[%s4391_s7 + $0x178] sm:$0xff]   ;;  %v4480_v40 = vld [vmem:[%s4619_s0 + $0x28] sm:$0xff] }
  0xef   : > { %3321 = vmatprep.subr.bf16.mxu1 %v3551_v58  ;;  %v3594_v41 = vld [vmem:[%s4391_s7 + $0x138] sm:$0xff]   ;;  %v3134_v45 = vcombine.high %v4473_v37, %v4473_v37  ;;  %v3599_v46 = vld [vmem:[%s4391_s7 + $0x240] sm:$0xff]   ;;  %v3136_v49 = vcombine.high %v4480_v40, %v4480_v40  ;;  %v3605_v52 = vld [vmem:[%s4391_s7 + $0x248] sm:$0xff]  }
  0xf0   : > { %3300 = vmatpush3.bf16.msra.mxu0 %v3550_v57  ;;  %v3595_v42 = vld [vmem:[%s4391_s7 + $0x1f8] sm:$0xff]   ;;  %v3602_v48 = vld [vmem:[%s4391_s7 + $0x200] sm:$0xff]   ;;  %v3606_v53 = vld [vmem:[%s4391_s7 + $0x208] sm:$0xff]  }
  0xf1   : > { %3301 = vmatprep.subr.bf16.mxu0 %v3553_v60  ;;  %v3598_v44 = vld [vmem:[%s4391_s7 + $0x1b8] sm:$0xff]   ;;  %v3603_v50 = vld [vmem:[%s4391_s7 + $0x2c0] sm:$0xff]   ;;  %v3607_v54 = vld [vmem:[%s4391_s7 + $0x2c8] sm:$0xff]  }
  0xf2   : > { %3322 = vmatpush3.bf16.msra.mxu1 %v3552_v59  ;;  %v3604_v51 = vld [vmem:[%s4391_s7 + $0x280] sm:$0xff]   ;;  %v3608_v55 = vld [vmem:[%s4391_s7 + $0x288] sm:$0xff]   ;;  %v3609_v56 = vld [vmem:[%s4391_s7 + $0x250] sm:$0xff]  }
  0xf3   : > { %3323 = vmatprep.subr.bf16.mxu1 %v3555_v62  ;;  %v3610_v57 = vld [vmem:[%s4391_s7 + $0x210] sm:$0xff]   ;;  %v3613_v60 = vld [vmem:[%s4391_s7 + $0x258] sm:$0xff]   ;;  %v3619_v2 = vld [vmem:[%s4391_s7 + $0x2e0] sm:$0xff]  }
  0xf4   : > { %3302 = vmatpush3.bf16.msra.mxu0 %v3554_v61  ;;  %v3611_v58 = vld [vmem:[%s4391_s7 + $0x2d0] sm:$0xff]   ;;  %v3614_v61 = vld [vmem:[%s4391_s7 + $0x218] sm:$0xff]  }
  0xf5   : > { %3303 = vmatprep.subr.bf16.mxu0 %v3557_v1  ;;  %v3612_v59 = vld [vmem:[%s4391_s7 + $0x290] sm:$0xff]   ;;  %v3615_v62 = vld [vmem:[%s4391_s7 + $0x2d8] sm:$0xff]   ;;  %v3618_v1 = vld [vmem:[%s4391_s7 + $0x220] sm:$0xff]  }
  0xf6   : > { %3324 = vmatpush3.bf16.msra.mxu1 %v3556_v0  ;;  %v3616_v63 = vld [vmem:[%s4391_s7 + $0x298] sm:$0xff]   ;;  %v3617_v0 = vld [vmem:[%s4391_s7 + $0x260] sm:$0xff]  }
  0xf7   : > { %3325 = vmatprep.subr.bf16.mxu1 %v3559_v4  ;;  %v3621_v4 = vld [vmem:[%s4391_s7 + $0x268] sm:$0xff]  }
  0xf8   : > { %3304 = vmatpush3.bf16.msra.mxu0 %v3558_v3  ;;  %v3620_v3 = vld [vmem:[%s4391_s7 + $0x2a0] sm:$0xff]  }
  0xf9   : > { %3333 = vmatprep.subr.bf16.mxu0 %v3563_v8  ;;  %v3625_v8 = vld [vmem:[%s4391_s7 + $0x270] sm:$0xff]  }
  0xfa   : > { %3326 = vmatpush3.bf16.msra.mxu1 %v3562_v6  ;;  %v3623_v6 = vld [vmem:[%s4391_s7 + $0x2e8] sm:$0xff]  }
  0xfb   : > { %2679 = vmatmul.mubr.bf16.vlgmr.msra.gmra.mrb[0].mxu0 %v3125_v5  ;;  %3355 = vmatprep.subr.bf16.mxu1 %v3567_v12  ;;  %v3622_v5 = vld [vmem:[%s4391_s7 + $0x228] sm:$0xff]   ;;  %v3628_v12 = vld [vmem:[%s4391_s7 + $0x2b0] sm:$0xff]  }
  0xfc   : > { %3334 = vmatpush3.bf16.msra.mxu0 %v3566_v10  ;;  %2758 = vmatprep.mubr.bf16.mxu0 %v3130_v7  ;;  %v3624_v7 = vld [vmem:[%s4391_s7 + $0x2a8] sm:$0xff]   ;;  %v3627_v10 = vld [vmem:[%s4391_s7 + $0x2f0] sm:$0xff]  }
  0xfd   : > { %2719 = vmatmul.mubr.bf16.vlgmr.msra.gmra.mrb[0].mxu1 %v3127_v9  ;;  %3335 = vmatprep.subr.bf16.mxu0 %v3569_v14  ;;  %v3626_v9 = vld [vmem:[%s4391_s7 + $0x230] sm:$0xff]   ;;  %v3630_v14 = vld [vmem:[%s4391_s7 + $0x238] sm:$0xff]  }
  0xfe   : > { %3356 = vmatpush3.bf16.msra.mxu1 %v3568_v13  ;;  %2798 = vmatprep.mubr.bf16.mxu1 %v3132_v11  ;;  %v4523_v11 = vld [vmem:[%s4619_s0 + $0x30] sm:$0xff]  ;;  %v3629_v13 = vld [vmem:[%s4391_s7 + $0x278] sm:$0xff]  }
  0xff   : > { %3357 = vmatprep.subr.bf16.mxu1 %v3571_v16  ;;  %v3133_v16 = vcombine.low %v4473_v37, %v4473_v37  ;;  %v3654_v37 = vld [vmem:[%s4391_s7 + $0x320] sm:$0xff]  }
 0x100   : > { %3336 = vmatpush3.bf16.msra.mxu0 %v3570_v15  ;;  %v3631_v15 = vld [vmem:[%s4391_s7 + $0x2f8] sm:$0xff]  }
 0x101   : > { %3337 = vmatprep.subr.bf16.mxu0 %v3573_v18  ;;  %v3138_v18 = vcombine.high %v4523_v11, %v4523_v11 }
 0x102   : > { %3358 = vmatpush3.bf16.msra.mxu1 %v3572_v17  ;;  %v3634_v17 = vld [vmem:[%s4391_s7 + $0x2b8] sm:$0xff]  }
 0x103   : > { %3359 = vmatprep.subr.bf16.mxu1 %v3575_v20  ;;  %v3135_v20 = vcombine.low %v4480_v40, %v4480_v40  ;;  %v3657_v40 = vld [vmem:[%s4391_s7 + $0x368] sm:$0xff]  }
 0x104   : > { %3338 = vmatpush3.bf16.msra.mxu0 %v3574_v19  ;;  %v3635_v19 = vld [vmem:[%s4391_s7 + $0x340] sm:$0xff]  }
 0x105   : > { %3339 = vmatprep.subr.bf16.mxu0 %v3577_v22  ;;  %v3639_v22 = vld [vmem:[%s4391_s7 + $0x3c0] sm:$0xff]  }
 0x106   : > { %3360 = vmatpush3.bf16.msra.mxu1 %v3576_v21  ;;  %v3638_v21 = vld [vmem:[%s4391_s7 + $0x300] sm:$0xff]  }
 0x107   : > { %3361 = vmatprep.subr.bf16.mxu1 %v3579_v24  ;;  %v3641_v24 = vld [vmem:[%s4391_s7 + $0x348] sm:$0xff]  }
 0x108   : > { %3340 = vmatpush3.bf16.msra.mxu0 %v3578_v23  ;;  %v3640_v23 = vld [vmem:[%s4391_s7 + $0x380] sm:$0xff]  }
 0x109   : > { %3341 = vmatprep.subr.bf16.mxu0 %v3581_v26  ;;  %v3643_v26 = vld [vmem:[%s4391_s7 + $0x3c8] sm:$0xff]  }
 0x10a   : > { %3362 = vmatpush3.bf16.msra.mxu1 %v3580_v25  ;;  %v3642_v25 = vld [vmem:[%s4391_s7 + $0x308] sm:$0xff]  }
 0x10b   : > { %3363 = vmatprep.subr.bf16.mxu1 %v3583_v28  ;;  %v3645_v28 = vld [vmem:[%s4391_s7 + $0x350] sm:$0xff]  }
 0x10c   : > { %3342 = vmatpush3.bf16.msra.mxu0 %v3582_v27  ;;  %v3644_v27 = vld [vmem:[%s4391_s7 + $0x388] sm:$0xff]  }
 0x10d   : > { %3343 = vmatprep.subr.bf16.mxu0 %v3585_v30  ;;  %v3647_v30 = vld [vmem:[%s4391_s7 + $0x3d0] sm:$0xff]  }
 0x10e   : > { %3364 = vmatpush3.bf16.msra.mxu1 %v3584_v29  ;;  %v3646_v29 = vld [vmem:[%s4391_s7 + $0x310] sm:$0xff]  }
 0x10f   : > { %3365 = vmatprep.subr.bf16.mxu1 %v3587_v32  ;;  %v3649_v32 = vld [vmem:[%s4391_s7 + $0x358] sm:$0xff]  }
 0x110   : > { %3344 = vmatpush3.bf16.msra.mxu0 %v3586_v31  ;;  %v3648_v31 = vld [vmem:[%s4391_s7 + $0x390] sm:$0xff]  }
 0x111   : > { %3345 = vmatprep.subr.bf16.mxu0 %v3589_v34  ;;  %v3651_v34 = vld [vmem:[%s4391_s7 + $0x3d8] sm:$0xff]  }
 0x112   : > { %3366 = vmatpush3.bf16.msra.mxu1 %v3588_v33  ;;  %v3650_v33 = vld [vmem:[%s4391_s7 + $0x318] sm:$0xff]  }
 0x113   : > { %3367 = vmatprep.subr.bf16.mxu1 %v3591_v36  ;;  %v3653_v36 = vld [vmem:[%s4391_s7 + $0x360] sm:$0xff]  }
 0x114   : > { %3346 = vmatpush3.bf16.msra.mxu0 %v3590_v35  ;;  %v3652_v35 = vld [vmem:[%s4391_s7 + $0x398] sm:$0xff]  }
 0x115   : > { %3347 = vmatprep.subr.bf16.mxu0 %v3593_v39  ;;  %v3656_v39 = vld [vmem:[%s4391_s7 + $0x3a0] sm:$0xff]  }
 0x116   : > { %3368 = vmatpush3.bf16.msra.mxu1 %v3592_v38  ;;  %v3655_v38 = vld [vmem:[%s4391_s7 + $0x3e0] sm:$0xff]  }
 0x117   : > { %3369 = vmatprep.subr.bf16.mxu1 %v3595_v42  ;;  %v3659_v42 = vld [vmem:[%s4391_s7 + $0x3e8] sm:$0xff]  }
 0x118   : > { %3348 = vmatpush3.bf16.msra.mxu0 %v3594_v41  ;;  %v3658_v41 = vld [vmem:[%s4391_s7 + $0x328] sm:$0xff]  }
 0x119   : > { %3377 = vmatprep.subr.bf16.mxu0 %v3599_v46  ;;  %v3663_v46 = vld [vmem:[%s4391_s7 + $0x3f0] sm:$0xff]  }
 0x11a   : > { %3370 = vmatpush3.bf16.msra.mxu1 %v3598_v44  ;;  %v3661_v44 = vld [vmem:[%s4391_s7 + $0x370] sm:$0xff]  }
 0x11b   : > { %2759 = vmatmul.mubr.bf16.vlgmr.msra.gmra.mrb[4].mxu0 %v3129_v43  ;;  %3399 = vmatprep.subr.bf16.mxu1 %v3603_v50  ;;  %v3660_v43 = vld [vmem:[%s4391_s7 + $0x3a8] sm:$0xff]   ;;  %v3667_v50 = vld [vmem:[%s4391_s7 + $0x3f8] sm:$0xff]  }
 0x11c   : > { %3378 = vmatpush3.bf16.msra.mxu0 %v3602_v48  ;;  %2838 = vmatprep.mubr.bf16.mxu0 %v3134_v45  ;;  %v3662_v45 = vld [vmem:[%s4391_s7 + $0x330] sm:$0xff]   ;;  %v3665_v48 = vld [vmem:[%s4391_s7 + $0x378] sm:$0xff]  }
 0x11d   : > { %2799 = vmatmul.mubr.bf16.vlgmr.msra.gmra.mrb[4].mxu1 %v3131_v47  ;;  %3379 = vmatprep.subr.bf16.mxu0 %v3605_v52  ;;  %v3664_v47 = vld [vmem:[%s4391_s7 + $0x3b0] sm:$0xff]   ;;  %v3670_v52 = vld [vmem:[%s4391_s7 + $0x3b8] sm:$0xff]  }
 0x11e   : > { %3400 = vmatpush3.bf16.msra.mxu1 %v3604_v51  ;;  %2878 = vmatprep.mubr.bf16.mxu1 %v3136_v49  ;;  %v3666_v49 = vld [vmem:[%s4391_s7 + $0x338] sm:$0xff]   ;;  %v3137_v51 = vcombine.low %v4523_v11, %v4523_v11 }
 0x11f   : > { %3401 = vmatprep.subr.bf16.mxu1 %v3607_v54  ;;  %v1422_v54 = vld [vmem:[%s4619_s0 + $0x38] sm:$0xff] }
 0x120   : > { %3380 = vmatpush3.bf16.msra.mxu0 %v3606_v53  ;;  %v3671_v53 = vld [vmem:[%s4391_s7 + $0x440] sm:$0xff]  }
 0x121   : > { %3381 = vmatprep.subr.bf16.mxu0 %v3609_v56  ;;  %v3140_v56 = vcombine.high %v1422_v54, %v1422_v54 }
 0x122   : > { %3402 = vmatpush3.bf16.msra.mxu1 %v3608_v55  ;;  %v3139_v55 = vcombine.low %v1422_v54, %v1422_v54 }
 0x123   : > { %3403 = vmatprep.subr.bf16.mxu1 %v3611_v58  ;;  %v3675_v58 = vld [vmem:[%s4391_s7 + $0x448] sm:$0xff]  }
 0x124   : > { %3382 = vmatpush3.bf16.msra.mxu0 %v3610_v57  ;;  %v3674_v57 = vld [vmem:[%s4391_s7 + $0x400] sm:$0xff]  }
 0x125   : > { %3383 = vmatprep.subr.bf16.mxu0 %v3613_v60  ;;  %v3677_v60 = vld [vmem:[%s4391_s7 + $0x450] sm:$0xff]  }
 0x126   : > { %3404 = vmatpush3.bf16.msra.mxu1 %v3612_v59  ;;  %v3676_v59 = vld [vmem:[%s4391_s7 + $0x408] sm:$0xff]  }
 0x127   : > { %3405 = vmatprep.subr.bf16.mxu1 %v3615_v62  ;;  %v3679_v62 = vld [vmem:[%s4391_s7 + $0x458] sm:$0xff]  }
 0x128   : > { %3384 = vmatpush3.bf16.msra.mxu0 %v3614_v61  ;;  %v3678_v61 = vld [vmem:[%s4391_s7 + $0x410] sm:$0xff]  }
 0x129   : > { %3385 = vmatprep.subr.bf16.mxu0 %v3617_v0  ;;  %v3681_v0 = vld [vmem:[%s4391_s7 + $0x460] sm:$0xff]  }
 0x12a   : > { %3406 = vmatpush3.bf16.msra.mxu1 %v3616_v63  ;;  %v3680_v63 = vld [vmem:[%s4391_s7 + $0x418] sm:$0xff]  }
 0x12b   : > { %3407 = vmatprep.subr.bf16.mxu1 %v3619_v2  ;;  %v1423_v2 = vld [vmem:[%s4619_s0 + $0x40] sm:$0xff] }
 0x12c   : > { %3386 = vmatpush3.bf16.msra.mxu0 %v3618_v1  ;;  %v3682_v1 = vld [vmem:[%s4391_s7 + $0x420] sm:$0xff]  }
 0x12d   : > { %3387 = vmatprep.subr.bf16.mxu0 %v3621_v4  ;;  %v3142_v4 = vcombine.high %v1423_v2, %v1423_v2 }
 0x12e   : > { %3408 = vmatpush3.bf16.msra.mxu1 %v3620_v3  ;;  %v3683_v3 = vld [vmem:[%s4391_s7 + $0x468] sm:$0xff]  }
 0x12f   : > { %3409 = vmatprep.subr.bf16.mxu1 %v3623_v6  ;;  %v3685_v6 = vld [vmem:[%s4391_s7 + $0x470] sm:$0xff]  }
 0x130   : > { %3388 = vmatpush3.bf16.msra.mxu0 %v3622_v5  ;;  %v3684_v5 = vld [vmem:[%s4391_s7 + $0x428] sm:$0xff]  }
 0x131   : > { %3389 = vmatprep.subr.bf16.mxu0 %v3625_v8  ;;  %v3687_v8 = vld [vmem:[%s4391_s7 + $0x478] sm:$0xff]  }
 0x132   : > { %3410 = vmatpush3.bf16.msra.mxu1 %v3624_v7  ;;  %v3686_v7 = vld [vmem:[%s4391_s7 + $0x430] sm:$0xff]  }
 0x133   : > { %3411 = vmatprep.subr.bf16.mxu1 %v3627_v10  ;;  %v3141_v10 = vcombine.low %v1423_v2, %v1423_v2 }
 0x134   : > { %3390 = vmatpush3.bf16.msra.mxu0 %v3626_v9  ;;  %v3688_v9 = vld [vmem:[%s4391_s7 + $0x438] sm:$0xff]   ;;  %s1413_s7 = scalar_lea.vmem %s4622_s3, %s3123_s4 }
 0x135   : > { %3391 = vmatprep.subr.bf16.mxu0 %v3629_v13 }
 0x136   : > { %3412 = vmatpush3.bf16.msra.mxu1 %v3628_v12  ;;  %v3124_v12 = vld [vmem:[%s1405_s30] ss:$0 sm:$0xff] }
 0x137   : > { %3413 = vmatprep.subr.bf16.mxu1 %v3631_v15 }
 0x138   : > { %3392 = vmatpush3.bf16.msra.mxu0 %v3630_v14 }
 0x139   : > { %3421 = vmatprep.subr.bf16.mxu0 %v3635_v19 }
 0x13a   : > { %3414 = vmatpush3.bf16.msra.mxu1 %v3634_v17 }
 0x13b   : > { %2839 = vmatmul.mubr.bf16.vlgmr.msra.gmra.mrb[8].mxu0 %v3133_v16  ;;  %3443 = vmatprep.subr.bf16.mxu1 %v3639_v22 }
 0x13c   : > { %3422 = vmatpush3.bf16.msra.mxu0 %v3638_v21  ;;  %2918 = vmatprep.mubr.bf16.mxu0 %v3138_v18 }
 0x13d   : > { %2879 = vmatmul.mubr.bf16.vlgmr.msra.gmra.mrb[8].mxu1 %v3135_v20  ;;  %3423 = vmatprep.subr.bf16.mxu0 %v3641_v24 }
 0x13e   : > { %3444 = vmatpush3.bf16.msra.mxu1 %v3640_v23  ;;  %2958 = vmatprep.mubr.bf16.mxu1 %v3140_v56 }
 0x13f   : > { %3445 = vmatprep.subr.bf16.mxu1 %v3643_v26 }
 0x140   : > { %3424 = vmatpush3.bf16.msra.mxu0 %v3642_v25 }
 0x141   : > { %3425 = vmatprep.subr.bf16.mxu0 %v3645_v28 }
 0x142   : > { %3446 = vmatpush3.bf16.msra.mxu1 %v3644_v27 }
 0x143   : > { %3447 = vmatprep.subr.bf16.mxu1 %v3647_v30 }
 0x144   : > { %3426 = vmatpush3.bf16.msra.mxu0 %v3646_v29 }
 0x145   : > { %3427 = vmatprep.subr.bf16.mxu0 %v3649_v32 }
 0x146   : > { %3448 = vmatpush3.bf16.msra.mxu1 %v3648_v31 }
 0x147   : > { %3449 = vmatprep.subr.bf16.mxu1 %v3651_v34 }
 0x148   : > { %3428 = vmatpush3.bf16.msra.mxu0 %v3650_v33 }
 0x149   : > { %3429 = vmatprep.subr.bf16.mxu0 %v3653_v36 }
 0x14a   : > { %3450 = vmatpush3.bf16.msra.mxu1 %v3652_v35 }
 0x14b   : > { %3451 = vmatprep.subr.bf16.mxu1 %v3655_v38 }
 0x14c   : > { %3430 = vmatpush3.bf16.msra.mxu0 %v3654_v37 }
 0x14d   : > { %3431 = vmatprep.subr.bf16.mxu0 %v3657_v40 }
 0x14e   : > { %3452 = vmatpush3.bf16.msra.mxu1 %v3656_v39 }
 0x14f   : > { %3453 = vmatprep.subr.bf16.mxu1 %v3659_v42 }
 0x150   : > { %3432 = vmatpush3.bf16.msra.mxu0 %v3658_v41 }
 0x151   : > { %3433 = vmatprep.subr.bf16.mxu0 %v3661_v44 }
 0x152   : > { %3454 = vmatpush3.bf16.msra.mxu1 %v3660_v43 }
 0x153   : > { %3455 = vmatprep.subr.bf16.mxu1 %v3663_v46 }
 0x154   : > { %3434 = vmatpush3.bf16.msra.mxu0 %v3662_v45 }
 0x155   : > { %3435 = vmatprep.subr.bf16.mxu0 %v3665_v48 }
 0x156   : > { %3456 = vmatpush3.bf16.msra.mxu1 %v3664_v47 }
 0x157   : > { %3457 = vmatprep.subr.bf16.mxu1 %v3667_v50 }
 0x158   : > { %3436 = vmatpush3.bf16.msra.mxu0 %v3666_v49 }
 0x159   : > { %3465 = vmatprep.subr.bf16.mxu0 %v3671_v53 }
 0x15a   : > { %3458 = vmatpush3.bf16.msra.mxu1 %v3670_v52 }
 0x15b   : > { %2919 = vmatmul.mubr.bf16.vlgmr.msra.gmra.mrb[12].mxu0 %v3137_v51 }
 0x15c   : > { %3466 = vmatpush3.bf16.msra.mxu0 %v3674_v57  ;;  %2998 = vmatprep.mubr.bf16.mxu0 %v3142_v4 }
 0x15d   : > { %2959 = vmatmul.mubr.bf16.vlgmr.msra.gmra.mrb[12].mxu1 %v3139_v55  ;;  %3467 = vmatprep.subr.bf16.mxu0 %v3675_v58 }
 0x160   : > { %3468 = vmatpush3.bf16.msra.mxu0 %v3676_v59 }
 0x161   : > { %3469 = vmatprep.subr.bf16.mxu0 %v3677_v60 }
 0x164   : > { %3470 = vmatpush3.bf16.msra.mxu0 %v3678_v61 }
 0x165   : > { %3471 = vmatprep.subr.bf16.mxu0 %v3679_v62 }
 0x168   : > { %3472 = vmatpush3.bf16.msra.mxu0 %v3680_v63 }
 0x169   : > { %3473 = vmatprep.subr.bf16.mxu0 %v3681_v0 }
 0x16c   : > { %3474 = vmatpush3.bf16.msra.mxu0 %v3682_v1 }
 0x16d   : > { %3475 = vmatprep.subr.bf16.mxu0 %v3683_v3 }
 0x170   : > { %3476 = vmatpush3.bf16.msra.mxu0 %v3684_v5 }
 0x171   : > { %3477 = vmatprep.subr.bf16.mxu0 %v3685_v6 }
 0x174   : > { %3478 = vmatpush3.bf16.msra.mxu0 %v3686_v7 }
 0x175   : > { %3479 = vmatprep.subr.bf16.mxu0 %v3687_v8 }
 0x178   : > { %3480 = vmatpush3.bf16.msra.mxu0 %v3688_v9 }
 0x17b   : > { %2999 = vmatmul.mubr.bf16.vlgmr.msra.gmra.mrb[16].mxu0 %v3141_v10 }
 0x1ce   : > { %v3305_v11 = vpop.f32.mrb[0].mxu0 }
 0x1cf   : > { %v3306_v13 = vpop.f32.mrb[1].mxu0 }
 0x1d0   : > { %v3307_v14 = vadd.f32 %v3306_v13, %v3305_v11  ;;  %v3308_v15 = vpop.f32.mrb[2].mxu0  ;;  %v3327_v16 = vpop.f32.mrb[0].mxu1 }
 0x1d1   : > { %v3309_v17 = vpop.f32.mrb[3].mxu0  ;;  %v3328_v18 = vpop.f32.mrb[1].mxu1 }
 0x1d2   : > { %v2681_v19 = vadd.f32 %v3307_v14, %v3124_v12  ;;  %v3329_v20 = vadd.f32 %v3328_v18, %v3327_v16  ;;  %v3330_v21 = vpop.f32.mrb[2].mxu1 }
 0x1d3   : > { %v3331_v22 = vpop.f32.mrb[3].mxu1 }
 0x1d4   : > { %v2721_v23 = vadd.f32 %v3329_v20, %v2681_v19 }
 0x1ee   : > { %v3349_v24 = vpop.f32.mrb[4].mxu0 }
 0x1ef   : > { %v3350_v25 = vpop.f32.mrb[5].mxu0 }
 0x1f0   : > { %v3351_v26 = vadd.f32 %v3350_v25, %v3349_v24  ;;  %v3352_v27 = vpop.f32.mrb[6].mxu0  ;;  %v3371_v28 = vpop.f32.mrb[4].mxu1 }
 0x1f1   : > { %v3353_v29 = vpop.f32.mrb[7].mxu0  ;;  %v3372_v30 = vpop.f32.mrb[5].mxu1 }
 0x1f2   : > { %v2761_v31 = vadd.f32 %v3351_v26, %v2721_v23  ;;  %v3373_v32 = vadd.f32 %v3372_v30, %v3371_v28  ;;  %v3374_v33 = vpop.f32.mrb[6].mxu1 }
 0x1f3   : > { %v3375_v34 = vpop.f32.mrb[7].mxu1 }
 0x1f4   : > { %v2801_v35 = vadd.f32 %v3373_v32, %v2761_v31 }
 0x20e   : > { %v3393_v36 = vpop.f32.mrb[8].mxu0 }
 0x20f   : > { %v3394_v37 = vpop.f32.mrb[9].mxu0 }
 0x210   : > { %v3395_v38 = vadd.f32 %v3394_v37, %v3393_v36  ;;  %v3396_v39 = vpop.f32.mrb[10].mxu0  ;;  %v3415_v40 = vpop.f32.mrb[8].mxu1 }
 0x211   : > { %v3397_v41 = vpop.f32.mrb[11].mxu0  ;;  %v3416_v42 = vpop.f32.mrb[9].mxu1 }
 0x212   : > { %v2841_v43 = vadd.f32 %v3395_v38, %v2801_v35  ;;  %v3417_v44 = vadd.f32 %v3416_v42, %v3415_v40  ;;  %v3418_v45 = vpop.f32.mrb[10].mxu1 }
 0x213   : > { %v3419_v46 = vpop.f32.mrb[11].mxu1 }
 0x214   : > { %v2881_v47 = vadd.f32 %v3417_v44, %v2841_v43 }
 0x22e   : > { %v3437_v48 = vpop.f32.mrb[12].mxu0 }
 0x22f   : > { %v3438_v49 = vpop.f32.mrb[13].mxu0 }
 0x230   : > { %v3439_v50 = vadd.f32 %v3438_v49, %v3437_v48  ;;  %v3440_v51 = vpop.f32.mrb[14].mxu0  ;;  %v3459_v52 = vpop.f32.mrb[12].mxu1 }
 0x231   : > { %v3441_v53 = vpop.f32.mrb[15].mxu0  ;;  %v3460_v55 = vpop.f32.mrb[13].mxu1 }
 0x232   : > { %v2921_v54 = vadd.f32 %v3439_v50, %v2881_v47  ;;  %v3461_v56 = vadd.f32 %v3460_v55, %v3459_v52  ;;  %v3462_v57 = vpop.f32.mrb[14].mxu1 }
 0x233   : > { %v3463_v58 = vpop.f32.mrb[15].mxu1 }
 0x234   : > { %v2961_v59 = vadd.f32 %v3461_v56, %v2921_v54 }
 0x24e   : > { %v3481_v60 = vpop.f32.mrb[16].mxu0 }
 0x24f   : > { %v3482_v61 = vpop.f32.mrb[17].mxu0 }
 0x250   : > { %v3483_v62 = vadd.f32 %v3482_v61, %v3481_v60  ;;  %v3484_v63 = vpop.f32.mrb[18].mxu0 }
 0x251   : > { %v3485_v0 = vpop.f32.mrb[19].mxu0 }
 0x252   : > { %v3001_v1 = vadd.f32 %v3483_v62, %v2961_v59 }
 0x254   : > { %v3006_v2 = vpack.c.bf16 %v3001_v1, %v3001_v1 }
 0x256   : > { %3007 = vst [vmem:[%s1413_s7] sm:$0xf] %v3006_v2 }
 0x257 PF: > { %s13_s16 = sadd.s32 1, %s3729_s16   ;;  %s4623_s12 = smov %s3717_s13 }
 0x258   : > { %p10_p10 = scmp.ge.s32.totalorder %s13_s16, 4   ;;  %s4624_s13 = smov %s3786_s20 }
 0x259   : > { %s4625_s14 = smov %s3725_s15  ;;  %s4626_s15 = smov %s4628_s17 }
 0x25a   :  { %12 = sbr.rel (!%p10_p10) target bundleno = 3 (0x3), region = 114 }

</bundles_post_ra>
